<compile_context>
chip_gen: v7x
topology: tpu7x:2x2x1
jax: 0.10.0
libtpu: 0.0.40
codegen_flags: <defaults>
</compile_context>

<pallas_src>
import functools

import jax
import jax.numpy as jnp
from jax import lax
from jax.experimental import pallas as pl
from jax.experimental.pallas import tpu as pltpu


def _sigmoid(z):
    # EUP exp + approximate reciprocal (keeps the Newton-refinement VALU work off
    # the critical path; eval-mode accuracy impact is ~1e-4).
    return pl.reciprocal(1.0 + jnp.exp(-z), approx=True)


def _feature_projection_kernel(
    x_ref,       # VMEM (Bt, C, HW)   feature tile, C on sublanes, H*W on lanes
    xcoord_ref,  # VMEM (1, 1, HW)    int32: column index (p mod W) per lane
    w1t_ref,     # VMEM (Cr, C)       channel-attention 1x1 conv #1 (transposed)
    w2t_ref,     # VMEM (C, Cr)       channel-attention 1x1 conv #2 (transposed)
    sconv_ref,   # SMEM (2, k*k)      spatial-attention 7x7 conv weights [avg, max]
    gemp_ref,    # SMEM (1, 1)        GeM exponent p (unused when specialized)
    wp_ref,      # VMEM (C, D)        projection Linear weight
    bp_ref,      # VMEM (1, D)        projection Linear bias
    bns_ref,     # VMEM (1, D)        folded BN scale = gamma / sqrt(var + eps)
    bnb_ref,     # VMEM (1, D)        folded BN bias  = beta - mean * scale
    out_ref,     # VMEM (Bt, 1, D)
    *, H, W, ksize, gem_eps, gem_p_static,
):
    f32 = jnp.float32
    x = x_ref[...].astype(f32)                               # (Bt, C, HW)
    Bt, C, HW = x.shape
    inv_hw = 1.0 / float(HW)

    # ---------------- channel attention (CBAM) ----------------
    avg_c = jnp.sum(x, axis=2, keepdims=True) * inv_hw       # (Bt, C, 1)
    max_c = jnp.max(x, axis=2, keepdims=True)                 # (Bt, C, 1)
    # Stack avg|max of every batch element along lanes -> ONE fused bottleneck MLP.
    ca_mat = jnp.concatenate([avg_c[b] for b in range(Bt)]
                             + [max_c[b] for b in range(Bt)], axis=1)     # (C, 2*Bt)
    h = jnp.maximum(jnp.dot(w1t_ref[...], ca_mat, preferred_element_type=f32), 0.0)
    o = jnp.dot(w2t_ref[...], h, preferred_element_type=f32)              # (C, 2*Bt)
    attn_c = _sigmoid(o[:, :Bt] + o[:, Bt:])                               # (C, Bt)
    attn_c3 = jnp.stack([attn_c[:, b:b + 1] for b in range(Bt)], axis=0)  # (Bt, C, 1)
    x_ca = x * attn_c3                                                     # lane bcast

    # ---------------- spatial attention (lane-dense 7x7 conv) ----------------
    mean_sp = jnp.sum(x_ca, axis=1, keepdims=True) * (1.0 / float(C))     # (Bt, 1, HW)
    max_sp = jnp.max(x_ca, axis=1, keepdims=True)                          # (Bt, 1, HW)

    pad = ksize // 2
    col = lax.broadcasted_iota(jnp.int32, (1, 1, HW), 2)                   # flat index
    xi = xcoord_ref[...]                                                   # col mod W
    # validity masks (no int div/rem needed): y-range is a range check on the flat
    # index, x-range is a check on the precomputed per-lane column index.
    ymask = [(col >= (-(dy - pad)) * W) & (col < (H - (dy - pad)) * W)
             for dy in range(ksize)]
    xmask = [(xi >= -(dx - pad)) & (xi < W - (dx - pad)) for dx in range(ksize)]

    def lane_roll(arr, shift):
        if shift == 0:
            return arr
        if HW % 128 == 0:
            return pltpu.roll(arr, shift, 2)          # XLU lane rotation
        # safe fallback when the lane extent is not 128-aligned
        return jnp.concatenate([arr[..., HW - shift:], arr[..., :HW - shift]], axis=2)

    conv = jnp.zeros((Bt, 1, HW), f32)
    for dy in range(ksize):
        oy = dy - pad
        if oy <= -H or oy >= H:          # tap statically out of range (tiny maps)
            continue
        for dx in range(ksize):
            ox = dx - pad
            if ox <= -W or ox >= W:
                continue
            tap = dy * ksize + dx
            shift = (-(oy * W + ox)) % HW
            m = (ymask[dy] & xmask[dx]).astype(f32)                        # (1, 1, HW)
            conv = conv + m * (sconv_ref[0, tap] * lane_roll(mean_sp, shift)
                               + sconv_ref[1, tap] * lane_roll(max_sp, shift))
    attn_sp = _sigmoid(conv)                                               # (Bt, 1, HW)
    x_sa = x_ca * attn_sp                                                  # sublane bcast

    # ---------------- GeM pooling ----------------
    xc = jnp.maximum(x_sa, gem_eps)
    if gem_p_static is not None and float(gem_p_static) == 3.0:
        xp = xc * xc * xc                             # VPU cubes, frees the EUP slot
        pooled = jnp.maximum(jnp.sum(xp, axis=2, keepdims=True) * inv_hw, 1e-30)
        gem = jnp.exp(jnp.log(pooled) * (1.0 / 3.0))  # (Bt, C, 1), tiny EUP work
    else:
        p = gemp_ref[0, 0]
        xp = jnp.exp(p * jnp.log(xc))
        pooled = jnp.maximum(jnp.sum(xp, axis=2, keepdims=True) * inv_hw, 1e-30)
        gem = jnp.exp(jnp.log(pooled) / p)

    # Move the pooled (C,) vectors from sublanes to lanes with a tiny MXU identity
    # matmul (A @ B^T form, natively supported), then one (Bt, C) @ (C, 512) matmul.
    gem_mat = jnp.concatenate([gem[b] for b in range(Bt)], axis=1)         # (C, Bt)
    eye_bt = (lax.broadcasted_iota(jnp.int32, (Bt, Bt), 0)
              == lax.broadcasted_iota(jnp.int32, (Bt, Bt), 1)).astype(f32)
    gem_rows = lax.dot_general(eye_bt, gem_mat, (((1,), (1,)), ((), ())),
                               preferred_element_type=f32)                 # (Bt, C)

    # ------------- projection: Linear -> BN(eval, folded) -> ReLU -------------
    # (Dropout(0.2) is identity in eval mode.)
    proj = jnp.dot(gem_rows, wp_ref[...], preferred_element_type=f32) + bp_ref[...]
    y = jnp.maximum(proj * bns_ref[...] + bnb_ref[...], 0.0)               # (Bt, D)
    out_ref[:, 0, :] = y.astype(out_ref.dtype)                             # lane-dense D


def _choose_batch_tile(batch, bytes_per_elem, *, vmem_budget=8 * 1024 * 1024):
    """Largest divisor of `batch` whose double-buffered input block fits the budget,
    then capped so the grid keeps >= 2 steps (both v7x TensorCores get work).

    8 MiB of double-buffered input stays under v5e's 16 MiB scoped-VMEM default and
    v7x's 32 MiB default / 64 MiB physical, leaving headroom for resident weights
    and the lane-dense conv temporaries."""
    max_bt = max(1, int(vmem_budget // max(1, 2 * bytes_per_elem)))
    bt = 1
    for cand in range(min(batch, max_bt), 0, -1):
        if batch % cand == 0:
            bt = cand
            break
    if bt == batch and batch >= 2:            # keep >= 2 grid steps for v7x megacore
        for cand in range(batch // 2, 0, -1):
            if batch % cand == 0:
                bt = cand
                break
    return bt


def feature_projection(feat_nchw, params, *, ksize=7, gem_eps=1e-6):
    """Fused Pallas FeatureProjection head (eval mode). feat_nchw: (B,C,H,W) -> (B,512)."""
    B, C, H, W = feat_nchw.shape
    HW = H * W
    Cr = params["w1"].shape[1]
    D = params["wp"].shape[1]

    # metadata-only reshape: C stays on sublanes, H*W becomes the lane axis
    x = feat_nchw.reshape(B, C, HW)
    # per-lane column index (p mod W), precomputed so the kernel needs no int div/rem
    xcoord = (jnp.arange(HW, dtype=jnp.int32) % W).reshape(1, 1, HW)

    # tiny weight transposes so the in-kernel MLP runs with C on sublanes
    w1t = jnp.transpose(params["w1"])      # (Cr, C)
    w2t = jnp.transpose(params["w2"])      # (C, Cr)

    # frozen-p specialization (eval): read the concrete GeM exponent if available
    try:
        gem_p_static = float(jax.device_get(params["p"]).reshape(-1)[0])
    except Exception:                      # traced / abstract -> dynamic in-kernel path
        gem_p_static = None

    bt = _choose_batch_tile(B, C * HW * feat_nchw.dtype.itemsize)

    kernel = functools.partial(_feature_projection_kernel, H=H, W=W, ksize=ksize,
                               gem_eps=gem_eps, gem_p_static=gem_p_static)

    out = pl.pallas_call(
        kernel,
        out_shape=jax.ShapeDtypeStruct((B, 1, D), jnp.float32),
        grid_spec=pltpu.PrefetchScalarGridSpec(
            num_scalar_prefetch=0,
            grid=(B // bt,),
            in_specs=[
                pl.BlockSpec((bt, C, HW), lambda b: (b, 0, 0)),
                pl.BlockSpec((1, 1, HW), lambda b: (0, 0, 0)),
                pl.BlockSpec((Cr, C), lambda b: (0, 0)),
                pl.BlockSpec((C, Cr), lambda b: (0, 0)),
                pl.BlockSpec(memory_space=pltpu.MemorySpace.SMEM),   # spatial conv w
                pl.BlockSpec(memory_space=pltpu.MemorySpace.SMEM),   # GeM p
                pl.BlockSpec((C, D), lambda b: (0, 0)),
                pl.BlockSpec((1, D), lambda b: (0, 0)),
                pl.BlockSpec((1, D), lambda b: (0, 0)),
                pl.BlockSpec((1, D), lambda b: (0, 0)),
            ],
            out_specs=pl.BlockSpec((bt, 1, D), lambda b: (b, 0, 0)),
        ),
        compiler_params=pltpu.CompilerParams(
            dimension_semantics=("parallel",)),     # batch tiles across TensorCores
    )(x, xcoord, w1t, w2t, params["sconv"], params["p"],
      params["wp"], params["bp"], params["bn_scale"], params["bn_bias"])
    return out[:, 0, :]


def _init_feature_projection_params(key, in_channels, out_dim=512, reduction=16,
                                    ksize=7, bn_eps=1e-5):
    Cr = max(in_channels // reduction, 1)
    ks = jax.random.split(key, 8)
    w1 = jax.random.normal(ks[0], (in_channels, Cr), jnp.float32) / jnp.sqrt(in_channels)
    w2 = jax.random.normal(ks[1], (Cr, in_channels), jnp.float32) / jnp.sqrt(float(Cr))
    sconv = jax.random.normal(ks[2], (2, ksize * ksize), jnp.float32) / float(ksize)
    p = jnp.full((1, 1), 3.0, jnp.float32)
    wp = jax.random.normal(ks[3], (in_channels, out_dim), jnp.float32) / jnp.sqrt(in_channels)
    bp = 0.01 * jax.random.normal(ks[4], (1, out_dim), jnp.float32)
    gamma = 1.0 + 0.1 * jax.random.normal(ks[5], (1, out_dim), jnp.float32)
    beta = 0.1 * jax.random.normal(ks[6], (1, out_dim), jnp.float32)
    running_mean = 0.1 * jax.random.normal(ks[7], (1, out_dim), jnp.float32)
    running_var = jnp.ones((1, out_dim), jnp.float32)
    bn_scale = gamma / jnp.sqrt(running_var + bn_eps)   # eval-mode BN folded to affine
    bn_bias = beta - running_mean * bn_scale
    return dict(w1=w1, w2=w2, sconv=sconv, p=p, wp=wp, bp=bp,
                bn_scale=bn_scale, bn_bias=bn_bias)


def _stub_backbone(img_nchw, channels, key):
    # TODO(synk): the pretrained timm EfficientNet trunk (features_only=True) has no
    # Pallas equivalent without its weights; this deterministic stand-in produces the
    # four multi-scale feature maps (strides 4/8/16/32) that the projections consume.
    B, Cin, H, W = img_nchw.shape
    feats = []
    for i, c in enumerate(channels):
        stride = 4 * (2 ** i)
        h, w = H // stride, W // stride
        pooled = img_nchw.reshape(B, Cin, h, stride, w, stride).mean(axis=(3, 5))
        wmix = jax.random.normal(jax.random.fold_in(key, i), (c, Cin), jnp.float32)
        f = jnp.einsum("bchw,kc->bkhw", pooled, wmix)
        f = (f - f.mean()) / (f.std() + 1e-6)
        feats.append(f)
    return feats


def efficientnet_backbone_forward(img_nchw, all_params, channels, backbone_key):
    """image -> {'scale_i': (B, 512)} like EfficientNetBackbone.forward (eval mode)."""
    feats = _stub_backbone(img_nchw, channels, backbone_key)
    return feats, {f"scale_{i}": feature_projection(f, all_params[i])
                   for i, f in enumerate(feats)}


def _reference_feature_projection(feat_nchw, params, *, ksize=7, gem_eps=1e-6):
    """Pure-JAX reference of the FeatureProjection head (eval mode)."""
    x = jnp.transpose(feat_nchw, (0, 2, 3, 1)).astype(jnp.float32)   # (B, H, W, C)

    def fc(v):
        return jnp.maximum(v @ params["w1"], 0.0) @ params["w2"]

    avg_c = jnp.mean(x, axis=(1, 2))
    max_c = jnp.max(x, axis=(1, 2))
    attn_c = jax.nn.sigmoid(fc(avg_c) + fc(max_c))                    # (B, C)
    x_ca = x * attn_c[:, None, None, :]

    maps = jnp.stack([jnp.mean(x_ca, axis=3), jnp.max(x_ca, axis=3)], axis=1)  # (B,2,H,W)
    w = params["sconv"].reshape(1, 2, ksize, ksize)
    pad = ksize // 2
    conv = jax.lax.conv_general_dilated(
        maps, w, window_strides=(1, 1), padding=[(pad, pad), (pad, pad)],
        dimension_numbers=("NCHW", "OIHW", "NCHW"),
        precision=jax.lax.Precision.HIGHEST)
    attn_sp = jax.nn.sigmoid(conv[:, 0])                              # (B, H, W)
    x_sa = x_ca * attn_sp[:, :, :, None]

    p = params["p"][0, 0]
    pooled = jnp.mean(jnp.maximum(x_sa, gem_eps) ** p, axis=(1, 2))   # (B, C)
    gem = pooled ** (1.0 / p)

    proj = gem @ params["wp"] + params["bp"]
    y = proj * params["bn_scale"] + params["bn_bias"]
    return jnp.maximum(y, 0.0)


if __name__ == "__main__":
    jax.config.update("jax_default_matmul_precision", "highest")

    key = jax.random.PRNGKey(0)
    k_img, k_bb, k_par = jax.random.split(key, 3)

    # B=4 exercises the batched (Bt=2) grid path while keeping 2 grid steps.
    B, IMG = 4, 64
    # efficientnet_b4 default feature channels from the spec's _get_feature_channels()
    channels = [24, 32, 56, 160]

    img = jax.random.normal(k_img, (B, 3, IMG, IMG), dtype=jnp.float32)
    all_params = [_init_feature_projection_params(jax.random.fold_in(k_par, i), c)
                  for i, c in enumerate(channels)]

    feats, projected = efficientnet_backbone_forward(img, all_params, channels, k_bb)
    projected = jax.block_until_ready(projected)

    # Verify the Pallas head against a pure-JAX reference at every scale.
    # Tolerance accounts for the approx-EUP reciprocal used inside the sigmoids.
    for i, f in enumerate(feats):
        got = projected[f"scale_{i}"]
        ref = _reference_feature_projection(f, all_params[i])
        assert got.shape == (B, 512), got.shape
        err = float(jnp.max(jnp.abs(got - ref)))
        assert jnp.allclose(got, ref, atol=2e-2, rtol=2e-2), (i, err)

    print("KERNEL_OK")
</pallas_src>

<mosaic_0001>
module attributes {stable_mosaic.version = 11 : i64} {
  func.func @_feature_projection_kernel(%arg0: i32, %arg1: memref<2x24x256xf32, #tpu.memory_space<vmem>>, %arg2: memref<1x1x256xi32, #tpu.memory_space<vmem>>, %arg3: memref<1x24xf32, #tpu.memory_space<vmem>>, %arg4: memref<24x1xf32, #tpu.memory_space<vmem>>, %arg5: memref<2x49xf32, #tpu.memory_space<smem>>, %arg6: memref<1x1xf32, #tpu.memory_space<smem>>, %arg7: memref<24x512xf32, #tpu.memory_space<vmem>>, %arg8: memref<1x512xf32, #tpu.memory_space<vmem>>, %arg9: memref<1x512xf32, #tpu.memory_space<vmem>>, %arg10: memref<1x512xf32, #tpu.memory_space<vmem>>, %arg11: memref<2x1x512xf32, #tpu.memory_space<vmem>>) attributes {dimension_semantics = [#tpu.dimension_semantics<parallel>], iteration_bounds = array<i64: 2>, scalar_prefetch = 0 : i64, scratch_operands = 0 : i64, tpu.core_type = #tpu.core_type<tc>, window_params = [{transform_indices = @transform_0, window_bounds = array<i64: 2, 24, 256>}, {pipeline_mode = #tpu.pipeline_mode<synchronous>, transform_indices = @transform_1, window_bounds = array<i64: 1, 1, 256>}, {pipeline_mode = #tpu.pipeline_mode<synchronous>, transform_indices = @transform_2, window_bounds = array<i64: 1, 24>}, {pipeline_mode = #tpu.pipeline_mode<synchronous>, transform_indices = @transform_3, window_bounds = array<i64: 24, 1>}, {transform_indices = @transform_4, window_bounds = array<i64: 2, 49>}, {transform_indices = @transform_5, window_bounds = array<i64: 1, 1>}, {pipeline_mode = #tpu.pipeline_mode<synchronous>, transform_indices = @transform_6, window_bounds = array<i64: 24, 512>}, {pipeline_mode = #tpu.pipeline_mode<synchronous>, transform_indices = @transform_7, window_bounds = array<i64: 1, 512>}, {pipeline_mode = #tpu.pipeline_mode<synchronous>, transform_indices = @transform_8, window_bounds = array<i64: 1, 512>}, {pipeline_mode = #tpu.pipeline_mode<synchronous>, transform_indices = @transform_9, window_bounds = array<i64: 1, 512>}, {transform_indices = @transform_10, window_bounds = array<i64: 2, 1, 512>}]} {
    %c0 = arith.constant 0 : index
    %c0_0 = arith.constant 0 : index
    %c0_1 = arith.constant 0 : index
    %0 = vector.load %arg1[%c0, %c0_0, %c0_1] : memref<2x24x256xf32, #tpu.memory_space<vmem>>, vector<2x24x256xf32>
    %cst = arith.constant dense<0.000000e+00> : vector<2x24xf32>
    %1 = vector.multi_reduction <add>, %0, %cst [2] : vector<2x24x256xf32> to vector<2x24xf32>
    %2 = vector.shape_cast %1 : vector<2x24xf32> to vector<2x24x1xf32>
    %cst_2 = arith.constant 3.906250e-03 : f32
    %3 = vector.broadcast %cst_2 : f32 to vector<2x24x1xf32>
    %4 = arith.mulf %2, %3 : vector<2x24x1xf32>
    %cst_3 = arith.constant dense<0xFF800000> : vector<2x24xf32>
    %5 = vector.multi_reduction <maximumf>, %0, %cst_3 [2] : vector<2x24x256xf32> to vector<2x24xf32>
    %6 = vector.shape_cast %5 : vector<2x24xf32> to vector<2x24x1xf32>
    %7 = vector.extract_strided_slice %4 {offsets = [0, 0, 0], sizes = [1, 24, 1], strides = [1, 1, 1]} : vector<2x24x1xf32> to vector<1x24x1xf32>
    %8 = vector.shape_cast %7 : vector<1x24x1xf32> to vector<24x1xf32>
    %9 = vector.extract_strided_slice %4 {offsets = [1, 0, 0], sizes = [1, 24, 1], strides = [1, 1, 1]} : vector<2x24x1xf32> to vector<1x24x1xf32>
    %10 = vector.shape_cast %9 : vector<1x24x1xf32> to vector<24x1xf32>
    %11 = vector.extract_strided_slice %6 {offsets = [0, 0, 0], sizes = [1, 24, 1], strides = [1, 1, 1]} : vector<2x24x1xf32> to vector<1x24x1xf32>
    %12 = vector.shape_cast %11 : vector<1x24x1xf32> to vector<24x1xf32>
    %13 = vector.extract_strided_slice %6 {offsets = [1, 0, 0], sizes = [1, 24, 1], strides = [1, 1, 1]} : vector<2x24x1xf32> to vector<1x24x1xf32>
    %14 = vector.shape_cast %13 : vector<1x24x1xf32> to vector<24x1xf32>
    %15 = tpu.concatenate %8, %10, %12, %14 in 1 : vector<24x1xf32>, vector<24x1xf32>, vector<24x1xf32>, vector<24x1xf32> -> vector<24x4xf32>
    %c0_4 = arith.constant 0 : index
    %c0_5 = arith.constant 0 : index
    %16 = vector.load %arg3[%c0_4, %c0_5] : memref<1x24xf32, #tpu.memory_space<vmem>>, vector<1x24xf32>
    %cst_6 = arith.constant dense<0.000000e+00> : vector<1x4xf32>
    %17 = tpu.matmul %16, %15, %cst_6 {dimension_numbers = #tpu.dot_dimension_numbers<[1], [0], [0], [1], [0, 0, 1, 1], [], []>, precision = #tpu.contract_precision<fp32>} : vector<1x24xf32>, vector<24x4xf32>, vector<1x4xf32> -> vector<1x4xf32>
    %cst_7 = arith.constant 0.000000e+00 : f32
    %18 = vector.broadcast %cst_7 : f32 to vector<1x4xf32>
    %19 = arith.maximumf %17, %18 : vector<1x4xf32>
    %c0_8 = arith.constant 0 : index
    %c0_9 = arith.constant 0 : index
    %20 = vector.load %arg4[%c0_8, %c0_9] : memref<24x1xf32, #tpu.memory_space<vmem>>, vector<24x1xf32>
    %cst_10 = arith.constant dense<0.000000e+00> : vector<24x4xf32>
    %21 = tpu.matmul %20, %19, %cst_10 {dimension_numbers = #tpu.dot_dimension_numbers<[1], [0], [0], [1], [0, 0, 1, 1], [], []>, precision = #tpu.contract_precision<fp32>} : vector<24x1xf32>, vector<1x4xf32>, vector<24x4xf32> -> vector<24x4xf32>
    %22 = vector.extract_strided_slice %21 {offsets = [0, 0], sizes = [24, 2], strides = [1, 1]} : vector<24x4xf32> to vector<24x2xf32>
    %23 = vector.extract_strided_slice %21 {offsets = [0, 2], sizes = [24, 2], strides = [1, 1]} : vector<24x4xf32> to vector<24x2xf32>
    %24 = arith.addf %22, %23 : vector<24x2xf32>
    %cst_11 = arith.constant 0.000000e+00 : f32
    %25 = vector.broadcast %cst_11 : f32 to vector<24x2xf32>
    %26 = arith.subf %25, %24 : vector<24x2xf32>
    %27 = math.exp %26 : vector<24x2xf32>
    %cst_12 = arith.constant 1.000000e+00 : f32
    %28 = vector.broadcast %cst_12 : f32 to vector<24x2xf32>
    %29 = arith.addf %28, %27 : vector<24x2xf32>
    %30 = tpu.reciprocal %29 {approx = true} : vector<24x2xf32> -> vector<24x2xf32>
    %31 = vector.extract_strided_slice %30 {offsets = [0, 0], sizes = [24, 1], strides = [1, 1]} : vector<24x2xf32> to vector<24x1xf32>
    %32 = vector.extract_strided_slice %30 {offsets = [0, 1], sizes = [24, 1], strides = [1, 1]} : vector<24x2xf32> to vector<24x1xf32>
    %33 = vector.shape_cast %31 : vector<24x1xf32> to vector<1x24x1xf32>
    %34 = vector.shape_cast %32 : vector<24x1xf32> to vector<1x24x1xf32>
    %35 = tpu.concatenate %33, %34 in 0 : vector<1x24x1xf32>, vector<1x24x1xf32> -> vector<2x24x1xf32>
    %36 = vector.broadcast %35 : vector<2x24x1xf32> to vector<2x24x256xf32>
    %37 = arith.mulf %0, %36 : vector<2x24x256xf32>
    %cst_13 = arith.constant dense<0.000000e+00> : vector<2x256xf32>
    %38 = vector.multi_reduction <add>, %37, %cst_13 [1] : vector<2x24x256xf32> to vector<2x256xf32>
    %39 = vector.shape_cast %38 : vector<2x256xf32> to vector<2x1x256xf32>
    %cst_14 = arith.constant 0.0416666679 : f32
    %40 = vector.broadcast %cst_14 : f32 to vector<2x1x256xf32>
    %41 = arith.mulf %39, %40 : vector<2x1x256xf32>
    %cst_15 = arith.constant dense<0xFF800000> : vector<2x256xf32>
    %42 = vector.multi_reduction <maximumf>, %37, %cst_15 [1] : vector<2x24x256xf32> to vector<2x256xf32>
    %43 = vector.shape_cast %42 : vector<2x256xf32> to vector<2x1x256xf32>
    %44 = tpu.iota {dimensions = array<i32: 2>} : vector<1x1x256xi32>
    %c0_16 = arith.constant 0 : index
    %c0_17 = arith.constant 0 : index
    %c0_18 = arith.constant 0 : index
    %45 = vector.load %arg2[%c0_16, %c0_17, %c0_18] : memref<1x1x256xi32, #tpu.memory_space<vmem>>, vector<1x1x256xi32>
    %c48_i32 = arith.constant 48 : i32
    %46 = vector.broadcast %c48_i32 : i32 to vector<1x1x256xi32>
    %47 = arith.cmpi sge, %44, %46 : vector<1x1x256xi32>
    %c304_i32 = arith.constant 304 : i32
    %48 = vector.broadcast %c304_i32 : i32 to vector<1x1x256xi32>
    %49 = arith.cmpi slt, %44, %48 : vector<1x1x256xi32>
    %50 = arith.andi %47, %49 : vector<1x1x256xi1>
    %c32_i32 = arith.constant 32 : i32
    %51 = vector.broadcast %c32_i32 : i32 to vector<1x1x256xi32>
    %52 = arith.cmpi sge, %44, %51 : vector<1x1x256xi32>
    %c288_i32 = arith.constant 288 : i32
    %53 = vector.broadcast %c288_i32 : i32 to vector<1x1x256xi32>
    %54 = arith.cmpi slt, %44, %53 : vector<1x1x256xi32>
    %55 = arith.andi %52, %54 : vector<1x1x256xi1>
    %c16_i32 = arith.constant 16 : i32
    %56 = vector.broadcast %c16_i32 : i32 to vector<1x1x256xi32>
    %57 = arith.cmpi sge, %44, %56 : vector<1x1x256xi32>
    %c272_i32 = arith.constant 272 : i32
    %58 = vector.broadcast %c272_i32 : i32 to vector<1x1x256xi32>
    %59 = arith.cmpi slt, %44, %58 : vector<1x1x256xi32>
    %60 = arith.andi %57, %59 : vector<1x1x256xi1>
    %c0_i32 = arith.constant 0 : i32
    %61 = vector.broadcast %c0_i32 : i32 to vector<1x1x256xi32>
    %62 = arith.cmpi sge, %44, %61 : vector<1x1x256xi32>
    %c256_i32 = arith.constant 256 : i32
    %63 = vector.broadcast %c256_i32 : i32 to vector<1x1x256xi32>
    %64 = arith.cmpi slt, %44, %63 : vector<1x1x256xi32>
    %65 = arith.andi %62, %64 : vector<1x1x256xi1>
    %c-16_i32 = arith.constant -16 : i32
    %66 = vector.broadcast %c-16_i32 : i32 to vector<1x1x256xi32>
    %67 = arith.cmpi sge, %44, %66 : vector<1x1x256xi32>
    %c240_i32 = arith.constant 240 : i32
    %68 = vector.broadcast %c240_i32 : i32 to vector<1x1x256xi32>
    %69 = arith.cmpi slt, %44, %68 : vector<1x1x256xi32>
    %70 = arith.andi %67, %69 : vector<1x1x256xi1>
    %c-32_i32 = arith.constant -32 : i32
    %71 = vector.broadcast %c-32_i32 : i32 to vector<1x1x256xi32>
    %72 = arith.cmpi sge, %44, %71 : vector<1x1x256xi32>
    %c224_i32 = arith.constant 224 : i32
    %73 = vector.broadcast %c224_i32 : i32 to vector<1x1x256xi32>
    %74 = arith.cmpi slt, %44, %73 : vector<1x1x256xi32>
    %75 = arith.andi %72, %74 : vector<1x1x256xi1>
    %c-48_i32 = arith.constant -48 : i32
    %76 = vector.broadcast %c-48_i32 : i32 to vector<1x1x256xi32>
    %77 = arith.cmpi sge, %44, %76 : vector<1x1x256xi32>
    %c208_i32 = arith.constant 208 : i32
    %78 = vector.broadcast %c208_i32 : i32 to vector<1x1x256xi32>
    %79 = arith.cmpi slt, %44, %78 : vector<1x1x256xi32>
    %80 = arith.andi %77, %79 : vector<1x1x256xi1>
    %c3_i32 = arith.constant 3 : i32
    %81 = vector.broadcast %c3_i32 : i32 to vector<1x1x256xi32>
    %82 = arith.cmpi sge, %45, %81 : vector<1x1x256xi32>
    %c19_i32 = arith.constant 19 : i32
    %83 = vector.broadcast %c19_i32 : i32 to vector<1x1x256xi32>
    %84 = arith.cmpi slt, %45, %83 : vector<1x1x256xi32>
    %85 = arith.andi %82, %84 : vector<1x1x256xi1>
    %c2_i32 = arith.constant 2 : i32
    %86 = vector.broadcast %c2_i32 : i32 to vector<1x1x256xi32>
    %87 = arith.cmpi sge, %45, %86 : vector<1x1x256xi32>
    %c18_i32 = arith.constant 18 : i32
    %88 = vector.broadcast %c18_i32 : i32 to vector<1x1x256xi32>
    %89 = arith.cmpi slt, %45, %88 : vector<1x1x256xi32>
    %90 = arith.andi %87, %89 : vector<1x1x256xi1>
    %c1_i32 = arith.constant 1 : i32
    %91 = vector.broadcast %c1_i32 : i32 to vector<1x1x256xi32>
    %92 = arith.cmpi sge, %45, %91 : vector<1x1x256xi32>
    %c17_i32 = arith.constant 17 : i32
    %93 = vector.broadcast %c17_i32 : i32 to vector<1x1x256xi32>
    %94 = arith.cmpi slt, %45, %93 : vector<1x1x256xi32>
    %95 = arith.andi %92, %94 : vector<1x1x256xi1>
    %c0_i32_19 = arith.constant 0 : i32
    %96 = vector.broadcast %c0_i32_19 : i32 to vector<1x1x256xi32>
    %97 = arith.cmpi sge, %45, %96 : vector<1x1x256xi32>
    %c16_i32_20 = arith.constant 16 : i32
    %98 = vector.broadcast %c16_i32_20 : i32 to vector<1x1x256xi32>
    %99 = arith.cmpi slt, %45, %98 : vector<1x1x256xi32>
    %100 = arith.andi %97, %99 : vector<1x1x256xi1>
    %c-1_i32 = arith.constant -1 : i32
    %101 = vector.broadcast %c-1_i32 : i32 to vector<1x1x256xi32>
    %102 = arith.cmpi sge, %45, %101 : vector<1x1x256xi32>
    %c15_i32 = arith.constant 15 : i32
    %103 = vector.broadcast %c15_i32 : i32 to vector<1x1x256xi32>
    %104 = arith.cmpi slt, %45, %103 : vector<1x1x256xi32>
    %105 = arith.andi %102, %104 : vector<1x1x256xi1>
    %c-2_i32 = arith.constant -2 : i32
    %106 = vector.broadcast %c-2_i32 : i32 to vector<1x1x256xi32>
    %107 = arith.cmpi sge, %45, %106 : vector<1x1x256xi32>
    %c14_i32 = arith.constant 14 : i32
    %108 = vector.broadcast %c14_i32 : i32 to vector<1x1x256xi32>
    %109 = arith.cmpi slt, %45, %108 : vector<1x1x256xi32>
    %110 = arith.andi %107, %109 : vector<1x1x256xi1>
    %c-3_i32 = arith.constant -3 : i32
    %111 = vector.broadcast %c-3_i32 : i32 to vector<1x1x256xi32>
    %112 = arith.cmpi sge, %45, %111 : vector<1x1x256xi32>
    %c13_i32 = arith.constant 13 : i32
    %113 = vector.broadcast %c13_i32 : i32 to vector<1x1x256xi32>
    %114 = arith.cmpi slt, %45, %113 : vector<1x1x256xi32>
    %115 = arith.andi %112, %114 : vector<1x1x256xi1>
    %cst_21 = arith.constant 0.000000e+00 : f32
    %116 = vector.broadcast %cst_21 : f32 to vector<2x1x256xf32>
    %117 = arith.andi %50, %85 : vector<1x1x256xi1>
    %118 = arith.extui %117 : vector<1x1x256xi1> to vector<1x1x256xi32>
    %119 = arith.sitofp %118 : vector<1x1x256xi32> to vector<1x1x256xf32>
    %c0_22 = arith.constant 0 : index
    %c0_23 = arith.constant 0 : index
    %120 = memref.load %arg5[%c0_22, %c0_23] : memref<2x49xf32, #tpu.memory_space<smem>>
    %c51_i32 = arith.constant 51 : i32
    %121 = tpu.dynamic_rotate %41 by %c51_i32 dim 2 : vector<2x1x256xf32>, i32 -> vector<2x1x256xf32>
    %122 = vector.broadcast %120 : f32 to vector<2x1x256xf32>
    %123 = arith.mulf %122, %121 : vector<2x1x256xf32>
    %c1 = arith.constant 1 : index
    %c0_24 = arith.constant 0 : index
    %124 = memref.load %arg5[%c1, %c0_24] : memref<2x49xf32, #tpu.memory_space<smem>>
    %c51_i32_25 = arith.constant 51 : i32
    %125 = tpu.dynamic_rotate %43 by %c51_i32_25 dim 2 : vector<2x1x256xf32>, i32 -> vector<2x1x256xf32>
    %126 = vector.broadcast %124 : f32 to vector<2x1x256xf32>
    %127 = arith.mulf %126, %125 : vector<2x1x256xf32>
    %128 = arith.addf %123, %127 : vector<2x1x256xf32>
    %129 = vector.broadcast %119 : vector<1x1x256xf32> to vector<2x1x256xf32>
    %130 = arith.mulf %129, %128 : vector<2x1x256xf32>
    %131 = arith.addf %116, %130 : vector<2x1x256xf32>
    %132 = arith.andi %50, %90 : vector<1x1x256xi1>
    %133 = arith.extui %132 : vector<1x1x256xi1> to vector<1x1x256xi32>
    %134 = arith.sitofp %133 : vector<1x1x256xi32> to vector<1x1x256xf32>
    %c0_26 = arith.constant 0 : index
    %c1_27 = arith.constant 1 : index
    %135 = memref.load %arg5[%c0_26, %c1_27] : memref<2x49xf32, #tpu.memory_space<smem>>
    %c50_i32 = arith.constant 50 : i32
    %136 = tpu.dynamic_rotate %41 by %c50_i32 dim 2 : vector<2x1x256xf32>, i32 -> vector<2x1x256xf32>
    %137 = vector.broadcast %135 : f32 to vector<2x1x256xf32>
    %138 = arith.mulf %137, %136 : vector<2x1x256xf32>
    %c1_28 = arith.constant 1 : index
    %c1_29 = arith.constant 1 : index
    %139 = memref.load %arg5[%c1_28, %c1_29] : memref<2x49xf32, #tpu.memory_space<smem>>
    %c50_i32_30 = arith.constant 50 : i32
    %140 = tpu.dynamic_rotate %43 by %c50_i32_30 dim 2 : vector<2x1x256xf32>, i32 -> vector<2x1x256xf32>
    %141 = vector.broadcast %139 : f32 to vector<2x1x256xf32>
    %142 = arith.mulf %141, %140 : vector<2x1x256xf32>
    %143 = arith.addf %138, %142 : vector<2x1x256xf32>
    %144 = vector.broadcast %134 : vector<1x1x256xf32> to vector<2x1x256xf32>
    %145 = arith.mulf %144, %143 : vector<2x1x256xf32>
    %146 = arith.addf %131, %145 : vector<2x1x256xf32>
    %147 = arith.andi %50, %95 : vector<1x1x256xi1>
    %148 = arith.extui %147 : vector<1x1x256xi1> to vector<1x1x256xi32>
    %149 = arith.sitofp %148 : vector<1x1x256xi32> to vector<1x1x256xf32>
    %c0_31 = arith.constant 0 : index
    %c2 = arith.constant 2 : index
    %150 = memref.load %arg5[%c0_31, %c2] : memref<2x49xf32, #tpu.memory_space<smem>>
    %c49_i32 = arith.constant 49 : i32
    %151 = tpu.dynamic_rotate %41 by %c49_i32 dim 2 : vector<2x1x256xf32>, i32 -> vector<2x1x256xf32>
    %152 = vector.broadcast %150 : f32 to vector<2x1x256xf32>
    %153 = arith.mulf %152, %151 : vector<2x1x256xf32>
    %c1_32 = arith.constant 1 : index
    %c2_33 = arith.constant 2 : index
    %154 = memref.load %arg5[%c1_32, %c2_33] : memref<2x49xf32, #tpu.memory_space<smem>>
    %c49_i32_34 = arith.constant 49 : i32
    %155 = tpu.dynamic_rotate %43 by %c49_i32_34 dim 2 : vector<2x1x256xf32>, i32 -> vector<2x1x256xf32>
    %156 = vector.broadcast %154 : f32 to vector<2x1x256xf32>
    %157 = arith.mulf %156, %155 : vector<2x1x256xf32>
    %158 = arith.addf %153, %157 : vector<2x1x256xf32>
    %159 = vector.broadcast %149 : vector<1x1x256xf32> to vector<2x1x256xf32>
    %160 = arith.mulf %159, %158 : vector<2x1x256xf32>
    %161 = arith.addf %146, %160 : vector<2x1x256xf32>
    %162 = arith.andi %50, %100 : vector<1x1x256xi1>
    %163 = arith.extui %162 : vector<1x1x256xi1> to vector<1x1x256xi32>
    %164 = arith.sitofp %163 : vector<1x1x256xi32> to vector<1x1x256xf32>
    %c0_35 = arith.constant 0 : index
    %c3 = arith.constant 3 : index
    %165 = memref.load %arg5[%c0_35, %c3] : memref<2x49xf32, #tpu.memory_space<smem>>
    %c48_i32_36 = arith.constant 48 : i32
    %166 = tpu.dynamic_rotate %41 by %c48_i32_36 dim 2 : vector<2x1x256xf32>, i32 -> vector<2x1x256xf32>
    %167 = vector.broadcast %165 : f32 to vector<2x1x256xf32>
    %168 = arith.mulf %167, %166 : vector<2x1x256xf32>
    %c1_37 = arith.constant 1 : index
    %c3_38 = arith.constant 3 : index
    %169 = memref.load %arg5[%c1_37, %c3_38] : memref<2x49xf32, #tpu.memory_space<smem>>
    %c48_i32_39 = arith.constant 48 : i32
    %170 = tpu.dynamic_rotate %43 by %c48_i32_39 dim 2 : vector<2x1x256xf32>, i32 -> vector<2x1x256xf32>
    %171 = vector.broadcast %169 : f32 to vector<2x1x256xf32>
    %172 = arith.mulf %171, %170 : vector<2x1x256xf32>
    %173 = arith.addf %168, %172 : vector<2x1x256xf32>
    %174 = vector.broadcast %164 : vector<1x1x256xf32> to vector<2x1x256xf32>
    %175 = arith.mulf %174, %173 : vector<2x1x256xf32>
    %176 = arith.addf %161, %175 : vector<2x1x256xf32>
    %177 = arith.andi %50, %105 : vector<1x1x256xi1>
    %178 = arith.extui %177 : vector<1x1x256xi1> to vector<1x1x256xi32>
    %179 = arith.sitofp %178 : vector<1x1x256xi32> to vector<1x1x256xf32>
    %c0_40 = arith.constant 0 : index
    %c4 = arith.constant 4 : index
    %180 = memref.load %arg5[%c0_40, %c4] : memref<2x49xf32, #tpu.memory_space<smem>>
    %c47_i32 = arith.constant 47 : i32
    %181 = tpu.dynamic_rotate %41 by %c47_i32 dim 2 : vector<2x1x256xf32>, i32 -> vector<2x1x256xf32>
    %182 = vector.broadcast %180 : f32 to vector<2x1x256xf32>
    %183 = arith.mulf %182, %181 : vector<2x1x256xf32>
    %c1_41 = arith.constant 1 : index
    %c4_42 = arith.constant 4 : index
    %184 = memref.load %arg5[%c1_41, %c4_42] : memref<2x49xf32, #tpu.memory_space<smem>>
    %c47_i32_43 = arith.constant 47 : i32
    %185 = tpu.dynamic_rotate %43 by %c47_i32_43 dim 2 : vector<2x1x256xf32>, i32 -> vector<2x1x256xf32>
    %186 = vector.broadcast %184 : f32 to vector<2x1x256xf32>
    %187 = arith.mulf %186, %185 : vector<2x1x256xf32>
    %188 = arith.addf %183, %187 : vector<2x1x256xf32>
    %189 = vector.broadcast %179 : vector<1x1x256xf32> to vector<2x1x256xf32>
    %190 = arith.mulf %189, %188 : vector<2x1x256xf32>
    %191 = arith.addf %176, %190 : vector<2x1x256xf32>
    %192 = arith.andi %50, %110 : vector<1x1x256xi1>
    %193 = arith.extui %192 : vector<1x1x256xi1> to vector<1x1x256xi32>
    %194 = arith.sitofp %193 : vector<1x1x256xi32> to vector<1x1x256xf32>
    %c0_44 = arith.constant 0 : index
    %c5 = arith.constant 5 : index
    %195 = memref.load %arg5[%c0_44, %c5] : memref<2x49xf32, #tpu.memory_space<smem>>
    %c46_i32 = arith.constant 46 : i32
    %196 = tpu.dynamic_rotate %41 by %c46_i32 dim 2 : vector<2x1x256xf32>, i32 -> vector<2x1x256xf32>
    %197 = vector.broadcast %195 : f32 to vector<2x1x256xf32>
    %198 = arith.mulf %197, %196 : vector<2x1x256xf32>
    %c1_45 = arith.constant 1 : index
    %c5_46 = arith.constant 5 : index
    %199 = memref.load %arg5[%c1_45, %c5_46] : memref<2x49xf32, #tpu.memory_space<smem>>
    %c46_i32_47 = arith.constant 46 : i32
    %200 = tpu.dynamic_rotate %43 by %c46_i32_47 dim 2 : vector<2x1x256xf32>, i32 -> vector<2x1x256xf32>
    %201 = vector.broadcast %199 : f32 to vector<2x1x256xf32>
    %202 = arith.mulf %201, %200 : vector<2x1x256xf32>
    %203 = arith.addf %198, %202 : vector<2x1x256xf32>
    %204 = vector.broadcast %194 : vector<1x1x256xf32> to vector<2x1x256xf32>
    %205 = arith.mulf %204, %203 : vector<2x1x256xf32>
    %206 = arith.addf %191, %205 : vector<2x1x256xf32>
    %207 = arith.andi %50, %115 : vector<1x1x256xi1>
    %208 = arith.extui %207 : vector<1x1x256xi1> to vector<1x1x256xi32>
    %209 = arith.sitofp %208 : vector<1x1x256xi32> to vector<1x1x256xf32>
    %c0_48 = arith.constant 0 : index
    %c6 = arith.constant 6 : index
    %210 = memref.load %arg5[%c0_48, %c6] : memref<2x49xf32, #tpu.memory_space<smem>>
    %c45_i32 = arith.constant 45 : i32
    %211 = tpu.dynamic_rotate %41 by %c45_i32 dim 2 : vector<2x1x256xf32>, i32 -> vector<2x1x256xf32>
    %212 = vector.broadcast %210 : f32 to vector<2x1x256xf32>
    %213 = arith.mulf %212, %211 : vector<2x1x256xf32>
    %c1_49 = arith.constant 1 : index
    %c6_50 = arith.constant 6 : index
    %214 = memref.load %arg5[%c1_49, %c6_50] : memref<2x49xf32, #tpu.memory_space<smem>>
    %c45_i32_51 = arith.constant 45 : i32
    %215 = tpu.dynamic_rotate %43 by %c45_i32_51 dim 2 : vector<2x1x256xf32>, i32 -> vector<2x1x256xf32>
    %216 = vector.broadcast %214 : f32 to vector<2x1x256xf32>
    %217 = arith.mulf %216, %215 : vector<2x1x256xf32>
    %218 = arith.addf %213, %217 : vector<2x1x256xf32>
    %219 = vector.broadcast %209 : vector<1x1x256xf32> to vector<2x1x256xf32>
    %220 = arith.mulf %219, %218 : vector<2x1x256xf32>
    %221 = arith.addf %206, %220 : vector<2x1x256xf32>
    %222 = arith.andi %55, %85 : vector<1x1x256xi1>
    %223 = arith.extui %222 : vector<1x1x256xi1> to vector<1x1x256xi32>
    %224 = arith.sitofp %223 : vector<1x1x256xi32> to vector<1x1x256xf32>
    %c0_52 = arith.constant 0 : index
    %c7 = arith.constant 7 : index
    %225 = memref.load %arg5[%c0_52, %c7] : memref<2x49xf32, #tpu.memory_space<smem>>
    %c35_i32 = arith.constant 35 : i32
    %226 = tpu.dynamic_rotate %41 by %c35_i32 dim 2 : vector<2x1x256xf32>, i32 -> vector<2x1x256xf32>
    %227 = vector.broadcast %225 : f32 to vector<2x1x256xf32>
    %228 = arith.mulf %227, %226 : vector<2x1x256xf32>
    %c1_53 = arith.constant 1 : index
    %c7_54 = arith.constant 7 : index
    %229 = memref.load %arg5[%c1_53, %c7_54] : memref<2x49xf32, #tpu.memory_space<smem>>
    %c35_i32_55 = arith.constant 35 : i32
    %230 = tpu.dynamic_rotate %43 by %c35_i32_55 dim 2 : vector<2x1x256xf32>, i32 -> vector<2x1x256xf32>
    %231 = vector.broadcast %229 : f32 to vector<2x1x256xf32>
    %232 = arith.mulf %231, %230 : vector<2x1x256xf32>
    %233 = arith.addf %228, %232 : vector<2x1x256xf32>
    %234 = vector.broadcast %224 : vector<1x1x256xf32> to vector<2x1x256xf32>
    %235 = arith.mulf %234, %233 : vector<2x1x256xf32>
    %236 = arith.addf %221, %235 : vector<2x1x256xf32>
    %237 = arith.andi %55, %90 : vector<1x1x256xi1>
    %238 = arith.extui %237 : vector<1x1x256xi1> to vector<1x1x256xi32>
    %239 = arith.sitofp %238 : vector<1x1x256xi32> to vector<1x1x256xf32>
    %c0_56 = arith.constant 0 : index
    %c8 = arith.constant 8 : index
    %240 = memref.load %arg5[%c0_56, %c8] : memref<2x49xf32, #tpu.memory_space<smem>>
    %c34_i32 = arith.constant 34 : i32
    %241 = tpu.dynamic_rotate %41 by %c34_i32 dim 2 : vector<2x1x256xf32>, i32 -> vector<2x1x256xf32>
    %242 = vector.broadcast %240 : f32 to vector<2x1x256xf32>
    %243 = arith.mulf %242, %241 : vector<2x1x256xf32>
    %c1_57 = arith.constant 1 : index
    %c8_58 = arith.constant 8 : index
    %244 = memref.load %arg5[%c1_57, %c8_58] : memref<2x49xf32, #tpu.memory_space<smem>>
    %c34_i32_59 = arith.constant 34 : i32
    %245 = tpu.dynamic_rotate %43 by %c34_i32_59 dim 2 : vector<2x1x256xf32>, i32 -> vector<2x1x256xf32>
    %246 = vector.broadcast %244 : f32 to vector<2x1x256xf32>
    %247 = arith.mulf %246, %245 : vector<2x1x256xf32>
    %248 = arith.addf %243, %247 : vector<2x1x256xf32>
    %249 = vector.broadcast %239 : vector<1x1x256xf32> to vector<2x1x256xf32>
    %250 = arith.mulf %249, %248 : vector<2x1x256xf32>
    %251 = arith.addf %236, %250 : vector<2x1x256xf32>
    %252 = arith.andi %55, %95 : vector<1x1x256xi1>
    %253 = arith.extui %252 : vector<1x1x256xi1> to vector<1x1x256xi32>
    %254 = arith.sitofp %253 : vector<1x1x256xi32> to vector<1x1x256xf32>
    %c0_60 = arith.constant 0 : index
    %c9 = arith.constant 9 : index
    %255 = memref.load %arg5[%c0_60, %c9] : memref<2x49xf32, #tpu.memory_space<smem>>
    %c33_i32 = arith.constant 33 : i32
    %256 = tpu.dynamic_rotate %41 by %c33_i32 dim 2 : vector<2x1x256xf32>, i32 -> vector<2x1x256xf32>
    %257 = vector.broadcast %255 : f32 to vector<2x1x256xf32>
    %258 = arith.mulf %257, %256 : vector<2x1x256xf32>
    %c1_61 = arith.constant 1 : index
    %c9_62 = arith.constant 9 : index
    %259 = memref.load %arg5[%c1_61, %c9_62] : memref<2x49xf32, #tpu.memory_space<smem>>
    %c33_i32_63 = arith.constant 33 : i32
    %260 = tpu.dynamic_rotate %43 by %c33_i32_63 dim 2 : vector<2x1x256xf32>, i32 -> vector<2x1x256xf32>
    %261 = vector.broadcast %259 : f32 to vector<2x1x256xf32>
    %262 = arith.mulf %261, %260 : vector<2x1x256xf32>
    %263 = arith.addf %258, %262 : vector<2x1x256xf32>
    %264 = vector.broadcast %254 : vector<1x1x256xf32> to vector<2x1x256xf32>
    %265 = arith.mulf %264, %263 : vector<2x1x256xf32>
    %266 = arith.addf %251, %265 : vector<2x1x256xf32>
    %267 = arith.andi %55, %100 : vector<1x1x256xi1>
    %268 = arith.extui %267 : vector<1x1x256xi1> to vector<1x1x256xi32>
    %269 = arith.sitofp %268 : vector<1x1x256xi32> to vector<1x1x256xf32>
    %c0_64 = arith.constant 0 : index
    %c10 = arith.constant 10 : index
    %270 = memref.load %arg5[%c0_64, %c10] : memref<2x49xf32, #tpu.memory_space<smem>>
    %c32_i32_65 = arith.constant 32 : i32
    %271 = tpu.dynamic_rotate %41 by %c32_i32_65 dim 2 : vector<2x1x256xf32>, i32 -> vector<2x1x256xf32>
    %272 = vector.broadcast %270 : f32 to vector<2x1x256xf32>
    %273 = arith.mulf %272, %271 : vector<2x1x256xf32>
    %c1_66 = arith.constant 1 : index
    %c10_67 = arith.constant 10 : index
    %274 = memref.load %arg5[%c1_66, %c10_67] : memref<2x49xf32, #tpu.memory_space<smem>>
    %c32_i32_68 = arith.constant 32 : i32
    %275 = tpu.dynamic_rotate %43 by %c32_i32_68 dim 2 : vector<2x1x256xf32>, i32 -> vector<2x1x256xf32>
    %276 = vector.broadcast %274 : f32 to vector<2x1x256xf32>
    %277 = arith.mulf %276, %275 : vector<2x1x256xf32>
    %278 = arith.addf %273, %277 : vector<2x1x256xf32>
    %279 = vector.broadcast %269 : vector<1x1x256xf32> to vector<2x1x256xf32>
    %280 = arith.mulf %279, %278 : vector<2x1x256xf32>
    %281 = arith.addf %266, %280 : vector<2x1x256xf32>
    %282 = arith.andi %55, %105 : vector<1x1x256xi1>
    %283 = arith.extui %282 : vector<1x1x256xi1> to vector<1x1x256xi32>
    %284 = arith.sitofp %283 : vector<1x1x256xi32> to vector<1x1x256xf32>
    %c0_69 = arith.constant 0 : index
    %c11 = arith.constant 11 : index
    %285 = memref.load %arg5[%c0_69, %c11] : memref<2x49xf32, #tpu.memory_space<smem>>
    %c31_i32 = arith.constant 31 : i32
    %286 = tpu.dynamic_rotate %41 by %c31_i32 dim 2 : vector<2x1x256xf32>, i32 -> vector<2x1x256xf32>
    %287 = vector.broadcast %285 : f32 to vector<2x1x256xf32>
    %288 = arith.mulf %287, %286 : vector<2x1x256xf32>
    %c1_70 = arith.constant 1 : index
    %c11_71 = arith.constant 11 : index
    %289 = memref.load %arg5[%c1_70, %c11_71] : memref<2x49xf32, #tpu.memory_space<smem>>
    %c31_i32_72 = arith.constant 31 : i32
    %290 = tpu.dynamic_rotate %43 by %c31_i32_72 dim 2 : vector<2x1x256xf32>, i32 -> vector<2x1x256xf32>
    %291 = vector.broadcast %289 : f32 to vector<2x1x256xf32>
    %292 = arith.mulf %291, %290 : vector<2x1x256xf32>
    %293 = arith.addf %288, %292 : vector<2x1x256xf32>
    %294 = vector.broadcast %284 : vector<1x1x256xf32> to vector<2x1x256xf32>
    %295 = arith.mulf %294, %293 : vector<2x1x256xf32>
    %296 = arith.addf %281, %295 : vector<2x1x256xf32>
    %297 = arith.andi %55, %110 : vector<1x1x256xi1>
    %298 = arith.extui %297 : vector<1x1x256xi1> to vector<1x1x256xi32>
    %299 = arith.sitofp %298 : vector<1x1x256xi32> to vector<1x1x256xf32>
    %c0_73 = arith.constant 0 : index
    %c12 = arith.constant 12 : index
    %300 = memref.load %arg5[%c0_73, %c12] : memref<2x49xf32, #tpu.memory_space<smem>>
    %c30_i32 = arith.constant 30 : i32
    %301 = tpu.dynamic_rotate %41 by %c30_i32 dim 2 : vector<2x1x256xf32>, i32 -> vector<2x1x256xf32>
    %302 = vector.broadcast %300 : f32 to vector<2x1x256xf32>
    %303 = arith.mulf %302, %301 : vector<2x1x256xf32>
    %c1_74 = arith.constant 1 : index
    %c12_75 = arith.constant 12 : index
    %304 = memref.load %arg5[%c1_74, %c12_75] : memref<2x49xf32, #tpu.memory_space<smem>>
    %c30_i32_76 = arith.constant 30 : i32
    %305 = tpu.dynamic_rotate %43 by %c30_i32_76 dim 2 : vector<2x1x256xf32>, i32 -> vector<2x1x256xf32>
    %306 = vector.broadcast %304 : f32 to vector<2x1x256xf32>
    %307 = arith.mulf %306, %305 : vector<2x1x256xf32>
    %308 = arith.addf %303, %307 : vector<2x1x256xf32>
    %309 = vector.broadcast %299 : vector<1x1x256xf32> to vector<2x1x256xf32>
    %310 = arith.mulf %309, %308 : vector<2x1x256xf32>
    %311 = arith.addf %296, %310 : vector<2x1x256xf32>
    %312 = arith.andi %55, %115 : vector<1x1x256xi1>
    %313 = arith.extui %312 : vector<1x1x256xi1> to vector<1x1x256xi32>
    %314 = arith.sitofp %313 : vector<1x1x256xi32> to vector<1x1x256xf32>
    %c0_77 = arith.constant 0 : index
    %c13 = arith.constant 13 : index
    %315 = memref.load %arg5[%c0_77, %c13] : memref<2x49xf32, #tpu.memory_space<smem>>
    %c29_i32 = arith.constant 29 : i32
    %316 = tpu.dynamic_rotate %41 by %c29_i32 dim 2 : vector<2x1x256xf32>, i32 -> vector<2x1x256xf32>
    %317 = vector.broadcast %315 : f32 to vector<2x1x256xf32>
    %318 = arith.mulf %317, %316 : vector<2x1x256xf32>
    %c1_78 = arith.constant 1 : index
    %c13_79 = arith.constant 13 : index
    %319 = memref.load %arg5[%c1_78, %c13_79] : memref<2x49xf32, #tpu.memory_space<smem>>
    %c29_i32_80 = arith.constant 29 : i32
    %320 = tpu.dynamic_rotate %43 by %c29_i32_80 dim 2 : vector<2x1x256xf32>, i32 -> vector<2x1x256xf32>
    %321 = vector.broadcast %319 : f32 to vector<2x1x256xf32>
    %322 = arith.mulf %321, %320 : vector<2x1x256xf32>
    %323 = arith.addf %318, %322 : vector<2x1x256xf32>
    %324 = vector.broadcast %314 : vector<1x1x256xf32> to vector<2x1x256xf32>
    %325 = arith.mulf %324, %323 : vector<2x1x256xf32>
    %326 = arith.addf %311, %325 : vector<2x1x256xf32>
    %327 = arith.andi %60, %85 : vector<1x1x256xi1>
    %328 = arith.extui %327 : vector<1x1x256xi1> to vector<1x1x256xi32>
    %329 = arith.sitofp %328 : vector<1x1x256xi32> to vector<1x1x256xf32>
    %c0_81 = arith.constant 0 : index
    %c14 = arith.constant 14 : index
    %330 = memref.load %arg5[%c0_81, %c14] : memref<2x49xf32, #tpu.memory_space<smem>>
    %c19_i32_82 = arith.constant 19 : i32
    %331 = tpu.dynamic_rotate %41 by %c19_i32_82 dim 2 : vector<2x1x256xf32>, i32 -> vector<2x1x256xf32>
    %332 = vector.broadcast %330 : f32 to vector<2x1x256xf32>
    %333 = arith.mulf %332, %331 : vector<2x1x256xf32>
    %c1_83 = arith.constant 1 : index
    %c14_84 = arith.constant 14 : index
    %334 = memref.load %arg5[%c1_83, %c14_84] : memref<2x49xf32, #tpu.memory_space<smem>>
    %c19_i32_85 = arith.constant 19 : i32
    %335 = tpu.dynamic_rotate %43 by %c19_i32_85 dim 2 : vector<2x1x256xf32>, i32 -> vector<2x1x256xf32>
    %336 = vector.broadcast %334 : f32 to vector<2x1x256xf32>
    %337 = arith.mulf %336, %335 : vector<2x1x256xf32>
    %338 = arith.addf %333, %337 : vector<2x1x256xf32>
    %339 = vector.broadcast %329 : vector<1x1x256xf32> to vector<2x1x256xf32>
    %340 = arith.mulf %339, %338 : vector<2x1x256xf32>
    %341 = arith.addf %326, %340 : vector<2x1x256xf32>
    %342 = arith.andi %60, %90 : vector<1x1x256xi1>
    %343 = arith.extui %342 : vector<1x1x256xi1> to vector<1x1x256xi32>
    %344 = arith.sitofp %343 : vector<1x1x256xi32> to vector<1x1x256xf32>
    %c0_86 = arith.constant 0 : index
    %c15 = arith.constant 15 : index
    %345 = memref.load %arg5[%c0_86, %c15] : memref<2x49xf32, #tpu.memory_space<smem>>
    %c18_i32_87 = arith.constant 18 : i32
    %346 = tpu.dynamic_rotate %41 by %c18_i32_87 dim 2 : vector<2x1x256xf32>, i32 -> vector<2x1x256xf32>
    %347 = vector.broadcast %345 : f32 to vector<2x1x256xf32>
    %348 = arith.mulf %347, %346 : vector<2x1x256xf32>
    %c1_88 = arith.constant 1 : index
    %c15_89 = arith.constant 15 : index
    %349 = memref.load %arg5[%c1_88, %c15_89] : memref<2x49xf32, #tpu.memory_space<smem>>
    %c18_i32_90 = arith.constant 18 : i32
    %350 = tpu.dynamic_rotate %43 by %c18_i32_90 dim 2 : vector<2x1x256xf32>, i32 -> vector<2x1x256xf32>
    %351 = vector.broadcast %349 : f32 to vector<2x1x256xf32>
    %352 = arith.mulf %351, %350 : vector<2x1x256xf32>
    %353 = arith.addf %348, %352 : vector<2x1x256xf32>
    %354 = vector.broadcast %344 : vector<1x1x256xf32> to vector<2x1x256xf32>
    %355 = arith.mulf %354, %353 : vector<2x1x256xf32>
    %356 = arith.addf %341, %355 : vector<2x1x256xf32>
    %357 = arith.andi %60, %95 : vector<1x1x256xi1>
    %358 = arith.extui %357 : vector<1x1x256xi1> to vector<1x1x256xi32>
    %359 = arith.sitofp %358 : vector<1x1x256xi32> to vector<1x1x256xf32>
    %c0_91 = arith.constant 0 : index
    %c16 = arith.constant 16 : index
    %360 = memref.load %arg5[%c0_91, %c16] : memref<2x49xf32, #tpu.memory_space<smem>>
    %c17_i32_92 = arith.constant 17 : i32
    %361 = tpu.dynamic_rotate %41 by %c17_i32_92 dim 2 : vector<2x1x256xf32>, i32 -> vector<2x1x256xf32>
    %362 = vector.broadcast %360 : f32 to vector<2x1x256xf32>
    %363 = arith.mulf %362, %361 : vector<2x1x256xf32>
    %c1_93 = arith.constant 1 : index
    %c16_94 = arith.constant 16 : index
    %364 = memref.load %arg5[%c1_93, %c16_94] : memref<2x49xf32, #tpu.memory_space<smem>>
    %c17_i32_95 = arith.constant 17 : i32
    %365 = tpu.dynamic_rotate %43 by %c17_i32_95 dim 2 : vector<2x1x256xf32>, i32 -> vector<2x1x256xf32>
    %366 = vector.broadcast %364 : f32 to vector<2x1x256xf32>
    %367 = arith.mulf %366, %365 : vector<2x1x256xf32>
    %368 = arith.addf %363, %367 : vector<2x1x256xf32>
    %369 = vector.broadcast %359 : vector<1x1x256xf32> to vector<2x1x256xf32>
    %370 = arith.mulf %369, %368 : vector<2x1x256xf32>
    %371 = arith.addf %356, %370 : vector<2x1x256xf32>
    %372 = arith.andi %60, %100 : vector<1x1x256xi1>
    %373 = arith.extui %372 : vector<1x1x256xi1> to vector<1x1x256xi32>
    %374 = arith.sitofp %373 : vector<1x1x256xi32> to vector<1x1x256xf32>
    %c0_96 = arith.constant 0 : index
    %c17 = arith.constant 17 : index
    %375 = memref.load %arg5[%c0_96, %c17] : memref<2x49xf32, #tpu.memory_space<smem>>
    %c16_i32_97 = arith.constant 16 : i32
    %376 = tpu.dynamic_rotate %41 by %c16_i32_97 dim 2 : vector<2x1x256xf32>, i32 -> vector<2x1x256xf32>
    %377 = vector.broadcast %375 : f32 to vector<2x1x256xf32>
    %378 = arith.mulf %377, %376 : vector<2x1x256xf32>
    %c1_98 = arith.constant 1 : index
    %c17_99 = arith.constant 17 : index
    %379 = memref.load %arg5[%c1_98, %c17_99] : memref<2x49xf32, #tpu.memory_space<smem>>
    %c16_i32_100 = arith.constant 16 : i32
    %380 = tpu.dynamic_rotate %43 by %c16_i32_100 dim 2 : vector<2x1x256xf32>, i32 -> vector<2x1x256xf32>
    %381 = vector.broadcast %379 : f32 to vector<2x1x256xf32>
    %382 = arith.mulf %381, %380 : vector<2x1x256xf32>
    %383 = arith.addf %378, %382 : vector<2x1x256xf32>
    %384 = vector.broadcast %374 : vector<1x1x256xf32> to vector<2x1x256xf32>
    %385 = arith.mulf %384, %383 : vector<2x1x256xf32>
    %386 = arith.addf %371, %385 : vector<2x1x256xf32>
    %387 = arith.andi %60, %105 : vector<1x1x256xi1>
    %388 = arith.extui %387 : vector<1x1x256xi1> to vector<1x1x256xi32>
    %389 = arith.sitofp %388 : vector<1x1x256xi32> to vector<1x1x256xf32>
    %c0_101 = arith.constant 0 : index
    %c18 = arith.constant 18 : index
    %390 = memref.load %arg5[%c0_101, %c18] : memref<2x49xf32, #tpu.memory_space<smem>>
    %c15_i32_102 = arith.constant 15 : i32
    %391 = tpu.dynamic_rotate %41 by %c15_i32_102 dim 2 : vector<2x1x256xf32>, i32 -> vector<2x1x256xf32>
    %392 = vector.broadcast %390 : f32 to vector<2x1x256xf32>
    %393 = arith.mulf %392, %391 : vector<2x1x256xf32>
    %c1_103 = arith.constant 1 : index
    %c18_104 = arith.constant 18 : index
    %394 = memref.load %arg5[%c1_103, %c18_104] : memref<2x49xf32, #tpu.memory_space<smem>>
    %c15_i32_105 = arith.constant 15 : i32
    %395 = tpu.dynamic_rotate %43 by %c15_i32_105 dim 2 : vector<2x1x256xf32>, i32 -> vector<2x1x256xf32>
    %396 = vector.broadcast %394 : f32 to vector<2x1x256xf32>
    %397 = arith.mulf %396, %395 : vector<2x1x256xf32>
    %398 = arith.addf %393, %397 : vector<2x1x256xf32>
    %399 = vector.broadcast %389 : vector<1x1x256xf32> to vector<2x1x256xf32>
    %400 = arith.mulf %399, %398 : vector<2x1x256xf32>
    %401 = arith.addf %386, %400 : vector<2x1x256xf32>
    %402 = arith.andi %60, %110 : vector<1x1x256xi1>
    %403 = arith.extui %402 : vector<1x1x256xi1> to vector<1x1x256xi32>
    %404 = arith.sitofp %403 : vector<1x1x256xi32> to vector<1x1x256xf32>
    %c0_106 = arith.constant 0 : index
    %c19 = arith.constant 19 : index
    %405 = memref.load %arg5[%c0_106, %c19] : memref<2x49xf32, #tpu.memory_space<smem>>
    %c14_i32_107 = arith.constant 14 : i32
    %406 = tpu.dynamic_rotate %41 by %c14_i32_107 dim 2 : vector<2x1x256xf32>, i32 -> vector<2x1x256xf32>
    %407 = vector.broadcast %405 : f32 to vector<2x1x256xf32>
    %408 = arith.mulf %407, %406 : vector<2x1x256xf32>
    %c1_108 = arith.constant 1 : index
    %c19_109 = arith.constant 19 : index
    %409 = memref.load %arg5[%c1_108, %c19_109] : memref<2x49xf32, #tpu.memory_space<smem>>
    %c14_i32_110 = arith.constant 14 : i32
    %410 = tpu.dynamic_rotate %43 by %c14_i32_110 dim 2 : vector<2x1x256xf32>, i32 -> vector<2x1x256xf32>
    %411 = vector.broadcast %409 : f32 to vector<2x1x256xf32>
    %412 = arith.mulf %411, %410 : vector<2x1x256xf32>
    %413 = arith.addf %408, %412 : vector<2x1x256xf32>
    %414 = vector.broadcast %404 : vector<1x1x256xf32> to vector<2x1x256xf32>
    %415 = arith.mulf %414, %413 : vector<2x1x256xf32>
    %416 = arith.addf %401, %415 : vector<2x1x256xf32>
    %417 = arith.andi %60, %115 : vector<1x1x256xi1>
    %418 = arith.extui %417 : vector<1x1x256xi1> to vector<1x1x256xi32>
    %419 = arith.sitofp %418 : vector<1x1x256xi32> to vector<1x1x256xf32>
    %c0_111 = arith.constant 0 : index
    %c20 = arith.constant 20 : index
    %420 = memref.load %arg5[%c0_111, %c20] : memref<2x49xf32, #tpu.memory_space<smem>>
    %c13_i32_112 = arith.constant 13 : i32
    %421 = tpu.dynamic_rotate %41 by %c13_i32_112 dim 2 : vector<2x1x256xf32>, i32 -> vector<2x1x256xf32>
    %422 = vector.broadcast %420 : f32 to vector<2x1x256xf32>
    %423 = arith.mulf %422, %421 : vector<2x1x256xf32>
    %c1_113 = arith.constant 1 : index
    %c20_114 = arith.constant 20 : index
    %424 = memref.load %arg5[%c1_113, %c20_114] : memref<2x49xf32, #tpu.memory_space<smem>>
    %c13_i32_115 = arith.constant 13 : i32
    %425 = tpu.dynamic_rotate %43 by %c13_i32_115 dim 2 : vector<2x1x256xf32>, i32 -> vector<2x1x256xf32>
    %426 = vector.broadcast %424 : f32 to vector<2x1x256xf32>
    %427 = arith.mulf %426, %425 : vector<2x1x256xf32>
    %428 = arith.addf %423, %427 : vector<2x1x256xf32>
    %429 = vector.broadcast %419 : vector<1x1x256xf32> to vector<2x1x256xf32>
    %430 = arith.mulf %429, %428 : vector<2x1x256xf32>
    %431 = arith.addf %416, %430 : vector<2x1x256xf32>
    %432 = arith.andi %65, %85 : vector<1x1x256xi1>
    %433 = arith.extui %432 : vector<1x1x256xi1> to vector<1x1x256xi32>
    %434 = arith.sitofp %433 : vector<1x1x256xi32> to vector<1x1x256xf32>
    %c0_116 = arith.constant 0 : index
    %c21 = arith.constant 21 : index
    %435 = memref.load %arg5[%c0_116, %c21] : memref<2x49xf32, #tpu.memory_space<smem>>
    %c3_i32_117 = arith.constant 3 : i32
    %436 = tpu.dynamic_rotate %41 by %c3_i32_117 dim 2 : vector<2x1x256xf32>, i32 -> vector<2x1x256xf32>
    %437 = vector.broadcast %435 : f32 to vector<2x1x256xf32>
    %438 = arith.mulf %437, %436 : vector<2x1x256xf32>
    %c1_118 = arith.constant 1 : index
    %c21_119 = arith.constant 21 : index
    %439 = memref.load %arg5[%c1_118, %c21_119] : memref<2x49xf32, #tpu.memory_space<smem>>
    %c3_i32_120 = arith.constant 3 : i32
    %440 = tpu.dynamic_rotate %43 by %c3_i32_120 dim 2 : vector<2x1x256xf32>, i32 -> vector<2x1x256xf32>
    %441 = vector.broadcast %439 : f32 to vector<2x1x256xf32>
    %442 = arith.mulf %441, %440 : vector<2x1x256xf32>
    %443 = arith.addf %438, %442 : vector<2x1x256xf32>
    %444 = vector.broadcast %434 : vector<1x1x256xf32> to vector<2x1x256xf32>
    %445 = arith.mulf %444, %443 : vector<2x1x256xf32>
    %446 = arith.addf %431, %445 : vector<2x1x256xf32>
    %447 = arith.andi %65, %90 : vector<1x1x256xi1>
    %448 = arith.extui %447 : vector<1x1x256xi1> to vector<1x1x256xi32>
    %449 = arith.sitofp %448 : vector<1x1x256xi32> to vector<1x1x256xf32>
    %c0_121 = arith.constant 0 : index
    %c22 = arith.constant 22 : index
    %450 = memref.load %arg5[%c0_121, %c22] : memref<2x49xf32, #tpu.memory_space<smem>>
    %c2_i32_122 = arith.constant 2 : i32
    %451 = tpu.dynamic_rotate %41 by %c2_i32_122 dim 2 : vector<2x1x256xf32>, i32 -> vector<2x1x256xf32>
    %452 = vector.broadcast %450 : f32 to vector<2x1x256xf32>
    %453 = arith.mulf %452, %451 : vector<2x1x256xf32>
    %c1_123 = arith.constant 1 : index
    %c22_124 = arith.constant 22 : index
    %454 = memref.load %arg5[%c1_123, %c22_124] : memref<2x49xf32, #tpu.memory_space<smem>>
    %c2_i32_125 = arith.constant 2 : i32
    %455 = tpu.dynamic_rotate %43 by %c2_i32_125 dim 2 : vector<2x1x256xf32>, i32 -> vector<2x1x256xf32>
    %456 = vector.broadcast %454 : f32 to vector<2x1x256xf32>
    %457 = arith.mulf %456, %455 : vector<2x1x256xf32>
    %458 = arith.addf %453, %457 : vector<2x1x256xf32>
    %459 = vector.broadcast %449 : vector<1x1x256xf32> to vector<2x1x256xf32>
    %460 = arith.mulf %459, %458 : vector<2x1x256xf32>
    %461 = arith.addf %446, %460 : vector<2x1x256xf32>
    %462 = arith.andi %65, %95 : vector<1x1x256xi1>
    %463 = arith.extui %462 : vector<1x1x256xi1> to vector<1x1x256xi32>
    %464 = arith.sitofp %463 : vector<1x1x256xi32> to vector<1x1x256xf32>
    %c0_126 = arith.constant 0 : index
    %c23 = arith.constant 23 : index
    %465 = memref.load %arg5[%c0_126, %c23] : memref<2x49xf32, #tpu.memory_space<smem>>
    %c1_i32_127 = arith.constant 1 : i32
    %466 = tpu.dynamic_rotate %41 by %c1_i32_127 dim 2 : vector<2x1x256xf32>, i32 -> vector<2x1x256xf32>
    %467 = vector.broadcast %465 : f32 to vector<2x1x256xf32>
    %468 = arith.mulf %467, %466 : vector<2x1x256xf32>
    %c1_128 = arith.constant 1 : index
    %c23_129 = arith.constant 23 : index
    %469 = memref.load %arg5[%c1_128, %c23_129] : memref<2x49xf32, #tpu.memory_space<smem>>
    %c1_i32_130 = arith.constant 1 : i32
    %470 = tpu.dynamic_rotate %43 by %c1_i32_130 dim 2 : vector<2x1x256xf32>, i32 -> vector<2x1x256xf32>
    %471 = vector.broadcast %469 : f32 to vector<2x1x256xf32>
    %472 = arith.mulf %471, %470 : vector<2x1x256xf32>
    %473 = arith.addf %468, %472 : vector<2x1x256xf32>
    %474 = vector.broadcast %464 : vector<1x1x256xf32> to vector<2x1x256xf32>
    %475 = arith.mulf %474, %473 : vector<2x1x256xf32>
    %476 = arith.addf %461, %475 : vector<2x1x256xf32>
    %477 = arith.andi %65, %100 : vector<1x1x256xi1>
    %478 = arith.extui %477 : vector<1x1x256xi1> to vector<1x1x256xi32>
    %479 = arith.sitofp %478 : vector<1x1x256xi32> to vector<1x1x256xf32>
    %c0_131 = arith.constant 0 : index
    %c24 = arith.constant 24 : index
    %480 = memref.load %arg5[%c0_131, %c24] : memref<2x49xf32, #tpu.memory_space<smem>>
    %481 = vector.broadcast %480 : f32 to vector<2x1x256xf32>
    %482 = arith.mulf %481, %41 : vector<2x1x256xf32>
    %c1_132 = arith.constant 1 : index
    %c24_133 = arith.constant 24 : index
    %483 = memref.load %arg5[%c1_132, %c24_133] : memref<2x49xf32, #tpu.memory_space<smem>>
    %484 = vector.broadcast %483 : f32 to vector<2x1x256xf32>
    %485 = arith.mulf %484, %43 : vector<2x1x256xf32>
    %486 = arith.addf %482, %485 : vector<2x1x256xf32>
    %487 = vector.broadcast %479 : vector<1x1x256xf32> to vector<2x1x256xf32>
    %488 = arith.mulf %487, %486 : vector<2x1x256xf32>
    %489 = arith.addf %476, %488 : vector<2x1x256xf32>
    %490 = arith.andi %65, %105 : vector<1x1x256xi1>
    %491 = arith.extui %490 : vector<1x1x256xi1> to vector<1x1x256xi32>
    %492 = arith.sitofp %491 : vector<1x1x256xi32> to vector<1x1x256xf32>
    %c0_134 = arith.constant 0 : index
    %c25 = arith.constant 25 : index
    %493 = memref.load %arg5[%c0_134, %c25] : memref<2x49xf32, #tpu.memory_space<smem>>
    %c255_i32 = arith.constant 255 : i32
    %494 = tpu.dynamic_rotate %41 by %c255_i32 dim 2 : vector<2x1x256xf32>, i32 -> vector<2x1x256xf32>
    %495 = vector.broadcast %493 : f32 to vector<2x1x256xf32>
    %496 = arith.mulf %495, %494 : vector<2x1x256xf32>
    %c1_135 = arith.constant 1 : index
    %c25_136 = arith.constant 25 : index
    %497 = memref.load %arg5[%c1_135, %c25_136] : memref<2x49xf32, #tpu.memory_space<smem>>
    %c255_i32_137 = arith.constant 255 : i32
    %498 = tpu.dynamic_rotate %43 by %c255_i32_137 dim 2 : vector<2x1x256xf32>, i32 -> vector<2x1x256xf32>
    %499 = vector.broadcast %497 : f32 to vector<2x1x256xf32>
    %500 = arith.mulf %499, %498 : vector<2x1x256xf32>
    %501 = arith.addf %496, %500 : vector<2x1x256xf32>
    %502 = vector.broadcast %492 : vector<1x1x256xf32> to vector<2x1x256xf32>
    %503 = arith.mulf %502, %501 : vector<2x1x256xf32>
    %504 = arith.addf %489, %503 : vector<2x1x256xf32>
    %505 = arith.andi %65, %110 : vector<1x1x256xi1>
    %506 = arith.extui %505 : vector<1x1x256xi1> to vector<1x1x256xi32>
    %507 = arith.sitofp %506 : vector<1x1x256xi32> to vector<1x1x256xf32>
    %c0_138 = arith.constant 0 : index
    %c26 = arith.constant 26 : index
    %508 = memref.load %arg5[%c0_138, %c26] : memref<2x49xf32, #tpu.memory_space<smem>>
    %c254_i32 = arith.constant 254 : i32
    %509 = tpu.dynamic_rotate %41 by %c254_i32 dim 2 : vector<2x1x256xf32>, i32 -> vector<2x1x256xf32>
    %510 = vector.broadcast %508 : f32 to vector<2x1x256xf32>
    %511 = arith.mulf %510, %509 : vector<2x1x256xf32>
    %c1_139 = arith.constant 1 : index
    %c26_140 = arith.constant 26 : index
    %512 = memref.load %arg5[%c1_139, %c26_140] : memref<2x49xf32, #tpu.memory_space<smem>>
    %c254_i32_141 = arith.constant 254 : i32
    %513 = tpu.dynamic_rotate %43 by %c254_i32_141 dim 2 : vector<2x1x256xf32>, i32 -> vector<2x1x256xf32>
    %514 = vector.broadcast %512 : f32 to vector<2x1x256xf32>
    %515 = arith.mulf %514, %513 : vector<2x1x256xf32>
    %516 = arith.addf %511, %515 : vector<2x1x256xf32>
    %517 = vector.broadcast %507 : vector<1x1x256xf32> to vector<2x1x256xf32>
    %518 = arith.mulf %517, %516 : vector<2x1x256xf32>
    %519 = arith.addf %504, %518 : vector<2x1x256xf32>
    %520 = arith.andi %65, %115 : vector<1x1x256xi1>
    %521 = arith.extui %520 : vector<1x1x256xi1> to vector<1x1x256xi32>
    %522 = arith.sitofp %521 : vector<1x1x256xi32> to vector<1x1x256xf32>
    %c0_142 = arith.constant 0 : index
    %c27 = arith.constant 27 : index
    %523 = memref.load %arg5[%c0_142, %c27] : memref<2x49xf32, #tpu.memory_space<smem>>
    %c253_i32 = arith.constant 253 : i32
    %524 = tpu.dynamic_rotate %41 by %c253_i32 dim 2 : vector<2x1x256xf32>, i32 -> vector<2x1x256xf32>
    %525 = vector.broadcast %523 : f32 to vector<2x1x256xf32>
    %526 = arith.mulf %525, %524 : vector<2x1x256xf32>
    %c1_143 = arith.constant 1 : index
    %c27_144 = arith.constant 27 : index
    %527 = memref.load %arg5[%c1_143, %c27_144] : memref<2x49xf32, #tpu.memory_space<smem>>
    %c253_i32_145 = arith.constant 253 : i32
    %528 = tpu.dynamic_rotate %43 by %c253_i32_145 dim 2 : vector<2x1x256xf32>, i32 -> vector<2x1x256xf32>
    %529 = vector.broadcast %527 : f32 to vector<2x1x256xf32>
    %530 = arith.mulf %529, %528 : vector<2x1x256xf32>
    %531 = arith.addf %526, %530 : vector<2x1x256xf32>
    %532 = vector.broadcast %522 : vector<1x1x256xf32> to vector<2x1x256xf32>
    %533 = arith.mulf %532, %531 : vector<2x1x256xf32>
    %534 = arith.addf %519, %533 : vector<2x1x256xf32>
    %535 = arith.andi %70, %85 : vector<1x1x256xi1>
    %536 = arith.extui %535 : vector<1x1x256xi1> to vector<1x1x256xi32>
    %537 = arith.sitofp %536 : vector<1x1x256xi32> to vector<1x1x256xf32>
    %c0_146 = arith.constant 0 : index
    %c28 = arith.constant 28 : index
    %538 = memref.load %arg5[%c0_146, %c28] : memref<2x49xf32, #tpu.memory_space<smem>>
    %c243_i32 = arith.constant 243 : i32
    %539 = tpu.dynamic_rotate %41 by %c243_i32 dim 2 : vector<2x1x256xf32>, i32 -> vector<2x1x256xf32>
    %540 = vector.broadcast %538 : f32 to vector<2x1x256xf32>
    %541 = arith.mulf %540, %539 : vector<2x1x256xf32>
    %c1_147 = arith.constant 1 : index
    %c28_148 = arith.constant 28 : index
    %542 = memref.load %arg5[%c1_147, %c28_148] : memref<2x49xf32, #tpu.memory_space<smem>>
    %c243_i32_149 = arith.constant 243 : i32
    %543 = tpu.dynamic_rotate %43 by %c243_i32_149 dim 2 : vector<2x1x256xf32>, i32 -> vector<2x1x256xf32>
    %544 = vector.broadcast %542 : f32 to vector<2x1x256xf32>
    %545 = arith.mulf %544, %543 : vector<2x1x256xf32>
    %546 = arith.addf %541, %545 : vector<2x1x256xf32>
    %547 = vector.broadcast %537 : vector<1x1x256xf32> to vector<2x1x256xf32>
    %548 = arith.mulf %547, %546 : vector<2x1x256xf32>
    %549 = arith.addf %534, %548 : vector<2x1x256xf32>
    %550 = arith.andi %70, %90 : vector<1x1x256xi1>
    %551 = arith.extui %550 : vector<1x1x256xi1> to vector<1x1x256xi32>
    %552 = arith.sitofp %551 : vector<1x1x256xi32> to vector<1x1x256xf32>
    %c0_150 = arith.constant 0 : index
    %c29 = arith.constant 29 : index
    %553 = memref.load %arg5[%c0_150, %c29] : memref<2x49xf32, #tpu.memory_space<smem>>
    %c242_i32 = arith.constant 242 : i32
    %554 = tpu.dynamic_rotate %41 by %c242_i32 dim 2 : vector<2x1x256xf32>, i32 -> vector<2x1x256xf32>
    %555 = vector.broadcast %553 : f32 to vector<2x1x256xf32>
    %556 = arith.mulf %555, %554 : vector<2x1x256xf32>
    %c1_151 = arith.constant 1 : index
    %c29_152 = arith.constant 29 : index
    %557 = memref.load %arg5[%c1_151, %c29_152] : memref<2x49xf32, #tpu.memory_space<smem>>
    %c242_i32_153 = arith.constant 242 : i32
    %558 = tpu.dynamic_rotate %43 by %c242_i32_153 dim 2 : vector<2x1x256xf32>, i32 -> vector<2x1x256xf32>
    %559 = vector.broadcast %557 : f32 to vector<2x1x256xf32>
    %560 = arith.mulf %559, %558 : vector<2x1x256xf32>
    %561 = arith.addf %556, %560 : vector<2x1x256xf32>
    %562 = vector.broadcast %552 : vector<1x1x256xf32> to vector<2x1x256xf32>
    %563 = arith.mulf %562, %561 : vector<2x1x256xf32>
    %564 = arith.addf %549, %563 : vector<2x1x256xf32>
    %565 = arith.andi %70, %95 : vector<1x1x256xi1>
    %566 = arith.extui %565 : vector<1x1x256xi1> to vector<1x1x256xi32>
    %567 = arith.sitofp %566 : vector<1x1x256xi32> to vector<1x1x256xf32>
    %c0_154 = arith.constant 0 : index
    %c30 = arith.constant 30 : index
    %568 = memref.load %arg5[%c0_154, %c30] : memref<2x49xf32, #tpu.memory_space<smem>>
    %c241_i32 = arith.constant 241 : i32
    %569 = tpu.dynamic_rotate %41 by %c241_i32 dim 2 : vector<2x1x256xf32>, i32 -> vector<2x1x256xf32>
    %570 = vector.broadcast %568 : f32 to vector<2x1x256xf32>
    %571 = arith.mulf %570, %569 : vector<2x1x256xf32>
    %c1_155 = arith.constant 1 : index
    %c30_156 = arith.constant 30 : index
    %572 = memref.load %arg5[%c1_155, %c30_156] : memref<2x49xf32, #tpu.memory_space<smem>>
    %c241_i32_157 = arith.constant 241 : i32
    %573 = tpu.dynamic_rotate %43 by %c241_i32_157 dim 2 : vector<2x1x256xf32>, i32 -> vector<2x1x256xf32>
    %574 = vector.broadcast %572 : f32 to vector<2x1x256xf32>
    %575 = arith.mulf %574, %573 : vector<2x1x256xf32>
    %576 = arith.addf %571, %575 : vector<2x1x256xf32>
    %577 = vector.broadcast %567 : vector<1x1x256xf32> to vector<2x1x256xf32>
    %578 = arith.mulf %577, %576 : vector<2x1x256xf32>
    %579 = arith.addf %564, %578 : vector<2x1x256xf32>
    %580 = arith.andi %70, %100 : vector<1x1x256xi1>
    %581 = arith.extui %580 : vector<1x1x256xi1> to vector<1x1x256xi32>
    %582 = arith.sitofp %581 : vector<1x1x256xi32> to vector<1x1x256xf32>
    %c0_158 = arith.constant 0 : index
    %c31 = arith.constant 31 : index
    %583 = memref.load %arg5[%c0_158, %c31] : memref<2x49xf32, #tpu.memory_space<smem>>
    %c240_i32_159 = arith.constant 240 : i32
    %584 = tpu.dynamic_rotate %41 by %c240_i32_159 dim 2 : vector<2x1x256xf32>, i32 -> vector<2x1x256xf32>
    %585 = vector.broadcast %583 : f32 to vector<2x1x256xf32>
    %586 = arith.mulf %585, %584 : vector<2x1x256xf32>
    %c1_160 = arith.constant 1 : index
    %c31_161 = arith.constant 31 : index
    %587 = memref.load %arg5[%c1_160, %c31_161] : memref<2x49xf32, #tpu.memory_space<smem>>
    %c240_i32_162 = arith.constant 240 : i32
    %588 = tpu.dynamic_rotate %43 by %c240_i32_162 dim 2 : vector<2x1x256xf32>, i32 -> vector<2x1x256xf32>
    %589 = vector.broadcast %587 : f32 to vector<2x1x256xf32>
    %590 = arith.mulf %589, %588 : vector<2x1x256xf32>
    %591 = arith.addf %586, %590 : vector<2x1x256xf32>
    %592 = vector.broadcast %582 : vector<1x1x256xf32> to vector<2x1x256xf32>
    %593 = arith.mulf %592, %591 : vector<2x1x256xf32>
    %594 = arith.addf %579, %593 : vector<2x1x256xf32>
    %595 = arith.andi %70, %105 : vector<1x1x256xi1>
    %596 = arith.extui %595 : vector<1x1x256xi1> to vector<1x1x256xi32>
    %597 = arith.sitofp %596 : vector<1x1x256xi32> to vector<1x1x256xf32>
    %c0_163 = arith.constant 0 : index
    %c32 = arith.constant 32 : index
    %598 = memref.load %arg5[%c0_163, %c32] : memref<2x49xf32, #tpu.memory_space<smem>>
    %c239_i32 = arith.constant 239 : i32
    %599 = tpu.dynamic_rotate %41 by %c239_i32 dim 2 : vector<2x1x256xf32>, i32 -> vector<2x1x256xf32>
    %600 = vector.broadcast %598 : f32 to vector<2x1x256xf32>
    %601 = arith.mulf %600, %599 : vector<2x1x256xf32>
    %c1_164 = arith.constant 1 : index
    %c32_165 = arith.constant 32 : index
    %602 = memref.load %arg5[%c1_164, %c32_165] : memref<2x49xf32, #tpu.memory_space<smem>>
    %c239_i32_166 = arith.constant 239 : i32
    %603 = tpu.dynamic_rotate %43 by %c239_i32_166 dim 2 : vector<2x1x256xf32>, i32 -> vector<2x1x256xf32>
    %604 = vector.broadcast %602 : f32 to vector<2x1x256xf32>
    %605 = arith.mulf %604, %603 : vector<2x1x256xf32>
    %606 = arith.addf %601, %605 : vector<2x1x256xf32>
    %607 = vector.broadcast %597 : vector<1x1x256xf32> to vector<2x1x256xf32>
    %608 = arith.mulf %607, %606 : vector<2x1x256xf32>
    %609 = arith.addf %594, %608 : vector<2x1x256xf32>
    %610 = arith.andi %70, %110 : vector<1x1x256xi1>
    %611 = arith.extui %610 : vector<1x1x256xi1> to vector<1x1x256xi32>
    %612 = arith.sitofp %611 : vector<1x1x256xi32> to vector<1x1x256xf32>
    %c0_167 = arith.constant 0 : index
    %c33 = arith.constant 33 : index
    %613 = memref.load %arg5[%c0_167, %c33] : memref<2x49xf32, #tpu.memory_space<smem>>
    %c238_i32 = arith.constant 238 : i32
    %614 = tpu.dynamic_rotate %41 by %c238_i32 dim 2 : vector<2x1x256xf32>, i32 -> vector<2x1x256xf32>
    %615 = vector.broadcast %613 : f32 to vector<2x1x256xf32>
    %616 = arith.mulf %615, %614 : vector<2x1x256xf32>
    %c1_168 = arith.constant 1 : index
    %c33_169 = arith.constant 33 : index
    %617 = memref.load %arg5[%c1_168, %c33_169] : memref<2x49xf32, #tpu.memory_space<smem>>
    %c238_i32_170 = arith.constant 238 : i32
    %618 = tpu.dynamic_rotate %43 by %c238_i32_170 dim 2 : vector<2x1x256xf32>, i32 -> vector<2x1x256xf32>
    %619 = vector.broadcast %617 : f32 to vector<2x1x256xf32>
    %620 = arith.mulf %619, %618 : vector<2x1x256xf32>
    %621 = arith.addf %616, %620 : vector<2x1x256xf32>
    %622 = vector.broadcast %612 : vector<1x1x256xf32> to vector<2x1x256xf32>
    %623 = arith.mulf %622, %621 : vector<2x1x256xf32>
    %624 = arith.addf %609, %623 : vector<2x1x256xf32>
    %625 = arith.andi %70, %115 : vector<1x1x256xi1>
    %626 = arith.extui %625 : vector<1x1x256xi1> to vector<1x1x256xi32>
    %627 = arith.sitofp %626 : vector<1x1x256xi32> to vector<1x1x256xf32>
    %c0_171 = arith.constant 0 : index
    %c34 = arith.constant 34 : index
    %628 = memref.load %arg5[%c0_171, %c34] : memref<2x49xf32, #tpu.memory_space<smem>>
    %c237_i32 = arith.constant 237 : i32
    %629 = tpu.dynamic_rotate %41 by %c237_i32 dim 2 : vector<2x1x256xf32>, i32 -> vector<2x1x256xf32>
    %630 = vector.broadcast %628 : f32 to vector<2x1x256xf32>
    %631 = arith.mulf %630, %629 : vector<2x1x256xf32>
    %c1_172 = arith.constant 1 : index
    %c34_173 = arith.constant 34 : index
    %632 = memref.load %arg5[%c1_172, %c34_173] : memref<2x49xf32, #tpu.memory_space<smem>>
    %c237_i32_174 = arith.constant 237 : i32
    %633 = tpu.dynamic_rotate %43 by %c237_i32_174 dim 2 : vector<2x1x256xf32>, i32 -> vector<2x1x256xf32>
    %634 = vector.broadcast %632 : f32 to vector<2x1x256xf32>
    %635 = arith.mulf %634, %633 : vector<2x1x256xf32>
    %636 = arith.addf %631, %635 : vector<2x1x256xf32>
    %637 = vector.broadcast %627 : vector<1x1x256xf32> to vector<2x1x256xf32>
    %638 = arith.mulf %637, %636 : vector<2x1x256xf32>
    %639 = arith.addf %624, %638 : vector<2x1x256xf32>
    %640 = arith.andi %75, %85 : vector<1x1x256xi1>
    %641 = arith.extui %640 : vector<1x1x256xi1> to vector<1x1x256xi32>
    %642 = arith.sitofp %641 : vector<1x1x256xi32> to vector<1x1x256xf32>
    %c0_175 = arith.constant 0 : index
    %c35 = arith.constant 35 : index
    %643 = memref.load %arg5[%c0_175, %c35] : memref<2x49xf32, #tpu.memory_space<smem>>
    %c227_i32 = arith.constant 227 : i32
    %644 = tpu.dynamic_rotate %41 by %c227_i32 dim 2 : vector<2x1x256xf32>, i32 -> vector<2x1x256xf32>
    %645 = vector.broadcast %643 : f32 to vector<2x1x256xf32>
    %646 = arith.mulf %645, %644 : vector<2x1x256xf32>
    %c1_176 = arith.constant 1 : index
    %c35_177 = arith.constant 35 : index
    %647 = memref.load %arg5[%c1_176, %c35_177] : memref<2x49xf32, #tpu.memory_space<smem>>
    %c227_i32_178 = arith.constant 227 : i32
    %648 = tpu.dynamic_rotate %43 by %c227_i32_178 dim 2 : vector<2x1x256xf32>, i32 -> vector<2x1x256xf32>
    %649 = vector.broadcast %647 : f32 to vector<2x1x256xf32>
    %650 = arith.mulf %649, %648 : vector<2x1x256xf32>
    %651 = arith.addf %646, %650 : vector<2x1x256xf32>
    %652 = vector.broadcast %642 : vector<1x1x256xf32> to vector<2x1x256xf32>
    %653 = arith.mulf %652, %651 : vector<2x1x256xf32>
    %654 = arith.addf %639, %653 : vector<2x1x256xf32>
    %655 = arith.andi %75, %90 : vector<1x1x256xi1>
    %656 = arith.extui %655 : vector<1x1x256xi1> to vector<1x1x256xi32>
    %657 = arith.sitofp %656 : vector<1x1x256xi32> to vector<1x1x256xf32>
    %c0_179 = arith.constant 0 : index
    %c36 = arith.constant 36 : index
    %658 = memref.load %arg5[%c0_179, %c36] : memref<2x49xf32, #tpu.memory_space<smem>>
    %c226_i32 = arith.constant 226 : i32
    %659 = tpu.dynamic_rotate %41 by %c226_i32 dim 2 : vector<2x1x256xf32>, i32 -> vector<2x1x256xf32>
    %660 = vector.broadcast %658 : f32 to vector<2x1x256xf32>
    %661 = arith.mulf %660, %659 : vector<2x1x256xf32>
    %c1_180 = arith.constant 1 : index
    %c36_181 = arith.constant 36 : index
    %662 = memref.load %arg5[%c1_180, %c36_181] : memref<2x49xf32, #tpu.memory_space<smem>>
    %c226_i32_182 = arith.constant 226 : i32
    %663 = tpu.dynamic_rotate %43 by %c226_i32_182 dim 2 : vector<2x1x256xf32>, i32 -> vector<2x1x256xf32>
    %664 = vector.broadcast %662 : f32 to vector<2x1x256xf32>
    %665 = arith.mulf %664, %663 : vector<2x1x256xf32>
    %666 = arith.addf %661, %665 : vector<2x1x256xf32>
    %667 = vector.broadcast %657 : vector<1x1x256xf32> to vector<2x1x256xf32>
    %668 = arith.mulf %667, %666 : vector<2x1x256xf32>
    %669 = arith.addf %654, %668 : vector<2x1x256xf32>
    %670 = arith.andi %75, %95 : vector<1x1x256xi1>
    %671 = arith.extui %670 : vector<1x1x256xi1> to vector<1x1x256xi32>
    %672 = arith.sitofp %671 : vector<1x1x256xi32> to vector<1x1x256xf32>
    %c0_183 = arith.constant 0 : index
    %c37 = arith.constant 37 : index
    %673 = memref.load %arg5[%c0_183, %c37] : memref<2x49xf32, #tpu.memory_space<smem>>
    %c225_i32 = arith.constant 225 : i32
    %674 = tpu.dynamic_rotate %41 by %c225_i32 dim 2 : vector<2x1x256xf32>, i32 -> vector<2x1x256xf32>
    %675 = vector.broadcast %673 : f32 to vector<2x1x256xf32>
    %676 = arith.mulf %675, %674 : vector<2x1x256xf32>
    %c1_184 = arith.constant 1 : index
    %c37_185 = arith.constant 37 : index
    %677 = memref.load %arg5[%c1_184, %c37_185] : memref<2x49xf32, #tpu.memory_space<smem>>
    %c225_i32_186 = arith.constant 225 : i32
    %678 = tpu.dynamic_rotate %43 by %c225_i32_186 dim 2 : vector<2x1x256xf32>, i32 -> vector<2x1x256xf32>
    %679 = vector.broadcast %677 : f32 to vector<2x1x256xf32>
    %680 = arith.mulf %679, %678 : vector<2x1x256xf32>
    %681 = arith.addf %676, %680 : vector<2x1x256xf32>
    %682 = vector.broadcast %672 : vector<1x1x256xf32> to vector<2x1x256xf32>
    %683 = arith.mulf %682, %681 : vector<2x1x256xf32>
    %684 = arith.addf %669, %683 : vector<2x1x256xf32>
    %685 = arith.andi %75, %100 : vector<1x1x256xi1>
    %686 = arith.extui %685 : vector<1x1x256xi1> to vector<1x1x256xi32>
    %687 = arith.sitofp %686 : vector<1x1x256xi32> to vector<1x1x256xf32>
    %c0_187 = arith.constant 0 : index
    %c38 = arith.constant 38 : index
    %688 = memref.load %arg5[%c0_187, %c38] : memref<2x49xf32, #tpu.memory_space<smem>>
    %c224_i32_188 = arith.constant 224 : i32
    %689 = tpu.dynamic_rotate %41 by %c224_i32_188 dim 2 : vector<2x1x256xf32>, i32 -> vector<2x1x256xf32>
    %690 = vector.broadcast %688 : f32 to vector<2x1x256xf32>
    %691 = arith.mulf %690, %689 : vector<2x1x256xf32>
    %c1_189 = arith.constant 1 : index
    %c38_190 = arith.constant 38 : index
    %692 = memref.load %arg5[%c1_189, %c38_190] : memref<2x49xf32, #tpu.memory_space<smem>>
    %c224_i32_191 = arith.constant 224 : i32
    %693 = tpu.dynamic_rotate %43 by %c224_i32_191 dim 2 : vector<2x1x256xf32>, i32 -> vector<2x1x256xf32>
    %694 = vector.broadcast %692 : f32 to vector<2x1x256xf32>
    %695 = arith.mulf %694, %693 : vector<2x1x256xf32>
    %696 = arith.addf %691, %695 : vector<2x1x256xf32>
    %697 = vector.broadcast %687 : vector<1x1x256xf32> to vector<2x1x256xf32>
    %698 = arith.mulf %697, %696 : vector<2x1x256xf32>
    %699 = arith.addf %684, %698 : vector<2x1x256xf32>
    %700 = arith.andi %75, %105 : vector<1x1x256xi1>
    %701 = arith.extui %700 : vector<1x1x256xi1> to vector<1x1x256xi32>
    %702 = arith.sitofp %701 : vector<1x1x256xi32> to vector<1x1x256xf32>
    %c0_192 = arith.constant 0 : index
    %c39 = arith.constant 39 : index
    %703 = memref.load %arg5[%c0_192, %c39] : memref<2x49xf32, #tpu.memory_space<smem>>
    %c223_i32 = arith.constant 223 : i32
    %704 = tpu.dynamic_rotate %41 by %c223_i32 dim 2 : vector<2x1x256xf32>, i32 -> vector<2x1x256xf32>
    %705 = vector.broadcast %703 : f32 to vector<2x1x256xf32>
    %706 = arith.mulf %705, %704 : vector<2x1x256xf32>
    %c1_193 = arith.constant 1 : index
    %c39_194 = arith.constant 39 : index
    %707 = memref.load %arg5[%c1_193, %c39_194] : memref<2x49xf32, #tpu.memory_space<smem>>
    %c223_i32_195 = arith.constant 223 : i32
    %708 = tpu.dynamic_rotate %43 by %c223_i32_195 dim 2 : vector<2x1x256xf32>, i32 -> vector<2x1x256xf32>
    %709 = vector.broadcast %707 : f32 to vector<2x1x256xf32>
    %710 = arith.mulf %709, %708 : vector<2x1x256xf32>
    %711 = arith.addf %706, %710 : vector<2x1x256xf32>
    %712 = vector.broadcast %702 : vector<1x1x256xf32> to vector<2x1x256xf32>
    %713 = arith.mulf %712, %711 : vector<2x1x256xf32>
    %714 = arith.addf %699, %713 : vector<2x1x256xf32>
    %715 = arith.andi %75, %110 : vector<1x1x256xi1>
    %716 = arith.extui %715 : vector<1x1x256xi1> to vector<1x1x256xi32>
    %717 = arith.sitofp %716 : vector<1x1x256xi32> to vector<1x1x256xf32>
    %c0_196 = arith.constant 0 : index
    %c40 = arith.constant 40 : index
    %718 = memref.load %arg5[%c0_196, %c40] : memref<2x49xf32, #tpu.memory_space<smem>>
    %c222_i32 = arith.constant 222 : i32
    %719 = tpu.dynamic_rotate %41 by %c222_i32 dim 2 : vector<2x1x256xf32>, i32 -> vector<2x1x256xf32>
    %720 = vector.broadcast %718 : f32 to vector<2x1x256xf32>
    %721 = arith.mulf %720, %719 : vector<2x1x256xf32>
    %c1_197 = arith.constant 1 : index
    %c40_198 = arith.constant 40 : index
    %722 = memref.load %arg5[%c1_197, %c40_198] : memref<2x49xf32, #tpu.memory_space<smem>>
    %c222_i32_199 = arith.constant 222 : i32
    %723 = tpu.dynamic_rotate %43 by %c222_i32_199 dim 2 : vector<2x1x256xf32>, i32 -> vector<2x1x256xf32>
    %724 = vector.broadcast %722 : f32 to vector<2x1x256xf32>
    %725 = arith.mulf %724, %723 : vector<2x1x256xf32>
    %726 = arith.addf %721, %725 : vector<2x1x256xf32>
    %727 = vector.broadcast %717 : vector<1x1x256xf32> to vector<2x1x256xf32>
    %728 = arith.mulf %727, %726 : vector<2x1x256xf32>
    %729 = arith.addf %714, %728 : vector<2x1x256xf32>
    %730 = arith.andi %75, %115 : vector<1x1x256xi1>
    %731 = arith.extui %730 : vector<1x1x256xi1> to vector<1x1x256xi32>
    %732 = arith.sitofp %731 : vector<1x1x256xi32> to vector<1x1x256xf32>
    %c0_200 = arith.constant 0 : index
    %c41 = arith.constant 41 : index
    %733 = memref.load %arg5[%c0_200, %c41] : memref<2x49xf32, #tpu.memory_space<smem>>
    %c221_i32 = arith.constant 221 : i32
    %734 = tpu.dynamic_rotate %41 by %c221_i32 dim 2 : vector<2x1x256xf32>, i32 -> vector<2x1x256xf32>
    %735 = vector.broadcast %733 : f32 to vector<2x1x256xf32>
    %736 = arith.mulf %735, %734 : vector<2x1x256xf32>
    %c1_201 = arith.constant 1 : index
    %c41_202 = arith.constant 41 : index
    %737 = memref.load %arg5[%c1_201, %c41_202] : memref<2x49xf32, #tpu.memory_space<smem>>
    %c221_i32_203 = arith.constant 221 : i32
    %738 = tpu.dynamic_rotate %43 by %c221_i32_203 dim 2 : vector<2x1x256xf32>, i32 -> vector<2x1x256xf32>
    %739 = vector.broadcast %737 : f32 to vector<2x1x256xf32>
    %740 = arith.mulf %739, %738 : vector<2x1x256xf32>
    %741 = arith.addf %736, %740 : vector<2x1x256xf32>
    %742 = vector.broadcast %732 : vector<1x1x256xf32> to vector<2x1x256xf32>
    %743 = arith.mulf %742, %741 : vector<2x1x256xf32>
    %744 = arith.addf %729, %743 : vector<2x1x256xf32>
    %745 = arith.andi %80, %85 : vector<1x1x256xi1>
    %746 = arith.extui %745 : vector<1x1x256xi1> to vector<1x1x256xi32>
    %747 = arith.sitofp %746 : vector<1x1x256xi32> to vector<1x1x256xf32>
    %c0_204 = arith.constant 0 : index
    %c42 = arith.constant 42 : index
    %748 = memref.load %arg5[%c0_204, %c42] : memref<2x49xf32, #tpu.memory_space<smem>>
    %c211_i32 = arith.constant 211 : i32
    %749 = tpu.dynamic_rotate %41 by %c211_i32 dim 2 : vector<2x1x256xf32>, i32 -> vector<2x1x256xf32>
    %750 = vector.broadcast %748 : f32 to vector<2x1x256xf32>
    %751 = arith.mulf %750, %749 : vector<2x1x256xf32>
    %c1_205 = arith.constant 1 : index
    %c42_206 = arith.constant 42 : index
    %752 = memref.load %arg5[%c1_205, %c42_206] : memref<2x49xf32, #tpu.memory_space<smem>>
    %c211_i32_207 = arith.constant 211 : i32
    %753 = tpu.dynamic_rotate %43 by %c211_i32_207 dim 2 : vector<2x1x256xf32>, i32 -> vector<2x1x256xf32>
    %754 = vector.broadcast %752 : f32 to vector<2x1x256xf32>
    %755 = arith.mulf %754, %753 : vector<2x1x256xf32>
    %756 = arith.addf %751, %755 : vector<2x1x256xf32>
    %757 = vector.broadcast %747 : vector<1x1x256xf32> to vector<2x1x256xf32>
    %758 = arith.mulf %757, %756 : vector<2x1x256xf32>
    %759 = arith.addf %744, %758 : vector<2x1x256xf32>
    %760 = arith.andi %80, %90 : vector<1x1x256xi1>
    %761 = arith.extui %760 : vector<1x1x256xi1> to vector<1x1x256xi32>
    %762 = arith.sitofp %761 : vector<1x1x256xi32> to vector<1x1x256xf32>
    %c0_208 = arith.constant 0 : index
    %c43 = arith.constant 43 : index
    %763 = memref.load %arg5[%c0_208, %c43] : memref<2x49xf32, #tpu.memory_space<smem>>
    %c210_i32 = arith.constant 210 : i32
    %764 = tpu.dynamic_rotate %41 by %c210_i32 dim 2 : vector<2x1x256xf32>, i32 -> vector<2x1x256xf32>
    %765 = vector.broadcast %763 : f32 to vector<2x1x256xf32>
    %766 = arith.mulf %765, %764 : vector<2x1x256xf32>
    %c1_209 = arith.constant 1 : index
    %c43_210 = arith.constant 43 : index
    %767 = memref.load %arg5[%c1_209, %c43_210] : memref<2x49xf32, #tpu.memory_space<smem>>
    %c210_i32_211 = arith.constant 210 : i32
    %768 = tpu.dynamic_rotate %43 by %c210_i32_211 dim 2 : vector<2x1x256xf32>, i32 -> vector<2x1x256xf32>
    %769 = vector.broadcast %767 : f32 to vector<2x1x256xf32>
    %770 = arith.mulf %769, %768 : vector<2x1x256xf32>
    %771 = arith.addf %766, %770 : vector<2x1x256xf32>
    %772 = vector.broadcast %762 : vector<1x1x256xf32> to vector<2x1x256xf32>
    %773 = arith.mulf %772, %771 : vector<2x1x256xf32>
    %774 = arith.addf %759, %773 : vector<2x1x256xf32>
    %775 = arith.andi %80, %95 : vector<1x1x256xi1>
    %776 = arith.extui %775 : vector<1x1x256xi1> to vector<1x1x256xi32>
    %777 = arith.sitofp %776 : vector<1x1x256xi32> to vector<1x1x256xf32>
    %c0_212 = arith.constant 0 : index
    %c44 = arith.constant 44 : index
    %778 = memref.load %arg5[%c0_212, %c44] : memref<2x49xf32, #tpu.memory_space<smem>>
    %c209_i32 = arith.constant 209 : i32
    %779 = tpu.dynamic_rotate %41 by %c209_i32 dim 2 : vector<2x1x256xf32>, i32 -> vector<2x1x256xf32>
    %780 = vector.broadcast %778 : f32 to vector<2x1x256xf32>
    %781 = arith.mulf %780, %779 : vector<2x1x256xf32>
    %c1_213 = arith.constant 1 : index
    %c44_214 = arith.constant 44 : index
    %782 = memref.load %arg5[%c1_213, %c44_214] : memref<2x49xf32, #tpu.memory_space<smem>>
    %c209_i32_215 = arith.constant 209 : i32
    %783 = tpu.dynamic_rotate %43 by %c209_i32_215 dim 2 : vector<2x1x256xf32>, i32 -> vector<2x1x256xf32>
    %784 = vector.broadcast %782 : f32 to vector<2x1x256xf32>
    %785 = arith.mulf %784, %783 : vector<2x1x256xf32>
    %786 = arith.addf %781, %785 : vector<2x1x256xf32>
    %787 = vector.broadcast %777 : vector<1x1x256xf32> to vector<2x1x256xf32>
    %788 = arith.mulf %787, %786 : vector<2x1x256xf32>
    %789 = arith.addf %774, %788 : vector<2x1x256xf32>
    %790 = arith.andi %80, %100 : vector<1x1x256xi1>
    %791 = arith.extui %790 : vector<1x1x256xi1> to vector<1x1x256xi32>
    %792 = arith.sitofp %791 : vector<1x1x256xi32> to vector<1x1x256xf32>
    %c0_216 = arith.constant 0 : index
    %c45 = arith.constant 45 : index
    %793 = memref.load %arg5[%c0_216, %c45] : memref<2x49xf32, #tpu.memory_space<smem>>
    %c208_i32_217 = arith.constant 208 : i32
    %794 = tpu.dynamic_rotate %41 by %c208_i32_217 dim 2 : vector<2x1x256xf32>, i32 -> vector<2x1x256xf32>
    %795 = vector.broadcast %793 : f32 to vector<2x1x256xf32>
    %796 = arith.mulf %795, %794 : vector<2x1x256xf32>
    %c1_218 = arith.constant 1 : index
    %c45_219 = arith.constant 45 : index
    %797 = memref.load %arg5[%c1_218, %c45_219] : memref<2x49xf32, #tpu.memory_space<smem>>
    %c208_i32_220 = arith.constant 208 : i32
    %798 = tpu.dynamic_rotate %43 by %c208_i32_220 dim 2 : vector<2x1x256xf32>, i32 -> vector<2x1x256xf32>
    %799 = vector.broadcast %797 : f32 to vector<2x1x256xf32>
    %800 = arith.mulf %799, %798 : vector<2x1x256xf32>
    %801 = arith.addf %796, %800 : vector<2x1x256xf32>
    %802 = vector.broadcast %792 : vector<1x1x256xf32> to vector<2x1x256xf32>
    %803 = arith.mulf %802, %801 : vector<2x1x256xf32>
    %804 = arith.addf %789, %803 : vector<2x1x256xf32>
    %805 = arith.andi %80, %105 : vector<1x1x256xi1>
    %806 = arith.extui %805 : vector<1x1x256xi1> to vector<1x1x256xi32>
    %807 = arith.sitofp %806 : vector<1x1x256xi32> to vector<1x1x256xf32>
    %c0_221 = arith.constant 0 : index
    %c46 = arith.constant 46 : index
    %808 = memref.load %arg5[%c0_221, %c46] : memref<2x49xf32, #tpu.memory_space<smem>>
    %c207_i32 = arith.constant 207 : i32
    %809 = tpu.dynamic_rotate %41 by %c207_i32 dim 2 : vector<2x1x256xf32>, i32 -> vector<2x1x256xf32>
    %810 = vector.broadcast %808 : f32 to vector<2x1x256xf32>
    %811 = arith.mulf %810, %809 : vector<2x1x256xf32>
    %c1_222 = arith.constant 1 : index
    %c46_223 = arith.constant 46 : index
    %812 = memref.load %arg5[%c1_222, %c46_223] : memref<2x49xf32, #tpu.memory_space<smem>>
    %c207_i32_224 = arith.constant 207 : i32
    %813 = tpu.dynamic_rotate %43 by %c207_i32_224 dim 2 : vector<2x1x256xf32>, i32 -> vector<2x1x256xf32>
    %814 = vector.broadcast %812 : f32 to vector<2x1x256xf32>
    %815 = arith.mulf %814, %813 : vector<2x1x256xf32>
    %816 = arith.addf %811, %815 : vector<2x1x256xf32>
    %817 = vector.broadcast %807 : vector<1x1x256xf32> to vector<2x1x256xf32>
    %818 = arith.mulf %817, %816 : vector<2x1x256xf32>
    %819 = arith.addf %804, %818 : vector<2x1x256xf32>
    %820 = arith.andi %80, %110 : vector<1x1x256xi1>
    %821 = arith.extui %820 : vector<1x1x256xi1> to vector<1x1x256xi32>
    %822 = arith.sitofp %821 : vector<1x1x256xi32> to vector<1x1x256xf32>
    %c0_225 = arith.constant 0 : index
    %c47 = arith.constant 47 : index
    %823 = memref.load %arg5[%c0_225, %c47] : memref<2x49xf32, #tpu.memory_space<smem>>
    %c206_i32 = arith.constant 206 : i32
    %824 = tpu.dynamic_rotate %41 by %c206_i32 dim 2 : vector<2x1x256xf32>, i32 -> vector<2x1x256xf32>
    %825 = vector.broadcast %823 : f32 to vector<2x1x256xf32>
    %826 = arith.mulf %825, %824 : vector<2x1x256xf32>
    %c1_226 = arith.constant 1 : index
    %c47_227 = arith.constant 47 : index
    %827 = memref.load %arg5[%c1_226, %c47_227] : memref<2x49xf32, #tpu.memory_space<smem>>
    %c206_i32_228 = arith.constant 206 : i32
    %828 = tpu.dynamic_rotate %43 by %c206_i32_228 dim 2 : vector<2x1x256xf32>, i32 -> vector<2x1x256xf32>
    %829 = vector.broadcast %827 : f32 to vector<2x1x256xf32>
    %830 = arith.mulf %829, %828 : vector<2x1x256xf32>
    %831 = arith.addf %826, %830 : vector<2x1x256xf32>
    %832 = vector.broadcast %822 : vector<1x1x256xf32> to vector<2x1x256xf32>
    %833 = arith.mulf %832, %831 : vector<2x1x256xf32>
    %834 = arith.addf %819, %833 : vector<2x1x256xf32>
    %835 = arith.andi %80, %115 : vector<1x1x256xi1>
    %836 = arith.extui %835 : vector<1x1x256xi1> to vector<1x1x256xi32>
    %837 = arith.sitofp %836 : vector<1x1x256xi32> to vector<1x1x256xf32>
    %c0_229 = arith.constant 0 : index
    %c48 = arith.constant 48 : index
    %838 = memref.load %arg5[%c0_229, %c48] : memref<2x49xf32, #tpu.memory_space<smem>>
    %c205_i32 = arith.constant 205 : i32
    %839 = tpu.dynamic_rotate %41 by %c205_i32 dim 2 : vector<2x1x256xf32>, i32 -> vector<2x1x256xf32>
    %840 = vector.broadcast %838 : f32 to vector<2x1x256xf32>
    %841 = arith.mulf %840, %839 : vector<2x1x256xf32>
    %c1_230 = arith.constant 1 : index
    %c48_231 = arith.constant 48 : index
    %842 = memref.load %arg5[%c1_230, %c48_231] : memref<2x49xf32, #tpu.memory_space<smem>>
    %c205_i32_232 = arith.constant 205 : i32
    %843 = tpu.dynamic_rotate %43 by %c205_i32_232 dim 2 : vector<2x1x256xf32>, i32 -> vector<2x1x256xf32>
    %844 = vector.broadcast %842 : f32 to vector<2x1x256xf32>
    %845 = arith.mulf %844, %843 : vector<2x1x256xf32>
    %846 = arith.addf %841, %845 : vector<2x1x256xf32>
    %847 = vector.broadcast %837 : vector<1x1x256xf32> to vector<2x1x256xf32>
    %848 = arith.mulf %847, %846 : vector<2x1x256xf32>
    %849 = arith.addf %834, %848 : vector<2x1x256xf32>
    %cst_233 = arith.constant 0.000000e+00 : f32
    %850 = vector.broadcast %cst_233 : f32 to vector<2x1x256xf32>
    %851 = arith.subf %850, %849 : vector<2x1x256xf32>
    %852 = math.exp %851 : vector<2x1x256xf32>
    %cst_234 = arith.constant 1.000000e+00 : f32
    %853 = vector.broadcast %cst_234 : f32 to vector<2x1x256xf32>
    %854 = arith.addf %853, %852 : vector<2x1x256xf32>
    %855 = tpu.reciprocal %854 {approx = true} : vector<2x1x256xf32> -> vector<2x1x256xf32>
    %856 = vector.broadcast %855 : vector<2x1x256xf32> to vector<2x24x256xf32>
    %857 = arith.mulf %37, %856 : vector<2x24x256xf32>
    %cst_235 = arith.constant 9.99999997E-7 : f32
    %858 = vector.broadcast %cst_235 : f32 to vector<2x24x256xf32>
    %859 = arith.maximumf %857, %858 : vector<2x24x256xf32>
    %860 = arith.mulf %859, %859 : vector<2x24x256xf32>
    %861 = arith.mulf %860, %859 : vector<2x24x256xf32>
    %cst_236 = arith.constant dense<0.000000e+00> : vector<2x24xf32>
    %862 = vector.multi_reduction <add>, %861, %cst_236 [2] : vector<2x24x256xf32> to vector<2x24xf32>
    %863 = vector.shape_cast %862 : vector<2x24xf32> to vector<2x24x1xf32>
    %cst_237 = arith.constant 3.906250e-03 : f32
    %864 = vector.broadcast %cst_237 : f32 to vector<2x24x1xf32>
    %865 = arith.mulf %863, %864 : vector<2x24x1xf32>
    %cst_238 = arith.constant 1.000000e-30 : f32
    %866 = vector.broadcast %cst_238 : f32 to vector<2x24x1xf32>
    %867 = arith.maximumf %865, %866 : vector<2x24x1xf32>
    %868 = math.log %867 : vector<2x24x1xf32>
    %cst_239 = arith.constant 0.333333343 : f32
    %869 = vector.broadcast %cst_239 : f32 to vector<2x24x1xf32>
    %870 = arith.mulf %868, %869 : vector<2x24x1xf32>
    %871 = math.exp %870 : vector<2x24x1xf32>
    %872 = vector.extract_strided_slice %871 {offsets = [0, 0, 0], sizes = [1, 24, 1], strides = [1, 1, 1]} : vector<2x24x1xf32> to vector<1x24x1xf32>
    %873 = vector.shape_cast %872 : vector<1x24x1xf32> to vector<24x1xf32>
    %874 = vector.extract_strided_slice %871 {offsets = [1, 0, 0], sizes = [1, 24, 1], strides = [1, 1, 1]} : vector<2x24x1xf32> to vector<1x24x1xf32>
    %875 = vector.shape_cast %874 : vector<1x24x1xf32> to vector<24x1xf32>
    %876 = tpu.concatenate %873, %875 in 1 : vector<24x1xf32>, vector<24x1xf32> -> vector<24x2xf32>
    %877 = tpu.iota {dimensions = array<i32: 0>} : vector<2x2xi32>
    %878 = tpu.iota {dimensions = array<i32: 1>} : vector<2x2xi32>
    %879 = arith.cmpi eq, %877, %878 : vector<2x2xi32>
    %880 = arith.extui %879 : vector<2x2xi1> to vector<2x2xi32>
    %881 = arith.sitofp %880 : vector<2x2xi32> to vector<2x2xf32>
    %cst_240 = arith.constant dense<0.000000e+00> : vector<2x24xf32>
    %882 = tpu.matmul %881, %876, %cst_240 {dimension_numbers = #tpu.dot_dimension_numbers<[1], [1], [0], [0], [0, 0, 1, 0], [], []>, precision = #tpu.contract_precision<fp32>} : vector<2x2xf32>, vector<24x2xf32>, vector<2x24xf32> -> vector<2x24xf32>
    %c0_241 = arith.constant 0 : index
    %c0_242 = arith.constant 0 : index
    %883 = vector.load %arg7[%c0_241, %c0_242] : memref<24x512xf32, #tpu.memory_space<vmem>>, vector<24x512xf32>
    %cst_243 = arith.constant dense<0.000000e+00> : vector<2x512xf32>
    %884 = tpu.matmul %882, %883, %cst_243 {dimension_numbers = #tpu.dot_dimension_numbers<[1], [0], [0], [1], [0, 0, 1, 1], [], []>, precision = #tpu.contract_precision<fp32>} : vector<2x24xf32>, vector<24x512xf32>, vector<2x512xf32> -> vector<2x512xf32>
    %c0_244 = arith.constant 0 : index
    %c0_245 = arith.constant 0 : index
    %885 = vector.load %arg8[%c0_244, %c0_245] : memref<1x512xf32, #tpu.memory_space<vmem>>, vector<1x512xf32>
    %886 = vector.broadcast %885 : vector<1x512xf32> to vector<2x512xf32>
    %887 = arith.addf %884, %886 : vector<2x512xf32>
    %c0_246 = arith.constant 0 : index
    %c0_247 = arith.constant 0 : index
    %888 = vector.load %arg9[%c0_246, %c0_247] : memref<1x512xf32, #tpu.memory_space<vmem>>, vector<1x512xf32>
    %889 = vector.broadcast %888 : vector<1x512xf32> to vector<2x512xf32>
    %890 = arith.mulf %887, %889 : vector<2x512xf32>
    %c0_248 = arith.constant 0 : index
    %c0_249 = arith.constant 0 : index
    %891 = vector.load %arg10[%c0_248, %c0_249] : memref<1x512xf32, #tpu.memory_space<vmem>>, vector<1x512xf32>
    %892 = vector.broadcast %891 : vector<1x512xf32> to vector<2x512xf32>
    %893 = arith.addf %890, %892 : vector<2x512xf32>
    %cst_250 = arith.constant 0.000000e+00 : f32
    %894 = vector.broadcast %cst_250 : f32 to vector<2x512xf32>
    %895 = arith.maximumf %893, %894 : vector<2x512xf32>
    %c0_251 = arith.constant 0 : index
    %c0_252 = arith.constant 0 : index
    %c0_253 = arith.constant 0 : index
    %896 = vector.load %arg11[%c0_251, %c0_252, %c0_253] : memref<2x1x512xf32, #tpu.memory_space<vmem>>, vector<2x1x512xf32>
    %897 = vector.shape_cast %896 : vector<2x1x512xf32> to vector<2x512xf32>
    %898 = vector.shape_cast %895 : vector<2x512xf32> to vector<2x1x512xf32>
    tpu.vector_store %arg11[%c0_251, %c0_252, %c0_253], %898 {strides = array<i32>} : memref<2x1x512xf32, #tpu.memory_space<vmem>>, vector<2x1x512xf32>,
    return
  }
  func.func @transform_0(%arg0: i32) -> (i32, i32, i32) {
    %c0_i32 = arith.constant 0 : i32
    %c0_i32_0 = arith.constant 0 : i32
    %c0_i32_1 = arith.constant 0 : i32
    return %arg0, %c0_i32, %c0_i32_0 : i32, i32, i32
  }
  func.func @transform_1(%arg0: i32) -> (i32, i32, i32) {
    %c0_i32 = arith.constant 0 : i32
    %c0_i32_0 = arith.constant 0 : i32
    %c0_i32_1 = arith.constant 0 : i32
    %c0_i32_2 = arith.constant 0 : i32
    return %c0_i32, %c0_i32_0, %c0_i32_1 : i32, i32, i32
  }
  func.func @transform_2(%arg0: i32) -> (i32, i32) {
    %c0_i32 = arith.constant 0 : i32
    %c0_i32_0 = arith.constant 0 : i32
    %c0_i32_1 = arith.constant 0 : i32
    return %c0_i32, %c0_i32_0 : i32, i32
  }
  func.func @transform_3(%arg0: i32) -> (i32, i32) {
    %c0_i32 = arith.constant 0 : i32
    %c0_i32_0 = arith.constant 0 : i32
    %c0_i32_1 = arith.constant 0 : i32
    return %c0_i32, %c0_i32_0 : i32, i32
  }
  func.func @transform_4(%arg0: i32) -> (i32, i32) {
    %c0_i32 = arith.constant 0 : i32
    %c0_i32_0 = arith.constant 0 : i32
    %c0_i32_1 = arith.constant 0 : i32
    return %c0_i32, %c0_i32_0 : i32, i32
  }
  func.func @transform_5(%arg0: i32) -> (i32, i32) {
    %c0_i32 = arith.constant 0 : i32
    %c0_i32_0 = arith.constant 0 : i32
    %c0_i32_1 = arith.constant 0 : i32
    return %c0_i32, %c0_i32_0 : i32, i32
  }
  func.func @transform_6(%arg0: i32) -> (i32, i32) {
    %c0_i32 = arith.constant 0 : i32
    %c0_i32_0 = arith.constant 0 : i32
    %c0_i32_1 = arith.constant 0 : i32
    return %c0_i32, %c0_i32_0 : i32, i32
  }
  func.func @transform_7(%arg0: i32) -> (i32, i32) {
    %c0_i32 = arith.constant 0 : i32
    %c0_i32_0 = arith.constant 0 : i32
    %c0_i32_1 = arith.constant 0 : i32
    return %c0_i32, %c0_i32_0 : i32, i32
  }
  func.func @transform_8(%arg0: i32) -> (i32, i32) {
    %c0_i32 = arith.constant 0 : i32
    %c0_i32_0 = arith.constant 0 : i32
    %c0_i32_1 = arith.constant 0 : i32
    return %c0_i32, %c0_i32_0 : i32, i32
  }
  func.func @transform_9(%arg0: i32) -> (i32, i32) {
    %c0_i32 = arith.constant 0 : i32
    %c0_i32_0 = arith.constant 0 : i32
    %c0_i32_1 = arith.constant 0 : i32
    return %c0_i32, %c0_i32_0 : i32, i32
  }
  func.func @transform_10(%arg0: i32) -> (i32, i32, i32) {
    %c0_i32 = arith.constant 0 : i32
    %c0_i32_0 = arith.constant 0 : i32
    %c0_i32_1 = arith.constant 0 : i32
    return %arg0, %c0_i32, %c0_i32_0 : i32, i32, i32
  }
}

</mosaic_0001>

<bundles_post_ra>
// kernel: tpu_custom_call.1
= control target key start
LH: loop header
LB: loop body
LE: loop exit
PB: predicated region body
PF: predicated region fallthrough
CT: control target
= control target key end

     0   :  { %s13235_s0 = inlined_call_operand.hbm [shape: f32[4,24,256], index: 0, kind: input, shape index: {}]   ;;  %s13236_s1 = inlined_call_operand.vmem [shape: s32[1,1,256], index: 1, kind: input, shape index: {}]   ;;  %s13237_s2 = inlined_call_operand.vmem [shape: f32[1,24], index: 2, kind: input, shape index: {}]   ;;  %s13238_s3 = inlined_call_operand.vmem [shape: f32[24,1], index: 3, kind: input, shape index: {}]   ;;  %s13239_s4 = inlined_call_operand.vmem [shape: f32[2,49], index: 4, kind: input, shape index: {}]   ;;  %s13240_s5 = inlined_call_operand.<no memory space> [shape: f32[1,1], index: 5, kind: input, shape index: {}]   ;;  %s13241_s6 = inlined_call_operand.hbm [shape: f32[24,512], index: 6, kind: input, shape index: {}]   ;;  %s13242_s7 = inlined_call_operand.vmem [shape: f32[1,512], index: 7, kind: input, shape index: {}]   ;;  %s13243_s8 = inlined_call_operand.vmem [shape: f32[1,512], index: 8, kind: input, shape index: {}]   ;;  %s13244_s9 = inlined_call_operand.vmem [shape: f32[1,512], index: 9, kind: input, shape index: {}]   ;;  %s13245_s10 = inlined_call_operand.hbm [shape: f32[4,1,512], index: 10, kind: output, shape index: {}]  }
   0x1   :  { %13903 = sst [smem:[#allocation336_spill]] %s13235_s0 }
   0x2   :  { %13904 = sst [smem:[#allocation337_spill]] %s13236_s1 }
   0x3   :  { %13905 = sst [smem:[#allocation338_spill]] %s13237_s2 }
   0x4   :  { %13906 = sst [smem:[#allocation339_spill]] %s13238_s3 }
   0x5   :  { %13907 = sst [smem:[#allocation340_spill]] %s13239_s4 }
   0x6   :  { %13908 = sst [smem:[#allocation341_spill]] %s13241_s6 }
   0x7   :  { %13909 = sst [smem:[#allocation342_spill]] %s13242_s7 }
   0x8   :  { %13910 = sst [smem:[#allocation343_spill]] %s13243_s8 }
   0x9   :  { %13911 = sst [smem:[#allocation344_spill]] %s13244_s9 }
   0xa   :  { %13912 = sst [smem:[#allocation345_spill]] %s13245_s10 }
   0xb   :  { %16 = vsyncpa [#allocation4], 0 }
   0xc   :  { %18 = vsyncpa [#allocation4 + $0x1], 0 }
   0xd   :  { %19 = vsyncpa [#allocation6], 0 }
   0xe   :  { %20 = vsyncpa [#allocation9], 0 }
   0xf   :  { %21 = vsyncpa [#allocation5], 0 }
  0x10   :  { %23 = vsyncpa [#allocation5 + $0x1], 0  ;;  %s7447_s5 = smov 0   ;;  %s7449_s13 = smov 0  }
  0x11   :  { %s7451_s14 = smov 0   ;;  %s7453_s15 = smov 0  }
  0x12 LB: > { %13913 = sst [smem:[#allocation15_spill]] %s7315_s5  ;;  %s7468_s16 = sadd.s32 4294967295, %s7327_s15   ;;  %s7327_s15 = sphi %s7453_s15, %s15449_s15   ;;  %s7323_s14 = sphi %s7451_s14, %s15452_s14   ;;  %s7319_s13 = sphi %s7449_s13, %s15451_s13   ;;  %s7315_s5 = sphi %s7447_s5, %s15450_s5  }
  0x13   : > { %13914 = sst [smem:[#allocation16_spill]] %s7319_s13  ;;  %s6377_s17 = sadd.s32 4294967294, %s7327_s15  }
  0x14   : > { %13915 = sst [smem:[#allocation17_spill]] %s7323_s14  ;;  %s7472_s18 = sadd.s32 1, %s7327_s15  }
  0x15   : > { %13916 = sst [smem:[#allocation18_spill]] %s7327_s15  ;;  %s36_s19 = sadd.s32 1, %s7323_s14 }
  0x16   : > { %13917 = sst [smem:[#allocation19_spill]] %s7468_s16  ;;  %s33_s20 = ssub.s32 %s7327_s15, %s7472_s18 }
  0x17   : > { %13918 = sst [smem:[#allocation20_spill]] %s7472_s18  ;;  %p43_p0 = scmp.ne.s32.totalorder %s7323_s14, %s7319_s13 }
  0x18   : > { %p34_p1 = scmp.eq.s32.totalorder %s33_s20, 0  ;;  %p44_p2 = scmp.eq.s32.totalorder %s7327_s15, 0 }
  0x19   : > { %p49_p3 = scmp.ne.s32.totalorder %s7319_s13, %s7315_s5  ;;  %p13246_p4 = scmp.eq.s32.totalorder %s7468_s16, 0 }
  0x1a   : > { %s7484_s21 = scalar_select %p34_p1, %s7323_s14, %s36_s19  }
  0x1b   : > { %p7486_p5 = por %p44_p2, %p43_p0  ;;  %p7492_p6 = por %p13246_p4, %p49_p3 }
  0x1c   : > { %13919 = sst [smem:[#allocation21_spill]] %s7484_s21  ;;  %p262_p7 = scmp.eq.s32.totalorder %s7468_s16, 1 }
  0x1d   : > { %s13921_s23 = scalar_select %p7492_p6, 1, 0 }
  0x1e   : > { %p268_p8 = scmp.eq.s32.totalorder %s6377_s17, 1  ;;  %p6378_p9 = scmp.ge.s32.totalorder %s7327_s15, 1 }
  0x1f   : > { %p275_p10 = scmp.lt.s32.totalorder %s7327_s15, 3  ;;  %p7499_p11 = por %p262_p7, %p43_p0 }
  0x20   : > { %p7503_p12 = por %p268_p8, %p49_p3  ;;  %s13927_s4 = sld [smem:[#allocation340_spill]] }
  0x21   : > { %s13922_s24 = scalar_select %p7499_p11, 1, 0 }
  0x22   : > { %s13924_s25 = scalar_select %p7503_p12, 1, 0 }
  0x23   : > { %13923 = sst [smem:[#allocation22_spill]] %s13922_s24  ;;  %p7507_p13 = pnand %p6378_p9, %p275_p10 }
  0x24   : > { %13925 = sst [smem:[#allocation23_spill]] %s13924_s25  ;;  %p7029_p2 = scmp.lt.s32.totalorder %s7327_s15, 2 }
  0x25   : > { %p7012_p1 = pneg %p7507_p13  ;;  %s7329_s12 = smov [#allocation8]  }
  0x26   : > { %s297_s29 = sshll.u32 %s13927_s4, 4  ;;  %p7526_p3 = pnand %p7029_p2, %p7486_p5  ;;  %s298_s29 = int_to_ptr.vmem [resolvable:$true] %s297_s29 }
  0x27   : > { %p7520_p7 = pnand %p7012_p1, %p13246_p4  ;;  %s310_s17 = sshll.u32 %s7329_s12, 4  ;;  %s7530_s17 = int_to_ptr.vmem [resolvable:$true] %s310_s17 }
  0x28   : > { %s7180_s19 = scalar_lea.vmem %s298_s29, 32  ;;  %p7188_p0 = scmp.lt.s32.totalorder %s298_s29, %s298_s29 }
  0x29   : > { %p7181_p8 = scmp.ne.s32.totalorder %s298_s29, %s7180_s19  ;;  %p7182_p9 = pneg %p7520_p7 }
  0x2a   : > { %p7189_p4 = scmp.lt.s32.totalorder %s7180_s19, %s7180_s19 }
  0x2b   : > { %p7183_p10 = pnand %p7182_p9, %p7181_p8 }
  0x2c   : > { %p7190_p12 = por %p7189_p4, %p7188_p0 }
  0x2d   : > { %p7184_p1 = pneg %p7183_p10 }
  0x2f   : > { %p7191_p11 = pnand %p7190_p12, %p7184_p1 }
  0x31   : > { %7194 = shalt.err (!%p7191_p11)
}
  0x32   : > { %s7330_s20 = smov [#allocation7]   ;;  %s333_s22 = sand.u32 1, %s7323_s14  }
  0x33   : > { %7015 = dma.vmem_to_smem (!%p7520_p7), %s298_s29, 32, %s7330_s20, [#allocation6]  }
  0x34   : > { %s13930_s6 = sld [smem:[#allocation341_spill]] }
  0x3a   : > { %s7195_s12 = scalar_lea.hbm %s13930_s6, 1536 }
  0x3b   : > { %p7196_p5 = scmp.ne.s32.totalorder %s13930_s6, %s7195_s12  ;;  %p7202_p11 = scmp.lt.u32.totalorder %s7195_s12, %s13930_s6 }
  0x3d   : > { %p7198_p4 = pnand %p7196_p5, %p7182_p9 }
  0x3f   : > { %p7199_p12 = pneg %p7198_p4 }
  0x41   : > { %p7204_p0 = pnand %p7202_p11, %p7199_p12 }
  0x43   : > { %7207 = shalt.err (!%p7204_p0)
}
  0x44   : > { %s7208_s29 = scalar_lea.vmem %s7530_s17, 1536  ;;  %p7216_p1 = scmp.lt.s32.totalorder %s7530_s17, %s7530_s17 }
  0x45   : > { %p7209_p2 = scmp.ne.s32.totalorder %s7530_s17, %s7208_s29  ;;  %p7217_p5 = scmp.lt.s32.totalorder %s7208_s29, %s7208_s29 }
  0x47   : > { %p7211_p8 = pnand %p7209_p2, %p7182_p9  ;;  %p7218_p4 = por %p7217_p5, %p7216_p1 }
  0x49   : > { %p7212_p10 = pneg %p7211_p8 }
  0x4b   : > { %p7219_p6 = pnand %p7218_p4, %p7212_p10 }
  0x4d   : > { %7222 = shalt.err (!%p7219_p6)
}
  0x4e   : > { %s7331_s4 = smov 512   ;;  %s7332_s18 = smov 32  }
  0x4f   : > { %7018 = dma.hbm_to_vmem [thread:$0]  (!%p7520_p7), %s13930_s6, 1536, %s7530_s17, [#allocation9], %s7331_s4, %s7331_s4, %s7332_s18  }
  0x50   : > { %s6997_s27 = smul.u32 96, %s333_s22  ;;  %s13931_s0 = sld [smem:[#allocation336_spill]] }
  0x51   : > { %s6998_s28 = smul.u32 1536, %s7327_s15  ;;  %s7573_s30 = scalar_lea.sflag [#allocation4], %s333_s22 }
  0x52   : > { %s337_s14 = scalar_lea.vmem [#allocation3], %s6997_s27  ;;  %p7225_p7 = pneg %p7526_p3 }
  0x53   : > { %s345_s25 = sshll.u32 %s337_s14, 4  ;;  %s7571_s25 = int_to_ptr.vmem [resolvable:$true] %s345_s25 }
  0x56   : > { %s7569_s29 = scalar_lea.hbm %s13931_s0, %s6998_s28  ;;  %s7228_s18 = scalar_lea.hbm %s13931_s0, 3072 }
  0x57   : > { %s7223_s5 = scalar_lea.hbm %s7569_s29, 1536  ;;  %p7229_p11 = scmp.lt.u32.totalorder %s7569_s29, %s13931_s0 }
  0x58   : > { %p7224_p6 = scmp.ne.s32.totalorder %s7569_s29, %s7223_s5  ;;  %p7230_p0 = scmp.lt.u32.totalorder %s7228_s18, %s7223_s5 }
  0x59   : > { %p7232_p8 = scmp.lt.u32.totalorder %s7223_s5, %s7569_s29 }
  0x5a   : > { %p7226_p9 = pnand %p7225_p7, %p7224_p6  ;;  %p7231_p2 = por %p7230_p0, %p7229_p11 }
  0x5c   : > { %p7227_p12 = pneg %p7226_p9  ;;  %p7233_p10 = por %p7232_p8, %p7231_p2 }
  0x5e   : > { %p7234_p1 = pnand %p7233_p10, %p7227_p12 }
  0x60   : > { %7237 = shalt.err (!%p7234_p1)
}
  0x61   : > { %s7238_s14 = scalar_lea.vmem %s7571_s25, 1536  ;;  %s7333_s22 = smov [#allocation3]  }
  0x62   : > { %p7239_p5 = scmp.ne.s32.totalorder %s7571_s25, %s7238_s14  ;;  %s7243_s27 = sshll.u32 %s7333_s22, 4  ;;  %s7244_s27 = int_to_ptr.vmem [resolvable:$false] %s7243_s27 }
  0x63   : > { %s7245_s28 = scalar_lea.vmem %s7244_s27, 3072  ;;  %p7246_p9 = scmp.lt.s32.totalorder %s7571_s25, %s7244_s27 }
  0x64   : > { %p7241_p4 = pnand %p7239_p5, %p7225_p7  ;;  %p7247_p11 = scmp.lt.s32.totalorder %s7245_s28, %s7238_s14 }
  0x66   : > { %p7242_p6 = pneg %p7241_p4  ;;  %p7248_p0 = por %p7247_p11, %p7246_p9 }
  0x68   : > { %p7249_p2 = pnand %p7248_p0, %p7242_p6 }
  0x6a   : > { %7252 = shalt.err (!%p7249_p2)
}
  0x6b   : > { %s7334_s5 = smov 256   ;;  %s7335_s12 = smov 16  }
  0x6c   : > { %7022 = dma.hbm_to_vmem [thread:$0]  (!%p7526_p3), %s7569_s29, 1536, %s7571_s25, %s7573_s30, %s7334_s5, %s7334_s5, %s7335_s12  }
  0x6d   : > { %357 = sbr.rel (%p7507_p13) target bundleno = 3047 (0xbe7), region = 60 }
  0x74   : > { %s7604_s19 = sand.u32 1, %s7319_s13   ;;  %p13933_p7 = scmp.ne.s32.totalorder %s13921_s23, 0 }
  0x75   : > { %13932 = sst [smem:[#allocation24_spill]] %s7604_s19  ;;  %s6999_s17 = smul.u32 96, %s7604_s19 }
  0x76   : > { %s360_s4 = scalar_lea.sflag [#allocation4], %s7604_s19 }
  0x77   : > { %s7608_s18 = scalar_lea.vmem [#allocation3], %s6999_s17 }
  0x78   : > { %7298 = dma.done.wait (%p13933_p7), %s360_s4, 1536  }
  0x79   : > { %7300 = vsyncadd (%p13933_p7), %s360_s4, 4294965760  ;;  %p13934_p3 = scmp.eq.s32.totalorder %s7468_s16, 0 }
  0x7b   : > { %7302 = dma.done.wait (%p13934_p3), [#allocation6], 32   ;;  %p13935_p13 = pmov %p13934_p3 }
  0x7c   : > { %p13936_p12 = pmov %p13934_p3 }
  0x7d   : > { %7304 = vsyncadd (%p13935_p13), [#allocation6], 4294967264 }
  0x7e   : > { %7306 = dma.done.wait (%p13936_p12), [#allocation9], 1536   ;;  %p13937_p8 = pmov %p13934_p3 }
  0x80   : > { %7308 = vsyncadd (%p13937_p8), [#allocation9], 4294965760 }
  0x81   : > { %376 = sfence }
  0x82   : > { %v7623_v0 = vld [vmem:[%s7608_s18 + $0x30] sm:$0xff]  ;;  %v7626_v1 = vld [vmem:[%s7608_s18 + $0x38] sm:$0xff]  ;;  %v7629_v2 = vld [vmem:[%s7608_s18] sm:$0xff]  ;;  %v13294_v24 = vmov 0.0|0.0   ;;  %v13296_v25 = vmov 0.0   ;;  %vm13563_vm0 = vmmov 0  }
  0x83   : > { %v432_v3 = vadd.f32 %v7626_v1, %v7623_v0  ;;  %v7634_v4 = vld [vmem:[%s7608_s18 + $0x8] sm:$0xff]  ;;  %v7637_v5 = vld [vmem:[%s7608_s18 + $0x40] sm:$0xff]  ;;  %v7645_v8 = vld [vmem:[%s7608_s18 + $0x10] sm:$0xff]  ;;  %v456_v15 = vmax.f32 %v7623_v0, %v7626_v1  ;;  %6842 = vmatprep.subr.bf16.mxu0 %v13294_v24  ;;  %6733 = vmatprep.subr.mxu1 %v13296_v25  ;;  %s13938_s2 = sld [smem:[#allocation338_spill]]  ;;  %vm13560_vm1 = vcmask 195584   ;;  %vm13568_vm2 = vcmask 7168  }
  0x84   : > { %v7640_v6 = vld [vmem:[%s7608_s18 + $0x48] sm:$0xff]  ;;  %v423_v7 = vadd.f32 %v7634_v4, %v7629_v2  ;;  %v7648_v9 = vld [vmem:[%s7608_s18 + $0x18] sm:$0xff]  ;;  %v447_v13 = vmax.f32 %v7629_v2, %v7634_v4  ;;  %v7663_v16 = vld [vmem:[%s7608_s18 + $0x50] sm:$0xff]  ;;  %6674 = vmatprep.mubr.msk.f32.mxu0 %vm13563_vm0, %v13296_v25  ;;  %6735 = vmatprep.mubr.msk.f32.mxu1 %vm13563_vm0, %v13296_v25  ;;  %vm13565_vm3 = vcmask 15360   ;;  %vm473_vm4 = vcmask 23552   ;;  %s13939_s3 = sld [smem:[#allocation339_spill]] }
  0x85   : > { %433 = vadd.xlane.f32.xlu1 %v432_v3  ;;  %v435_v10 = vadd.f32 %v7640_v6, %v7637_v5  ;;  %v426_v11 = vadd.f32 %v7648_v9, %v7645_v8  ;;  %v450_v12 = vmax.f32 %v7645_v8, %v7648_v9  ;;  %v459_v14 = vmax.f32 %v7637_v5, %v7640_v6  ;;  %v7666_v17 = vld [vmem:[%s7608_s18 + $0x58] sm:$0xff]  ;;  %v7669_v18 = vld [vmem:[%s7608_s18 + $0x20] sm:$0xff]  ;;  %v7672_v19 = vld [vmem:[%s7608_s18 + $0x28] sm:$0xff]  ;;  %s13349_s14 = smov 126   ;;  %s13343_s22 = smov 127  }
  0x86   : > { %424 = vadd.xlane.f32.xlu0 %v423_v7  ;;  %v438_v20 = vadd.f32 %v7666_v17, %v7663_v16  ;;  %v429_v21 = vadd.f32 %v7672_v19, %v7669_v18  ;;  %v462_v22 = vmax.f32 %v7663_v16, %v7666_v17  ;;  %v453_v23 = vmax.f32 %v7669_v18, %v7672_v19  ;;  %s13260_s27 = smov 51   ;;  %s13262_s28 = smov 50  }
  0x87   : > { %vm967_vm5 = vcmask 1040384   ;;  %s13264_s5 = smov 49   ;;  %s13266_s12 = smov 48  }
  0x88   : > { %s13268_s17 = smov 47   ;;  %s13270_s4 = smov 46  }
  0x89   : > { %436 = vadd.xlane.f32.xlu1 %v435_v10  ;;  %v477_v28 = vld [vmem:[%s13938_s2] sm:$0x1]  ;;  %s13284_s18 = smov 45   ;;  %s13280_s23 = smov 35  }
  0x8a   : > { %427 = vadd.xlane.f32.xlu0 %v426_v11  ;;  %v480_v30 = vsel %vm13560_vm1, %v477_v28, 0  ;;  %s13272_s25 = smov 34   ;;  %s13274_s26 = smov 33  }
  0x8b   : > { %v7692_v34 = vand.u32 4294901760, %v480_v30  ;;  %s13276_s11 = smov 32   ;;  %s13278_s29 = smov 31  }
  0x8c   : > { %s13282_s30 = smov 30   ;;  %s13254_s21 = smov 29  }
  0x8d   : > { %451 = vmax.xlane.f32.xlu1 %v450_v12  ;;  %v551_v40 = vsub.f32 %v480_v30, %v7692_v34  ;;  %s13256_s20 = smov 19   ;;  %s14076_s0 = smov 33  }
  0x8e   : > { %448 = vmax.xlane.f32.xlu0 %v447_v13  ;;  %s14081_s2 = smov 82   ;;  %s14087_s6 = smov 81  }
  0x8f   : > { %v552_v50 = vand.u32 4294901760, %v551_v40  ;;  %s14088_s13 = smov 31   ;;  %s14093_s15 = smov 80  }
  0x90   : > { %s14094_s10 = smov 30   ;;  %s14099_s24 = smov 79  }
  0x91   : > { %460 = vmax.xlane.f32.xlu1 %v459_v14  ;;  %v553_v60 = vsub.f32 %v551_v40, %v552_v50  ;;  %s14104_s16 = smov 78   ;;  %s14109_s19 = smov 77  }
  0x92   : > { %457 = vmax.xlane.f32.xlu0 %v456_v15  ;;  %s14114_s9 = smov 17   ;;  %s14127_s1 = sld [smem:[#allocation337_spill]] }
  0x93   : > { %v554_v14 = vand.u32 4294901760, %v553_v60  ;;  %s6487_s7 = sld [smem:[#allocation7 + $0x98]]  ;;  %s14132_s8 = smov 14  }
  0x95   : > { %439 = vadd.xlane.f32.xlu1 %v438_v20 }
  0x96   : > { %430 = vadd.xlane.f32.xlu0 %v429_v21 }
  0x99   : > { %463 = vmax.xlane.f32.xlu1 %v462_v22 }
  0x9a   : > { %454 = vmax.xlane.f32.xlu0 %v453_v23 }
 0x112   : > { %v434_v26 = vpop.xlane.xlu1 %433 }
 0x113   : > { %v425_v27 = vpop.xlane.xlu0 %424  ;;  %v444_v35 = vmul.f32 0.00390625, %v434_v26 }
 0x114   : > { %v441_v36 = vmul.f32 0.00390625, %v425_v27 }
 0x116   : > { %v437_v29 = vpop.xlane.xlu1 %436  ;;  %v466_v42 = vsel %vm13568_vm2, %v441_v36, %v444_v35  ;;  %v957_v36 = vld [vmem:[%s13939_s3 + $0x10] sm:$0xff] }
 0x117   : > { %v445_v31 = vmul.f32 0.00390625, %v437_v29  ;;  %v428_v32 = vpop.xlane.xlu0 %427  ;;  %v955_v29 = vld [vmem:[%s13939_s3] sm:$0xff] }
 0x118   : > { %v442_v33 = vmul.f32 0.00390625, %v428_v32  ;;  %v959_v30 = vsel %vm13568_vm2, %v955_v29, 0 }
 0x119   : > { %v7738_v32 = vand.u32 4294901760, %v959_v30 }
 0x11a   : > { %v452_v37 = vpop.xlane.xlu1 %451  ;;  %v467_v38 = vsel %vm13568_vm2, %v442_v33, %v445_v31  ;;  %v956_v31 = vld [vmem:[%s13939_s3 + $0x8] sm:$0xff]  ;;  %s14082_s3 = smov 32  }
 0x11b   : > { %v449_v39 = vpop.xlane.xlu0 %448  ;;  %v471_v41 = vsel %vm13565_vm3, %v467_v38, %v452_v37  ;;  %v962_v33 = vsel %vm13568_vm2, %v956_v31, 0  ;;  %v1038_v35 = vsub.f32 %v959_v30, %v7738_v32 }
 0x11c   : > { %v470_v44 = vsel %vm13565_vm3, %v466_v42, %v449_v39 }
 0x11d   : > { %v1039_v37 = vand.u32 4294901760, %v1038_v35 }
 0x11e   : > { %v461_v43 = vpop.xlane.xlu1 %460 }
 0x11f   : > { %v475_v45 = vsel %vm473_vm4, %v471_v41, %v461_v43  ;;  %v458_v46 = vpop.xlane.xlu0 %457  ;;  %v1040_v39 = vsub.f32 %v1038_v35, %v1039_v37  ;;  %v965_v41 = vsel %vm13568_vm2, %v957_v36, 0 }
 0x120   : > { %v486_v47 = vand.u32 4294901760, %v475_v45  ;;  %v474_v48 = vsel %vm473_vm4, %v470_v44, %v458_v46  ;;  %v1057_v46 = vand.u32 4294901760, %v965_v41 }
 0x121   : > { %v483_v49 = vand.u32 4294901760, %v474_v48 }
 0x122   : > { %v569_v51 = vsub.f32 %v475_v45, %v486_v47  ;;  %v440_v52 = vpop.xlane.xlu1 %439 }
 0x123   : > { %v562_v53 = vsub.f32 %v474_v48, %v483_v49  ;;  %v446_v54 = vmul.f32 0.00390625, %v440_v52  ;;  %v431_v55 = vpop.xlane.xlu0 %430  ;;  %v6843_v56 = vpack.c.bf16 %v486_v47, %v483_v49  ;;  %v1041_v47 = vand.u32 4294901760, %v1040_v39 }
 0x124   : > { %v570_v57 = vand.u32 4294901760, %v569_v51  ;;  %v443_v58 = vmul.f32 0.00390625, %v431_v55 }
 0x125   : > { %v563_v59 = vand.u32 4294901760, %v562_v53  ;;  %6844 = vmatpush3.bf16.msra.mxu0 %v6843_v56  ;;  %v6849_v27 = vpack.c.bf16 %v569_v51, %v562_v53 }
 0x126   : > { %v571_v61 = vsub.f32 %v569_v51, %v570_v57  ;;  %v468_v62 = vsel %vm13568_vm2, %v443_v58, %v446_v54  ;;  %v464_v63 = vpop.xlane.xlu1 %463  ;;  %6672 = vmatprep.subr.mxu0 %v13296_v25 }
 0x127   : > { %v564_v3 = vsub.f32 %v562_v53, %v563_v59  ;;  %v455_v7 = vpop.xlane.xlu0 %454  ;;  %v6855_v28 = vpack.c.bf16 %v570_v57, %v563_v59 }
 0x128   : > { %v572_v10 = vand.u32 4294901760, %v571_v61  ;;  %v472_v11 = vsel %vm13565_vm3, %v468_v62, %v455_v7 }
 0x129   : > { %v565_v12 = vand.u32 4294901760, %v564_v3  ;;  %v476_v13 = vsel %vm473_vm4, %v472_v11, %v464_v63 }
 0x12a   : > { %v489_v15 = vand.u32 4294901760, %v476_v13 }
 0x12b   : > { %v6846_v20 = vpack.c.bf16 %v572_v10, %v565_v12 }
 0x12c   : > { %v576_v21 = vsub.f32 %v476_v13, %v489_v15  ;;  %6673 = vmatpush3.msra.mxu0 %v489_v15 }
 0x12d   : > { %6675 = vmatmul.mubr.f32.vlgmr.msra.gmra.mrb[0].mxu0 %v554_v14  ;;  %6845 = vmatprep.subr.bf16.mxu0 %v13294_v24 }
 0x12e   : > { %v577_v22 = vand.u32 4294901760, %v576_v21  ;;  %6847 = vmatpush3.bf16.msra.mxu0 %v6846_v20  ;;  %6683 = vmatprep.mubr.msk.f32.mxu0 %vm13563_vm0, %v13296_v25 }
 0x12f   : > { %6681 = vmatprep.subr.mxu0 %v13296_v25 }
 0x130   : > { %v578_v23 = vsub.f32 %v576_v21, %v577_v22 }
 0x132   : > { %v579_v26 = vand.u32 4294901760, %v578_v23 }
 0x134   : > { %6682 = vmatpush3.msra.mxu0 %v579_v26 }
 0x135   : > { %6684 = vmatmul.mubr.f32.vlgmr.msra.gmra.mrb[0].mxu0 %v7692_v34  ;;  %6848 = vmatprep.subr.bf16.mxu0 %v13294_v24 }
 0x136   : > { %6850 = vmatpush3.bf16.msra.mxu0 %v6849_v27  ;;  %6692 = vmatprep.mubr.msk.f32.mxu0 %vm13563_vm0, %v13296_v25 }
 0x137   : > { %6690 = vmatprep.subr.mxu0 %v13296_v25 }
 0x13a   : > { %6691 = vmatpush3.msra.mxu0 %v576_v21 }
 0x13b   : > { %6851 = vmatprep.subr.bf16.mxu0 %v13294_v24 }
 0x13d   : > { %6693 = vmatmul.mubr.f32.vlgmr.msra.gmra.mrb[0].mxu0 %v551_v40 }
 0x13e   : > { %6853 = vmatpush3.bf16.msra.mxu0 %v6843_v56  ;;  %6701 = vmatprep.mubr.msk.f32.mxu0 %vm13563_vm0, %v13296_v25 }
 0x13f   : > { %6699 = vmatprep.subr.mxu0 %v13296_v25 }
 0x142   : > { %6700 = vmatpush3.msra.mxu0 %v489_v15 }
 0x143   : > { %6854 = vmatprep.subr.bf16.mxu0 %v13294_v24 }
 0x145   : > { %6702 = vmatmul.mubr.f32.vlgmr.msra.gmra.mrb[0].mxu0 %v552_v50  ;;  %v1058_v50 = vsub.f32 %v965_v41, %v1057_v46 }
 0x146   : > { %6856 = vmatpush3.bf16.msra.mxu0 %v6855_v28  ;;  %6710 = vmatprep.mubr.msk.f32.mxu0 %vm13563_vm0, %v13296_v25 }
 0x147   : > { %6708 = vmatprep.subr.mxu0 %v13296_v25  ;;  %v1059_v52 = vand.u32 4294901760, %v1058_v50 }
 0x149   : > { %v1060_v55 = vsub.f32 %v1058_v50, %v1059_v52 }
 0x14a   : > { %6709 = vmatpush3.msra.mxu0 %v577_v22  ;;  %v13298_v22 = vmov 0  }
 0x14b   : > { %6857 = vmatprep.subr.bf16.mxu0 %v13294_v24  ;;  %v1061_v58 = vand.u32 4294901760, %v1060_v55  ;;  %7126 = vset.pattern.permute.xlu0 %v13298_v22 }
 0x14c   : > { %7127 = vset.pattern.permute.xlu1 %v13298_v22 }
 0x14d   : > { %6711 = vmatmul.mubr.f32.vlgmr.msra.gmra.mrb[0].mxu0 %v7692_v34 }
 0x14e   : > { %6859 = vmatpush3.bf16.msra.mxu0 %v6843_v56  ;;  %6719 = vmatprep.mubr.msk.f32.mxu0 %vm13563_vm0, %v13296_v25 }
 0x14f   : > { %6717 = vmatprep.subr.mxu0 %v13296_v25 }
 0x152   : > { %6718 = vmatpush3.msra.mxu0 %v489_v15 }
 0x153   : > { %6722 = vmatprep.subr.mxu0 %v13296_v25 }
 0x155   : > { %6720 = vmatmul.mubr.f32.vlgmr.msra.gmra.mrb[0].mxu0 %v7692_v34  ;;  %v7742_v34 = vand.u32 4294901760, %v962_v33 }
 0x156   : > { %6724 = vmatprep.mubr.msk.f32.mxu0 %vm13563_vm0, %v13296_v25 }
 0x157   : > { %v1048_v38 = vsub.f32 %v962_v33, %v7742_v34 }
 0x159   : > { %v1049_v44 = vand.u32 4294901760, %v1048_v38 }
 0x15b   : > { %v1050_v48 = vsub.f32 %v1048_v38, %v1049_v44 }
 0x15d   : > { %v1051_v53 = vand.u32 4294901760, %v1050_v48 }
 0x228   : > { %v950_v40 = vpop.f32.mrb[0].mxu0 }
 0x229   : > { %v954_v42 = vmax.f32 %v950_v40, 0.0  ;;  %v6721_v43 = vpop.f32.mrb[1].mxu0 }
 0x22b   : > { %v969_v45 = vsel %vm967_vm5, %v954_v42, 0 }
 0x22c   : > { %v972_v49 = vand.u32 4294901760, %v969_v45 }
 0x22e   : > { %v1069_v51 = vsub.f32 %v969_v45, %v972_v49  ;;  %6723 = vmatpush3.msra.mxu0 %v972_v49 }
 0x22f   : > { %6725 = vmatmul.mubr.f32.vlgmr.msra.gmra.mrb[2].mxu0 %v1041_v47  ;;  %6860 = vmatprep.subr.bf16.mxu0 %v13294_v24 }
 0x230   : > { %v1070_v54 = vand.u32 4294901760, %v1069_v51  ;;  %6727 = vmatprep.mubr.msk.f32.mxu0 %vm13563_vm0, %v13296_v25 }
 0x232   : > { %v1071_v56 = vsub.f32 %v1069_v51, %v1070_v54 }
 0x233   : > { %6728 = vmatmul.mubr.f32.gmra.mrb[4].mxu0 %v1051_v53 }
 0x234   : > { %v1072_v57 = vand.u32 4294901760, %v1071_v56  ;;  %6730 = vmatprep.mubr.msk.f32.mxu0 %vm13563_vm0, %v13296_v25 }
 0x236   : > { %6734 = vmatpush3.msra.mxu1 %v1072_v57 }
 0x237   : > { %6736 = vmatmul.mubr.f32.vlgmr.msra.gmra.mrb[0].mxu1 %v7738_v32  ;;  %6744 = vmatprep.subr.mxu1 %v13296_v25 }
 0x238   : > { %6745 = vmatpush3.msra.mxu1 %v1069_v51  ;;  %6738 = vmatprep.mubr.msk.f32.mxu1 %vm13563_vm0, %v13296_v25 }
 0x239   : > { %6755 = vmatprep.subr.mxu1 %v13296_v25  ;;  %6731 = vmatmul.mubr.f32.gmra.mrb[6].mxu0 %v1061_v58 }
 0x23a   : > { %6794 = vmatprep.mubr.msk.f32.mxu0 %vm13563_vm0, %v13296_v25 }
 0x23b   : > { %6739 = vmatmul.mubr.f32.gmra.mrb[2].mxu1 %v7742_v34 }
 0x23c   : > { %6741 = vmatprep.mubr.msk.f32.mxu1 %vm13563_vm0, %v13296_v25 }
 0x23f   : > { %6742 = vmatmul.mubr.f32.gmra.mrb[4].mxu1 %v1057_v46 }
 0x240   : > { %6746 = vmatprep.mubr.msk.f32.mxu1 %vm13563_vm0, %v13296_v25 }
 0x243   : > { %6747 = vmatmul.mubr.f32.vlgmr.msra.gmra.mrb[0].mxu1 %v1038_v35 }
 0x244   : > { %6756 = vmatpush3.msra.mxu1 %v972_v49  ;;  %6749 = vmatprep.mubr.msk.f32.mxu1 %vm13563_vm0, %v13296_v25 }
 0x245   : > { %6766 = vmatprep.subr.mxu1 %v13296_v25 }
 0x247   : > { %6750 = vmatmul.mubr.f32.gmra.mrb[2].mxu1 %v1048_v38 }
 0x248   : > { %6752 = vmatprep.mubr.msk.f32.mxu1 %vm13563_vm0, %v13296_v25 }
 0x24b   : > { %6753 = vmatmul.mubr.f32.gmra.mrb[4].mxu1 %v1058_v50 }
 0x24c   : > { %6757 = vmatprep.mubr.msk.f32.mxu1 %vm13563_vm0, %v13296_v25 }
 0x24f   : > { %6758 = vmatmul.mubr.f32.vlgmr.msra.gmra.mrb[0].mxu1 %v1039_v37 }
 0x250   : > { %6767 = vmatpush3.msra.mxu1 %v1070_v54  ;;  %6760 = vmatprep.mubr.msk.f32.mxu1 %vm13563_vm0, %v13296_v25 }
 0x251   : > { %6777 = vmatprep.subr.mxu1 %v13296_v25 }
 0x253   : > { %6761 = vmatmul.mubr.f32.gmra.mrb[2].mxu1 %v1049_v44 }
 0x254   : > { %6763 = vmatprep.mubr.msk.f32.mxu1 %vm13563_vm0, %v13296_v25 }
 0x257   : > { %6764 = vmatmul.mubr.f32.gmra.mrb[4].mxu1 %v1059_v52 }
 0x258   : > { %6768 = vmatprep.mubr.msk.f32.mxu1 %vm13563_vm0, %v13296_v25 }
 0x25b   : > { %6769 = vmatmul.mubr.f32.vlgmr.msra.gmra.mrb[0].mxu1 %v7738_v32 }
 0x25c   : > { %6778 = vmatpush3.msra.mxu1 %v972_v49  ;;  %6771 = vmatprep.mubr.msk.f32.mxu1 %vm13563_vm0, %v13296_v25 }
 0x25f   : > { %6772 = vmatmul.mubr.f32.gmra.mrb[2].mxu1 %v7742_v34 }
 0x260   : > { %6774 = vmatprep.mubr.msk.f32.mxu1 %vm13563_vm0, %v13296_v25 }
 0x263   : > { %6775 = vmatmul.mubr.f32.gmra.mrb[4].mxu1 %v1057_v46 }
 0x264   : > { %6779 = vmatprep.mubr.msk.f32.mxu1 %vm13563_vm0, %v13296_v25 }
 0x267   : > { %6780 = vmatmul.mubr.f32.vlgmr.msra.gmra.mrb[0].mxu1 %v7738_v32 }
 0x268   : > { %6782 = vmatprep.mubr.msk.f32.mxu1 %vm13563_vm0, %v13296_v25 }
 0x26b   : > { %6783 = vmatmul.mubr.f32.gmra.mrb[2].mxu1 %v7742_v34 }
 0x26c   : > { %6785 = vmatprep.mubr.msk.f32.mxu1 %vm13563_vm0, %v13296_v25 }
 0x26f   : > { %6786 = vmatmul.mubr.f32.gmra.mrb[4].mxu1 %v1057_v46 }
 0x270   : > { %5309 = vmatprep.mubr.f32.mxu1 %v13296_v25 }
 0x302   : > { %v1043_v59 = vpop.f32.mrb[2].mxu0 }
 0x303   : > { %v6726_v60 = vpop.f32.mrb[3].mxu0 }
 0x306   : > { %v1053_v61 = vpop.f32.mrb[4].mxu0 }
 0x307   : > { %v6729_v62 = vpop.f32.mrb[5].mxu0 }
 0x30c   : > { %v1063_v63 = vpop.f32.mrb[6].mxu0 }
 0x30d   : > { %v6732_v3 = vpop.f32.mrb[7].mxu0 }
 0x33a   : > { %v1487_v7 = vpop.f32.mrb[0].mxu1 }
 0x33b   : > { %v6926_v10 = vadd.f32 %v1487_v7, %v1043_v59  ;;  %v6781_v11 = vpop.f32.mrb[1].mxu1 }
 0x33d   : > { %1506 = vrot.lane.b32.xlu0 %v6926_v10, %s13349_s14 }
 0x33e   : > { %v1493_v12 = vpop.f32.mrb[2].mxu1 }
 0x33f   : > { %v6927_v13 = vadd.f32 %v1493_v12, %v1053_v61  ;;  %v6784_v14 = vpop.f32.mrb[3].mxu1 }
 0x341   : > { %1508 = vrot.lane.b32.xlu1 %v6927_v13, %s13349_s14 }
 0x342   : > { %v1499_v15 = vpop.f32.mrb[4].mxu1 }
 0x343   : > { %v6928_v20 = vadd.f32 %v1499_v15, %v1063_v63  ;;  %v6787_v21 = vpop.f32.mrb[5].mxu1 }
 0x345   : > { %1510 = vrot.lane.b32.xlu1 %v6928_v20, %s13349_s14 }
 0x3af   : > { %v1507_v23 = vpop.permute.xlu0 %1506 }
 0x3b0   : > { %v1515_v26 = vadd.f32 %v6926_v10, %v1507_v23 }
 0x3b2   : > { %v1518_v27 = vsub.f32 0.0, %v1515_v26 }
 0x3b3   : > { %v1509_v28 = vpop.permute.xlu1 %1508 }
 0x3b4   : > { %v1521_v29 = vmul.f32 1.442695, %v1518_v27  ;;  %v1516_v30 = vadd.f32 %v6927_v13, %v1509_v28 }
 0x3b6   : > { %7128 = vpow2.f32 %v1521_v29  ;;  %v1519_v31 = vsub.f32 0.0, %v1516_v30 }
 0x3b7   : > { %v1511_v32 = vpop.permute.xlu1 %1510 }
 0x3b8   : > { %v1523_v33 = vmul.f32 1.442695, %v1519_v31  ;;  %v1517_v35 = vadd.f32 %v6928_v20, %v1511_v32 }
 0x3ba   : > { %7130 = vpow2.f32 %v1523_v33  ;;  %v1520_v34 = vsub.f32 0.0, %v1517_v35 }
 0x3bc   : > { %v1525_v36 = vmul.f32 1.442695, %v1520_v34 }
 0x3be   : > { %7132 = vpow2.f32 %v1525_v36 }
 0x3c0   : > { %v7129_v37 = vpop.eup %7128 }
 0x3c1   : > { %v1527_v38 = vadd.f32 1.0, %v7129_v37 }
 0x3c3   : > { %7134 = vrcp.f32 %v1527_v38 }
 0x3c4   : > { %v7131_v39 = vpop.eup %7130 }
 0x3c5   : > { %v1528_v40 = vadd.f32 1.0, %v7131_v39 }
 0x3c7   : > { %7136 = vrcp.f32 %v1528_v40 }
 0x3c8   : > { %v7133_v41 = vpop.eup %7132 }
 0x3c9   : > { %v1529_v42 = vadd.f32 1.0, %v7133_v41 }
 0x3cb   : > { %7138 = vrcp.f32 %v1529_v42 }
 0x3cd   : > { %v7135_v43 = vpop.eup %7134 }
 0x3ce   : > { %1543 = vperm.xlu0 %7126, %v7135_v43   ;;  %1536 = vrot.lane.b32.xlu1 %v7135_v43, %s13343_s22 }
 0x3d1   : > { %v7137_v44 = vpop.eup %7136 }
 0x3d2   : > { %1538 = vrot.lane.b32.xlu0 %v7137_v44, %s13343_s22  ;;  %1547 = vperm.xlu1 %7127, %v7137_v44  }
 0x3d5   : > { %v7139_v45 = vpop.eup %7138 }
 0x3d6   : > { %1540 = vrot.lane.b32.xlu1 %v7139_v45, %s13343_s22 }
 0x3da   : > { %1551 = vperm.xlu1 %7127, %v7139_v45  }
 0x440   : > { %v1537_v46 = vpop.permute.xlu1 %1536 }
 0x441   : > { %1555 = vperm.xlu1 %7127, %v1537_v46  }
 0x44d   : > { %v1544_v47 = vpop.permute.xlu0 %1543 }
 0x44e   : > { %v7810_v53 = vmul.f32 %v1544_v47, %v7629_v2  ;;  %v7813_v54 = vmul.f32 %v1544_v47, %v7634_v4 }
 0x450   : > { %13942 = vst [vmem:[#allocation27_spill] sm:$0xff] %v7810_v53  ;;  %13943 = vst [vmem:[#allocation28_spill] sm:$0xff] %v7813_v54 }
 0x451   : > { %v1539_v48 = vpop.permute.xlu0 %1538  ;;  %v1548_v49 = vpop.permute.xlu1 %1547 }
 0x452   : > { %1559 = vperm.xlu0 %7126, %v1539_v48   ;;  %v7804_v51 = vmul.f32 %v1548_v49, %v7645_v8  ;;  %v7807_v52 = vmul.f32 %v1548_v49, %v7648_v9 }
 0x454   : > { %13940 = vst [vmem:[#allocation25_spill] sm:$0xff] %v7804_v51  ;;  %13941 = vst [vmem:[#allocation26_spill] sm:$0xff] %v7807_v52  ;;  %v1614_v56 = vmax.f32 %v7810_v53, %v7804_v51  ;;  %v1622_v57 = vmax.f32 %v7813_v54, %v7807_v52 }
 0x455   : > { %v1541_v50 = vpop.permute.xlu1 %1540 }
 0x456   : > { %1563 = vperm.xlu0 %7126, %v1541_v50  }
 0x459   : > { %v1552_v55 = vpop.permute.xlu1 %1551 }
 0x45a   : > { %v7820_v8 = vmul.f32 %v1552_v55, %v7669_v18  ;;  %v7823_v9 = vmul.f32 %v1552_v55, %v7672_v19 }
 0x45c   : > { %13944 = vst [vmem:[#allocation29_spill] sm:$0xff] %v7820_v8  ;;  %13945 = vst [vmem:[#allocation30_spill] sm:$0xff] %v7823_v9  ;;  %v1615_v58 = vmax.f32 %v1614_v56, %v7820_v8  ;;  %v1623_v2 = vmax.f32 %v1622_v57, %v7823_v9 }
 0x45e   : > { %v1616_v59 = vrot.slane %v1615_v58, 4  ;;  %v1624_v4 = vrot.slane %v1623_v2, 4 }
 0x460   : > { %v1617_v60 = vmax.f32 %v1615_v58, %v1616_v59  ;;  %v1625_v61 = vmax.f32 %v1623_v2, %v1624_v4 }
 0x462   : > { %v1618_v62 = vrot.slane %v1617_v60, 2  ;;  %v1626_v63 = vrot.slane %v1625_v61, 2 }
 0x464   : > { %v1619_v3 = vmax.f32 %v1617_v60, %v1618_v62  ;;  %v1627_v7 = vmax.f32 %v1625_v61, %v1626_v63 }
 0x466   : > { %v1620_v10 = vrot.slane %v1619_v3, 1  ;;  %v1628_v18 = vrot.slane %v1627_v7, 1 }
 0x468   : > { %v7827_v11 = vmax.f32 %v1619_v3, %v1620_v10  ;;  %v7831_v19 = vmax.f32 %v1627_v7, %v1628_v18 }
 0x46a   : > { %1750 = vrot.lane.b32.xlu1 %v7827_v11, %s13260_s27  ;;  %13946 = vst [vmem:[#allocation31_spill] sm:$0xff] %v7831_v19 }
 0x46e   : > { %1754 = vrot.lane.b32.xlu1 %v7831_v19, %s13260_s27 }
 0x472   : > { %1816 = vrot.lane.b32.xlu1 %v7827_v11, %s13262_s28 }
 0x476   : > { %1820 = vrot.lane.b32.xlu1 %v7831_v19, %s13262_s28 }
 0x47a   : > { %1882 = vrot.lane.b32.xlu1 %v7827_v11, %s13264_s5 }
 0x47e   : > { %1886 = vrot.lane.b32.xlu1 %v7831_v19, %s13264_s5 }
 0x482   : > { %1948 = vrot.lane.b32.xlu1 %v7827_v11, %s13266_s12 }
 0x486   : > { %1952 = vrot.lane.b32.xlu1 %v7831_v19, %s13266_s12 }
 0x48a   : > { %2014 = vrot.lane.b32.xlu1 %v7827_v11, %s13268_s17 }
 0x48e   : > { %2018 = vrot.lane.b32.xlu1 %v7831_v19, %s13268_s17 }
 0x492   : > { %2080 = vrot.lane.b32.xlu1 %v7827_v11, %s13270_s4 }
 0x496   : > { %2084 = vrot.lane.b32.xlu1 %v7831_v19, %s13270_s4 }
 0x49a   : > { %2146 = vrot.lane.b32.xlu1 %v7827_v11, %s13284_s18 }
 0x49e   : > { %2150 = vrot.lane.b32.xlu1 %v7831_v19, %s13284_s18 }
 0x4a2   : > { %2201 = vrot.lane.b32.xlu1 %v7827_v11, %s13280_s23 }
 0x4a6   : > { %2205 = vrot.lane.b32.xlu1 %v7831_v19, %s13280_s23 }
 0x4aa   : > { %2256 = vrot.lane.b32.xlu1 %v7827_v11, %s13272_s25 }
 0x4ae   : > { %2260 = vrot.lane.b32.xlu1 %v7831_v19, %s13272_s25 }
 0x4b2   : > { %2311 = vrot.lane.b32.xlu1 %v7827_v11, %s13274_s26 }
 0x4b6   : > { %2315 = vrot.lane.b32.xlu1 %v7831_v19, %s13274_s26 }
 0x4ba   : > { %2366 = vrot.lane.b32.xlu1 %v7827_v11, %s13276_s11 }
 0x4be   : > { %2370 = vrot.lane.b32.xlu1 %v7831_v19, %s13276_s11 }
 0x4c0   : > { %v1556_v12 = vpop.permute.xlu1 %1555 }
 0x4c1   : > { %v7892_v20 = vmul.f32 %v1556_v12, %v7623_v0  ;;  %v7895_v21 = vmul.f32 %v1556_v12, %v7626_v1 }
 0x4c2   : > { %2421 = vrot.lane.b32.xlu1 %v7827_v11, %s13278_s29 }
 0x4c3   : > { %13949 = vst [vmem:[#allocation34_spill] sm:$0xff] %v7892_v20  ;;  %13950 = vst [vmem:[#allocation35_spill] sm:$0xff] %v7895_v21 }
 0x4c6   : > { %2425 = vrot.lane.b32.xlu1 %v7831_v19, %s13278_s29 }
 0x4ca   : > { %2476 = vrot.lane.b32.xlu1 %v7827_v11, %s13282_s30 }
 0x4ce   : > { %2480 = vrot.lane.b32.xlu1 %v7831_v19, %s13282_s30 }
 0x4d1   : > { %v1560_v13 = vpop.permute.xlu0 %1559 }
 0x4d2   : > { %v7884_v14 = vmul.f32 %v1560_v13, %v7637_v5  ;;  %v7887_v15 = vmul.f32 %v1560_v13, %v7640_v6  ;;  %2531 = vrot.lane.b32.xlu1 %v7827_v11, %s13254_s21 }
 0x4d4   : > { %13947 = vst [vmem:[#allocation32_spill] sm:$0xff] %v7884_v14  ;;  %13948 = vst [vmem:[#allocation33_spill] sm:$0xff] %v7887_v15  ;;  %v1630_v26 = vmax.f32 %v7892_v20, %v7884_v14  ;;  %v1638_v5 = vmax.f32 %v7895_v21, %v7887_v15 }
 0x4d5   : > { %v1564_v23 = vpop.permute.xlu0 %1563 }
 0x4d6   : > { %v7902_v6 = vmul.f32 %v1564_v23, %v7663_v16  ;;  %v7905_v27 = vmul.f32 %v1564_v23, %v7666_v17  ;;  %2535 = vrot.lane.b32.xlu1 %v7831_v19, %s13254_s21  ;;  %s13258_s21 = smov 18  }
 0x4d8   : > { %13951 = vst [vmem:[#allocation36_spill] sm:$0xff] %v7902_v6  ;;  %13952 = vst [vmem:[#allocation37_spill] sm:$0xff] %v7905_v27  ;;  %v1631_v0 = vmax.f32 %v1630_v26, %v7902_v6  ;;  %v1639_v1 = vmax.f32 %v1638_v5, %v7905_v27 }
 0x4da   : > { %v1632_v28 = vrot.slane %v1631_v0, 4  ;;  %v1640_v29 = vrot.slane %v1639_v1, 4  ;;  %2586 = vrot.lane.b32.xlu1 %v7827_v11, %s13256_s20 }
 0x4dc   : > { %v1633_v30 = vmax.f32 %v1631_v0, %v1632_v28  ;;  %v1641_v31 = vmax.f32 %v1639_v1, %v1640_v29  ;;  %v7913_v16 = vpop.permute.xlu1 %1750 }
 0x4de   : > { %v1634_v32 = vrot.slane %v1633_v30, 2  ;;  %v1642_v17 = vrot.slane %v1641_v31, 2  ;;  %2590 = vrot.lane.b32.xlu1 %v7831_v19, %s13256_s20  ;;  %s13292_s20 = smov 17  }
 0x4e0   : > { %v1635_v33 = vmax.f32 %v1633_v30, %v1634_v32  ;;  %v1643_v35 = vmax.f32 %v1641_v31, %v1642_v17  ;;  %v7917_v34 = vpop.permute.xlu1 %1754 }
 0x4e2   : > { %v1636_v36 = vrot.slane %v1635_v33, 1  ;;  %2641 = vrot.lane.b32.xlu1 %v7827_v11, %s13258_s21  ;;  %v1644_v38 = vrot.slane %v1643_v35, 1 }
 0x4e4   : > { %v7921_v37 = vmax.f32 %v1635_v33, %v1636_v36  ;;  %v7923_v39 = vpop.permute.xlu1 %1816  ;;  %v7929_v40 = vmax.f32 %v1643_v35, %v1644_v38 }
 0x4e6   : > { %2645 = vrot.lane.b32.xlu1 %v7831_v19, %s13258_s21  ;;  %1752 = vrot.lane.b32.xlu0 %v7921_v37, %s13260_s27  ;;  %13953 = vst [vmem:[#allocation38_spill] sm:$0xff] %v7929_v40  ;;  %s13301_s21 = smov 16  }
 0x4e8   : > { %v7931_v41 = vpop.permute.xlu1 %1820 }
 0x4ea   : > { %2696 = vrot.lane.b32.xlu1 %v7827_v11, %s13292_s20  ;;  %1756 = vrot.lane.b32.xlu0 %v7929_v40, %s13260_s27  ;;  %s13307_s27 = smov 15  }
 0x4ec   : > { %v7937_v42 = vpop.permute.xlu1 %1882 }
 0x4ee   : > { %2700 = vrot.lane.b32.xlu1 %v7831_v19, %s13292_s20  ;;  %1818 = vrot.lane.b32.xlu0 %v7921_v37, %s13262_s28 }
 0x4f0   : > { %v7943_v43 = vpop.permute.xlu1 %1886 }
 0x4f2   : > { %2751 = vrot.lane.b32.xlu1 %v7827_v11, %s13301_s21  ;;  %1822 = vrot.lane.b32.xlu0 %v7929_v40, %s13262_s28  ;;  %s13313_s28 = smov 14  }
 0x4f4   : > { %v7949_v44 = vpop.permute.xlu1 %1948 }
 0x4f6   : > { %2755 = vrot.lane.b32.xlu1 %v7831_v19, %s13301_s21  ;;  %1884 = vrot.lane.b32.xlu0 %v7921_v37, %s13264_s5 }
 0x4f8   : > { %v7955_v45 = vpop.permute.xlu1 %1952 }
 0x4fa   : > { %2806 = vrot.lane.b32.xlu1 %v7827_v11, %s13307_s27  ;;  %1888 = vrot.lane.b32.xlu0 %v7929_v40, %s13264_s5  ;;  %s13319_s5 = smov 13  }
 0x4fc   : > { %v7961_v46 = vpop.permute.xlu1 %2014 }
 0x4fe   : > { %2810 = vrot.lane.b32.xlu1 %v7831_v19, %s13307_s27  ;;  %1950 = vrot.lane.b32.xlu0 %v7921_v37, %s13266_s12 }
 0x500   : > { %v7967_v47 = vpop.permute.xlu1 %2018 }
 0x502   : > { %2861 = vrot.lane.b32.xlu1 %v7827_v11, %s13313_s28  ;;  %1954 = vrot.lane.b32.xlu0 %v7929_v40, %s13266_s12  ;;  %s13325_s12 = smov 3  }
 0x504   : > { %v7973_v48 = vpop.permute.xlu1 %2080 }
 0x506   : > { %2865 = vrot.lane.b32.xlu1 %v7831_v19, %s13313_s28  ;;  %2016 = vrot.lane.b32.xlu0 %v7921_v37, %s13268_s17 }
 0x508   : > { %v7979_v49 = vpop.permute.xlu1 %2084 }
 0x50a   : > { %2916 = vrot.lane.b32.xlu1 %v7827_v11, %s13319_s5  ;;  %2020 = vrot.lane.b32.xlu0 %v7929_v40, %s13268_s17  ;;  %s13331_s17 = smov 2  }
 0x50c   : > { %v7985_v50 = vpop.permute.xlu1 %2146 }
 0x50e   : > { %2920 = vrot.lane.b32.xlu1 %v7831_v19, %s13319_s5  ;;  %2082 = vrot.lane.b32.xlu0 %v7921_v37, %s13270_s4 }
 0x510   : > { %v7991_v55 = vpop.permute.xlu1 %2150 }
 0x512   : > { %2971 = vrot.lane.b32.xlu1 %v7827_v11, %s13325_s12  ;;  %2086 = vrot.lane.b32.xlu0 %v7929_v40, %s13270_s4  ;;  %s13337_s4 = smov 1  }
 0x514   : > { %v7997_v56 = vpop.permute.xlu1 %2201 }
 0x516   : > { %2975 = vrot.lane.b32.xlu1 %v7831_v19, %s13325_s12  ;;  %2148 = vrot.lane.b32.xlu0 %v7921_v37, %s13284_s18 }
 0x518   : > { %v8003_v57 = vpop.permute.xlu1 %2205 }
 0x51a   : > { %3026 = vrot.lane.b32.xlu1 %v7827_v11, %s13331_s17  ;;  %2152 = vrot.lane.b32.xlu0 %v7929_v40, %s13284_s18  ;;  %s13290_s18 = smov 112  }
 0x51c   : > { %v8009_v58 = vpop.permute.xlu1 %2256 }
 0x51e   : > { %3030 = vrot.lane.b32.xlu1 %v7831_v19, %s13331_s17  ;;  %2203 = vrot.lane.b32.xlu0 %v7921_v37, %s13280_s23 }
 0x520   : > { %v8015_v2 = vpop.permute.xlu1 %2260 }
 0x522   : > { %3081 = vrot.lane.b32.xlu1 %v7827_v11, %s13337_s4  ;;  %2207 = vrot.lane.b32.xlu0 %v7929_v40, %s13280_s23  ;;  %s13288_s23 = smov 113  }
 0x524   : > { %v8021_v59 = vpop.permute.xlu1 %2311 }
 0x526   : > { %3085 = vrot.lane.b32.xlu1 %v7831_v19, %s13337_s4  ;;  %2258 = vrot.lane.b32.xlu0 %v7921_v37, %s13272_s25 }
 0x528   : > { %v8027_v4 = vpop.permute.xlu1 %2315 }
 0x52a   : > { %2262 = vrot.lane.b32.xlu0 %v7929_v40, %s13272_s25  ;;  %3166 = vrot.lane.b32.xlu1 %v7827_v11, %s13343_s22  ;;  %s13355_s25 = smov 125  }
 0x52c   : > { %v8033_v60 = vpop.permute.xlu1 %2366 }
 0x52e   : > { %2313 = vrot.lane.b32.xlu0 %v7921_v37, %s13274_s26  ;;  %3170 = vrot.lane.b32.xlu1 %v7831_v19, %s13343_s22 }
 0x530   : > { %v8039_v61 = vpop.permute.xlu1 %2370 }
 0x532   : > { %2317 = vrot.lane.b32.xlu0 %v7929_v40, %s13274_s26  ;;  %3221 = vrot.lane.b32.xlu1 %v7827_v11, %s13349_s14  ;;  %s13366_s26 = smov 115  }
 0x534   : > { %v8045_v62 = vpop.permute.xlu1 %2421 }
 0x536   : > { %2368 = vrot.lane.b32.xlu0 %v7921_v37, %s13276_s11  ;;  %3225 = vrot.lane.b32.xlu1 %v7831_v19, %s13349_s14 }
 0x538   : > { %v8051_v63 = vpop.permute.xlu1 %2425 }
 0x53a   : > { %2372 = vrot.lane.b32.xlu0 %v7929_v40, %s13276_s11  ;;  %3276 = vrot.lane.b32.xlu1 %v7827_v11, %s13355_s25  ;;  %s13286_s11 = smov 114  }
 0x53c   : > { %v8057_v3 = vpop.permute.xlu1 %2476 }
 0x53e   : > { %2423 = vrot.lane.b32.xlu0 %v7921_v37, %s13278_s29  ;;  %3280 = vrot.lane.b32.xlu1 %v7831_v19, %s13355_s25 }
 0x540   : > { %v8063_v7 = vpop.permute.xlu1 %2480 }
 0x542   : > { %2427 = vrot.lane.b32.xlu0 %v7929_v40, %s13278_s29  ;;  %3331 = vrot.lane.b32.xlu1 %v7827_v11, %s13366_s26  ;;  %s13954_s29 = smov 29  }
 0x544   : > { %v8069_v10 = vpop.permute.xlu1 %2531 }
 0x546   : > { %2478 = vrot.lane.b32.xlu0 %v7921_v37, %s13282_s30  ;;  %3335 = vrot.lane.b32.xlu1 %v7831_v19, %s13366_s26 }
 0x548   : > { %v8075_v18 = vpop.permute.xlu1 %2535 }
 0x54a   : > { %2482 = vrot.lane.b32.xlu0 %v7929_v40, %s13282_s30  ;;  %3386 = vrot.lane.b32.xlu1 %v7827_v11, %s13286_s11  ;;  %s13955_s30 = smov 19  }
 0x54c   : > { %v8081_v12 = vpop.permute.xlu1 %2586 }
 0x54e   : > { %2533 = vrot.lane.b32.xlu0 %v7921_v37, %s13954_s29  ;;  %3390 = vrot.lane.b32.xlu1 %v7831_v19, %s13286_s11  ;;  %s13957_s11 = smov 18  }
 0x550   : > { %v8087_v13 = vpop.permute.xlu1 %2590 }
 0x552   : > { %2537 = vrot.lane.b32.xlu0 %v7929_v40, %s13954_s29  ;;  %3441 = vrot.lane.b32.xlu1 %v7827_v11, %s13288_s23 }
 0x554   : > { %v8093_v23 = vpop.permute.xlu1 %2641 }
 0x556   : > { %2588 = vrot.lane.b32.xlu0 %v7921_v37, %s13955_s30  ;;  %3445 = vrot.lane.b32.xlu1 %v7831_v19, %s13288_s23  ;;  %s13399_s23 = smov 111  }
 0x558   : > { %v8099_v26 = vpop.permute.xlu0 %1752  ;;  %v8101_v5 = vpop.permute.xlu1 %2645 }
 0x55a   : > { %2592 = vrot.lane.b32.xlu0 %v7929_v40, %s13955_s30  ;;  %3496 = vrot.lane.b32.xlu1 %v7827_v11, %s13290_s18 }
 0x55c   : > { %v8107_v0 = vpop.permute.xlu0 %1756  ;;  %v8109_v1 = vpop.permute.xlu1 %2696 }
 0x55d   : > { %13956 = vst [vmem:[#allocation39_spill] sm:$0xff] %v8109_v1 }
 0x55e   : > { %2643 = vrot.lane.b32.xlu0 %v7921_v37, %s13957_s11  ;;  %3500 = vrot.lane.b32.xlu1 %v7831_v19, %s13290_s18  ;;  %s13403_s18 = smov 110  }
 0x560   : > { %v8115_v28 = vpop.permute.xlu0 %1818  ;;  %v8117_v29 = vpop.permute.xlu1 %2700 }
 0x561   : > { %13958 = vst [vmem:[#allocation40_spill] sm:$0xff] %v8115_v28  ;;  %13959 = vst [vmem:[#allocation41_spill] sm:$0xff] %v8117_v29 }
 0x562   : > { %2647 = vrot.lane.b32.xlu0 %v7929_v40, %s13957_s11  ;;  %3551 = vrot.lane.b32.xlu1 %v7827_v11, %s13399_s23 }
 0x564   : > { %v8123_v30 = vpop.permute.xlu0 %1822  ;;  %v8125_v31 = vpop.permute.xlu1 %2751 }
 0x565   : > { %13960 = vst [vmem:[#allocation42_spill] sm:$0xff] %v8123_v30  ;;  %13961 = vst [vmem:[#allocation43_spill] sm:$0xff] %v8125_v31 }
 0x566   : > { %2698 = vrot.lane.b32.xlu0 %v7921_v37, %s13292_s20  ;;  %3555 = vrot.lane.b32.xlu1 %v7831_v19, %s13399_s23 }
 0x568   : > { %v8131_v32 = vpop.permute.xlu0 %1884  ;;  %v8133_v17 = vpop.permute.xlu1 %2755 }
 0x569   : > { %13962 = vst [vmem:[#allocation44_spill] sm:$0xff] %v8131_v32  ;;  %13963 = vst [vmem:[#allocation45_spill] sm:$0xff] %v8133_v17 }
 0x56a   : > { %2702 = vrot.lane.b32.xlu0 %v7929_v40, %s13292_s20  ;;  %3606 = vrot.lane.b32.xlu1 %v7827_v11, %s13403_s18  ;;  %s13409_s20 = smov 109  }
 0x56c   : > { %v8139_v33 = vpop.permute.xlu0 %1888  ;;  %v8141_v35 = vpop.permute.xlu1 %2806 }
 0x56d   : > { %13964 = vst [vmem:[#allocation46_spill] sm:$0xff] %v8139_v33  ;;  %13965 = vst [vmem:[#allocation47_spill] sm:$0xff] %v8141_v35 }
 0x56e   : > { %2753 = vrot.lane.b32.xlu0 %v7921_v37, %s13301_s21  ;;  %3610 = vrot.lane.b32.xlu1 %v7831_v19, %s13403_s18 }
 0x570   : > { %v8147_v36 = vpop.permute.xlu0 %1950  ;;  %v8149_v38 = vpop.permute.xlu1 %2810 }
 0x571   : > { %13966 = vst [vmem:[#allocation48_spill] sm:$0xff] %v8147_v36  ;;  %13967 = vst [vmem:[#allocation49_spill] sm:$0xff] %v8149_v38  ;;  %v1578_v38 = vadd.f32 %v7804_v51, %v7810_v53 }
 0x572   : > { %2757 = vrot.lane.b32.xlu0 %v7929_v40, %s13301_s21  ;;  %3661 = vrot.lane.b32.xlu1 %v7827_v11, %s13409_s20  ;;  %s13415_s21 = smov 99  }
 0x574   : > { %v8155_v24 = vpop.permute.xlu0 %1954  ;;  %v8157_v25 = vpop.permute.xlu1 %2861 }
 0x575   : > { %13968 = vst [vmem:[#allocation50_spill] sm:$0xff] %v8155_v24  ;;  %13969 = vst [vmem:[#allocation51_spill] sm:$0xff] %v8157_v25 }
 0x576   : > { %2808 = vrot.lane.b32.xlu0 %v7921_v37, %s13307_s27  ;;  %3665 = vrot.lane.b32.xlu1 %v7831_v19, %s13409_s20 }
 0x578   : > { %v8163_v22 = vpop.permute.xlu0 %2016  ;;  %v8165_v36 = vpop.permute.xlu1 %2865 }
 0x579   : > { %13970 = vst [vmem:[#allocation52_spill] sm:$0xff] %v8163_v22  ;;  %13971 = vst [vmem:[#allocation53_spill] sm:$0xff] %v8165_v36 }
 0x57a   : > { %2812 = vrot.lane.b32.xlu0 %v7929_v40, %s13307_s27  ;;  %3716 = vrot.lane.b32.xlu1 %v7827_v11, %s13415_s21  ;;  %s13421_s27 = smov 98  }
 0x57c   : > { %v8171_v24 = vpop.permute.xlu0 %2020  ;;  %v8173_v25 = vpop.permute.xlu1 %2916 }
 0x57d   : > { %13972 = vst [vmem:[#allocation54_spill] sm:$0xff] %v8171_v24  ;;  %13973 = vst [vmem:[#allocation55_spill] sm:$0xff] %v8173_v25 }
 0x57e   : > { %2863 = vrot.lane.b32.xlu0 %v7921_v37, %s13313_s28  ;;  %3720 = vrot.lane.b32.xlu1 %v7831_v19, %s13415_s21 }
 0x580   : > { %v8179_v22 = vpop.permute.xlu0 %2082  ;;  %v8181_v36 = vpop.permute.xlu1 %2920 }
 0x581   : > { %13974 = vst [vmem:[#allocation56_spill] sm:$0xff] %v8179_v22  ;;  %13975 = vst [vmem:[#allocation57_spill] sm:$0xff] %v8181_v36 }
 0x582   : > { %2867 = vrot.lane.b32.xlu0 %v7929_v40, %s13313_s28  ;;  %3771 = vrot.lane.b32.xlu1 %v7827_v11, %s13421_s27  ;;  %s13427_s28 = smov 97  }
 0x584   : > { %v8187_v24 = vpop.permute.xlu0 %2086  ;;  %v8189_v25 = vpop.permute.xlu1 %2971 }
 0x585   : > { %13976 = vst [vmem:[#allocation58_spill] sm:$0xff] %v8187_v24  ;;  %13977 = vst [vmem:[#allocation59_spill] sm:$0xff] %v8189_v25 }
 0x586   : > { %2918 = vrot.lane.b32.xlu0 %v7921_v37, %s13319_s5  ;;  %3775 = vrot.lane.b32.xlu1 %v7831_v19, %s13421_s27 }
 0x588   : > { %v8195_v22 = vpop.permute.xlu0 %2148  ;;  %v8197_v36 = vpop.permute.xlu1 %2975 }
 0x589   : > { %13978 = vst [vmem:[#allocation60_spill] sm:$0xff] %v8195_v22  ;;  %13979 = vst [vmem:[#allocation61_spill] sm:$0xff] %v8197_v36 }
 0x58a   : > { %2922 = vrot.lane.b32.xlu0 %v7929_v40, %s13319_s5  ;;  %3826 = vrot.lane.b32.xlu1 %v7827_v11, %s13427_s28  ;;  %s13433_s5 = smov 96  }
 0x58c   : > { %v8203_v24 = vpop.permute.xlu0 %2152  ;;  %v8205_v25 = vpop.permute.xlu1 %3026 }
 0x58d   : > { %13980 = vst [vmem:[#allocation62_spill] sm:$0xff] %v8203_v24  ;;  %13981 = vst [vmem:[#allocation63_spill] sm:$0xff] %v8205_v25 }
 0x58e   : > { %2973 = vrot.lane.b32.xlu0 %v7921_v37, %s13325_s12  ;;  %3830 = vrot.lane.b32.xlu1 %v7831_v19, %s13427_s28 }
 0x590   : > { %v8211_v22 = vpop.permute.xlu0 %2203  ;;  %v8213_v36 = vpop.permute.xlu1 %3030 }
 0x591   : > { %13982 = vst [vmem:[#allocation64_spill] sm:$0xff] %v8211_v22  ;;  %13983 = vst [vmem:[#allocation65_spill] sm:$0xff] %v8213_v36 }
 0x592   : > { %2977 = vrot.lane.b32.xlu0 %v7929_v40, %s13325_s12  ;;  %3881 = vrot.lane.b32.xlu1 %v7827_v11, %s13433_s5  ;;  %s13439_s12 = smov 95  }
 0x594   : > { %v8219_v24 = vpop.permute.xlu0 %2207  ;;  %v8221_v25 = vpop.permute.xlu1 %3081 }
 0x595   : > { %13984 = vst [vmem:[#allocation66_spill] sm:$0xff] %v8219_v24  ;;  %13985 = vst [vmem:[#allocation67_spill] sm:$0xff] %v8221_v25 }
 0x596   : > { %3028 = vrot.lane.b32.xlu0 %v7921_v37, %s13331_s17  ;;  %3885 = vrot.lane.b32.xlu1 %v7831_v19, %s13433_s5 }
 0x598   : > { %v8227_v22 = vpop.permute.xlu0 %2258  ;;  %v8229_v36 = vpop.permute.xlu1 %3085 }
 0x599   : > { %13986 = vst [vmem:[#allocation68_spill] sm:$0xff] %v8227_v22  ;;  %13987 = vst [vmem:[#allocation69_spill] sm:$0xff] %v8229_v36 }
 0x59a   : > { %3032 = vrot.lane.b32.xlu0 %v7929_v40, %s13331_s17  ;;  %3936 = vrot.lane.b32.xlu1 %v7827_v11, %s13439_s12  ;;  %s13447_s17 = smov 94  }
 0x59c   : > { %v8235_v24 = vpop.permute.xlu0 %2262  ;;  %v8237_v25 = vpop.permute.xlu1 %3166 }
 0x59d   : > { %13988 = vst [vmem:[#allocation70_spill] sm:$0xff] %v8235_v24  ;;  %13989 = vst [vmem:[#allocation71_spill] sm:$0xff] %v8237_v25 }
 0x59e   : > { %3083 = vrot.lane.b32.xlu0 %v7921_v37, %s13337_s4  ;;  %3940 = vrot.lane.b32.xlu1 %v7831_v19, %s13439_s12 }
 0x5a0   : > { %v8243_v22 = vpop.permute.xlu0 %2313  ;;  %v8245_v36 = vpop.permute.xlu1 %3170 }
 0x5a1   : > { %13990 = vst [vmem:[#allocation72_spill] sm:$0xff] %v8243_v22  ;;  %13991 = vst [vmem:[#allocation73_spill] sm:$0xff] %v8245_v36 }
 0x5a2   : > { %3087 = vrot.lane.b32.xlu0 %v7929_v40, %s13337_s4  ;;  %3991 = vrot.lane.b32.xlu1 %v7827_v11, %s13447_s17  ;;  %s13386_s4 = smov 93  }
 0x5a4   : > { %v8251_v24 = vpop.permute.xlu0 %2317  ;;  %v8253_v25 = vpop.permute.xlu1 %3221 }
 0x5a5   : > { %13992 = vst [vmem:[#allocation74_spill] sm:$0xff] %v8251_v24  ;;  %13993 = vst [vmem:[#allocation75_spill] sm:$0xff] %v8253_v25 }
 0x5a6   : > { %3168 = vrot.lane.b32.xlu0 %v7921_v37, %s13343_s22  ;;  %3995 = vrot.lane.b32.xlu1 %v7831_v19, %s13447_s17 }
 0x5a8   : > { %v8259_v22 = vpop.permute.xlu0 %2368  ;;  %v8261_v36 = vpop.permute.xlu1 %3225 }
 0x5a9   : > { %13994 = vst [vmem:[#allocation76_spill] sm:$0xff] %v8259_v22  ;;  %13995 = vst [vmem:[#allocation77_spill] sm:$0xff] %v8261_v36 }
 0x5aa   : > { %3172 = vrot.lane.b32.xlu0 %v7929_v40, %s13343_s22  ;;  %4046 = vrot.lane.b32.xlu1 %v7827_v11, %s13386_s4  ;;  %s13360_s22 = smov 83  }
 0x5ac   : > { %v8267_v24 = vpop.permute.xlu0 %2372  ;;  %v8269_v25 = vpop.permute.xlu1 %3276 }
 0x5ad   : > { %13996 = vst [vmem:[#allocation78_spill] sm:$0xff] %v8267_v24  ;;  %13997 = vst [vmem:[#allocation79_spill] sm:$0xff] %v8269_v25 }
 0x5ae   : > { %3223 = vrot.lane.b32.xlu0 %v7921_v37, %s13349_s14  ;;  %4050 = vrot.lane.b32.xlu1 %v7831_v19, %s13386_s4  ;;  %s13396_s4 = smov 78  }
 0x5b0   : > { %v8275_v22 = vpop.permute.xlu0 %2423  ;;  %v8277_v36 = vpop.permute.xlu1 %3280 }
 0x5b1   : > { %13998 = vst [vmem:[#allocation80_spill] sm:$0xff] %v8275_v22  ;;  %13999 = vst [vmem:[#allocation81_spill] sm:$0xff] %v8277_v36 }
 0x5b2   : > { %3227 = vrot.lane.b32.xlu0 %v7929_v40, %s13349_s14  ;;  %4101 = vrot.lane.b32.xlu1 %v7827_v11, %s13360_s22  ;;  %s13377_s14 = smov 82  }
 0x5b4   : > { %v8283_v24 = vpop.permute.xlu0 %2427  ;;  %v8285_v25 = vpop.permute.xlu1 %3331 }
 0x5b5   : > { %14000 = vst [vmem:[#allocation82_spill] sm:$0xff] %v8283_v24  ;;  %14001 = vst [vmem:[#allocation83_spill] sm:$0xff] %v8285_v25 }
 0x5b6   : > { %3278 = vrot.lane.b32.xlu0 %v7921_v37, %s13355_s25  ;;  %4105 = vrot.lane.b32.xlu1 %v7831_v19, %s13360_s22  ;;  %s14010_s22 = smov 114  }
 0x5b8   : > { %v8291_v22 = vpop.permute.xlu0 %2478  ;;  %v8293_v36 = vpop.permute.xlu1 %3335 }
 0x5b9   : > { %14002 = vst [vmem:[#allocation84_spill] sm:$0xff] %v8291_v22  ;;  %14003 = vst [vmem:[#allocation85_spill] sm:$0xff] %v8293_v36 }
 0x5ba   : > { %3282 = vrot.lane.b32.xlu0 %v7929_v40, %s13355_s25  ;;  %4156 = vrot.lane.b32.xlu1 %v7827_v11, %s13377_s14  ;;  %s13371_s25 = smov 81  }
 0x5bc   : > { %v8299_v24 = vpop.permute.xlu0 %2482  ;;  %v8301_v25 = vpop.permute.xlu1 %3386 }
 0x5bd   : > { %14004 = vst [vmem:[#allocation86_spill] sm:$0xff] %v8299_v24  ;;  %14005 = vst [vmem:[#allocation87_spill] sm:$0xff] %v8301_v25 }
 0x5be   : > { %3333 = vrot.lane.b32.xlu0 %v7921_v37, %s13366_s26  ;;  %4160 = vrot.lane.b32.xlu1 %v7831_v19, %s13377_s14  ;;  %s13392_s14 = smov 79  }
 0x5c0   : > { %v8307_v22 = vpop.permute.xlu0 %2533  ;;  %v8309_v36 = vpop.permute.xlu1 %3390 }
 0x5c1   : > { %14006 = vst [vmem:[#allocation88_spill] sm:$0xff] %v8307_v22  ;;  %14007 = vst [vmem:[#allocation89_spill] sm:$0xff] %v8309_v36  ;;  %v1579_v22 = vadd.f32 %v1578_v38, %v7820_v8 }
 0x5c2   : > { %3337 = vrot.lane.b32.xlu0 %v7929_v40, %s13366_s26  ;;  %4211 = vrot.lane.b32.xlu1 %v7827_v11, %s13371_s25  ;;  %s13382_s26 = smov 80  }
 0x5c3   : > { %v1580_v53 = vrot.slane %v1579_v22, 4 }
 0x5c4   : > { %v8315_v24 = vpop.permute.xlu0 %2537  ;;  %v8317_v25 = vpop.permute.xlu1 %3441 }
 0x5c5   : > { %14008 = vst [vmem:[#allocation90_spill] sm:$0xff] %v8315_v24  ;;  %14009 = vst [vmem:[#allocation91_spill] sm:$0xff] %v8317_v25  ;;  %v1586_v24 = vadd.f32 %v7807_v52, %v7813_v54  ;;  %v1581_v8 = vadd.f32 %v1580_v53, %v1579_v22 }
 0x5c6   : > { %3388 = vrot.lane.b32.xlu0 %v7921_v37, %s14010_s22  ;;  %4215 = vrot.lane.b32.xlu1 %v7831_v19, %s13371_s25  ;;  %s14015_s25 = smov 113  }
 0x5c7   : > { %v1587_v51 = vadd.f32 %v1586_v24, %v7823_v9  ;;  %v1582_v24 = vrot.slane %v1581_v8, 2 }
 0x5c8   : > { %v8326_v36 = vpop.permute.xlu0 %2588  ;;  %v8328_v35 = vpop.permute.xlu1 %3445 }
 0x5c9   : > { %14011 = vst [vmem:[#allocation92_spill] sm:$0xff] %v8326_v36  ;;  %14012 = vst [vmem:[#allocation93_spill] sm:$0xff] %v8328_v35  ;;  %v1588_v54 = vrot.slane %v1587_v51, 4  ;;  %v1583_v22 = vadd.f32 %v1582_v24, %v1581_v8 }
 0x5ca   : > { %3392 = vrot.lane.b32.xlu0 %v7929_v40, %s14010_s22  ;;  %4266 = vrot.lane.b32.xlu1 %v7827_v11, %s13382_s26 }
 0x5cb   : > { %v1589_v9 = vadd.f32 %v1588_v54, %v1587_v51  ;;  %v1584_v51 = vrot.slane %v1583_v22, 1 }
 0x5cc   : > { %v8337_v25 = vpop.permute.xlu0 %2592  ;;  %v8339_v38 = vpop.permute.xlu1 %3496 }
 0x5cd   : > { %14013 = vst [vmem:[#allocation94_spill] sm:$0xff] %v8337_v25  ;;  %14014 = vst [vmem:[#allocation95_spill] sm:$0xff] %v8339_v38  ;;  %v1590_v53 = vrot.slane %v1589_v9, 2  ;;  %v1585_v8 = vadd.f32 %v1584_v51, %v1583_v22 }
 0x5ce   : > { %3443 = vrot.lane.b32.xlu0 %v7921_v37, %s14015_s25  ;;  %4270 = vrot.lane.b32.xlu1 %v7831_v19, %s13382_s26  ;;  %s14020_s26 = smov 112  }
 0x5cf   : > { %v1591_v54 = vadd.f32 %v1590_v53, %v1589_v9  ;;  %v8385_v53 = vmul.f32 0.041666668, %v1585_v8 }
 0x5d0   : > { %v8345_v52 = vpop.permute.xlu0 %2643  ;;  %v8347_v36 = vpop.permute.xlu1 %3500 }
 0x5d1   : > { %14016 = vst [vmem:[#allocation96_spill] sm:$0xff] %v8345_v52  ;;  %14017 = vst [vmem:[#allocation97_spill] sm:$0xff] %v8347_v36  ;;  %v1592_v24 = vrot.slane %v1591_v54, 1 }
 0x5d2   : > { %3447 = vrot.lane.b32.xlu0 %v7929_v40, %s14015_s25  ;;  %4321 = vrot.lane.b32.xlu1 %v7827_v11, %s13392_s14 }
 0x5d3   : > { %v1593_v9 = vadd.f32 %v1592_v24, %v1591_v54 }
 0x5d4   : > { %v8353_v38 = vpop.permute.xlu0 %2647  ;;  %v8355_v25 = vpop.permute.xlu1 %3551 }
 0x5d5   : > { %14018 = vst [vmem:[#allocation98_spill] sm:$0xff] %v8353_v38  ;;  %14019 = vst [vmem:[#allocation99_spill] sm:$0xff] %v8355_v25  ;;  %v8395_v22 = vmul.f32 0.041666668, %v1593_v9 }
 0x5d6   : > { %3498 = vrot.lane.b32.xlu0 %v7921_v37, %s14020_s26  ;;  %4325 = vrot.lane.b32.xlu1 %v7831_v19, %s13392_s14  ;;  %s13441_s14 = smov 77  }
 0x5d8   : > { %v8361_v52 = vpop.permute.xlu0 %2698  ;;  %v8363_v36 = vpop.permute.xlu1 %3555 }
 0x5d9   : > { %14021 = vst [vmem:[#allocation100_spill] sm:$0xff] %v8361_v52  ;;  %14022 = vst [vmem:[#allocation101_spill] sm:$0xff] %v8363_v36 }
 0x5da   : > { %3502 = vrot.lane.b32.xlu0 %v7929_v40, %s14020_s26  ;;  %4376 = vrot.lane.b32.xlu1 %v7827_v11, %s13396_s4 }
 0x5dc   : > { %v8369_v25 = vpop.permute.xlu0 %2702  ;;  %v8371_v38 = vpop.permute.xlu1 %3606 }
 0x5dd   : > { %14023 = vst [vmem:[#allocation102_spill] sm:$0xff] %v8369_v25  ;;  %14024 = vst [vmem:[#allocation103_spill] sm:$0xff] %v8371_v38 }
 0x5de   : > { %3553 = vrot.lane.b32.xlu0 %v7921_v37, %s13399_s23  ;;  %4380 = vrot.lane.b32.xlu1 %v7831_v19, %s13396_s4  ;;  %s14029_s4 = smov 51  }
 0x5e0   : > { %v8377_v52 = vpop.permute.xlu0 %2753  ;;  %v8379_v36 = vpop.permute.xlu1 %3610 }
 0x5e1   : > { %14025 = vst [vmem:[#allocation104_spill] sm:$0xff] %v8377_v52  ;;  %14026 = vst [vmem:[#allocation105_spill] sm:$0xff] %v8379_v36  ;;  %v14143_v36 = vmov 0 }
 0x5e2   : > { %3557 = vrot.lane.b32.xlu0 %v7929_v40, %s13399_s23  ;;  %4431 = vrot.lane.b32.xlu1 %v7827_v11, %s13441_s14  ;;  %s14034_s23 = smov 50   ;;  %s14070_s14 = smov 34  }
 0x5e4   : > { %v8387_v38 = vpop.permute.xlu0 %2757  ;;  %v8389_v25 = vpop.permute.xlu1 %3661 }
 0x5e5   : > { %14027 = vst [vmem:[#allocation106_spill] sm:$0xff] %v8387_v38  ;;  %14028 = vst [vmem:[#allocation107_spill] sm:$0xff] %v8389_v25 }
 0x5e6   : > { %3608 = vrot.lane.b32.xlu0 %v7921_v37, %s13403_s18  ;;  %1731 = vrot.lane.b32.xlu1 %v8385_v53, %s14029_s4 }
 0x5e8   : > { %v8397_v51 = vpop.permute.xlu0 %2808  ;;  %v8399_v52 = vpop.permute.xlu1 %3665 }
 0x5e9   : > { %14030 = vst [vmem:[#allocation108_spill] sm:$0xff] %v8397_v51  ;;  %14031 = vst [vmem:[#allocation109_spill] sm:$0xff] %v8399_v52 }
 0x5ea   : > { %3612 = vrot.lane.b32.xlu0 %v7929_v40, %s13403_s18  ;;  %1735 = vrot.lane.b32.xlu1 %v8395_v22, %s14029_s4  ;;  %s14039_s18 = smov 49  }
 0x5ec   : > { %v8405_v54 = vpop.permute.xlu0 %2812  ;;  %v8407_v8 = vpop.permute.xlu1 %3716 }
 0x5ed   : > { %14032 = vst [vmem:[#allocation110_spill] sm:$0xff] %v8405_v54  ;;  %14033 = vst [vmem:[#allocation111_spill] sm:$0xff] %v8407_v8 }
 0x5ee   : > { %3663 = vrot.lane.b32.xlu0 %v7921_v37, %s13409_s20  ;;  %1797 = vrot.lane.b32.xlu1 %v8385_v53, %s14034_s23 }
 0x5f0   : > { %v8413_v24 = vpop.permute.xlu0 %2863  ;;  %v8415_v9 = vpop.permute.xlu1 %3720 }
 0x5f1   : > { %14035 = vst [vmem:[#allocation112_spill] sm:$0xff] %v8413_v24  ;;  %14036 = vst [vmem:[#allocation113_spill] sm:$0xff] %v8415_v9 }
 0x5f2   : > { %3667 = vrot.lane.b32.xlu0 %v7929_v40, %s13409_s20  ;;  %1801 = vrot.lane.b32.xlu1 %v8395_v22, %s14034_s23  ;;  %s14044_s20 = smov 48  }
 0x5f4   : > { %v8421_v51 = vpop.permute.xlu0 %2867  ;;  %v8423_v54 = vpop.permute.xlu1 %3771 }
 0x5f5   : > { %14037 = vst [vmem:[#allocation114_spill] sm:$0xff] %v8421_v51  ;;  %14038 = vst [vmem:[#allocation115_spill] sm:$0xff] %v8423_v54 }
 0x5f6   : > { %3718 = vrot.lane.b32.xlu0 %v7921_v37, %s13415_s21  ;;  %1863 = vrot.lane.b32.xlu1 %v8385_v53, %s14039_s18 }
 0x5f8   : > { %v8429_v8 = vpop.permute.xlu0 %2918  ;;  %v8431_v24 = vpop.permute.xlu1 %3775 }
 0x5f9   : > { %14040 = vst [vmem:[#allocation116_spill] sm:$0xff] %v8429_v8  ;;  %14041 = vst [vmem:[#allocation117_spill] sm:$0xff] %v8431_v24 }
 0x5fa   : > { %3722 = vrot.lane.b32.xlu0 %v7929_v40, %s13415_s21  ;;  %1867 = vrot.lane.b32.xlu1 %v8395_v22, %s14039_s18  ;;  %s14049_s21 = smov 47  }
 0x5fc   : > { %v8437_v9 = vpop.permute.xlu0 %2922  ;;  %v8439_v51 = vpop.permute.xlu1 %3826 }
 0x5fd   : > { %14042 = vst [vmem:[#allocation118_spill] sm:$0xff] %v8437_v9  ;;  %14043 = vst [vmem:[#allocation119_spill] sm:$0xff] %v8439_v51 }
 0x5fe   : > { %3773 = vrot.lane.b32.xlu0 %v7921_v37, %s13421_s27  ;;  %1929 = vrot.lane.b32.xlu1 %v8385_v53, %s14044_s20 }
 0x600   : > { %v8445_v54 = vpop.permute.xlu0 %2973  ;;  %v8447_v8 = vpop.permute.xlu1 %3830 }
 0x601   : > { %14045 = vst [vmem:[#allocation120_spill] sm:$0xff] %v8445_v54  ;;  %14046 = vst [vmem:[#allocation121_spill] sm:$0xff] %v8447_v8 }
 0x602   : > { %3777 = vrot.lane.b32.xlu0 %v7929_v40, %s13421_s27  ;;  %1933 = vrot.lane.b32.xlu1 %v8395_v22, %s14044_s20  ;;  %s14054_s27 = smov 46  }
 0x604   : > { %v8453_v24 = vpop.permute.xlu0 %2977  ;;  %v8455_v9 = vpop.permute.xlu1 %3881 }
 0x605   : > { %14047 = vst [vmem:[#allocation122_spill] sm:$0xff] %v8453_v24  ;;  %14048 = vst [vmem:[#allocation123_spill] sm:$0xff] %v8455_v9 }
 0x606   : > { %3828 = vrot.lane.b32.xlu0 %v7921_v37, %s13427_s28  ;;  %1995 = vrot.lane.b32.xlu1 %v8385_v53, %s14049_s21 }
 0x608   : > { %v8461_v51 = vpop.permute.xlu0 %3028  ;;  %v8463_v54 = vpop.permute.xlu1 %3885 }
 0x609   : > { %14050 = vst [vmem:[#allocation124_spill] sm:$0xff] %v8461_v51  ;;  %14051 = vst [vmem:[#allocation125_spill] sm:$0xff] %v8463_v54 }
 0x60a   : > { %3832 = vrot.lane.b32.xlu0 %v7929_v40, %s13427_s28  ;;  %1999 = vrot.lane.b32.xlu1 %v8395_v22, %s14049_s21  ;;  %s14059_s28 = smov 45  }
 0x60c   : > { %v8469_v8 = vpop.permute.xlu0 %3032  ;;  %v8471_v24 = vpop.permute.xlu1 %3936 }
 0x60d   : > { %14052 = vst [vmem:[#allocation126_spill] sm:$0xff] %v8469_v8  ;;  %14053 = vst [vmem:[#allocation127_spill] sm:$0xff] %v8471_v24 }
 0x60e   : > { %3883 = vrot.lane.b32.xlu0 %v7921_v37, %s13433_s5  ;;  %2061 = vrot.lane.b32.xlu1 %v8385_v53, %s14054_s27 }
 0x610   : > { %v8477_v9 = vpop.permute.xlu0 %3083  ;;  %v8479_v51 = vpop.permute.xlu1 %3940 }
 0x611   : > { %14055 = vst [vmem:[#allocation128_spill] sm:$0xff] %v8477_v9  ;;  %14056 = vst [vmem:[#allocation129_spill] sm:$0xff] %v8479_v51 }
 0x612   : > { %3887 = vrot.lane.b32.xlu0 %v7929_v40, %s13433_s5  ;;  %2065 = vrot.lane.b32.xlu1 %v8395_v22, %s14054_s27  ;;  %s14064_s5 = smov 35  }
 0x614   : > { %v8485_v54 = vpop.permute.xlu0 %3087  ;;  %v8487_v8 = vpop.permute.xlu1 %3991 }
 0x615   : > { %14057 = vst [vmem:[#allocation130_spill] sm:$0xff] %v8485_v54  ;;  %14058 = vst [vmem:[#allocation131_spill] sm:$0xff] %v8487_v8 }
 0x616   : > { %3938 = vrot.lane.b32.xlu0 %v7921_v37, %s13439_s12  ;;  %2127 = vrot.lane.b32.xlu1 %v8385_v53, %s14059_s28 }
 0x618   : > { %v8493_v24 = vpop.permute.xlu0 %3168  ;;  %v8495_v9 = vpop.permute.xlu1 %3995 }
 0x619   : > { %14060 = vst [vmem:[#allocation132_spill] sm:$0xff] %v8493_v24  ;;  %14061 = vst [vmem:[#allocation133_spill] sm:$0xff] %v8495_v9 }
 0x61a   : > { %3942 = vrot.lane.b32.xlu0 %v7929_v40, %s13439_s12  ;;  %2131 = vrot.lane.b32.xlu1 %v8395_v22, %s14059_s28  ;;  %s14069_s12 = smov 93  }
 0x61c   : > { %v8501_v51 = vpop.permute.xlu0 %3172  ;;  %v8503_v54 = vpop.permute.xlu1 %4046 }
 0x61d   : > { %14062 = vst [vmem:[#allocation134_spill] sm:$0xff] %v8501_v51  ;;  %14063 = vst [vmem:[#allocation135_spill] sm:$0xff] %v8503_v54 }
 0x61e   : > { %3993 = vrot.lane.b32.xlu0 %v7921_v37, %s13447_s17  ;;  %2182 = vrot.lane.b32.xlu1 %v8385_v53, %s14064_s5 }
 0x620   : > { %v8509_v8 = vpop.permute.xlu0 %3223  ;;  %v8511_v24 = vpop.permute.xlu1 %4050 }
 0x621   : > { %14065 = vst [vmem:[#allocation136_spill] sm:$0xff] %v8509_v8  ;;  %14066 = vst [vmem:[#allocation137_spill] sm:$0xff] %v8511_v24 }
 0x622   : > { %3997 = vrot.lane.b32.xlu0 %v7929_v40, %s13447_s17  ;;  %2186 = vrot.lane.b32.xlu1 %v8395_v22, %s14064_s5  ;;  %s14075_s17 = smov 83  }
 0x624   : > { %v8517_v9 = vpop.permute.xlu0 %3227  ;;  %v8519_v51 = vpop.permute.xlu1 %4101 }
 0x625   : > { %14067 = vst [vmem:[#allocation138_spill] sm:$0xff] %v8517_v9  ;;  %14068 = vst [vmem:[#allocation139_spill] sm:$0xff] %v8519_v51 }
 0x626   : > { %4048 = vrot.lane.b32.xlu0 %v7921_v37, %s14069_s12  ;;  %2237 = vrot.lane.b32.xlu1 %v8385_v53, %s14070_s14 }
 0x628   : > { %v8525_v54 = vpop.permute.xlu0 %3278  ;;  %v8527_v8 = vpop.permute.xlu1 %4105 }
 0x629   : > { %14071 = vst [vmem:[#allocation140_spill] sm:$0xff] %v8525_v54  ;;  %14072 = vst [vmem:[#allocation141_spill] sm:$0xff] %v8527_v8 }
 0x62a   : > { %4052 = vrot.lane.b32.xlu0 %v7929_v40, %s14069_s12  ;;  %2241 = vrot.lane.b32.xlu1 %v8395_v22, %s14070_s14  ;;  %s8808_s12 = sld [smem:[#allocation7 + $0x8b]] }
 0x62c   : > { %v8533_v24 = vpop.permute.xlu0 %3282  ;;  %v8535_v9 = vpop.permute.xlu1 %4156 }
 0x62d   : > { %14073 = vst [vmem:[#allocation142_spill] sm:$0xff] %v8533_v24  ;;  %14074 = vst [vmem:[#allocation143_spill] sm:$0xff] %v8535_v9 }
 0x62e   : > { %4103 = vrot.lane.b32.xlu0 %v7921_v37, %s14075_s17  ;;  %2292 = vrot.lane.b32.xlu1 %v8385_v53, %s14076_s0 }
 0x630   : > { %v8541_v51 = vpop.permute.xlu0 %3333  ;;  %v8543_v54 = vpop.permute.xlu1 %4160  ;;  %v8921_v1 = vstv %s8808_s12  ;;  %s9003_s12 = sld [smem:[#allocation7 + $0x99]] }
 0x631   : > { %14077 = vst [vmem:[#allocation144_spill] sm:$0xff] %v8541_v51  ;;  %14078 = vst [vmem:[#allocation145_spill] sm:$0xff] %v8543_v54 }
 0x632   : > { %4107 = vrot.lane.b32.xlu0 %v7929_v40, %s14075_s17  ;;  %2296 = vrot.lane.b32.xlu1 %v8395_v22, %s14076_s0  ;;  %s8797_s17 = sld [smem:[#allocation7 + $0x8a]] }
 0x634   : > { %v8549_v8 = vpop.permute.xlu0 %3337  ;;  %v8551_v24 = vpop.permute.xlu1 %4211 }
 0x635   : > { %14079 = vst [vmem:[#allocation146_spill] sm:$0xff] %v8549_v8  ;;  %14080 = vst [vmem:[#allocation147_spill] sm:$0xff] %v8551_v24 }
 0x636   : > { %4158 = vrot.lane.b32.xlu0 %v7921_v37, %s14081_s2  ;;  %2347 = vrot.lane.b32.xlu1 %v8385_v53, %s14082_s3 }
 0x638   : > { %v8557_v9 = vpop.permute.xlu0 %3388  ;;  %v8559_v51 = vpop.permute.xlu1 %4215  ;;  %v8901_v31 = vstv %s8797_s17  ;;  %s9040_s17 = sld [smem:[#allocation7 + $0x9a]] }
 0x639   : > { %14083 = vst [vmem:[#allocation148_spill] sm:$0xff] %v8557_v9  ;;  %14084 = vst [vmem:[#allocation149_spill] sm:$0xff] %v8559_v51  ;;  %v1594_v51 = vadd.f32 %v7884_v14, %v7892_v20 }
 0x63a   : > { %4162 = vrot.lane.b32.xlu0 %v7929_v40, %s14081_s2  ;;  %2351 = vrot.lane.b32.xlu1 %v8395_v22, %s14082_s3  ;;  %s8793_s2 = sld [smem:[#allocation7 + $0x89]] }
 0x63c   : > { %v8565_v54 = vpop.permute.xlu0 %3392  ;;  %v8567_v8 = vpop.permute.xlu1 %4266 }
 0x63d   : > { %14085 = vst [vmem:[#allocation150_spill] sm:$0xff] %v8565_v54  ;;  %14086 = vst [vmem:[#allocation151_spill] sm:$0xff] %v8567_v8  ;;  %v1595_v8 = vadd.f32 %v1594_v51, %v7902_v6 }
 0x63e   : > { %4213 = vrot.lane.b32.xlu0 %v7921_v37, %s14087_s6  ;;  %2402 = vrot.lane.b32.xlu1 %v8385_v53, %s14088_s13 }
 0x63f   : > { %v1596_v14 = vrot.slane %v1595_v8, 4 }
 0x640   : > { %v8573_v24 = vpop.permute.xlu0 %3443  ;;  %v8575_v9 = vpop.permute.xlu1 %4270  ;;  %v8883_v33 = vstv %s8793_s2  ;;  %s8903_s2 = sld [smem:[#allocation7 + $0x93]] }
 0x641   : > { %14089 = vst [vmem:[#allocation152_spill] sm:$0xff] %v8573_v24  ;;  %14090 = vst [vmem:[#allocation153_spill] sm:$0xff] %v8575_v9  ;;  %v1602_v24 = vadd.f32 %v7887_v15, %v7895_v21  ;;  %v1597_v51 = vadd.f32 %v1596_v14, %v1595_v8 }
 0x642   : > { %4217 = vrot.lane.b32.xlu0 %v7929_v40, %s14087_s6  ;;  %2406 = vrot.lane.b32.xlu1 %v8395_v22, %s14088_s13  ;;  %s8791_s6 = sld [smem:[#allocation7 + $0x88]] }
 0x643   : > { %v1603_v20 = vadd.f32 %v1602_v24, %v7905_v27  ;;  %v1598_v24 = vrot.slane %v1597_v51, 2 }
 0x644   : > { %v8584_v54 = vpop.permute.xlu0 %3447  ;;  %v8586_v25 = vpop.permute.xlu1 %4321 }
 0x645   : > { %14091 = vst [vmem:[#allocation154_spill] sm:$0xff] %v8584_v54  ;;  %14092 = vst [vmem:[#allocation155_spill] sm:$0xff] %v8586_v25  ;;  %v1604_v15 = vrot.slane %v1603_v20, 4  ;;  %v1599_v14 = vadd.f32 %v1598_v24, %v1597_v51 }
 0x646   : > { %4268 = vrot.lane.b32.xlu0 %v7921_v37, %s14093_s15  ;;  %2457 = vrot.lane.b32.xlu1 %v8385_v53, %s14094_s10 }
 0x647   : > { %v1605_v27 = vadd.f32 %v1604_v15, %v1603_v20  ;;  %v1600_v15 = vrot.slane %v1599_v14, 1 }
 0x648   : > { %v8595_v9 = vpop.permute.xlu0 %3498  ;;  %v8597_v52 = vpop.permute.xlu1 %4325 }
 0x649   : > { %14095 = vst [vmem:[#allocation156_spill] sm:$0xff] %v8595_v9  ;;  %14096 = vst [vmem:[#allocation157_spill] sm:$0xff] %v8597_v52  ;;  %v1606_v8 = vrot.slane %v1605_v27, 2  ;;  %v1601_v51 = vadd.f32 %v1600_v15, %v1599_v14 }
 0x64a   : > { %4272 = vrot.lane.b32.xlu0 %v7929_v40, %s14093_s15  ;;  %2461 = vrot.lane.b32.xlu1 %v8395_v22, %s14094_s10  ;;  %s8781_s15 = sld [smem:[#allocation7 + $0x87]] }
 0x64b   : > { %v1607_v20 = vadd.f32 %v1606_v8, %v1605_v27  ;;  %v8643_v8 = vmul.f32 0.041666668, %v1601_v51 }
 0x64c   : > { %v8603_v21 = vpop.permute.xlu0 %3502  ;;  %v8605_v6 = vpop.permute.xlu1 %4376 }
 0x64d   : > { %14097 = vst [vmem:[#allocation158_spill] sm:$0xff] %v8603_v21  ;;  %14098 = vst [vmem:[#allocation159_spill] sm:$0xff] %v8605_v6  ;;  %v1608_v24 = vrot.slane %v1607_v20, 1 }
 0x64e   : > { %4323 = vrot.lane.b32.xlu0 %v7921_v37, %s14099_s24  ;;  %2512 = vrot.lane.b32.xlu1 %v8385_v53, %s13954_s29 }
 0x64f   : > { %v1609_v27 = vadd.f32 %v1608_v24, %v1607_v20 }
 0x650   : > { %v8611_v9 = vpop.permute.xlu0 %3553  ;;  %v8613_v25 = vpop.permute.xlu1 %4380 }
 0x651   : > { %14100 = vst [vmem:[#allocation160_spill] sm:$0xff] %v8611_v9  ;;  %14101 = vst [vmem:[#allocation161_spill] sm:$0xff] %v8613_v25  ;;  %v8653_v14 = vmul.f32 0.041666668, %v1609_v27 }
 0x652   : > { %4327 = vrot.lane.b32.xlu0 %v7929_v40, %s14099_s24  ;;  %2516 = vrot.lane.b32.xlu1 %v8395_v22, %s13954_s29  ;;  %s8779_s24 = sld [smem:[#allocation7 + $0x86]] }
 0x654   : > { %v8619_v6 = vpop.permute.xlu0 %3557  ;;  %v8621_v21 = vpop.permute.xlu1 %4431 }
 0x655   : > { %14102 = vst [vmem:[#allocation162_spill] sm:$0xff] %v8619_v6  ;;  %14103 = vst [vmem:[#allocation163_spill] sm:$0xff] %v8621_v21 }
 0x656   : > { %4378 = vrot.lane.b32.xlu0 %v7921_v37, %s14104_s16  ;;  %2567 = vrot.lane.b32.xlu1 %v8385_v53, %s13955_s30 }
 0x658   : > { %v8627_v9 = vpop.permute.xlu0 %3608  ;;  %v8629_v25 = vpop.permute.xlu1 %1731 }
 0x659   : > { %14105 = vst [vmem:[#allocation164_spill] sm:$0xff] %v8627_v9  ;;  %14106 = vst [vmem:[#allocation165_spill] sm:$0xff] %v8629_v25 }
 0x65a   : > { %4382 = vrot.lane.b32.xlu0 %v7929_v40, %s14104_s16  ;;  %2571 = vrot.lane.b32.xlu1 %v8395_v22, %s13955_s30  ;;  %s8758_s16 = sld [smem:[#allocation7 + $0x83]] }
 0x65c   : > { %v8635_v21 = vpop.permute.xlu0 %3612  ;;  %v8637_v6 = vpop.permute.xlu1 %1735 }
 0x65d   : > { %14107 = vst [vmem:[#allocation166_spill] sm:$0xff] %v8635_v21  ;;  %14108 = vst [vmem:[#allocation167_spill] sm:$0xff] %v8637_v6 }
 0x65e   : > { %4433 = vrot.lane.b32.xlu0 %v7921_v37, %s14109_s19  ;;  %2622 = vrot.lane.b32.xlu1 %v8385_v53, %s13957_s11  ;;  %s14140_s19 = smov 13  }
 0x660   : > { %v8645_v9 = vpop.permute.xlu0 %3663  ;;  %v8647_v52 = vpop.permute.xlu1 %1797 }
 0x661   : > { %14110 = vst [vmem:[#allocation168_spill] sm:$0xff] %v8645_v9  ;;  %14111 = vst [vmem:[#allocation169_spill] sm:$0xff] %v8647_v52 }
 0x662   : > { %1733 = vrot.lane.b32.xlu0 %v8643_v8, %s14029_s4  ;;  %2626 = vrot.lane.b32.xlu1 %v8395_v22, %s13957_s11 }
 0x664   : > { %v8655_v15 = vpop.permute.xlu0 %3667  ;;  %v8657_v21 = vpop.permute.xlu1 %1801 }
 0x665   : > { %14112 = vst [vmem:[#allocation170_spill] sm:$0xff] %v8655_v15  ;;  %14113 = vst [vmem:[#allocation171_spill] sm:$0xff] %v8657_v21  ;;  %v8748_v21 = vstv %s6487_s7  ;;  %s8768_s7 = sld [smem:[#allocation7 + $0x85]] }
 0x666   : > { %1737 = vrot.lane.b32.xlu0 %v8653_v14, %s14029_s4  ;;  %2677 = vrot.lane.b32.xlu1 %v8385_v53, %s14114_s9  ;;  %s14119_s4 = smov 16   ;;  %v3127_v32 = vmul.f32 %v8748_v21, %v7929_v40  ;;  %v3126_v28 = vmul.f32 %v8748_v21, %v7921_v37 }
 0x668   : > { %v8663_v20 = vpop.permute.xlu0 %3718  ;;  %v8665_v51 = vpop.permute.xlu1 %1863 }
 0x669   : > { %14115 = vst [vmem:[#allocation172_spill] sm:$0xff] %v8663_v20  ;;  %14116 = vst [vmem:[#allocation173_spill] sm:$0xff] %v8665_v51 }
 0x66a   : > { %1799 = vrot.lane.b32.xlu0 %v8643_v8, %s14034_s23  ;;  %2681 = vrot.lane.b32.xlu1 %v8395_v22, %s14114_s9  ;;  %s14155_s9 = smov 3  }
 0x66c   : > { %v8671_v24 = vpop.permute.xlu0 %3722  ;;  %v8673_v27 = vpop.permute.xlu1 %1867 }
 0x66d   : > { %14117 = vst [vmem:[#allocation174_spill] sm:$0xff] %v8671_v24  ;;  %14118 = vst [vmem:[#allocation175_spill] sm:$0xff] %v8673_v27  ;;  %v8702_v27 = vld [vmem:[%s14127_s1] sm:$0x3]  ;;  %s8750_s1 = sld [smem:[#allocation7 + $0x81]] }
 0x66e   : > { %1803 = vrot.lane.b32.xlu0 %v8653_v14, %s14034_s23  ;;  %2732 = vrot.lane.b32.xlu1 %v8385_v53, %s14119_s4  ;;  %s14124_s23 = smov 15   ;;  %14128 = vst [vmem:[#allocation182_spill] sm:$0xff] %v8702_v27  ;;  %vm1701_vm6 = vcmp.ge.s32.totalorder %v8702_v27, 0  ;;  %vm1702_vm7 = vcmp.lt.s32.totalorder %v8702_v27, 16  ;;  %v8865_v27 = vstv %s8768_s7  ;;  %s9215_s7 = sld [smem:[#allocation7 + $0xa1]] }
 0x66f   : > { %vm1703_vm8 = vmand %vm1701_vm6, %vm1702_vm7 }
 0x670   : > { %v8679_v9 = vpop.permute.xlu0 %3773  ;;  %v8681_v20 = vpop.permute.xlu1 %1929 }
 0x671   : > { %14120 = vst [vmem:[#allocation176_spill] sm:$0xff] %v8679_v9  ;;  %14121 = vst [vmem:[#allocation177_spill] sm:$0xff] %v8681_v20  ;;  %v13506_v20 = vlaneseq }
 0x672   : > { %1865 = vrot.lane.b32.xlu0 %v8643_v8, %s14039_s18  ;;  %2736 = vrot.lane.b32.xlu1 %v8395_v22, %s14119_s4  ;;  %s8832_s4 = sld [smem:[#allocation7 + $0x8f]] }
 0x674   : > { %v8687_v15 = vpop.permute.xlu0 %3777  ;;  %v8689_v24 = vpop.permute.xlu1 %1933 }
 0x675   : > { %14122 = vst [vmem:[#allocation178_spill] sm:$0xff] %v8687_v15  ;;  %14123 = vst [vmem:[#allocation179_spill] sm:$0xff] %v8689_v24 }
 0x676   : > { %1869 = vrot.lane.b32.xlu0 %v8653_v14, %s14039_s18  ;;  %2787 = vrot.lane.b32.xlu1 %v8385_v53, %s14124_s23  ;;  %s6486_s18 = sld [smem:[#allocation7 + $0x18]] }
 0x678   : > { %v8695_v54 = vpop.permute.xlu0 %3828  ;;  %v8697_v9 = vpop.permute.xlu1 %1995 }
 0x679   : > { %14125 = vst [vmem:[#allocation180_spill] sm:$0xff] %v8695_v54  ;;  %14126 = vst [vmem:[#allocation181_spill] sm:$0xff] %v8697_v9  ;;  %v8715_v9 = vshrl.u32 %v13506_v20, 7  ;;  %v14137_v20 = vmov 0  }
 0x67a   : > { %1931 = vrot.lane.b32.xlu0 %v8643_v8, %s14044_s20  ;;  %2791 = vrot.lane.b32.xlu1 %v8395_v22, %s14124_s23  ;;  %v1911_v25 = vsel %vm1703_vm8, 1, %v14137_v20  ;;  %s8823_s23 = sld [smem:[#allocation7 + $0x8e]] }
 0x67b   : > { %14131 = vst [vmem:[#allocation185_spill] sm:$0xff] %v8715_v9 }
 0x67c   : > { %v8710_v15 = vpop.permute.xlu0 %3832  ;;  %v8712_v54 = vpop.permute.xlu1 %1999 }
 0x67d   : > { %14129 = vst [vmem:[#allocation183_spill] sm:$0xff] %v8710_v15  ;;  %14130 = vst [vmem:[#allocation184_spill] sm:$0xff] %v8712_v54  ;;  %v8726_v15 = vsub.s32 0, %v8715_v9  ;;  %v8729_v54 = vsub.s32 1, %v8715_v9 }
 0x67e   : > { %1935 = vrot.lane.b32.xlu0 %v8653_v14, %s14044_s20  ;;  %2842 = vrot.lane.b32.xlu1 %v8385_v53, %s14132_s8  ;;  %s8743_s20 = sld [smem:[#allocation7 + $0x80]] }
 0x67f   : > { %14135 = vst [vmem:[#allocation188_spill] sm:$0xff] %v8726_v15  ;;  %14136 = vst [vmem:[#allocation189_spill] sm:$0xff] %v8729_v54  ;;  %v1919_v9 = vrot.slane %v1911_v25, %v8729_v54  ;;  %v3124_v54 = vmul.f32 %v8748_v21, %v7827_v11 }
 0x680   : > { %v8721_v24 = vpop.permute.xlu0 %3883  ;;  %v8723_v51 = vpop.permute.xlu1 %2061 }
 0x681   : > { %14133 = vst [vmem:[#allocation186_spill] sm:$0xff] %v8721_v24  ;;  %14134 = vst [vmem:[#allocation187_spill] sm:$0xff] %v8723_v51  ;;  %v8740_v24 = vstv %s6486_s18  ;;  %v1915_v51 = vrot.slane %v1911_v25, %v8726_v15  ;;  %s8756_s18 = sld [smem:[#allocation7 + $0x82]]  ;;  %v14146_v15 = vlaneseq  ;;  %vm8783_vm10 = vcmp.ne.s32.totalorder %v1919_v9, 0 }
 0x682   : > { %1997 = vrot.lane.b32.xlu0 %v8643_v8, %s14049_s21  ;;  %2846 = vrot.lane.b32.xlu1 %v8395_v22, %s14132_s8  ;;  %v3119_v38 = vmul.f32 %v8740_v24, %v8395_v22  ;;  %v14150_v9 = vmov 0.0   ;;  %s8810_s8 = sld [smem:[#allocation7 + $0x8c]] }
 0x683   : > { %vm8770_vm9 = vcmp.ne.s32.totalorder %v1915_v51, 0  ;;  %v8777_v20 = vand.u32 127, %v14146_v15  ;;  %v3125_v51 = vmul.f32 %v8748_v21, %v7831_v19 }
 0x684   : > { %v8736_v6 = vpop.permute.xlu0 %3887  ;;  %v8738_v52 = vpop.permute.xlu1 %2065  ;;  %v14144_v36 = vsel %vm8770_vm9, 4294967295, %v14143_v36  ;;  %v8802_v15 = vsel %vm8770_vm9, 1.0, %v14150_v9 }
 0x685   : > { %14138 = vst [vmem:[#allocation190_spill] sm:$0xff] %v8736_v6  ;;  %14139 = vst [vmem:[#allocation191_spill] sm:$0xff] %v8738_v52  ;;  %v3118_v6 = vmul.f32 %v8740_v24, %v8385_v53  ;;  %v3129_v19 = vadd.f32 %v3125_v51, %v3119_v38  ;;  %vm13586_vm11 = vcmp.lt.s32.totalorder %v8777_v20, 51  ;;  %vm13646_vm12 = vcmp.lt.s32.totalorder %v8777_v20, 50 }
 0x686   : > { %2001 = vrot.lane.b32.xlu0 %v8653_v14, %s14049_s21  ;;  %2897 = vrot.lane.b32.xlu1 %v8385_v53, %s14140_s19  ;;  %s8766_s21 = sld [smem:[#allocation7 + $0x84]]  ;;  %14145 = vst [vmem:[#allocation194_spill] sm:$0xff] %v14144_v36  ;;  %14151 = vst [vmem:[#allocation196_spill] sm:$0xff] %v8802_v15  ;;  %v8829_v38 = vstv %s8750_s1  ;;  %vm13589_vm13 = vcmp.lt.s32.totalorder %v8777_v20, 49  ;;  %vm13593_vm14 = vcmp.lt.s32.totalorder %v8777_v20, 48  ;;  %s8846_s1 = sld [smem:[#allocation7 + $0x90]]  ;;  %v1760_v17 = vsel %vm13586_vm11, %v7917_v34, %v7913_v16 }
 0x687   : > { %v3128_v11 = vadd.f32 %v3124_v54, %v3118_v6  ;;  %v8815_v6 = vsel %vm8783_vm10, 1.0, %v14150_v9  ;;  %v8819_v54 = vstv %s8743_s20  ;;  %vm13569_vm15 = vcmp.lt.s32.totalorder %v8777_v20, 47  ;;  %s9131_s20 = sld [smem:[#allocation7 + $0x9e]] }
 0x688   : > { %v8760_v52 = vpop.permute.xlu0 %3938  ;;  %v8762_v25 = vpop.permute.xlu1 %2127  ;;  %14154 = vst [vmem:[#allocation199_spill] sm:$0xff] %v8815_v6  ;;  %v8853_v9 = vmul.f32 %v8815_v6, %v3129_v19  ;;  %vm13572_vm4 = vcmp.lt.s32.totalorder %v8777_v20, 46  ;;  %vm13609_vm5 = vcmp.lt.s32.totalorder %v8777_v20, 45  ;;  %v3120_v19 = vmul.f32 %v8740_v24, %v8643_v8 }
 0x689   : > { %14141 = vst [vmem:[#allocation192_spill] sm:$0xff] %v8760_v52  ;;  %14142 = vst [vmem:[#allocation193_spill] sm:$0xff] %v8762_v25  ;;  %v14147_v52 = vmov 0  ;;  %v8837_v51 = vmul.f32 %v8802_v15, %v3128_v11  ;;  %vm13576_vm6 = vcmp.lt.s32.totalorder %v8777_v20, 35  ;;  %vm13578_vm7 = vcmp.lt.s32.totalorder %v8777_v20, 34 }
 0x68a   : > { %v14148_v52 = vsel %vm8783_vm10, 4294967295, %v14147_v52  ;;  %2063 = vrot.lane.b32.xlu0 %v8643_v8, %s14054_s27  ;;  %2901 = vrot.lane.b32.xlu1 %v8395_v22, %s14140_s19  ;;  %s8821_s19 = sld [smem:[#allocation7 + $0x8d]]  ;;  %14159 = vst [vmem:[#allocation203_spill] sm:$0xff] %v8853_v9  ;;  %v8877_v9 = vstv %s8781_s15  ;;  %vm13644_vm8 = vcmp.lt.s32.totalorder %v8777_v20, 33  ;;  %vm13580_vm1 = vcmp.lt.s32.totalorder %v8777_v20, 32 }
 0x68b   : > { %14149 = vst [vmem:[#allocation195_spill] sm:$0xff] %v14148_v52  ;;  %14156 = vst [vmem:[#allocation200_spill] sm:$0xff] %v8837_v51  ;;  %v8844_v52 = vstv %s8758_s16  ;;  %s8860_s16 = sld [smem:[#allocation7 + $0x91]]  ;;  %v3121_v51 = vmul.f32 %v8740_v24, %v8653_v14  ;;  %v1758_v24 = vsel %vm13586_vm11, %v7913_v16, %v7917_v34  ;;  %v1824_v16 = vsel %vm13646_vm12, %v7923_v39, %v7931_v41  ;;  %s8950_s15 = sld [smem:[#allocation7 + $0x95]] }
 0x68c   : > { %v8804_v25 = vpop.permute.xlu0 %3942  ;;  %v8806_v35 = vpop.permute.xlu1 %2131  ;;  %v8857_v11 = vstv %s8766_s21  ;;  %v1826_v34 = vsel %vm13646_vm12, %v7931_v41, %v7923_v39  ;;  %v8927_v21 = vstv %s8810_s8  ;;  %v3130_v39 = vadd.f32 %v3126_v28, %v3120_v19  ;;  %s9095_s8 = sld [smem:[#allocation7 + $0x9d]]  ;;  %s9165_s21 = sld [smem:[#allocation7 + $0xa0]] }
 0x68d   : > { %14152 = vst [vmem:[#allocation197_spill] sm:$0xff] %v8804_v25  ;;  %14153 = vst [vmem:[#allocation198_spill] sm:$0xff] %v8806_v35  ;;  %v8840_v25 = vstv %s8756_s18  ;;  %v8938_v41 = vmul.f32 %v8819_v54, %v1760_v17  ;;  %v8941_v29 = vmul.f32 %v8819_v54, %v1758_v24  ;;  %v8955_v28 = vmul.f32 %v8829_v38, %v1826_v34  ;;  %s9146_s18 = sld [smem:[#allocation7 + $0x9f]] }
 0x68e   : > { %2067 = vrot.lane.b32.xlu0 %v8653_v14, %s14054_s27  ;;  %2952 = vrot.lane.b32.xlu1 %v8385_v53, %s14155_s9  ;;  %s8885_s27 = sld [smem:[#allocation7 + $0x92]]  ;;  %v8958_v17 = vmul.f32 %v8829_v38, %v1824_v16  ;;  %v1890_v19 = vsel %vm13589_vm13, %v7937_v42, %v7943_v43  ;;  %vm13642_vm0 = vcmp.lt.s32.totalorder %v8777_v20, 31  ;;  %v8966_v24 = vstv %s8846_s1  ;;  %s14200_s1 = smov 127  }
 0x68f   : > { %14162 = vst [vmem:[#allocation206_spill] sm:$0xff] %v8938_v41  ;;  %14163 = vst [vmem:[#allocation207_spill] sm:$0xff] %v8941_v29  ;;  %v1956_v16 = vsel %vm13593_vm14, %v7949_v44, %v7955_v45  ;;  %vm13582_vm3 = vcmp.lt.s32.totalorder %v8777_v20, 30  ;;  %vm13640_vm2 = vcmp.lt.s32.totalorder %v8777_v20, 29 }
 0x690   : > { %v8848_v35 = vpop.permute.xlu0 %3993  ;;  %v8850_v36 = vpop.permute.xlu1 %2182  ;;  %v8930_v37 = vstv %s8821_s19  ;;  %s8968_s19 = sld [smem:[#allocation7 + $0x96]] }
 0x691   : > { %14157 = vst [vmem:[#allocation201_spill] sm:$0xff] %v8848_v35  ;;  %14158 = vst [vmem:[#allocation202_spill] sm:$0xff] %v8850_v36  ;;  %v8869_v35 = vstv %s8779_s24  ;;  %v8880_v36 = vstv %s8791_s6  ;;  %s8923_s6 = sld [smem:[#allocation7 + $0x94]]  ;;  %s14164_s24 = smov 2  }
 0x692   : > { %2129 = vrot.lane.b32.xlu0 %v8643_v8, %s14059_s28  ;;  %2956 = vrot.lane.b32.xlu1 %v8395_v22, %s14155_s9 }
 0x694   : > { %v8905_v40 = vpop.permute.xlu0 %3997  ;;  %v8907_v30 = vpop.permute.xlu1 %2186 }
 0x695   : > { %14160 = vst [vmem:[#allocation204_spill] sm:$0xff] %v8905_v40  ;;  %14161 = vst [vmem:[#allocation205_spill] sm:$0xff] %v8907_v30  ;;  %v3131_v40 = vadd.f32 %v3127_v32, %v3121_v51  ;;  %v8933_v30 = vstv %s8823_s23  ;;  %v1892_v32 = vsel %vm13589_vm13, %v7943_v43, %v7937_v42  ;;  %v8948_v51 = vstv %s8832_s4  ;;  %s9060_s4 = sld [smem:[#allocation7 + $0x9b]]  ;;  %s9076_s23 = sld [smem:[#allocation7 + $0x9c]] }
 0x696   : > { %2133 = vrot.lane.b32.xlu0 %v8653_v14, %s14059_s28  ;;  %3007 = vrot.lane.b32.xlu1 %v8385_v53, %s14164_s24  ;;  %v1958_v42 = vsel %vm13593_vm14, %v7955_v45, %v7949_v44  ;;  %v8984_v43 = vstv %s8860_s16  ;;  %s8986_s28 = sld [smem:[#allocation7 + $0x97]]  ;;  %v2024_v44 = vsel %vm13569_vm15, %v7967_v47, %v7961_v46  ;;  %v9011_v45 = vmul.f32 %v8840_v25, %v1890_v19  ;;  %s9284_s16 = sld [smem:[#allocation7 + $0xa3]] }
 0x697   : > { %14167 = vst [vmem:[#allocation210_spill] sm:$0xff] %v8984_v43  ;;  %v8989_v34 = vmul.f32 %v8815_v6, %v3131_v40  ;;  %v9008_v40 = vmul.f32 %v8802_v15, %v3130_v39  ;;  %v9028_v39 = vmul.f32 %v8844_v52, %v1958_v42  ;;  %v9031_v19 = vmul.f32 %v8844_v52, %v1956_v16 }
 0x698   : > { %v8970_v29 = vpop.permute.xlu0 %4048  ;;  %v8972_v41 = vpop.permute.xlu1 %2237  ;;  %v9047_v15 = vmul.f32 %v8857_v11, %v2024_v44  ;;  %v2154_v42 = vsel %vm13609_vm5, %v7985_v50, %v7991_v55  ;;  %v9058_v6 = vstv %s8923_s6  ;;  %s9405_s6 = sld [smem:[#allocation7 + $0xa6]] }
 0x699   : > { %14165 = vst [vmem:[#allocation208_spill] sm:$0xff] %v8970_v29  ;;  %14166 = vst [vmem:[#allocation209_spill] sm:$0xff] %v8972_v41  ;;  %v8992_v29 = vmul.f32 %v8840_v25, %v1892_v32  ;;  %v2022_v41 = vsel %vm13569_vm15, %v7961_v46, %v7967_v47  ;;  %v2088_v32 = vsel %vm13572_vm4, %v7973_v48, %v7979_v49  ;;  %vm13583_vm15 = vcmp.lt.s32.totalorder %v8777_v20, 19 }
 0x69a   : > { %14168 = vst [vmem:[#allocation211_spill] sm:$0xff] %v8989_v34  ;;  %2184 = vrot.lane.b32.xlu0 %v8643_v8, %s14064_s5  ;;  %14169 = vst [vmem:[#allocation212_spill] sm:$0xff] %v9008_v40  ;;  %v2090_v46 = vsel %vm13572_vm4, %v7979_v49, %v7973_v48  ;;  %v9023_v47 = vstv %s8885_s27  ;;  %3011 = vrot.lane.b32.xlu1 %v8395_v22, %s14164_s24  ;;  %v2156_v40 = vsel %vm13609_vm5, %v7991_v55, %v7985_v50  ;;  %s9318_s27 = sld [smem:[#allocation7 + $0xa4]] }
 0x69b   : > { %14170 = vst [vmem:[#allocation213_spill] sm:$0xff] %v9023_v47  ;;  %v9038_v34 = vstv %s8903_s2  ;;  %v9050_v16 = vmul.f32 %v8857_v11, %v2022_v41  ;;  %vm13585_vm4 = vcmp.lt.s32.totalorder %v8777_v20, 18  ;;  %14174 = vst [vmem:[#allocation217_spill] sm:$0xff] %v9058_v6  ;;  %v9066_v44 = vmul.f32 %v8865_v27, %v2088_v32  ;;  %s9369_s2 = sld [smem:[#allocation7 + $0xa5]] }
 0x69c   : > { %14171 = vst [vmem:[#allocation214_spill] sm:$0xff] %v9038_v34  ;;  %v9042_v48 = vpop.permute.xlu0 %4052  ;;  %v9044_v49 = vpop.permute.xlu1 %2241  ;;  %v2209_v41 = vsel %vm13576_vm6, %v7997_v56, %v8003_v57  ;;  %v2211_v50 = vsel %vm13576_vm6, %v8003_v57, %v7997_v56  ;;  %v9081_v55 = vmul.f32 %v8869_v35, %v2156_v40  ;;  %v2264_v32 = vsel %vm13578_vm7, %v8009_v58, %v8015_v2 }
 0x69d   : > { %14172 = vst [vmem:[#allocation215_spill] sm:$0xff] %v9042_v48  ;;  %14173 = vst [vmem:[#allocation216_spill] sm:$0xff] %v9044_v49  ;;  %v9063_v48 = vmul.f32 %v8865_v27, %v2090_v46  ;;  %v2266_v46 = vsel %vm13578_vm7, %v8015_v2, %v8009_v58  ;;  %vm13672_vm6 = vcmp.lt.s32.totalorder %v8777_v20, 17  ;;  %v9093_v56 = vstv %s8950_s15  ;;  %s9438_s15 = sld [smem:[#allocation7 + $0xa7]] }
 0x69e   : > { %14175 = vst [vmem:[#allocation218_spill] sm:$0xff] %v9066_v44  ;;  %2188 = vrot.lane.b32.xlu0 %v8653_v14, %s14064_s5  ;;  %14176 = vst [vmem:[#allocation219_spill] sm:$0xff] %v9081_v55  ;;  %s14178_s5 = smov 1   ;;  %v9100_v57 = vmul.f32 %v8869_v35, %v2154_v42  ;;  %v2319_v40 = vsel %vm13644_vm8, %v8021_v59, %v8027_v4  ;;  %v2321_v58 = vsel %vm13644_vm8, %v8027_v4, %v8021_v59 }
 0x69f   : > { %14177 = vst [vmem:[#allocation220_spill] sm:$0xff] %v9093_v56  ;;  %3062 = vrot.lane.b32.xlu1 %v8385_v53, %s14178_s5  ;;  %v9111_v2 = vstv %s8968_s19  ;;  %v9118_v44 = vmul.f32 %v8877_v9, %v2211_v50  ;;  %v9121_v42 = vmul.f32 %v8877_v9, %v2209_v41  ;;  %vm13647_vm7 = vcmp.lt.s32.totalorder %v8777_v20, 16  ;;  %s9488_s19 = sld [smem:[#allocation7 + $0xa8]] }
 0x6a0   : > { %14179 = vst [vmem:[#allocation221_spill] sm:$0xff] %v9100_v57  ;;  %14180 = vst [vmem:[#allocation222_spill] sm:$0xff] %v9111_v2  ;;  %v9113_v49 = vpop.permute.xlu0 %4103  ;;  %v9115_v55 = vpop.permute.xlu1 %2292  ;;  %v2376_v57 = vsel %vm13580_vm1, %v8039_v61, %v8033_v60  ;;  %v9129_v59 = vstv %s8986_s28  ;;  %v9134_v4 = vmul.f32 %v8880_v36, %v2266_v46  ;;  %v9137_v50 = vmul.f32 %v8880_v36, %v2264_v32  ;;  %s9507_s28 = sld [smem:[#allocation7 + $0xa9]] }
 0x6a1   : > { %14181 = vst [vmem:[#allocation223_spill] sm:$0xff] %v9113_v49  ;;  %14182 = vst [vmem:[#allocation224_spill] sm:$0xff] %v9121_v42  ;;  %v2374_v41 = vsel %vm13580_vm1, %v8033_v60, %v8039_v61  ;;  %v9144_v49 = vstv %s9003_s12  ;;  %v9151_v42 = vmul.f32 %v8883_v33, %v2321_v58  ;;  %v9154_v46 = vmul.f32 %v8883_v33, %v2319_v40  ;;  %s9573_s12 = sld [smem:[#allocation7 + $0xaa]] }
 0x6a2   : > { %14183 = vst [vmem:[#allocation225_spill] sm:$0xff] %v9129_v59  ;;  %14184 = vst [vmem:[#allocation226_spill] sm:$0xff] %v9134_v4  ;;  %2239 = vrot.lane.b32.xlu0 %v8643_v8, %s14070_s14  ;;  %v2429_v32 = vsel %vm13642_vm0, %v8045_v62, %v8051_v63  ;;  %v2431_v60 = vsel %vm13642_vm0, %v8051_v63, %v8045_v62  ;;  %vm13592_vm1 = vcmp.lt.s32.totalorder %v8777_v20, 15  ;;  %v9181_v63 = vstv %s9040_s17  ;;  %s9591_s17 = sld [smem:[#allocation7 + $0xab]] }
 0x6a3   : > { %14185 = vst [vmem:[#allocation227_spill] sm:$0xff] %v9137_v50  ;;  %14186 = vst [vmem:[#allocation228_spill] sm:$0xff] %v9144_v49  ;;  %3066 = vrot.lane.b32.xlu1 %v8395_v22, %s14178_s5  ;;  %v9170_v61 = vmul.f32 %v8901_v31, %v2376_v57  ;;  %v2484_v40 = vsel %vm13582_vm3, %v8057_v3, %v8063_v7  ;;  %v2486_v62 = vsel %vm13582_vm3, %v8063_v7, %v8057_v3 }
 0x6a4   : > { %14187 = vst [vmem:[#allocation229_spill] sm:$0xff] %v9151_v42  ;;  %14188 = vst [vmem:[#allocation230_spill] sm:$0xff] %v9154_v46  ;;  %v9183_v58 = vpop.permute.xlu0 %4107  ;;  %v9185_v46 = vpop.permute.xlu1 %2296  ;;  %v9188_v57 = vmul.f32 %v8901_v31, %v2374_v41  ;;  %v2541_v3 = vsel %vm13640_vm2, %v8075_v18, %v8069_v10  ;;  %v9199_v7 = vstv %s9060_s4  ;;  %v9205_v42 = vmul.f32 %v8921_v1, %v2429_v32  ;;  %s9625_s4 = sld [smem:[#allocation7 + $0xac]] }
 0x6a5   : > { %14189 = vst [vmem:[#allocation231_spill] sm:$0xff] %v9170_v61  ;;  %14190 = vst [vmem:[#allocation232_spill] sm:$0xff] %v9181_v63  ;;  %v2539_v61 = vsel %vm13640_vm2, %v8069_v10, %v8075_v18  ;;  %v2596_v41 = vsel %vm13583_vm15, %v8087_v13, %v8081_v12  ;;  %vm13595_vm3 = vcmp.lt.s32.totalorder %v8777_v20, 14  ;;  %v9220_v10 = vmul.f32 %v8927_v21, %v2486_v62 }
 0x6a6   : > { %14191 = vst [vmem:[#allocation233_spill] sm:$0xff] %v9183_v58  ;;  %14192 = vst [vmem:[#allocation234_spill] sm:$0xff] %v9188_v57  ;;  %v9202_v58 = vmul.f32 %v8921_v1, %v2431_v60  ;;  %v9213_v57 = vstv %s9076_s23  ;;  %2243 = vrot.lane.b32.xlu0 %v8653_v14, %s14070_s14  ;;  %v9223_v18 = vmul.f32 %v8927_v21, %v2484_v40  ;;  %v9230_v60 = vstv %s9095_s8  ;;  %s9249_s14 = sld [smem:[#allocation7 + $0xa2]]  ;;  %s14314_s23 = smov 115  }
 0x6a7   : > { %14193 = vst [vmem:[#allocation235_spill] sm:$0xff] %v9199_v7  ;;  %14195 = vst [vmem:[#allocation237_spill] sm:$0xff] %v9205_v42  ;;  %v2594_v32 = vsel %vm13583_vm15, %v8081_v12, %v8087_v13  ;;  %3147 = vrot.lane.b32.xlu1 %v8385_v53, %s14200_s1  ;;  %v9235_v42 = vmul.f32 %v8930_v37, %v2541_v3  ;;  %v9238_v62 = vmul.f32 %v8930_v37, %v2539_v61  ;;  %s9756_s8 = sld [smem:[#allocation7 + $0xae]] }
 0x6a8   : > { %14194 = vst [vmem:[#allocation236_spill] sm:$0xff] %v9202_v58  ;;  %14196 = vst [vmem:[#allocation238_spill] sm:$0xff] %v9213_v57  ;;  %v2649_v40 = vsel %vm13585_vm4, %v8093_v23, %v8101_v5  ;;  %v2651_v12 = vsel %vm13585_vm4, %v8101_v5, %v8093_v23  ;;  %vm13600_vm15 = vcmp.lt.s32.totalorder %v8777_v20, 13  ;;  %v9251_v13 = vpop.permute.xlu0 %4158  ;;  %v9253_v3 = vpop.permute.xlu1 %2347  ;;  %v9256_v61 = vmul.f32 %v8933_v30, %v2596_v41 }
 0x6a9   : > { %14197 = vst [vmem:[#allocation239_spill] sm:$0xff] %v9220_v10  ;;  %14198 = vst [vmem:[#allocation240_spill] sm:$0xff] %v9223_v18  ;;  %v1761_v23 = vsel %vm13586_vm11, %v8107_v0, %v8099_v26  ;;  %v9267_v5 = vstv %s9131_s20  ;;  %v14209_v18 = vld [vmem:[#allocation39_spill] sm:$0xff]  ;;  %vm13608_vm4 = vcmp.lt.s32.totalorder %v8777_v20, 3  ;;  %v9282_v10 = vstv %s9146_s18  ;;  %s9906_s20 = sld [smem:[#allocation7]]  ;;  %s10010_s18 = sld [smem:[#allocation7 + $0x2]] }
 0x6aa   : > { %14199 = vst [vmem:[#allocation241_spill] sm:$0xff] %v9230_v60  ;;  %14201 = vst [vmem:[#allocation242_spill] sm:$0xff] %v9235_v42  ;;  %v14208_v42 = vld [vmem:[#allocation41_spill] sm:$0xff]  ;;  %2294 = vrot.lane.b32.xlu0 %v8643_v8, %s14076_s0  ;;  %v9304_v58 = vmul.f32 %v8819_v54, %v1761_v23 }
 0x6ab   : > { %14202 = vst [vmem:[#allocation243_spill] sm:$0xff] %v9238_v62  ;;  %14203 = vst [vmem:[#allocation244_spill] sm:$0xff] %v9251_v13  ;;  %v1759_v62 = vsel %vm13586_vm11, %v8099_v26, %v8107_v0  ;;  %v9270_v13 = vmul.f32 %v8933_v30, %v2594_v32  ;;  %v2704_v41 = vsel %vm13672_vm6, %v14209_v18, %v14208_v42  ;;  %v14213_v32 = vld [vmem:[#allocation40_spill] sm:$0xff]  ;;  %3151 = vrot.lane.b32.xlu1 %v8395_v22, %s14200_s1 }
 0x6ac   : > { %14204 = vst [vmem:[#allocation245_spill] sm:$0xff] %v9253_v3  ;;  %14205 = vst [vmem:[#allocation246_spill] sm:$0xff] %v9256_v61  ;;  %v2706_v61 = vsel %vm13672_vm6, %v14208_v42, %v14209_v18  ;;  %v9289_v26 = vmul.f32 %v8948_v51, %v2651_v12  ;;  %v9292_v0 = vmul.f32 %v8948_v51, %v2649_v40  ;;  %v9299_v18 = vstv %s9165_s21  ;;  %v9320_v4 = vpop.permute.xlu0 %4162  ;;  %v9322_v23 = vpop.permute.xlu1 %2351  ;;  %s10026_s21 = sld [smem:[#allocation7 + $0x3]] }
 0x6ad   : > { %14206 = vst [vmem:[#allocation247_spill] sm:$0xff] %v9267_v5  ;;  %14207 = vst [vmem:[#allocation248_spill] sm:$0xff] %v9270_v13  ;;  %v14214_v13 = vld [vmem:[#allocation42_spill] sm:$0xff]  ;;  %v9307_v12 = vmul.f32 %v8819_v54, %v1759_v62  ;;  %vm13613_vm11 = vcmp.lt.s32.totalorder %v8777_v20, 2  ;;  %v9325_v54 = vmul.f32 %v8966_v24, %v2706_v61  ;;  %v9328_v62 = vmul.f32 %v8966_v24, %v2704_v41  ;;  %v14226_v41 = vld [vmem:[#allocation47_spill] sm:$0xff] }
 0x6ae   : > { %14210 = vst [vmem:[#allocation41_spill] sm:$0xff] %v9282_v10  ;;  %14211 = vst [vmem:[#allocation39_spill] sm:$0xff] %v9289_v26  ;;  %v1827_v42 = vsel %vm13646_vm12, %v14214_v13, %v14213_v32  ;;  %v1825_v40 = vsel %vm13646_vm12, %v14213_v32, %v14214_v13  ;;  %v14219_v26 = vld [vmem:[#allocation45_spill] sm:$0xff]  ;;  %v14223_v32 = vld [vmem:[#allocation44_spill] sm:$0xff]  ;;  %2298 = vrot.lane.b32.xlu0 %v8653_v14, %s14076_s0  ;;  %s14233_s0 = smov 126  }
 0x6af   : > { %14212 = vst [vmem:[#allocation249_spill] sm:$0xff] %v9292_v0  ;;  %14215 = vst [vmem:[#allocation40_spill] sm:$0xff] %v9299_v18  ;;  %v14218_v0 = vld [vmem:[#allocation43_spill] sm:$0xff]  ;;  %3202 = vrot.lane.b32.xlu1 %v8385_v53, %s14233_s0 }
 0x6b0   : > { %14216 = vst [vmem:[#allocation42_spill] sm:$0xff] %v9304_v58  ;;  %14217 = vst [vmem:[#allocation250_spill] sm:$0xff] %v9307_v12  ;;  %v2761_v50 = vsel %vm13647_vm7, %v14219_v26, %v14218_v0  ;;  %v2759_v13 = vsel %vm13647_vm7, %v14218_v0, %v14219_v26  ;;  %v14224_v12 = vld [vmem:[#allocation46_spill] sm:$0xff]  ;;  %v9350_v26 = vstv %s9215_s7  ;;  %v9355_v0 = vmul.f32 %v8829_v38, %v1825_v40  ;;  %s10055_s7 = sld [smem:[#allocation7 + $0x5]] }
 0x6b1   : > { %14220 = vst [vmem:[#allocation43_spill] sm:$0xff] %v9320_v4  ;;  %14221 = vst [vmem:[#allocation45_spill] sm:$0xff] %v9325_v54  ;;  %v1893_v58 = vsel %vm13589_vm13, %v14224_v12, %v14223_v32  ;;  %v9339_v4 = vmul.f32 %v8829_v38, %v1827_v42  ;;  %v1891_v61 = vsel %vm13589_vm13, %v14223_v32, %v14224_v12  ;;  %v14231_v32 = vld [vmem:[#allocation48_spill] sm:$0xff]  ;;  %vm13639_vm13 = vcmp.lt.s32.totalorder %v8777_v20, 1 }
 0x6b2   : > { %14222 = vst [vmem:[#allocation251_spill] sm:$0xff] %v9328_v62  ;;  %v14227_v62 = vld [vmem:[#allocation49_spill] sm:$0xff]  ;;  %14228 = vst [vmem:[#allocation46_spill] sm:$0xff] %v9350_v26  ;;  %v9358_v42 = vmul.f32 %v8984_v43, %v2761_v50  ;;  %v9374_v38 = vmul.f32 %v8984_v43, %v2759_v13  ;;  %v9377_v50 = vmul.f32 %v8840_v25, %v1893_v58  ;;  %v14242_v58 = vld [vmem:[#allocation51_spill] sm:$0xff]  ;;  %2349 = vrot.lane.b32.xlu0 %v8643_v8, %s14082_s3 }
 0x6b3   : > { %14225 = vst [vmem:[#allocation44_spill] sm:$0xff] %v9339_v4  ;;  %v2816_v54 = vsel %vm13592_vm1, %v14227_v62, %v14226_v41  ;;  %14229 = vst [vmem:[#allocation47_spill] sm:$0xff] %v9355_v0  ;;  %v2814_v12 = vsel %vm13592_vm1, %v14226_v41, %v14227_v62  ;;  %v14232_v4 = vld [vmem:[#allocation50_spill] sm:$0xff]  ;;  %v9384_v62 = vstv %s9249_s14  ;;  %v9386_v41 = vpop.permute.xlu0 %4213  ;;  %v9388_v0 = vpop.permute.xlu1 %2402  ;;  %v14241_v43 = vld [vmem:[#allocation53_spill] sm:$0xff]  ;;  %vm13635_vm1 = vcmp.lt.s32.totalorder %v8777_v20, 127  ;;  %3206 = vrot.lane.b32.xlu1 %v8395_v22, %s14233_s0  ;;  %s10082_s14 = sld [smem:[#allocation7 + $0x6]] }
 0x6b4   : > { %14230 = vst [vmem:[#allocation49_spill] sm:$0xff] %v9358_v42  ;;  %v1959_v3 = vsel %vm13593_vm14, %v14232_v4, %v14231_v32  ;;  %14234 = vst [vmem:[#allocation48_spill] sm:$0xff] %v9374_v38  ;;  %v1957_v40 = vsel %vm13593_vm14, %v14231_v32, %v14232_v4  ;;  %v9391_v42 = vmul.f32 %v8840_v25, %v1891_v61  ;;  %v14245_v61 = vld [vmem:[#allocation52_spill] sm:$0xff]  ;;  %v14246_v32 = vld [vmem:[#allocation54_spill] sm:$0xff]  ;;  %vm14247_vm14 = vcmp.lt.s32.totalorder %v8777_v20, 47 }
 0x6b5   : > { %14235 = vst [vmem:[#allocation50_spill] sm:$0xff] %v9377_v50  ;;  %14236 = vst [vmem:[#allocation252_spill] sm:$0xff] %v9384_v62  ;;  %v9394_v13 = vmul.f32 %v9023_v47, %v2816_v54  ;;  %v2869_v50 = vsel %vm13595_vm3, %v14242_v58, %v14241_v43  ;;  %v2871_v4 = vsel %vm13595_vm3, %v14241_v43, %v14242_v58  ;;  %v14252_v58 = vld [vmem:[#allocation55_spill] sm:$0xff] }
 0x6b6   : > { %14237 = vst [vmem:[#allocation253_spill] sm:$0xff] %v9386_v41  ;;  %14238 = vst [vmem:[#allocation254_spill] sm:$0xff] %v9388_v0  ;;  %v9408_v25 = vmul.f32 %v9023_v47, %v2814_v12  ;;  %v9411_v54 = vmul.f32 %v8844_v52, %v1959_v3  ;;  %v2025_v41 = vsel %vm14247_vm14, %v14246_v32, %v14245_v61  ;;  %v14251_v3 = vld [vmem:[#allocation57_spill] sm:$0xff]  ;;  %v9453_v47 = vstv %s9318_s27  ;;  %s10133_s27 = sld [smem:[#allocation7 + $0x8]] }
 0x6b7   : > { %14239 = vst [vmem:[#allocation255_spill] sm:$0xff] %v9391_v42  ;;  %14240 = vst [vmem:[#allocation256_spill] sm:$0xff] %v9394_v13  ;;  %v9418_v42 = vstv %s9284_s16  ;;  %v9423_v43 = vmul.f32 %v8844_v52, %v1957_v40  ;;  %v9443_v52 = vmul.f32 %v9038_v34, %v2871_v4  ;;  %v9446_v40 = vmul.f32 %v9038_v34, %v2869_v50  ;;  %v14263_v4 = vld [vmem:[#allocation61_spill] sm:$0xff]  ;;  %v14264_v34 = vld [vmem:[#allocation59_spill] sm:$0xff]  ;;  %s10106_s16 = sld [smem:[#allocation7 + $0x7]] }
 0x6b8   : > { %14243 = vst [vmem:[#allocation53_spill] sm:$0xff] %v9408_v25  ;;  %14244 = vst [vmem:[#allocation51_spill] sm:$0xff] %v9411_v54  ;;  %v2924_v54 = vsel %vm13600_vm15, %v14252_v58, %v14251_v3  ;;  %v9460_v62 = vmul.f32 %v8857_v11, %v2025_v41  ;;  %2353 = vrot.lane.b32.xlu0 %v8653_v14, %s14082_s3  ;;  %s14274_s3 = smov 125  }
 0x6b9   : > { %14248 = vst [vmem:[#allocation52_spill] sm:$0xff] %v9418_v42  ;;  %14249 = vst [vmem:[#allocation54_spill] sm:$0xff] %v9423_v43  ;;  %v2926_v42 = vsel %vm13600_vm15, %v14251_v3, %v14252_v58  ;;  %v9455_v3 = vpop.permute.xlu0 %4217  ;;  %v9457_v58 = vpop.permute.xlu1 %2406  ;;  %3257 = vrot.lane.b32.xlu1 %v8385_v53, %s14274_s3  ;;  %v10298_v13 = vstv %s10082_s14  ;;  %s10612_s14 = sld [smem:[#allocation7 + $0x15]] }
 0x6ba   : > { %vm14250_vm3 = vmmov %vm14247_vm14  ;;  %vm13621_vm14 = vcmp.lt.s32.totalorder %v8777_v20, 126  ;;  %14253 = vst [vmem:[#allocation57_spill] sm:$0xff] %v9443_v52  ;;  %v9478_v41 = vmul.f32 %v9058_v6, %v2926_v42  ;;  %v14271_v42 = vld [vmem:[#allocation63_spill] sm:$0xff] }
 0x6bb   : > { %v2023_v12 = vsel %vm14250_vm3, %v14245_v61, %v14246_v32  ;;  %14254 = vst [vmem:[#allocation55_spill] sm:$0xff] %v9446_v40  ;;  %v14255_v61 = vld [vmem:[#allocation56_spill] sm:$0xff]  ;;  %v14256_v32 = vld [vmem:[#allocation58_spill] sm:$0xff]  ;;  %vm14257_vm3 = vcmp.lt.s32.totalorder %v8777_v20, 46  ;;  %14260 = vst [vmem:[#allocation257_spill] sm:$0xff] %v9457_v58  ;;  %v2979_v40 = vsel %vm13608_vm4, %v14264_v34, %v14263_v4 }
 0x6bc   : > { %v2091_v43 = vsel %vm14257_vm3, %v14256_v32, %v14255_v61  ;;  %14258 = vst [vmem:[#allocation56_spill] sm:$0xff] %v9453_v47  ;;  %14259 = vst [vmem:[#allocation58_spill] sm:$0xff] %v9455_v3  ;;  %v2981_v3 = vsel %vm13608_vm4, %v14263_v4, %v14264_v34  ;;  %v9475_v47 = vmul.f32 %v8857_v11, %v2023_v12  ;;  %v9505_v4 = vstv %s9369_s2  ;;  %s10161_s2 = sld [smem:[#allocation7 + $0x9]] }
 0x6bd   : > { %14261 = vst [vmem:[#allocation258_spill] sm:$0xff] %v9460_v62  ;;  %vm14262_vm15 = vmmov %vm14257_vm3  ;;  %v9481_v62 = vmul.f32 %v9058_v6, %v2924_v54  ;;  %v9493_v11 = vmul.f32 %v8865_v27, %v2091_v43  ;;  %v14272_v54 = vld [vmem:[#allocation65_spill] sm:$0xff]  ;;  %vm13630_vm3 = vcmp.lt.s32.totalorder %v8777_v20, 115  ;;  %vm14283_vm4 = vcmp.lt.s32.totalorder %v8777_v20, 35  ;;  %2404 = vrot.lane.b32.xlu0 %v8643_v8, %s14088_s13  ;;  %3261 = vrot.lane.b32.xlu1 %v8395_v22, %s14274_s3 }
 0x6be   : > { %v2089_v50 = vsel %vm14262_vm15, %v14255_v61, %v14256_v32  ;;  %14265 = vst [vmem:[#allocation61_spill] sm:$0xff] %v9475_v47  ;;  %14266 = vst [vmem:[#allocation59_spill] sm:$0xff] %v9478_v41  ;;  %v14268_v61 = vld [vmem:[#allocation60_spill] sm:$0xff]  ;;  %v14269_v32 = vld [vmem:[#allocation62_spill] sm:$0xff]  ;;  %vm13634_vm15 = vcmp.lt.s32.totalorder %v8777_v20, 125  ;;  %v3036_v12 = vsel %vm13613_vm11, %v14272_v54, %v14271_v42  ;;  %v9524_v47 = vpop.permute.xlu0 %4268 }
 0x6bf   : > { %14267 = vst [vmem:[#allocation259_spill] sm:$0xff] %v9481_v62  ;;  %v2157_v52 = vsel %vm13609_vm5, %v14269_v32, %v14268_v61  ;;  %14270 = vst [vmem:[#allocation60_spill] sm:$0xff] %v9493_v11  ;;  %v2155_v34 = vsel %vm13609_vm5, %v14268_v61, %v14269_v32  ;;  %v9512_v43 = vmul.f32 %v8865_v27, %v2089_v50  ;;  %v14281_v27 = vld [vmem:[#allocation66_spill] sm:$0xff]  ;;  %v14282_v50 = vld [vmem:[#allocation64_spill] sm:$0xff]  ;;  %v10266_v62 = vstv %s10055_s7  ;;  %s14583_s7 = smov 15  }
 0x6c0   : > { %14273 = vst [vmem:[#allocation62_spill] sm:$0xff] %v9505_v4  ;;  %v9515_v11 = vmul.f32 %v9093_v56, %v2981_v3  ;;  %v9518_v61 = vmul.f32 %v9093_v56, %v2979_v40  ;;  %v3034_v32 = vsel %vm13613_vm11, %v14271_v42, %v14272_v54  ;;  %14278 = vst [vmem:[#allocation261_spill] sm:$0xff] %v9524_v47  ;;  %v9526_v4 = vpop.permute.xlu1 %2457  ;;  %v14289_v47 = vld [vmem:[#allocation67_spill] sm:$0xff]  ;;  %vm13632_vm11 = vcmp.lt.s32.totalorder %v8777_v20, 114 }
 0x6c1   : > { %14275 = vst [vmem:[#allocation63_spill] sm:$0xff] %v9512_v43  ;;  %14279 = vst [vmem:[#allocation262_spill] sm:$0xff] %v9526_v4  ;;  %v9529_v6 = vmul.f32 %v8869_v35, %v2157_v52  ;;  %v2210_v3 = vsel %vm14283_vm4, %v14282_v50, %v14281_v27  ;;  %v9540_v43 = vstv %s9405_s6  ;;  %v9543_v42 = vmul.f32 %v8869_v35, %v2155_v34  ;;  %v14288_v52 = vld [vmem:[#allocation69_spill] sm:$0xff]  ;;  %v14291_v35 = vld [vmem:[#allocation70_spill] sm:$0xff]  ;;  %s10190_s6 = sld [smem:[#allocation7 + $0xa]] }
 0x6c2   : > { %14276 = vst [vmem:[#allocation65_spill] sm:$0xff] %v9515_v11  ;;  %14277 = vst [vmem:[#allocation260_spill] sm:$0xff] %v9518_v61  ;;  %v9546_v54 = vmul.f32 %v9111_v2, %v3036_v12  ;;  %v3091_v56 = vsel %vm13639_vm13, %v14288_v52, %v14289_v47  ;;  %v14292_v34 = vld [vmem:[#allocation68_spill] sm:$0xff]  ;;  %2408 = vrot.lane.b32.xlu0 %v8653_v14, %s14088_s13  ;;  %3312 = vrot.lane.b32.xlu1 %v8385_v53, %s14314_s23  ;;  %s9693_s13 = sld [smem:[#allocation7 + $0xad]]  ;;  %v14520_v4 = vld [vmem:[#allocation175_spill] sm:$0xff] }
 0x6c3   : > { %14280 = vst [vmem:[#allocation263_spill] sm:$0xff] %v9529_v6  ;;  %vm14284_vm5 = vmmov %vm14283_vm4  ;;  %v3089_v6 = vsel %vm13639_vm13, %v14289_v47, %v14288_v52  ;;  %vm14293_vm4 = vcmp.lt.s32.totalorder %v8777_v20, 34  ;;  %v14298_v52 = vld [vmem:[#allocation73_spill] sm:$0xff] }
 0x6c4   : > { %v2212_v40 = vsel %vm14284_vm5, %v14281_v27, %v14282_v50  ;;  %14285 = vst [vmem:[#allocation66_spill] sm:$0xff] %v9540_v43  ;;  %14286 = vst [vmem:[#allocation64_spill] sm:$0xff] %v9543_v42  ;;  %v9559_v27 = vmul.f32 %v9111_v2, %v3034_v32  ;;  %v2265_v12 = vsel %vm14293_vm4, %v14292_v34, %v14291_v35  ;;  %v9571_v42 = vstv %s9438_s15  ;;  %v14299_v2 = vld [vmem:[#allocation71_spill] sm:$0xff]  ;;  %s10218_s15 = sld [smem:[#allocation7 + $0xb]] }
 0x6c5   : > { %14287 = vst [vmem:[#allocation264_spill] sm:$0xff] %v9546_v54  ;;  %vm14294_vm5 = vmmov %vm14293_vm4  ;;  %v9578_v47 = vmul.f32 %v8877_v9, %v2212_v40  ;;  %v9581_v32 = vmul.f32 %v8877_v9, %v2210_v3  ;;  %v9595_v40 = vpop.permute.xlu1 %2461  ;;  %v9598_v9 = vmul.f32 %v9129_v59, %v3091_v56  ;;  %v9601_v3 = vmul.f32 %v9129_v59, %v3089_v6  ;;  %v14308_v6 = vld [vmem:[#allocation77_spill] sm:$0xff] }
 0x6c6   : > { %14290 = vst [vmem:[#allocation69_spill] sm:$0xff] %v9559_v27  ;;  %v2267_v50 = vsel %vm14294_vm5, %v14291_v35, %v14292_v34  ;;  %14295 = vst [vmem:[#allocation67_spill] sm:$0xff] %v9571_v42  ;;  %v3174_v35 = vsel %vm13635_vm1, %v14299_v2, %v14298_v52  ;;  %v3176_v34 = vsel %vm13635_vm1, %v14298_v52, %v14299_v2  ;;  %v9593_v42 = vpop.permute.xlu0 %4272  ;;  %vm13643_vm4 = vcmp.lt.s32.totalorder %v8777_v20, 113 }
 0x6c7   : > { %14296 = vst [vmem:[#allocation70_spill] sm:$0xff] %v9578_v47  ;;  %14297 = vst [vmem:[#allocation68_spill] sm:$0xff] %v9581_v32  ;;  %v14304_v32 = vld [vmem:[#allocation74_spill] sm:$0xff]  ;;  %v14305_v47 = vld [vmem:[#allocation72_spill] sm:$0xff]  ;;  %v9613_v52 = vmul.f32 %v8880_v36, %v2267_v50  ;;  %v9616_v56 = vmul.f32 %v8880_v36, %v2265_v12  ;;  %v9633_v50 = vmul.f32 %v9144_v49, %v3176_v34  ;;  %v9640_v12 = vstv %s9507_s28  ;;  %s10278_s28 = sld [smem:[#allocation7 + $0xe]] }
 0x6c8   : > { %14300 = vst [vmem:[#allocation73_spill] sm:$0xff] %v9593_v42  ;;  %14301 = vst [vmem:[#allocation71_spill] sm:$0xff] %v9595_v40  ;;  %v2320_v43 = vsel %vm13644_vm8, %v14305_v47, %v14304_v32  ;;  %v2322_v2 = vsel %vm13644_vm8, %v14304_v32, %v14305_v47  ;;  %v14309_v42 = vld [vmem:[#allocation75_spill] sm:$0xff]  ;;  %v9630_v47 = vmul.f32 %v9144_v49, %v3174_v35  ;;  %v14317_v35 = vld [vmem:[#allocation78_spill] sm:$0xff]  ;;  %vm14319_vm5 = vcmp.lt.s32.totalorder %v8777_v20, 32 }
 0x6c9   : > { %14302 = vst [vmem:[#allocation265_spill] sm:$0xff] %v9598_v9  ;;  %14303 = vst [vmem:[#allocation266_spill] sm:$0xff] %v9601_v3  ;;  %v3229_v59 = vsel %vm13621_vm14, %v14309_v42, %v14308_v6  ;;  %v9623_v3 = vstv %s9488_s19  ;;  %v3231_v36 = vsel %vm13621_vm14, %v14308_v6, %v14309_v42  ;;  %v9645_v32 = vmul.f32 %v8883_v33, %v2322_v2  ;;  %v14326_v49 = vld [vmem:[#allocation80_spill] sm:$0xff]  ;;  %s10248_s19 = sld [smem:[#allocation7 + $0xc]] }
 0x6ca   : > { %14306 = vst [vmem:[#allocation74_spill] sm:$0xff] %v9613_v52  ;;  %14307 = vst [vmem:[#allocation72_spill] sm:$0xff] %v9616_v56  ;;  %v9648_v56 = vmul.f32 %v8883_v33, %v2320_v43  ;;  %v14318_v52 = vld [vmem:[#allocation76_spill] sm:$0xff]  ;;  %v9658_v6 = vpop.permute.xlu0 %4323  ;;  %v9663_v2 = vmul.f32 %v9181_v63, %v3229_v59  ;;  %v14324_v33 = vld [vmem:[#allocation81_spill] sm:$0xff]  ;;  %v9679_v59 = vmul.f32 %v9181_v63, %v3231_v36  ;;  %2459 = vrot.lane.b32.xlu0 %v8643_v8, %s14094_s10  ;;  %v14462_v27 = vmov 0 }
 0x6cb   : > { %14310 = vst [vmem:[#allocation77_spill] sm:$0xff] %v9623_v3  ;;  %14311 = vst [vmem:[#allocation75_spill] sm:$0xff] %v9630_v47  ;;  %v2375_v34 = vsel %vm14319_vm5, %v14318_v52, %v14317_v35  ;;  %v14325_v43 = vld [vmem:[#allocation79_spill] sm:$0xff]  ;;  %v14329_v3 = vld [vmem:[#allocation85_spill] sm:$0xff]  ;;  %3316 = vrot.lane.b32.xlu1 %v8395_v22, %s14314_s23  ;;  %v10200_v54 = vstv %s10010_s18  ;;  %s10531_s18 = sld [smem:[#allocation7 + $0x13]] }
 0x6cc   : > { %14312 = vst [vmem:[#allocation267_spill] sm:$0xff] %v9633_v50  ;;  %14313 = vst [vmem:[#allocation268_spill] sm:$0xff] %v9640_v12  ;;  %v9660_v12 = vpop.permute.xlu1 %2512  ;;  %v14334_v63 = vld [vmem:[#allocation86_spill] sm:$0xff]  ;;  %v9708_v50 = vstv %s9573_s12  ;;  %s14494_s12 = smov 111   ;;  %v14501_v47 = vld [vmem:[#allocation171_spill] sm:$0xff] }
 0x6cd   : > { %14315 = vst [vmem:[#allocation269_spill] sm:$0xff] %v9645_v32  ;;  %14316 = vst [vmem:[#allocation270_spill] sm:$0xff] %v9648_v56  ;;  %v3284_v56 = vsel %vm13634_vm15, %v14325_v43, %v14324_v33  ;;  %v3286_v32 = vsel %vm13634_vm15, %v14324_v33, %v14325_v43 }
 0x6ce   : > { %vm14320_vm14 = vmmov %vm14319_vm5  ;;  %14321 = vst [vmem:[#allocation78_spill] sm:$0xff] %v9658_v6  ;;  %vm14335_vm5 = vcmp.lt.s32.totalorder %v8777_v20, 30  ;;  %2463 = vrot.lane.b32.xlu0 %v8653_v14, %s14094_s10  ;;  %s9791_s10 = sld [smem:[#allocation7 + $0xaf]] }
 0x6cf   : > { %v2377_v42 = vsel %vm14320_vm14, %v14317_v35, %v14318_v52  ;;  %14322 = vst [vmem:[#allocation76_spill] sm:$0xff] %v9660_v12  ;;  %14323 = vst [vmem:[#allocation271_spill] sm:$0xff] %v9663_v2  ;;  %v14327_v52 = vld [vmem:[#allocation82_spill] sm:$0xff]  ;;  %vm13668_vm14 = vcmp.lt.s32.totalorder %v8777_v20, 112  ;;  %v14330_v2 = vld [vmem:[#allocation83_spill] sm:$0xff]  ;;  %3367 = vrot.lane.b32.xlu1 %v8385_v53, %s14010_s22 }
 0x6d0   : > { %v2432_v35 = vsel %vm13642_vm0, %v14327_v52, %v14326_v49  ;;  %14328 = vst [vmem:[#allocation81_spill] sm:$0xff] %v9679_v59  ;;  %v2430_v6 = vsel %vm13642_vm0, %v14326_v49, %v14327_v52  ;;  %v3339_v33 = vsel %vm13630_vm3, %v14330_v2, %v14329_v3  ;;  %v3341_v43 = vsel %vm13630_vm3, %v14329_v3, %v14330_v2  ;;  %v14333_v52 = vld [vmem:[#allocation84_spill] sm:$0xff]  ;;  %v9724_v2 = vpop.permute.xlu0 %4327  ;;  %v14511_v12 = vld [vmem:[#allocation165_spill] sm:$0xff] }
 0x6d1   : > { %v9698_v36 = vmul.f32 %v8901_v31, %v2377_v42  ;;  %v9701_v49 = vmul.f32 %v8901_v31, %v2375_v34  ;;  %v2487_v59 = vsel %vm14335_vm5, %v14334_v63, %v14333_v52  ;;  %14336 = vst [vmem:[#allocation82_spill] sm:$0xff] %v9708_v50  ;;  %v9713_v3 = vmul.f32 %v9199_v7, %v3284_v56 }
 0x6d2   : > { %v9716_v42 = vmul.f32 %v9199_v7, %v3286_v32  ;;  %v9719_v31 = vmul.f32 %v8921_v1, %v2432_v35  ;;  %v9722_v34 = vstv %s9591_s17  ;;  %14341 = vst [vmem:[#allocation272_spill] sm:$0xff] %v9724_v2  ;;  %v9732_v50 = vmul.f32 %v9213_v57, %v3339_v33  ;;  %v14347_v2 = vld [vmem:[#allocation89_spill] sm:$0xff]  ;;  %2514 = vrot.lane.b32.xlu0 %v8643_v8, %s13954_s29  ;;  %s14518_s17 = smov 17  }
 0x6d3   : > { %14331 = vst [vmem:[#allocation79_spill] sm:$0xff] %v9698_v36  ;;  %14332 = vst [vmem:[#allocation80_spill] sm:$0xff] %v9701_v49  ;;  %v9726_v49 = vpop.permute.xlu1 %2516  ;;  %v9729_v36 = vmul.f32 %v8921_v1, %v2430_v6  ;;  %v9735_v56 = vmul.f32 %v9213_v57, %v3341_v43  ;;  %v2485_v32 = vsel %vm14335_vm5, %v14333_v52, %v14334_v63  ;;  %vm13667_vm3 = vcmp.lt.s32.totalorder %v8777_v20, 111  ;;  %v14350_v63 = vld [vmem:[#allocation90_spill] sm:$0xff] }
 0x6d4   : > { %14337 = vst [vmem:[#allocation85_spill] sm:$0xff] %v9713_v3  ;;  %14338 = vst [vmem:[#allocation83_spill] sm:$0xff] %v9716_v42  ;;  %v9743_v35 = vmul.f32 %v8927_v21, %v2487_v59  ;;  %v9754_v33 = vstv %s9625_s4  ;;  %v14351_v59 = vld [vmem:[#allocation88_spill] sm:$0xff]  ;;  %3371 = vrot.lane.b32.xlu1 %v8395_v22, %s14010_s22  ;;  %v14377_v7 = vmov 0   ;;  %v14433_v3 = vmov 0  ;;  %s10383_s4 = sld [smem:[#allocation7 + $0xf]] }
 0x6d5   : > { %14339 = vst [vmem:[#allocation84_spill] sm:$0xff] %v9719_v31  ;;  %14340 = vst [vmem:[#allocation86_spill] sm:$0xff] %v9722_v34  ;;  %v14348_v31 = vld [vmem:[#allocation87_spill] sm:$0xff]  ;;  %v2540_v43 = vsel %vm13640_vm2, %v14351_v59, %v14350_v63  ;;  %v2542_v52 = vsel %vm13640_vm2, %v14350_v63, %v14351_v59  ;;  %v9781_v63 = vpop.permute.xlu0 %4378 }
 0x6d6   : > { %14342 = vst [vmem:[#allocation273_spill] sm:$0xff] %v9726_v49  ;;  %14343 = vst [vmem:[#allocation274_spill] sm:$0xff] %v9729_v36  ;;  %v3394_v1 = vsel %vm13632_vm11, %v14348_v31, %v14347_v2  ;;  %v3396_v6 = vsel %vm13632_vm11, %v14347_v2, %v14348_v31  ;;  %v9773_v31 = vmul.f32 %v8927_v21, %v2485_v32  ;;  %v14354_v2 = vld [vmem:[#allocation93_spill] sm:$0xff]  ;;  %v14355_v36 = vld [vmem:[#allocation91_spill] sm:$0xff]  ;;  %2518 = vrot.lane.b32.xlu0 %v8653_v14, %s13954_s29  ;;  %s9995_s29 = sld [smem:[#allocation7 + $0x1]] }
 0x6d7   : > { %14344 = vst [vmem:[#allocation275_spill] sm:$0xff] %v9732_v50  ;;  %14345 = vst [vmem:[#allocation276_spill] sm:$0xff] %v9735_v56  ;;  %v9783_v59 = vpop.permute.xlu1 %2567  ;;  %v9786_v57 = vmul.f32 %v9230_v60, %v3394_v1  ;;  %v9789_v34 = vmul.f32 %v9230_v60, %v3396_v6  ;;  %v9796_v21 = vmul.f32 %v8930_v37, %v2542_v52  ;;  %v14367_v52 = vld [vmem:[#allocation92_spill] sm:$0xff]  ;;  %v9879_v50 = vstv %s9756_s8  ;;  %v14544_v49 = vld [vmem:[#allocation177_spill] sm:$0xff]  ;;  %s10461_s8 = sld [smem:[#allocation7 + $0x11]] }
 0x6d8   : > { %14346 = vst [vmem:[#allocation277_spill] sm:$0xff] %v9743_v35  ;;  %14349 = vst [vmem:[#allocation89_spill] sm:$0xff] %v9754_v33  ;;  %v14352_v35 = vld [vmem:[#allocation182_spill] sm:$0xff]  ;;  %v3449_v33 = vsel %vm13643_vm4, %v14355_v36, %v14354_v2  ;;  %v9799_v32 = vmul.f32 %v8930_v37, %v2540_v43  ;;  %v3451_v1 = vsel %vm13643_vm4, %v14354_v2, %v14355_v36  ;;  %vm14368_vm4 = vcmp.lt.s32.totalorder %v8777_v20, 19 }
 0x6d9   : > { %vm1692_vm5 = vcmp.ge.s32.totalorder %v14352_v35, 3  ;;  %vm1693_vm11 = vcmp.lt.s32.totalorder %v14352_v35, 19  ;;  %14353 = vst [vmem:[#allocation87_spill] sm:$0xff] %v9773_v31  ;;  %vm1695_vm15 = vcmp.ge.s32.totalorder %v14352_v35, 2  ;;  %vm1696_vm1 = vcmp.lt.s32.totalorder %v14352_v35, 18  ;;  %14356 = vst [vmem:[#allocation90_spill] sm:$0xff] %v9781_v63  ;;  %3422 = vrot.lane.b32.xlu1 %v8385_v53, %s14015_s25 }
 0x6da   : > { %14357 = vst [vmem:[#allocation88_spill] sm:$0xff] %v9783_v59  ;;  %14358 = vst [vmem:[#allocation182_spill] sm:$0xff] %v9786_v57  ;;  %vm1698_vm13 = vcmp.ge.s32.totalorder %v14352_v35, 1  ;;  %vm1699_vm2 = vcmp.lt.s32.totalorder %v14352_v35, 17  ;;  %v9806_v63 = vstv %s9693_s13  ;;  %v9819_v37 = vmul.f32 %v9267_v5, %v3449_v33  ;;  %v14366_v43 = vld [vmem:[#allocation94_spill] sm:$0xff]  ;;  %2569 = vrot.lane.b32.xlu0 %v8643_v8, %s13955_s30  ;;  %s10385_s13 = sld [smem:[#allocation7 + $0x10]] }
 0x6db   : > { %14359 = vst [vmem:[#allocation93_spill] sm:$0xff] %v9789_v34  ;;  %14360 = vst [vmem:[#allocation91_spill] sm:$0xff] %v9796_v21  ;;  %v2595_v36 = vsel %vm14368_vm4, %v14367_v52, %v14366_v43  ;;  %v2597_v33 = vsel %vm14368_vm4, %v14366_v43, %v14367_v52  ;;  %v14372_v21 = vld [vmem:[#allocation95_spill] sm:$0xff]  ;;  %vm1707_vm12 = vcmp.ge.s32.totalorder %v14352_v35, 4294967294  ;;  %vm1708_vm7 = vcmp.lt.s32.totalorder %v14352_v35, 14  ;;  %v9856_v43 = vpop.permute.xlu0 %4382  ;;  %v9858_v52 = vpop.permute.xlu1 %2571  ;;  %v14380_v57 = vld [vmem:[#allocation98_spill] sm:$0xff] }
 0x6dc   : > { %14361 = vst [vmem:[#allocation278_spill] sm:$0xff] %v9799_v32  ;;  %14362 = vst [vmem:[#allocation279_spill] sm:$0xff] %v9806_v63  ;;  %v14371_v32 = vld [vmem:[#allocation97_spill] sm:$0xff]  ;;  %v9872_v34 = vmul.f32 %v9267_v5, %v3451_v1  ;;  %vm14381_vm4 = vcmp.lt.s32.totalorder %v8777_v20, 18  ;;  %v9897_v1 = vmul.f32 %v8933_v30, %v2597_v33  ;;  %v9900_v6 = vmul.f32 %v8933_v30, %v2595_v36  ;;  %v14393_v36 = vld [vmem:[#allocation99_spill] sm:$0xff] }
 0x6dd   : > { %vm9812_vm0 = vmand %vm1692_vm5, %vm1693_vm11  ;;  %14365 = vst [vmem:[#allocation280_spill] sm:$0xff] %v9819_v37  ;;  %vm1704_vm11 = vcmp.ge.s32.totalorder %v14352_v35, 4294967295  ;;  %vm1705_vm5 = vcmp.lt.s32.totalorder %v14352_v35, 15  ;;  %v3504_v31 = vsel %vm13668_vm14, %v14372_v21, %v14371_v32  ;;  %v3506_v60 = vsel %vm13668_vm14, %v14371_v32, %v14372_v21  ;;  %v14392_v63 = vld [vmem:[#allocation101_spill] sm:$0xff]  ;;  %3426 = vrot.lane.b32.xlu1 %v8395_v22, %s14015_s25 }
 0x6de   : > { %vm9829_vm8 = vmand %vm1695_vm15, %vm1696_vm1  ;;  %vm13664_vm1 = vcmp.lt.s32.totalorder %v8777_v20, 110  ;;  %14375 = vst [vmem:[#allocation94_spill] sm:$0xff] %v9856_v43  ;;  %v9867_v37 = vsel %vm9812_vm0, 1, %v14377_v7  ;;  %v14379_v43 = vld [vmem:[#allocation96_spill] sm:$0xff]  ;;  %v9924_v30 = vmul.f32 %v9282_v10, %v3504_v31  ;;  %2573 = vrot.lane.b32.xlu0 %v8653_v14, %s13955_s30  ;;  %s10053_s30 = sld [smem:[#allocation7 + $0x4]] }
 0x6df   : > { %vm9850_vm15 = vmand %vm1698_vm13, %vm1699_vm2  ;;  %14376 = vst [vmem:[#allocation92_spill] sm:$0xff] %v9858_v52  ;;  %vm1710_vm2 = vcmp.ge.s32.totalorder %v14352_v35, 4294967293  ;;  %vm1711_vm13 = vcmp.lt.s32.totalorder %v14352_v35, 13  ;;  %v2652_v56 = vsel %vm14381_vm4, %v14380_v57, %v14379_v43  ;;  %v9884_v21 = vsel %vm9829_vm8, 1, %v14377_v7  ;;  %v9939_v5 = vpop.permute.xlu0 %4433  ;;  %v14510_v52 = vld [vmem:[#allocation167_spill] sm:$0xff] }
 0x6e0   : > { %14378 = vst [vmem:[#allocation97_spill] sm:$0xff] %v9872_v34  ;;  %14382 = vst [vmem:[#allocation95_spill] sm:$0xff] %v9879_v50  ;;  %v9911_v50 = vsel %vm9850_vm15, 1, %v14377_v7  ;;  %v9942_v31 = vmul.f32 %v8948_v51, %v2652_v56  ;;  %v3561_v56 = vsel %vm13667_vm3, %v14392_v63, %v14393_v36 }
 0x6e1   : > { %vm9890_vm0 = vmand %vm1704_vm11, %vm1705_vm5  ;;  %14385 = vst [vmem:[#allocation96_spill] sm:$0xff] %v9897_v1  ;;  %3477 = vrot.lane.b32.xlu1 %v8385_v53, %s14020_s26 }
 0x6e2   : > { %14386 = vst [vmem:[#allocation98_spill] sm:$0xff] %v9900_v6  ;;  %vm14387_vm8 = vmmov %vm14381_vm4  ;;  %v14394_v6 = vld [vmem:[#allocation188_spill] sm:$0xff]  ;;  %2624 = vrot.lane.b32.xlu0 %v8643_v8, %s13957_s11 }
 0x6e3   : > { %v2650_v2 = vsel %vm14387_vm8, %v14379_v43, %v14380_v57  ;;  %vm9917_vm11 = vmand %vm1707_vm12, %vm1708_vm7  ;;  %14390 = vst [vmem:[#allocation281_spill] sm:$0xff] %v9924_v30  ;;  %v9927_v57 = vmul.f32 %v9282_v10, %v3506_v60  ;;  %v3559_v43 = vsel %vm13667_vm3, %v14393_v36, %v14392_v63  ;;  %v1717_v1 = vrot.slane %v9867_v37, %v14394_v6  ;;  %v9954_v30 = vpop.permute.xlu1 %2622  ;;  %v14403_v36 = vld [vmem:[#allocation189_spill] sm:$0xff] }
 0x6e4   : > { %vm1712_vm12 = vmand %vm1710_vm2, %vm1711_vm13  ;;  %14395 = vst [vmem:[#allocation101_spill] sm:$0xff] %v9939_v5  ;;  %v9945_v60 = vstv %s9791_s10  ;;  %v1783_v10 = vrot.slane %v9884_v21, %v14394_v6  ;;  %v9957_v35 = vmul.f32 %v8948_v51, %v2650_v2  ;;  %v1849_v5 = vrot.slane %v9911_v50, %v14394_v6  ;;  %v14401_v51 = vld [vmem:[#allocation102_spill] sm:$0xff]  ;;  %v14402_v2 = vld [vmem:[#allocation100_spill] sm:$0xff]  ;;  %s14550_s10 = smov 110  }
 0x6e5   : > { %14391 = vst [vmem:[#allocation282_spill] sm:$0xff] %v9927_v57  ;;  %14396 = vst [vmem:[#allocation99_spill] sm:$0xff] %v9942_v31  ;;  %v9952_v57 = vsel %vm9890_vm0, 1, %v14377_v7  ;;  %v9973_v32 = vmul.f32 %v9299_v18, %v3559_v43  ;;  %v2707_v63 = vsel %vm13672_vm6, %v14401_v51, %v14402_v2  ;;  %v9984_v33 = vsel %vm1712_vm12, 1, %v14377_v7  ;;  %3481 = vrot.lane.b32.xlu1 %v8395_v22, %s14020_s26 }
 0x6e6   : > { %14397 = vst [vmem:[#allocation283_spill] sm:$0xff] %v9945_v60  ;;  %14398 = vst [vmem:[#allocation284_spill] sm:$0xff] %v9954_v30  ;;  %v9968_v60 = vsel %vm9917_vm11, 1, %v14377_v7  ;;  %vm13677_vm7 = vcmp.ge.s32.totalorder %v8777_v20, 48  ;;  %v1721_v43 = vrot.slane %v9867_v37, %v14403_v36  ;;  %vm9991_vm5 = vcmp.ne.s32.totalorder %v1717_v1, 0  ;;  %2628 = vrot.lane.b32.xlu0 %v8653_v14, %s13957_s11  ;;  %s10276_s11 = sld [smem:[#allocation7 + $0xd]] }
 0x6e7   : > { %14399 = vst [vmem:[#allocation285_spill] sm:$0xff] %v9957_v35  ;;  %14400 = vst [vmem:[#allocation286_spill] sm:$0xff] %v9973_v32  ;;  %v2705_v35 = vsel %vm13672_vm6, %v14402_v2, %v14401_v51  ;;  %v1981_v51 = vrot.slane %v9952_v57, %v14394_v6  ;;  %v9999_v2 = vpop.permute.xlu0 %1733  ;;  %v10002_v7 = vmul.f32 %v9299_v18, %v3561_v56  ;;  %vm10006_vm15 = vcmp.ne.s32.totalorder %v1783_v10, 0  ;;  %v10014_v34 = vpop.permute.xlu1 %2626 }
 0x6e8   : > { %14406 = vst [vmem:[#allocation102_spill] sm:$0xff] %v9999_v2  ;;  %v1787_v32 = vrot.slane %v9884_v21, %v14403_v36  ;;  %v14408_v37 = vmov 0  ;;  %v2047_v1 = vrot.slane %v9968_v60, %v14394_v6  ;;  %14411 = vst [vmem:[#allocation288_spill] sm:$0xff] %v10014_v34  ;;  %v10017_v2 = vmul.f32 %v8966_v24, %v2707_v63  ;;  %v14417_v21 = vld [vmem:[#allocation105_spill] sm:$0xff] }
 0x6e9   : > { %14407 = vst [vmem:[#allocation100_spill] sm:$0xff] %v10002_v7  ;;  %v14409_v37 = vsel %vm10006_vm15, 4294967295, %v14408_v37  ;;  %v10020_v56 = vmul.f32 %v8966_v24, %v2705_v35  ;;  %vm10022_vm2 = vcmp.ne.s32.totalorder %v1849_v5, 0  ;;  %v14414_v18 = vmov 0  ;;  %v14418_v7 = vld [vmem:[#allocation103_spill] sm:$0xff]  ;;  %vm10044_vm13 = vmand %vm13677_vm7, %vm9991_vm5  ;;  %v14452_v5 = vld [vmem:[#allocation106_spill] sm:$0xff]  ;;  %3532 = vrot.lane.b32.xlu1 %v8385_v53, %s14494_s12 }
 0x6ea   : > { %14410 = vst [vmem:[#allocation287_spill] sm:$0xff] %v14409_v37  ;;  %14412 = vst [vmem:[#allocation289_spill] sm:$0xff] %v10017_v2  ;;  %v14415_v18 = vsel %vm10022_vm2, 4294967295, %v14414_v18  ;;  %v2113_v10 = vrot.slane %v9984_v33, %v14394_v6  ;;  %v3614_v63 = vsel %vm13664_vm1, %v14418_v7, %v14417_v21  ;;  %v3616_v24 = vsel %vm13664_vm1, %v14417_v21, %v14418_v7 }
 0x6eb   : > { %14413 = vst [vmem:[#allocation290_spill] sm:$0xff] %v10020_v56  ;;  %14416 = vst [vmem:[#allocation291_spill] sm:$0xff] %v14415_v18  ;;  %v10049_v35 = vstv %s9906_s20  ;;  %v1853_v6 = vrot.slane %v9911_v50, %v14403_v36  ;;  %vm10059_vm4 = vcmp.ne.s32.totalorder %v1721_v43, 0  ;;  %v14422_v7 = vmov 0  ;;  %v10084_v42 = vpop.permute.xlu0 %1737  ;;  %2679 = vrot.lane.b32.xlu0 %v8643_v8, %s14518_s17  ;;  %s14562_s20 = smov 16   ;;  %v14567_v18 = vld [vmem:[#allocation191_spill] sm:$0xff] }
 0x6ec   : > { %14421 = vst [vmem:[#allocation105_spill] sm:$0xff] %v10049_v35  ;;  %v14423_v7 = vsel %vm10059_vm4, 4294967295, %v14422_v7  ;;  %v14425_v21 = vmov 0.0   ;;  %vm10072_vm0 = vmand %vm13677_vm7, %vm10006_vm15  ;;  %v1985_v2 = vrot.slane %v9952_v57, %v14403_v36  ;;  %vm10078_vm8 = vcmp.ne.s32.totalorder %v1981_v51, 0 }
 0x6ed   : > { %14424 = vst [vmem:[#allocation103_spill] sm:$0xff] %v14423_v7  ;;  %v10066_v56 = vsel %vm9991_vm5, 1.0, %v14425_v21  ;;  %v14429_v43 = vmov 0  ;;  %14432 = vst [vmem:[#allocation294_spill] sm:$0xff] %v10084_v42  ;;  %vm10086_vm11 = vcmp.ne.s32.totalorder %v1787_v32, 0  ;;  %v2051_v57 = vrot.slane %v9968_v60, %v14403_v36  ;;  %v10108_v42 = vpop.permute.xlu1 %2677  ;;  %3536 = vrot.lane.b32.xlu1 %v8395_v22, %s14494_s12 }
 0x6ee   : > { %14426 = vst [vmem:[#allocation292_spill] sm:$0xff] %v10066_v56  ;;  %v14430_v43 = vsel %vm10078_vm8, 4294967295, %v14429_v43  ;;  %v14434_v3 = vsel %vm10086_vm11, 4294967295, %v14433_v3  ;;  %vm10094_vm12 = vmand %vm13677_vm7, %vm10022_vm2  ;;  %vm10100_vm1 = vcmp.ne.s32.totalorder %v2047_v1, 0  ;;  %v14438_v51 = vmov 0 }
 0x6ef   : > { %14431 = vst [vmem:[#allocation293_spill] sm:$0xff] %v14430_v43  ;;  %14435 = vst [vmem:[#allocation295_spill] sm:$0xff] %v14434_v3  ;;  %v14439_v51 = vsel %vm10100_vm1, 4294967295, %v14438_v51  ;;  %v2117_v32 = vrot.slane %v9984_v33, %v14403_v36  ;;  %v10111_v9 = vmul.f32 %v9350_v26, %v3614_v63  ;;  %v10114_v56 = vmul.f32 %v9350_v26, %v3616_v24  ;;  %v14451_v24 = vld [vmem:[#allocation104_spill] sm:$0xff]  ;;  %v10192_v3 = vpop.permute.xlu0 %1799  ;;  %v14663_v43 = vld [vmem:[#allocation243_spill] sm:$0xff] }
 0x6f0   : > { %14440 = vst [vmem:[#allocation296_spill] sm:$0xff] %v14439_v51  ;;  %14441 = vst [vmem:[#allocation297_spill] sm:$0xff] %v10108_v42  ;;  %v10119_v60 = vsel %vm10044_vm13, 1.0, %v14425_v21  ;;  %vm10129_vm14 = vcmp.ne.s32.totalorder %v2113_v10, 0  ;;  %v14448_v63 = vmov 0  ;;  %vm14453_vm13 = vcmp.lt.s32.totalorder %v8777_v20, 16  ;;  %2683 = vrot.lane.b32.xlu0 %v8653_v14, %s14518_s17 }
 0x6f1   : > { %14442 = vst [vmem:[#allocation298_spill] sm:$0xff] %v10111_v9  ;;  %14443 = vst [vmem:[#allocation299_spill] sm:$0xff] %v10114_v56  ;;  %v14449_v63 = vsel %vm10129_vm14, 4294967295, %v14448_v63  ;;  %v10141_v36 = vsel %vm14453_vm13, %v14452_v5, %v14451_v24  ;;  %v10146_v26 = vsel %vm10059_vm4, 1.0, %v14425_v21  ;;  %vm10148_vm6 = vcmp.ne.s32.totalorder %v1853_v6, 0  ;;  %v14502_v42 = vld [vmem:[#allocation169_spill] sm:$0xff]  ;;  %3587 = vrot.lane.b32.xlu1 %v8385_v53, %s14550_s10 }
 0x6f2   : > { %14444 = vst [vmem:[#allocation300_spill] sm:$0xff] %v10119_v60  ;;  %vm10125_vm3 = vmand %vm13677_vm7, %vm8770_vm9  ;;  %v14455_v10 = vmov 0  ;;  %v10168_v6 = vsel %vm10072_vm0, 1.0, %v14425_v21  ;;  %v10173_v9 = vsel %vm10086_vm11, 1.0, %v14425_v21  ;;  %v10176_v7 = vstv %s9995_s29  ;;  %s10504_s29 = sld [smem:[#allocation7 + $0x12]] }
 0x6f3   : > { %14450 = vst [vmem:[#allocation194_spill] sm:$0xff] %v14449_v63  ;;  %14454 = vst [vmem:[#allocation301_spill] sm:$0xff] %v10141_v36  ;;  %v14456_v10 = vsel %vm10148_vm6, 4294967295, %v14455_v10  ;;  %vm14465_vm13 = vcmp.ge.s32.totalorder %v8777_v20, 48  ;;  %vm10202_vm0 = vcmp.ne.s32.totalorder %v2051_v57, 0  ;;  %v14471_v36 = vmov 0  ;;  %v10308_v38 = vpop.permute.xlu0 %1803 }
 0x6f4   : > { %14457 = vst [vmem:[#allocation302_spill] sm:$0xff] %v14456_v10  ;;  %vm10156_vm10 = vmand %vm13677_vm7, %vm10078_vm8  ;;  %vm10178_vm7 = vcmp.ne.s32.totalorder %v1985_v2, 0  ;;  %v10197_v2 = vsel %vm10094_vm12, 1.0, %v14425_v21  ;;  %v14472_v36 = vsel %vm10202_vm0, 4294967295, %v14471_v36  ;;  %v14474_v24 = vmov 0  ;;  %2734 = vrot.lane.b32.xlu0 %v8643_v8, %s14562_s20  ;;  %v14644_v63 = vld [vmem:[#allocation237_spill] sm:$0xff] }
 0x6f5   : > { %14460 = vst [vmem:[#allocation303_spill] sm:$0xff] %v10168_v6  ;;  %14461 = vst [vmem:[#allocation304_spill] sm:$0xff] %v10176_v7  ;;  %v14463_v27 = vsel %vm10178_vm7, 4294967295, %v14462_v27  ;;  %vm14477_vm11 = vcmp.ge.s32.totalorder %v8777_v20, 48  ;;  %v10225_v57 = vsel %vm10148_vm6, 1.0, %v14425_v21  ;;  %v10233_v5 = vstv %s10026_s21  ;;  %3591 = vrot.lane.b32.xlu1 %v8395_v22, %s14550_s10  ;;  %s14578_s21 = smov 109  }
 0x6f6   : > { %14464 = vst [vmem:[#allocation305_spill] sm:$0xff] %v14463_v27  ;;  %vm10186_vm4 = vmand %vm14465_vm13, %vm10100_vm1  ;;  %vm10206_vm13 = vcmp.ne.s32.totalorder %v2117_v32, 0  ;;  %v10230_v32 = vsel %vm10125_vm3, 1.0, %v14425_v21  ;;  %v10238_v61 = vsel %vm10156_vm10, 1.0, %v14425_v21  ;;  %v10255_v56 = vsel %vm10178_vm7, 1.0, %v14425_v21  ;;  %s10935_s17 = sld [smem:[#allocation7 + $0x1a]] }
 0x6f7   : > { %14468 = vst [vmem:[#allocation306_spill] sm:$0xff] %v10192_v3  ;;  %14469 = vst [vmem:[#allocation307_spill] sm:$0xff] %v10197_v2  ;;  %v14475_v24 = vsel %vm10206_vm13, 4294967295, %v14474_v24  ;;  %v10220_v3 = vpop.permute.xlu1 %2681  ;;  %v10258_v33 = vstv %s10053_s30  ;;  %v10263_v11 = vsel %vm10186_vm4, 1.0, %v14425_v21  ;;  %v10285_v50 = vsel %vm10202_vm0, 1.0, %v14425_v21  ;;  %v10403_v58 = vpop.permute.xlu0 %1865  ;;  %s10565_s30 = sld [smem:[#allocation7 + $0x14]] }
 0x6f8   : > { %14470 = vst [vmem:[#allocation308_spill] sm:$0xff] %v10200_v54  ;;  %14473 = vst [vmem:[#allocation309_spill] sm:$0xff] %v14472_v36  ;;  %v10295_v25 = vsel %vm10206_vm13, 1.0, %v14425_v21  ;;  %v10324_v34 = vstv %s10106_s16  ;;  %v10459_v37 = vstv %s10278_s28  ;;  %v10514_v31 = vstv %s10385_s13  ;;  %2738 = vrot.lane.b32.xlu0 %v8653_v14, %s14562_s20  ;;  %s10642_s16 = sld [smem:[#allocation7 + $0x16]]  ;;  %s14680_s28 = smov 96  }
 0x6f9   : > { %14476 = vst [vmem:[#allocation310_spill] sm:$0xff] %v14475_v24  ;;  %vm10214_vm1 = vmand %vm14477_vm11, %vm10129_vm14  ;;  %vm14485_vm11 = vcmp.ge.s32.totalorder %v8777_v20, 32  ;;  %3642 = vrot.lane.b32.xlu1 %v8385_v53, %s14578_s21  ;;  %s14734_s13 = smov 93   ;;  %s14793_s20 = smov 82  }
 0x6fa   : > { %14480 = vst [vmem:[#allocation311_spill] sm:$0xff] %v10220_v3  ;;  %14481 = vst [vmem:[#allocation312_spill] sm:$0xff] %v10225_v57  ;;  %v10290_v27 = vsel %vm10214_vm1, 1.0, %v14425_v21  ;;  %vm14503_vm1 = vcmp.lt.s32.totalorder %v8777_v20, 50 }
 0x6fb   : > { %14482 = vst [vmem:[#allocation313_spill] sm:$0xff] %v10230_v32  ;;  %14483 = vst [vmem:[#allocation314_spill] sm:$0xff] %v10233_v5  ;;  %v1806_v24 = vsel %vm14503_vm1, %v14502_v42, %v14501_v47  ;;  %v10334_v59 = vpop.permute.xlu1 %2732 }
 0x6fc   : > { %14484 = vst [vmem:[#allocation315_spill] sm:$0xff] %v10238_v61  ;;  %vm10244_vm12 = vmand %vm14485_vm11, %vm9991_vm5  ;;  %v1812_v36 = vmul.f32 %v10176_v7, %v1806_v24  ;;  %2789 = vrot.lane.b32.xlu0 %v8643_v8, %s14583_s7 }
 0x6fd   : > { %14488 = vst [vmem:[#allocation316_spill] sm:$0xff] %v10258_v33  ;;  %14489 = vst [vmem:[#allocation317_spill] sm:$0xff] %v10263_v11  ;;  %v10321_v30 = vsel %vm10244_vm12, 1.0, %v14425_v21  ;;  %3646 = vrot.lane.b32.xlu1 %v8395_v22, %s14578_s21 }
 0x6fe   : > { %14490 = vst [vmem:[#allocation318_spill] sm:$0xff] %v10266_v62  ;;  %vm14491_vm10 = vmmov %vm14485_vm11 }
 0x6ff   : > { %vm10272_vm3 = vmand %vm14491_vm10, %vm10006_vm15  ;;  %14495 = vst [vmem:[#allocation319_spill] sm:$0xff] %v10290_v27 }
 0x700   : > { %14496 = vst [vmem:[#allocation320_spill] sm:$0xff] %v10298_v13  ;;  %vm14497_vm4 = vmmov %vm14491_vm10  ;;  %2793 = vrot.lane.b32.xlu0 %v8653_v14, %s14583_s7  ;;  %s11611_s7 = sld [smem:[#allocation7 + $0x22]] }
 0x701   : > { %vm10304_vm11 = vmand %vm14497_vm4, %vm10022_vm2  ;;  %14500 = vst [vmem:[#allocation321_spill] sm:$0xff] %v10308_v38 }
 0x702   : > { %vm14504_vm10 = vmmov %vm14503_vm1  ;;  %14505 = vst [vmem:[#allocation171_spill] sm:$0xff] %v10321_v30  ;;  %vm14512_vm1 = vcmp.lt.s32.totalorder %v8777_v20, 51  ;;  %v10370_v40 = vsel %vm10304_vm11, 1.0, %v14425_v21  ;;  %v10373_v30 = vstv %s10161_s2  ;;  %s10671_s2 = sld [smem:[#allocation7 + $0x17]] }
 0x703   : > { %v1808_v3 = vsel %vm14504_vm10, %v14501_v47, %v14502_v42  ;;  %14506 = vst [vmem:[#allocation169_spill] sm:$0xff] %v10324_v34  ;;  %vm10330_vm13 = vmand %vm14497_vm4, %vm8770_vm9  ;;  %v1740_v42 = vsel %vm14512_vm1, %v14511_v12, %v14510_v52  ;;  %v10345_v47 = vstv %s10133_s27  ;;  %s14602_s27 = smov 99  }
 0x704   : > { %14509 = vst [vmem:[#allocation322_spill] sm:$0xff] %v10334_v59  ;;  %vm14513_vm12 = vmmov %vm14512_vm1  ;;  %v14519_v59 = vld [vmem:[#allocation173_spill] sm:$0xff]  ;;  %vm14521_vm1 = vcmp.lt.s32.totalorder %v8777_v20, 49  ;;  %v1811_v41 = vmul.f32 %v10176_v7, %v1808_v3  ;;  %v1746_v24 = vmul.f32 %v10049_v35, %v1740_v42  ;;  %v10412_v7 = vstv %s10218_s15  ;;  %3697 = vrot.lane.b32.xlu1 %v8385_v53, %s14602_s27  ;;  %s14626_s15 = smov 98  }
 0x705   : > { %v1742_v10 = vsel %vm14513_vm12, %v14510_v52, %v14511_v12  ;;  %14514 = vst [vmem:[#allocation167_spill] sm:$0xff] %v10345_v47  ;;  %vm14515_vm10 = vmmov %vm14497_vm4  ;;  %v1874_v12 = vsel %vm14521_vm1, %v14520_v4, %v14519_v59  ;;  %v10365_v52 = vsel %vm10272_vm3, 1.0, %v14425_v21  ;;  %vm14525_vm12 = vnez %v14439_v51 }
 0x706   : > { %vm10351_vm4 = vmand %vm14515_vm10, %vm10078_vm8  ;;  %14522 = vst [vmem:[#allocation165_spill] sm:$0xff] %v10365_v52  ;;  %v10397_v52 = vstv %s10190_s6  ;;  %v1745_v3 = vmul.f32 %v10049_v35, %v1742_v10  ;;  %v1877_v10 = vmul.f32 %v10200_v54, %v1874_v12  ;;  %v14545_v12 = vld [vmem:[#allocation179_spill] sm:$0xff]  ;;  %s14610_s6 = smov 14  }
 0x707   : > { %14523 = vst [vmem:[#allocation173_spill] sm:$0xff] %v10370_v40  ;;  %14524 = vst [vmem:[#allocation175_spill] sm:$0xff] %v10373_v30  ;;  %v10394_v40 = vsel %vm10330_vm13, 1.0, %v14425_v21  ;;  %v10428_v42 = vsel %vm10351_vm4, 1.0, %v14425_v21  ;;  %vm14546_vm4 = vcmp.lt.s32.totalorder %v8777_v20, 48  ;;  %2844 = vrot.lane.b32.xlu0 %v8643_v8, %s14610_s6 }
 0x708   : > { %vm10379_vm0 = vmand %vm14515_vm10, %vm14525_vm12  ;;  %14528 = vst [vmem:[#allocation323_spill] sm:$0xff] %v10394_v40  ;;  %v1940_v0 = vsel %vm14546_vm4, %v14545_v12, %v14544_v49  ;;  %3701 = vrot.lane.b32.xlu1 %v8395_v22, %s14602_s27 }
 0x709   : > { %14529 = vst [vmem:[#allocation324_spill] sm:$0xff] %v10397_v52  ;;  %vm14530_vm3 = vmmov %vm14515_vm10 }
 0x70a   : > { %vm2505_vm11 = vmand %vm14530_vm3, %vm10129_vm14  ;;  %14531 = vst [vmem:[#allocation325_spill] sm:$0xff] %v10403_v58  ;;  %v10422_v58 = vpop.permute.xlu1 %2736 }
 0x70b   : > { %vm14532_vm13 = vmmov %vm14521_vm1  ;;  %14533 = vst [vmem:[#allocation326_spill] sm:$0xff] %v10412_v7  ;;  %vm14534_vm1 = vcmp.ge.s32.totalorder %v8777_v20, 16  ;;  %v10453_v35 = vsel %vm2505_vm11, 1.0, %v14425_v21  ;;  %2848 = vrot.lane.b32.xlu0 %v8653_v14, %s14610_s6  ;;  %s12252_s6 = sld [smem:[#allocation7 + $0x29]] }
 0x70c   : > { %v1872_v38 = vsel %vm14532_vm13, %v14519_v59, %v14520_v4  ;;  %vm10418_vm10 = vmand %vm14534_vm1, %vm9991_vm5  ;;  %14537 = vst [vmem:[#allocation327_spill] sm:$0xff] %v10422_v58  ;;  %v10433_v4 = vsel %vm10379_vm0, 1.0, %v14425_v21  ;;  %v10436_v59 = vstv %s10248_s19  ;;  %v10456_v58 = vstv %s10276_s11  ;;  %3752 = vrot.lane.b32.xlu1 %v8385_v53, %s14626_s15  ;;  %s14640_s19 = smov 13   ;;  %s14658_s11 = smov 97  }
 0x70d   : > { %14538 = vst [vmem:[#allocation328_spill] sm:$0xff] %v10428_v42  ;;  %14539 = vst [vmem:[#allocation329_spill] sm:$0xff] %v10433_v4  ;;  %v1833_v4 = vadd.f32 %v8955_v28, %v1811_v41  ;;  %v1834_v42 = vadd.f32 %v8958_v17, %v1812_v36  ;;  %v14555_v41 = vld [vmem:[#allocation207_spill] sm:$0xff]  ;;  %v10483_v36 = vsel %vm10418_vm10, 1.0, %v14425_v21 }
 0x70e   : > { %14540 = vst [vmem:[#allocation330_spill] sm:$0xff] %v10436_v59  ;;  %vm14541_vm5 = vmmov %vm14534_vm1  ;;  %v1878_v59 = vmul.f32 %v10200_v54, %v1872_v38  ;;  %v1768_v17 = vadd.f32 %v14555_v41, %v1746_v24  ;;  %v1943_v54 = vmul.f32 %v10233_v5, %v1940_v0 }
 0x70f   : > { %vm10442_vm3 = vmand %vm14541_vm5, %vm10006_vm15  ;;  %14547 = vst [vmem:[#allocation177_spill] sm:$0xff] %v10453_v35  ;;  %v1837_v0 = vmul.f32 %v10168_v6, %v1833_v4  ;;  %vm14568_vm5 = vcmp.lt.s32.totalorder %v8777_v20, 46  ;;  %2899 = vrot.lane.b32.xlu0 %v8643_v8, %s14640_s19 }
 0x710   : > { %14548 = vst [vmem:[#allocation179_spill] sm:$0xff] %v10456_v58  ;;  %14549 = vst [vmem:[#allocation331_spill] sm:$0xff] %v10459_v37  ;;  %v10476_v37 = vpop.permute.xlu0 %1869  ;;  %v14554_v58 = vld [vmem:[#allocation206_spill] sm:$0xff]  ;;  %v10488_v38 = vsel %vm10442_vm3, 1.0, %v14425_v21  ;;  %v1900_v41 = vadd.f32 %v9011_v45, %v1878_v59  ;;  %v1772_v6 = vmul.f32 %v10146_v26, %v1768_v17  ;;  %v10557_v17 = vstv %s10461_s8  ;;  %3756 = vrot.lane.b32.xlu1 %v8395_v22, %s14626_s15  ;;  %s14761_s8 = smov 83  }
 0x711   : > { %vm14551_vm0 = vmmov %vm14546_vm4  ;;  %14553 = vst [vmem:[#allocation332_spill] sm:$0xff] %v10476_v37  ;;  %v1767_v28 = vadd.f32 %v14554_v58, %v1745_v3  ;;  %v14558_v37 = vld [vmem:[#allocation184_spill] sm:$0xff]  ;;  %v14559_v58 = vld [vmem:[#allocation181_spill] sm:$0xff] }
 0x712   : > { %v1938_v35 = vsel %vm14551_vm0, %v14544_v49, %v14545_v12  ;;  %vm14552_vm11 = vmmov %vm14534_vm1  ;;  %14556 = vst [vmem:[#allocation206_spill] sm:$0xff] %v10483_v36  ;;  %v10490_v49 = vpop.permute.xlu1 %2787  ;;  %v1899_v12 = vadd.f32 %v8992_v29, %v1877_v10  ;;  %vm14560_vm1 = vcmp.lt.s32.totalorder %v8777_v20, 47  ;;  %v10508_v29 = vstv %s10383_s4  ;;  %v14573_v36 = vld [vmem:[#allocation198_spill] sm:$0xff]  ;;  %s14713_s4 = smov 94  }
 0x713   : > { %vm2670_vm13 = vmand %vm14552_vm11, %vm10022_vm2  ;;  %14557 = vst [vmem:[#allocation207_spill] sm:$0xff] %v10488_v38  ;;  %v2004_v3 = vsel %vm14560_vm1, %v14559_v58, %v14558_v37  ;;  %v1944_v24 = vmul.f32 %v10233_v5, %v1938_v35  ;;  %v1771_v4 = vmul.f32 %v10119_v60, %v1767_v28  ;;  %v14572_v38 = vld [vmem:[#allocation193_spill] sm:$0xff]  ;;  %2903 = vrot.lane.b32.xlu0 %v8653_v14, %s14640_s19  ;;  %s12312_s19 = sld [smem:[#allocation7 + $0x2b]] }
 0x714   : > { %vm14561_vm10 = vmmov %vm14560_vm1  ;;  %14563 = vst [vmem:[#allocation184_spill] sm:$0xff] %v10508_v29  ;;  %v10511_v10 = vsel %vm2670_vm13, 1.0, %v14425_v21  ;;  %v10529_v5 = vpop.permute.xlu0 %1931  ;;  %v2010_v45 = vmul.f32 %v10258_v33, %v2004_v3  ;;  %3807 = vrot.lane.b32.xlu1 %v8385_v53, %s14658_s11 }
 0x715   : > { %v2006_v40 = vsel %vm14561_vm10, %v14558_v37, %v14559_v58  ;;  %14564 = vst [vmem:[#allocation181_spill] sm:$0xff] %v10511_v10  ;;  %14565 = vst [vmem:[#allocation333_spill] sm:$0xff] %v10514_v31  ;;  %v1838_v37 = vmul.f32 %v10173_v9, %v1834_v42  ;;  %v14566_v58 = vld [vmem:[#allocation187_spill] sm:$0xff]  ;;  %v1903_v10 = vmul.f32 %v10197_v2, %v1899_v12 }
 0x716   : > { %v2072_v35 = vsel %vm14568_vm5, %v14567_v18, %v14566_v58  ;;  %vm14569_vm3 = vmmov %vm14552_vm11  ;;  %14570 = vst [vmem:[#allocation187_spill] sm:$0xff] %v10529_v5  ;;  %v2009_v42 = vmul.f32 %v10258_v33, %v2006_v40  ;;  %v10540_v1 = vpop.permute.xlu1 %2791  ;;  %v1965_v5 = vadd.f32 %v9028_v39, %v1943_v54  ;;  %v1966_v3 = vadd.f32 %v9031_v19, %v1944_v24 }
 0x717   : > { %vm2725_vm4 = vmand %vm14569_vm3, %vm8770_vm9  ;;  %vm14574_vm9 = vcmp.lt.s32.totalorder %v8777_v20, 45  ;;  %14576 = vst [vmem:[#allocation193_spill] sm:$0xff] %v10557_v17  ;;  %v1841_v39 = vadd.f32 %v1837_v0, %v1771_v4  ;;  %v1842_v19 = vadd.f32 %v1838_v37, %v1772_v6  ;;  %v1904_v54 = vmul.f32 %v10225_v57, %v1900_v41  ;;  %v14646_v51 = vld [vmem:[#allocation179_spill] sm:$0xff]  ;;  %2954 = vrot.lane.b32.xlu0 %v8643_v8, %s14155_s9 }
 0x718   : > { %vm14571_vm0 = vmmov %vm14568_vm5  ;;  %v2138_v28 = vsel %vm14574_vm9, %v14573_v36, %v14572_v38  ;;  %v10554_v40 = vsel %vm2725_vm4, 1.0, %v14425_v21  ;;  %v10569_v24 = vpop.permute.xlu0 %1935  ;;  %v1969_v0 = vmul.f32 %v10230_v32, %v1965_v5  ;;  %v10585_v41 = vstv %s10504_s29  ;;  %3811 = vrot.lane.b32.xlu1 %v8395_v22, %s14658_s11  ;;  %s14835_s29 = smov 81  }
 0x719   : > { %v2070_v59 = vsel %vm14571_vm0, %v14566_v58, %v14567_v18  ;;  %v2075_v18 = vmul.f32 %v10266_v62, %v2072_v35  ;;  %14575 = vst [vmem:[#allocation191_spill] sm:$0xff] %v10554_v40  ;;  %vm14577_vm11 = vmmov %vm14569_vm3  ;;  %v2031_v58 = vadd.f32 %v9047_v15, %v2009_v42  ;;  %v2032_v35 = vadd.f32 %v9050_v16, %v2010_v45  ;;  %v14585_v15 = vld [vmem:[#allocation199_spill] sm:$0xff]  ;;  %v14590_v45 = vld [vmem:[#allocation218_spill] sm:$0xff] }
 0x71a   : > { %vm2780_vm13 = vmand %vm14577_vm11, %vm10078_vm8  ;;  %v2076_v12 = vmul.f32 %v10266_v62, %v2070_v59  ;;  %14579 = vst [vmem:[#allocation198_spill] sm:$0xff] %v10569_v24  ;;  %v2141_v2 = vmul.f32 %v10298_v13, %v2138_v28  ;;  %v10578_v60 = vpop.permute.xlu1 %2842  ;;  %v1907_v6 = vadd.f32 %v1903_v10, %v1841_v39  ;;  %v1970_v16 = vmul.f32 %v14585_v15, %v1966_v3  ;;  %v14587_v10 = vld [vmem:[#allocation202_spill] sm:$0xff]  ;;  %v14637_v24 = vld [vmem:[#allocation76_spill] sm:$0xff] }
 0x71b   : > { %vm14580_vm1 = vmmov %vm14574_vm9  ;;  %v10582_v37 = vsel %vm2780_vm13, 1.0, %v14425_v21  ;;  %14582 = vst [vmem:[#allocation335_spill] sm:$0xff] %v10585_v41  ;;  %v1908_v42 = vadd.f32 %v1904_v54, %v1842_v19  ;;  %v2036_v39 = vmul.f32 %v10255_v56, %v2032_v35  ;;  %vm14597_vm0 = vcmp.lt.s32.totalorder %v8777_v20, 34  ;;  %2958 = vrot.lane.b32.xlu0 %v8653_v14, %s14155_s9  ;;  %s14696_s9 = smov 95  }
 0x71c   : > { %v2136_v33 = vsel %vm14580_vm1, %v14572_v38, %v14573_v36  ;;  %14581 = vst [vmem:[#allocation334_spill] sm:$0xff] %v10582_v37  ;;  %vm14584_vm10 = vmmov %vm14569_vm3  ;;  %v2097_v36 = vadd.f32 %v9063_v48, %v2075_v18  ;;  %v14586_v38 = vld [vmem:[#allocation205_spill] sm:$0xff]  ;;  %vm14588_vm3 = vcmp.lt.s32.totalorder %v8777_v20, 35  ;;  %v2098_v59 = vadd.f32 %v14590_v45, %v2076_v12  ;;  %v10607_v3 = vpop.permute.xlu0 %1997  ;;  %v14595_v12 = vld [vmem:[#allocation216_spill] sm:$0xff]  ;;  %3862 = vrot.lane.b32.xlu1 %v8385_v53, %s14680_s28 }
 0x71d   : > { %vm2835_vm5 = vmand %vm14584_vm10, %vm14525_vm12  ;;  %v2191_v5 = vsel %vm14588_vm3, %v14587_v10, %v14586_v38  ;;  %v2142_v28 = vmul.f32 %v10298_v13, %v2136_v33  ;;  %14591 = vst [vmem:[#allocation199_spill] sm:$0xff] %v10607_v3  ;;  %v10610_v48 = vstv %s10531_s18  ;;  %v2035_v18 = vmul.f32 %v10238_v61, %v2031_v58  ;;  %v14596_v45 = vld [vmem:[#allocation209_spill] sm:$0xff]  ;;  %s14877_s18 = smov 80  }
 0x71e   : > { %vm14589_vm4 = vmmov %vm14588_vm3  ;;  %14592 = vst [vmem:[#allocation205_spill] sm:$0xff] %v10610_v48  ;;  %v10618_v32 = vsel %vm2835_vm5, 1.0, %v14425_v21  ;;  %v10620_v19 = vpop.permute.xlu1 %2846  ;;  %v2197_v54 = vmul.f32 %v10324_v34, %v2191_v5  ;;  %v2246_v13 = vsel %vm14597_vm0, %v14596_v45, %v14595_v12  ;;  %v1973_v35 = vadd.f32 %v1969_v0, %v1907_v6 }
 0x71f   : > { %v2193_v4 = vsel %vm14589_vm4, %v14586_v38, %v14587_v10  ;;  %v14593_v38 = vld [vmem:[#allocation219_spill] sm:$0xff]  ;;  %14594 = vst [vmem:[#allocation202_spill] sm:$0xff] %v10618_v32  ;;  %vm14598_vm9 = vmmov %vm14597_vm0  ;;  %v1974_v5 = vadd.f32 %v1970_v16, %v1908_v42  ;;  %vm14605_vm1 = vcmp.lt.s32.totalorder %v8777_v20, 33  ;;  %v2252_v42 = vmul.f32 %v10345_v47, %v2246_v13  ;;  %3009 = vrot.lane.b32.xlu0 %v8643_v8, %s14164_s24 }
 0x720   : > { %v2163_v10 = vadd.f32 %v14593_v38, %v2141_v2  ;;  %v2196_v33 = vmul.f32 %v10324_v34, %v2193_v4  ;;  %v2248_v58 = vsel %vm14598_vm9, %v14595_v12, %v14596_v45  ;;  %vm14599_vm11 = vmmov %vm14584_vm10  ;;  %v2101_v4 = vmul.f32 %v10263_v11, %v2097_v36  ;;  %v14604_v45 = vld [vmem:[#allocation221_spill] sm:$0xff]  ;;  %v10660_v0 = vpop.permute.xlu0 %2001  ;;  %v14619_v11 = vld [vmem:[#allocation254_spill] sm:$0xff]  ;;  %3866 = vrot.lane.b32.xlu1 %v8395_v22, %s14680_s28 }
 0x721   : > { %vm10638_vm13 = vmand %vm14599_vm11, %vm10129_vm14  ;;  %v10648_v38 = vstv %s10565_s30  ;;  %v2102_v12 = vmul.f32 %v10285_v50, %v2098_v59  ;;  %v2164_v34 = vadd.f32 %v14604_v45, %v2142_v28  ;;  %v2301_v61 = vsel %vm14605_vm1, %v9115_v55, %v9185_v46  ;;  %14607 = vst [vmem:[#allocation219_spill] sm:$0xff] %v10660_v0  ;;  %v14611_v2 = vld [vmem:[#allocation245_spill] sm:$0xff]  ;;  %s14921_s30 = smov 79  }
 0x722   : > { %14603 = vst [vmem:[#allocation218_spill] sm:$0xff] %v10648_v38  ;;  %vm14606_vm10 = vmmov %vm14605_vm1  ;;  %v2039_v16 = vadd.f32 %v2035_v18, %v1973_v35  ;;  %v2251_v36 = vmul.f32 %v10345_v47, %v2248_v58  ;;  %v10664_v59 = vpop.permute.xlu1 %2897  ;;  %v10669_v28 = vsel %vm10638_vm13, 1.0, %v14425_v21  ;;  %v2040_v45 = vadd.f32 %v2036_v39, %v1974_v5  ;;  %v14609_v18 = vld [vmem:[#allocation224_spill] sm:$0xff]  ;;  %v14616_v5 = vld [vmem:[#allocation226_spill] sm:$0xff] }
 0x723   : > { %v2303_v6 = vsel %vm14606_vm10, %v9185_v46, %v9115_v55  ;;  %14608 = vst [vmem:[#allocation216_spill] sm:$0xff] %v10669_v28  ;;  %v2167_v55 = vmul.f32 %v10290_v27, %v2163_v10  ;;  %v2218_v46 = vadd.f32 %v9118_v44, %v2196_v33  ;;  %v2219_v35 = vadd.f32 %v14609_v18, %v2197_v54  ;;  %v14617_v18 = vld [vmem:[#allocation227_spill] sm:$0xff]  ;;  %v14618_v27 = vld [vmem:[#allocation257_spill] sm:$0xff] }
 0x724   : > { %v2306_v13 = vmul.f32 %v10373_v30, %v2303_v6  ;;  %v2307_v58 = vmul.f32 %v10373_v30, %v2301_v61  ;;  %vm14612_vm5 = vcmp.lt.s32.totalorder %v8777_v20, 32  ;;  %v2105_v44 = vadd.f32 %v2101_v4, %v2039_v16  ;;  %v10691_v54 = vpop.permute.xlu0 %2063  ;;  %v14636_v0 = vld [vmem:[#allocation273_spill] sm:$0xff]  ;;  %3013 = vrot.lane.b32.xlu0 %v8653_v14, %s14164_s24  ;;  %3917 = vrot.lane.b32.xlu1 %v8385_v53, %s14696_s9  ;;  %s10908_s24 = sld [smem:[#allocation7 + $0x19]] }
 0x725   : > { %v2356_v47 = vsel %vm14612_vm5, %v14611_v2, %v9322_v23  ;;  %vm14613_vm3 = vmmov %vm14612_vm5  ;;  %v2106_v10 = vadd.f32 %v2102_v12, %v2040_v45  ;;  %v2168_v33 = vmul.f32 %v10295_v25, %v2164_v34  ;;  %14614 = vst [vmem:[#allocation209_spill] sm:$0xff] %v10691_v54  ;;  %v10694_v61 = vstv %s10612_s14  ;;  %v14635_v54 = vld [vmem:[#allocation234_spill] sm:$0xff]  ;;  %s14960_s14 = smov 78  }
 0x726   : > { %v2358_v39 = vsel %vm14613_vm3, %v9322_v23, %v14611_v2  ;;  %14615 = vst [vmem:[#allocation221_spill] sm:$0xff] %v10694_v61  ;;  %v2273_v6 = vadd.f32 %v14616_v5, %v2251_v36  ;;  %v2274_v30 = vadd.f32 %v14617_v18, %v2252_v42  ;;  %vm14620_vm4 = vcmp.lt.s32.totalorder %v8777_v20, 31  ;;  %v10706_v12 = vpop.permute.xlu1 %2901  ;;  %v14623_v42 = vld [vmem:[#allocation171_spill] sm:$0xff]  ;;  %v14624_v18 = vld [vmem:[#allocation229_spill] sm:$0xff] }
 0x727   : > { %v2411_v23 = vsel %vm14620_vm4, %v14619_v11, %v14618_v27  ;;  %vm14621_vm0 = vmmov %vm14620_vm4  ;;  %v2171_v34 = vadd.f32 %v2167_v55, %v2105_v44  ;;  %v2361_v16 = vmul.f32 %v10397_v52, %v2358_v39  ;;  %v2362_v45 = vmul.f32 %v10397_v52, %v2356_v47  ;;  %v14627_v39 = vld [vmem:[#allocation71_spill] sm:$0xff]  ;;  %v14628_v44 = vld [vmem:[#allocation262_spill] sm:$0xff] }
 0x728   : > { %v2413_v4 = vsel %vm14621_vm0, %v14618_v27, %v14619_v11  ;;  %v10713_v36 = vstv %s10642_s16  ;;  %v2222_v2 = vmul.f32 %v14623_v42, %v2218_v46  ;;  %v2223_v5 = vmul.f32 %v10146_v26, %v2219_v35  ;;  %v14625_v11 = vld [vmem:[#allocation230_spill] sm:$0xff]  ;;  %v10731_v35 = vpop.permute.xlu0 %2067  ;;  %3064 = vrot.lane.b32.xlu0 %v8643_v8, %s14178_s5  ;;  %3921 = vrot.lane.b32.xlu1 %v8395_v22, %s14696_s9  ;;  %s14990_s16 = smov 77  }
 0x729   : > { %14622 = vst [vmem:[#allocation224_spill] sm:$0xff] %v10713_v36  ;;  %v2328_v62 = vadd.f32 %v14624_v18, %v2306_v13  ;;  %v2329_v27 = vadd.f32 %v14625_v11, %v2307_v58  ;;  %v2416_v55 = vmul.f32 %v10412_v7, %v2413_v4  ;;  %v2417_v47 = vmul.f32 %v10412_v7, %v2411_v23  ;;  %v14632_v58 = vld [vmem:[#allocation165_spill] sm:$0xff]  ;;  %v14634_v7 = vld [vmem:[#allocation231_spill] sm:$0xff] }
 0x72a   : > { %vm14629_vm9 = vcmp.lt.s32.totalorder %v8777_v20, 30  ;;  %14631 = vst [vmem:[#allocation245_spill] sm:$0xff] %v10731_v35  ;;  %v2172_v13 = vadd.f32 %v2168_v33, %v2106_v10  ;;  %v2277_v18 = vmul.f32 %v14632_v58, %v2273_v6  ;;  %v2278_v11 = vmul.f32 %v10173_v9, %v2274_v30  ;;  %v10735_v4 = vpop.permute.xlu1 %2952  ;;  %v14641_v6 = vld [vmem:[#allocation330_spill] sm:$0xff]  ;;  %v14643_v58 = vld [vmem:[#allocation236_spill] sm:$0xff] }
 0x72b   : > { %v2466_v52 = vsel %vm14629_vm9, %v14628_v44, %v14627_v39  ;;  %vm14630_vm11 = vmmov %vm14629_vm9  ;;  %v10738_v23 = vstv %s10671_s2  ;;  %v2383_v42 = vadd.f32 %v14634_v7, %v2361_v16  ;;  %v2384_v3 = vadd.f32 %v14635_v54, %v2362_v45  ;;  %v14642_v54 = vld [vmem:[#allocation173_spill] sm:$0xff]  ;;  %s12250_s2 = sld [smem:[#allocation7 + $0x28]] }
 0x72c   : > { %v2468_v46 = vsel %vm14630_vm11, %v14627_v39, %v14628_v44  ;;  %14633 = vst [vmem:[#allocation226_spill] sm:$0xff] %v10738_v23  ;;  %vm14638_vm13 = vcmp.lt.s32.totalorder %v8777_v20, 29  ;;  %v2226_v30 = vadd.f32 %v2222_v2, %v2171_v34  ;;  %v2227_v33 = vadd.f32 %v2223_v5, %v2172_v13  ;;  %v14647_v5 = vld [vmem:[#allocation92_spill] sm:$0xff]  ;;  %3068 = vrot.lane.b32.xlu0 %v8653_v14, %s14178_s5  ;;  %s11001_s5 = sld [smem:[#allocation7 + $0x1b]] }
 0x72d   : > { %v2521_v39 = vsel %vm14638_vm13, %v14637_v24, %v14636_v0  ;;  %vm14639_vm1 = vmmov %vm14638_vm13  ;;  %v2471_v44 = vmul.f32 %v14641_v6, %v2468_v46  ;;  %v2472_v7 = vmul.f32 %v14641_v6, %v2466_v52  ;;  %v2332_v16 = vmul.f32 %v14642_v54, %v2328_v62  ;;  %v14648_v46 = vld [vmem:[#allocation88_spill] sm:$0xff]  ;;  %3972 = vrot.lane.b32.xlu1 %v8385_v53, %s14713_s4 }
 0x72e   : > { %v2523_v10 = vsel %vm14639_vm1, %v14636_v0, %v14637_v24  ;;  %v2333_v45 = vmul.f32 %v10225_v57, %v2329_v27  ;;  %v2438_v35 = vadd.f32 %v14643_v58, %v2416_v55  ;;  %v2439_v24 = vadd.f32 %v14644_v63, %v2417_v47  ;;  %v10760_v0 = vpop.permute.xlu0 %2129  ;;  %v10772_v27 = vpop.permute.xlu1 %2956  ;;  %v14651_v47 = vld [vmem:[#allocation323_spill] sm:$0xff]  ;;  %v14654_v54 = vld [vmem:[#allocation288_spill] sm:$0xff] }
 0x72f   : > { %14645 = vst [vmem:[#allocation227_spill] sm:$0xff] %v10760_v0  ;;  %v2526_v34 = vmul.f32 %v14646_v51, %v2523_v10  ;;  %v2527_v2 = vmul.f32 %v14646_v51, %v2521_v39  ;;  %vm14649_vm10 = vcmp.lt.s32.totalorder %v8777_v20, 19  ;;  %v2281_v55 = vadd.f32 %v2277_v18, %v2226_v30  ;;  %v14652_v39 = vld [vmem:[#allocation239_spill] sm:$0xff]  ;;  %v14653_v51 = vld [vmem:[#allocation240_spill] sm:$0xff] }
 0x730   : > { %v2576_v52 = vsel %vm14649_vm10, %v14648_v46, %v14647_v5  ;;  %vm14650_vm5 = vmmov %vm14649_vm10  ;;  %v2282_v63 = vadd.f32 %v2278_v11, %v2227_v33  ;;  %v2387_v13 = vmul.f32 %v14651_v47, %v2383_v42  ;;  %v2388_v58 = vmul.f32 %v14585_v15, %v2384_v3  ;;  %v14655_v0 = vld [vmem:[#allocation284_spill] sm:$0xff]  ;;  %v14659_v11 = vld [vmem:[#allocation331_spill] sm:$0xff]  ;;  %3149 = vrot.lane.b32.xlu0 %v8643_v8, %s14200_s1 }
 0x731   : > { %v2578_v62 = vsel %vm14650_vm5, %v14647_v5, %v14648_v46  ;;  %v2493_v10 = vadd.f32 %v14652_v39, %v2471_v44  ;;  %v2494_v6 = vadd.f32 %v14653_v51, %v2472_v7  ;;  %vm14656_vm3 = vcmp.lt.s32.totalorder %v8777_v20, 18  ;;  %v14661_v44 = vld [vmem:[#allocation328_spill] sm:$0xff]  ;;  %v14662_v39 = vld [vmem:[#allocation242_spill] sm:$0xff]  ;;  %3976 = vrot.lane.b32.xlu1 %v8395_v22, %s14713_s4 }
 0x732   : > { %v2631_v5 = vsel %vm14656_vm3, %v14655_v0, %v14654_v54  ;;  %vm14657_vm4 = vmmov %vm14656_vm3  ;;  %v2336_v3 = vadd.f32 %v2332_v16, %v2281_v55  ;;  %v2337_v42 = vadd.f32 %v2333_v45, %v2282_v63  ;;  %v2581_v30 = vmul.f32 %v14659_v11, %v2578_v62  ;;  %v10792_v51 = vpop.permute.xlu0 %2133  ;;  %v14664_v45 = vld [vmem:[#allocation311_spill] sm:$0xff]  ;;  %v14665_v62 = vld [vmem:[#allocation297_spill] sm:$0xff] }
 0x733   : > { %v2633_v18 = vsel %vm14657_vm4, %v14654_v54, %v14655_v0  ;;  %v2582_v33 = vmul.f32 %v14659_v11, %v2576_v52  ;;  %14660 = vst [vmem:[#allocation257_spill] sm:$0xff] %v10792_v51  ;;  %v2442_v7 = vmul.f32 %v14661_v44, %v2438_v35  ;;  %v2443_v46 = vmul.f32 %v10255_v56, %v2439_v24  ;;  %v10798_v54 = vpop.permute.xlu1 %3007  ;;  %v14669_v63 = vld [vmem:[#allocation246_spill] sm:$0xff]  ;;  %v14677_v44 = vld [vmem:[#allocation249_spill] sm:$0xff] }
 0x734   : > { %v2548_v47 = vadd.f32 %v14662_v39, %v2526_v34  ;;  %v2549_v21 = vadd.f32 %v14663_v43, %v2527_v2  ;;  %v2636_v0 = vmul.f32 %v10508_v29, %v2633_v18  ;;  %v2637_v16 = vmul.f32 %v10508_v29, %v2631_v5  ;;  %v14668_v34 = vld [vmem:[#allocation329_spill] sm:$0xff]  ;;  %v14670_v18 = vld [vmem:[#allocation248_spill] sm:$0xff]  ;;  %v14671_v29 = vld [vmem:[#allocation327_spill] sm:$0xff]  ;;  %3153 = vrot.lane.b32.xlu0 %v8653_v14, %s14200_s1  ;;  %s11082_s1 = sld [smem:[#allocation7 + $0x1c]] }
 0x735   : > { %vm14666_vm0 = vcmp.lt.s32.totalorder %v8777_v20, 17  ;;  %v2391_v43 = vadd.f32 %v2387_v13, %v2336_v3  ;;  %v2392_v24 = vadd.f32 %v2388_v58, %v2337_v42  ;;  %v2497_v2 = vmul.f32 %v14668_v34, %v2493_v10  ;;  %v14672_v11 = vld [vmem:[#allocation322_spill] sm:$0xff]  ;;  %4027 = vrot.lane.b32.xlu1 %v8385_v53, %s14734_s13 }
 0x736   : > { %v2686_v52 = vsel %vm14666_vm0, %v14665_v62, %v14664_v45  ;;  %vm14667_vm9 = vmmov %vm14666_vm0  ;;  %v2498_v55 = vmul.f32 %v10285_v50, %v2494_v6  ;;  %v2603_v5 = vadd.f32 %v14669_v63, %v2581_v30  ;;  %v2604_v39 = vadd.f32 %v14670_v18, %v2582_v33  ;;  %v10826_v58 = vpop.permute.xlu0 %2184  ;;  %v14675_v33 = vld [vmem:[#allocation177_spill] sm:$0xff]  ;;  %v14676_v18 = vld [vmem:[#allocation39_spill] sm:$0xff] }
 0x737   : > { %v2688_v35 = vsel %vm14667_vm9, %v14664_v45, %v14665_v62  ;;  %vm14673_vm11 = vcmp.lt.s32.totalorder %v8777_v20, 16  ;;  %v2446_v6 = vadd.f32 %v2442_v7, %v2391_v43  ;;  %v2447_v10 = vadd.f32 %v2443_v46, %v2392_v24  ;;  %v3012_v30 = vpop.permute.xlu1 %3011  ;;  %v14681_v46 = vld [vmem:[#allocation206_spill] sm:$0xff]  ;;  %v14683_v24 = vld [vmem:[#allocation251_spill] sm:$0xff] }
 0x738   : > { %v2741_v45 = vsel %vm14673_vm11, %v14672_v11, %v14671_v29  ;;  %vm14674_vm13 = vmmov %vm14673_vm11  ;;  %v2691_v3 = vmul.f32 %v10514_v31, %v2688_v35  ;;  %v2692_v42 = vmul.f32 %v10514_v31, %v2686_v52  ;;  %v2552_v62 = vmul.f32 %v14675_v33, %v2548_v47  ;;  %v14682_v35 = vld [vmem:[#allocation45_spill] sm:$0xff]  ;;  %3204 = vrot.lane.b32.xlu0 %v8643_v8, %s14233_s0 }
 0x739   : > { %v2743_v13 = vsel %vm14674_vm13, %v14671_v29, %v14672_v11  ;;  %v2553_v63 = vmul.f32 %v10295_v25, %v2549_v21  ;;  %v2658_v34 = vadd.f32 %v14676_v18, %v2636_v0  ;;  %v2659_v51 = vadd.f32 %v14677_v44, %v2637_v16  ;;  %4031 = vrot.lane.b32.xlu1 %v8395_v22, %s14734_s13 }
 0x73a   : > { %v2746_v29 = vmul.f32 %v10557_v17, %v2743_v13  ;;  %v2747_v11 = vmul.f32 %v10557_v17, %v2741_v45  ;;  %vm14678_vm1 = vcmp.lt.s32.totalorder %v8777_v20, 15  ;;  %v2501_v47 = vadd.f32 %v2497_v2, %v2446_v6  ;;  %v10850_v52 = vpop.permute.xlu0 %2188  ;;  %v14686_v6 = vld [vmem:[#allocation207_spill] sm:$0xff]  ;;  %v14807_v17 = vld [vmem:[#allocation220_spill] sm:$0xff] }
 0x73b   : > { %v2796_v7 = vsel %vm14678_vm1, %v10490_v49, %v10540_v1  ;;  %vm14679_vm10 = vmmov %vm14678_vm1  ;;  %v2502_v44 = vadd.f32 %v2498_v55, %v2447_v10  ;;  %v2607_v0 = vmul.f32 %v14681_v46, %v2603_v5  ;;  %v2608_v16 = vmul.f32 %v10146_v26, %v2604_v39  ;;  %v3063_v2 = vpop.permute.xlu1 %3062 }
 0x73c   : > { %v2798_v21 = vsel %vm14679_vm10, %v10540_v1, %v10490_v49  ;;  %v2713_v43 = vadd.f32 %v14682_v35, %v2691_v3  ;;  %v2714_v45 = vadd.f32 %v14683_v24, %v2692_v42  ;;  %vm14684_vm5 = vcmp.lt.s32.totalorder %v8777_v20, 14  ;;  %v14687_v42 = vld [vmem:[#allocation49_spill] sm:$0xff]  ;;  %v14688_v35 = vld [vmem:[#allocation48_spill] sm:$0xff]  ;;  %3208 = vrot.lane.b32.xlu0 %v8653_v14, %s14233_s0  ;;  %s11163_s0 = sld [smem:[#allocation7 + $0x1d]] }
 0x73d   : > { %v2851_v49 = vsel %vm14684_vm5, %v10578_v60, %v10620_v19  ;;  %vm14685_vm3 = vmmov %vm14684_vm5  ;;  %v2556_v55 = vadd.f32 %v2552_v62, %v2501_v47  ;;  %v2557_v5 = vadd.f32 %v2553_v63, %v2502_v44  ;;  %v2801_v39 = vmul.f32 %v10585_v41, %v2798_v21  ;;  %v14692_v44 = vld [vmem:[#allocation256_spill] sm:$0xff]  ;;  %4082 = vrot.lane.b32.xlu1 %v8385_v53, %s14761_s8 }
 0x73e   : > { %v2853_v1 = vsel %vm14685_vm3, %v10620_v19, %v10578_v60  ;;  %v2802_v13 = vmul.f32 %v10585_v41, %v2796_v7  ;;  %v2662_v10 = vmul.f32 %v14686_v6, %v2658_v34  ;;  %v2663_v3 = vmul.f32 %v10173_v9, %v2659_v51  ;;  %v10882_v34 = vpop.permute.xlu0 %2239  ;;  %v14770_v6 = vld [vmem:[#allocation118_spill] sm:$0xff] }
 0x73f   : > { %v2768_v18 = vadd.f32 %v14687_v42, %v2746_v29  ;;  %v2769_v24 = vadd.f32 %v14688_v35, %v2747_v11  ;;  %v2856_v60 = vmul.f32 %v10610_v48, %v2853_v1  ;;  %v2857_v19 = vmul.f32 %v10610_v48, %v2851_v49  ;;  %v14691_v11 = vld [vmem:[#allocation181_spill] sm:$0xff]  ;;  %v3067_v47 = vpop.permute.xlu1 %3066 }
 0x740   : > { %vm14689_vm4 = vcmp.lt.s32.totalorder %v8777_v20, 13  ;;  %v2611_v63 = vadd.f32 %v2607_v0, %v2556_v55  ;;  %v2612_v29 = vadd.f32 %v2608_v16, %v2557_v5  ;;  %v2717_v7 = vmul.f32 %v14691_v11, %v2713_v43  ;;  %v14693_v1 = vld [vmem:[#allocation53_spill] sm:$0xff]  ;;  %3259 = vrot.lane.b32.xlu0 %v8643_v8, %s14274_s3 }
 0x741   : > { %v2906_v62 = vsel %vm14689_vm4, %v10664_v59, %v10706_v12  ;;  %vm14690_vm0 = vmmov %vm14689_vm4  ;;  %v2718_v21 = vmul.f32 %v10225_v57, %v2714_v45  ;;  %v2823_v49 = vadd.f32 %v14692_v44, %v2801_v39  ;;  %v2824_v42 = vadd.f32 %v14693_v1, %v2802_v13  ;;  %v14697_v5 = vld [vmem:[#allocation57_spill] sm:$0xff]  ;;  %v14698_v13 = vld [vmem:[#allocation55_spill] sm:$0xff]  ;;  %4086 = vrot.lane.b32.xlu1 %v8395_v22, %s14761_s8 }
 0x742   : > { %v2908_v51 = vsel %vm14690_vm0, %v10706_v12, %v10664_v59  ;;  %vm14694_vm9 = vcmp.lt.s32.totalorder %v8777_v20, 3  ;;  %v2666_v12 = vadd.f32 %v2662_v10, %v2611_v63  ;;  %v2667_v0 = vadd.f32 %v2663_v3, %v2612_v29  ;;  %v14701_v29 = vld [vmem:[#allocation59_spill] sm:$0xff] }
 0x743   : > { %v2961_v35 = vsel %vm14694_vm9, %v10735_v4, %v10772_v27  ;;  %vm14695_vm11 = vmmov %vm14694_vm9  ;;  %v2911_v16 = vmul.f32 %v10648_v38, %v2908_v51  ;;  %v2912_v43 = vmul.f32 %v10648_v38, %v2906_v62  ;;  %v2772_v45 = vmul.f32 %v10554_v40, %v2768_v18  ;;  %v14702_v1 = vld [vmem:[#allocation259_spill] sm:$0xff] }
 0x744   : > { %v2963_v59 = vsel %vm14695_vm11, %v10772_v27, %v10735_v4  ;;  %v2773_v55 = vmul.f32 %v14585_v15, %v2769_v24  ;;  %v2878_v39 = vadd.f32 %v14697_v5, %v2856_v60  ;;  %v2879_v4 = vadd.f32 %v14698_v13, %v2857_v19  ;;  %v10906_v27 = vpop.permute.xlu0 %2243  ;;  %v3148_v60 = vpop.permute.xlu1 %3147  ;;  %3263 = vrot.lane.b32.xlu0 %v8653_v14, %s14274_s3  ;;  %s11276_s3 = sld [smem:[#allocation7 + $0x1e]] }
 0x745   : > { %vm3650_vm13 = vcmp.lt.s32.totalorder %v8777_v20, 109  ;;  %v2966_v10 = vmul.f32 %v10694_v61, %v2963_v59  ;;  %v2967_v3 = vmul.f32 %v10694_v61, %v2961_v35  ;;  %vm14699_vm1 = vcmp.lt.s32.totalorder %v8777_v20, 2  ;;  %4137 = vrot.lane.b32.xlu1 %v8385_v53, %s14793_s20 }
 0x746   : > { %v3016_v18 = vsel %vm14699_vm1, %v10798_v54, %v3012_v30  ;;  %vm14700_vm10 = vmmov %vm14699_vm1  ;;  %v2721_v19 = vadd.f32 %v2717_v7, %v2666_v12  ;;  %v2722_v62 = vadd.f32 %v2718_v21, %v2667_v0  ;;  %v2827_v51 = vmul.f32 %v10582_v37, %v2823_v49 }
 0x747   : > { %v3018_v24 = vsel %vm14700_vm10, %v3012_v30, %v10798_v54  ;;  %v2828_v63 = vmul.f32 %v10255_v56, %v2824_v42  ;;  %v2933_v44 = vadd.f32 %v14701_v29, %v2911_v16  ;;  %v2934_v35 = vadd.f32 %v14702_v1, %v2912_v43  ;;  %v14705_v16 = vld [vmem:[#allocation65_spill] sm:$0xff] }
 0x748   : > { %vm14703_vm5 = vcmp.lt.s32.totalorder %v8777_v20, 1  ;;  %v2776_v30 = vadd.f32 %v2772_v45, %v2721_v19  ;;  %v2777_v7 = vadd.f32 %v2773_v55, %v2722_v62  ;;  %v3021_v21 = vmul.f32 %v10713_v36, %v3018_v24  ;;  %v10933_v42 = vpop.permute.xlu0 %2294  ;;  %v3152_v5 = vpop.permute.xlu1 %3151  ;;  %v14707_v45 = vld [vmem:[#allocation106_spill] sm:$0xff]  ;;  %v14708_v55 = vld [vmem:[#allocation104_spill] sm:$0xff]  ;;  %3314 = vrot.lane.b32.xlu0 %v8643_v8, %s14314_s23 }
 0x749   : > { %v3071_v59 = vsel %vm14703_vm5, %v3063_v2, %v3067_v47  ;;  %vm14704_vm3 = vmmov %vm14703_vm5  ;;  %v3022_v49 = vmul.f32 %v10713_v36, %v3016_v18  ;;  %v2882_v12 = vmul.f32 %v10618_v32, %v2878_v39  ;;  %v2883_v0 = vmul.f32 %v10285_v50, %v2879_v4  ;;  %v14710_v18 = vld [vmem:[#allocation301_spill] sm:$0xff]  ;;  %v14711_v24 = vld [vmem:[#allocation210_spill] sm:$0xff]  ;;  %4141 = vrot.lane.b32.xlu1 %v8395_v22, %s14793_s20 }
 0x74a   : > { %v3073_v54 = vsel %vm14704_vm3, %v3067_v47, %v3063_v2  ;;  %v2988_v43 = vadd.f32 %v14705_v16, %v2966_v10  ;;  %v14706_v2 = vld [vmem:[#allocation260_spill] sm:$0xff]  ;;  %vm14709_vm4 = vcmp.lt.s32.totalorder %v8777_v20, 16  ;;  %v10947_v19 = vmul.f32 %v14711_v24, %v14710_v18  ;;  %v14722_v32 = vld [vmem:[#allocation266_spill] sm:$0xff] }
 0x74b   : > { %v2989_v47 = vadd.f32 %v14706_v2, %v2967_v3  ;;  %v2760_v13 = vsel %vm14709_vm4, %v14708_v55, %v14707_v45  ;;  %vm13883_vm0 = vcmp.lt.s32.totalorder %v8777_v20, 99  ;;  %v3076_v39 = vmul.f32 %v10738_v23, %v3073_v54  ;;  %v14717_v54 = vld [vmem:[#allocation264_spill] sm:$0xff] }
 0x74c   : > { %14712 = vst [vmem:[#allocation254_spill] sm:$0xff] %v10947_v19  ;;  %v3077_v4 = vmul.f32 %v10738_v23, %v3071_v59  ;;  %v2831_v10 = vadd.f32 %v2827_v51, %v2776_v30  ;;  %v2832_v3 = vadd.f32 %v2828_v63, %v2777_v7  ;;  %v2937_v62 = vmul.f32 %v10669_v28, %v2933_v44  ;;  %v14718_v59 = vld [vmem:[#allocation69_spill] sm:$0xff]  ;;  %v10968_v51 = vpop.permute.xlu0 %2298  ;;  %v14720_v30 = vld [vmem:[#allocation292_spill] sm:$0xff]  ;;  %v3203_v28 = vpop.permute.xlu1 %3202 }
 0x74d   : > { %v2938_v29 = vmul.f32 %v10295_v25, %v2934_v35  ;;  %v14714_v1 = vmov 0.0   ;;  %v3043_v45 = vadd.f32 %v14717_v54, %v3021_v21  ;;  %v3044_v55 = vadd.f32 %v14718_v59, %v3022_v49  ;;  %v14721_v23 = vld [vmem:[#allocation265_spill] sm:$0xff]  ;;  %3318 = vrot.lane.b32.xlu0 %v8653_v14, %s14314_s23  ;;  %4192 = vrot.lane.b32.xlu1 %v8385_v53, %s14835_s29  ;;  %s11388_s23 = sld [smem:[#allocation7 + $0x1f]] }
 0x74e   : > { %v10961_v2 = vsel %vm10006_vm15, 1.0, %v14714_v1  ;;  %v10966_v18 = vstv %s10908_s24  ;;  %v2886_v63 = vadd.f32 %v2882_v12, %v2831_v10  ;;  %v2887_v44 = vadd.f32 %v2883_v0, %v2832_v3  ;;  %s12424_s24 = sld [smem:[#allocation7 + $0x2f]] }
 0x74f   : > { %14716 = vst [vmem:[#allocation229_spill] sm:$0xff] %v10961_v2  ;;  %14719 = vst [vmem:[#allocation230_spill] sm:$0xff] %v10966_v18  ;;  %v2992_v35 = vmul.f32 %v14720_v30, %v2988_v43  ;;  %v2993_v7 = vmul.f32 %v10146_v26, %v2989_v47  ;;  %v3098_v16 = vadd.f32 %v14721_v23, %v3076_v39  ;;  %vm14723_vm15 = vcmp.lt.s32.totalorder %v8777_v20, 127  ;;  %v14729_v39 = vld [vmem:[#allocation107_spill] sm:$0xff] }
 0x750   : > { %v3099_v36 = vadd.f32 %v14722_v32, %v3077_v4  ;;  %v3156_v21 = vsel %vm14723_vm15, %v3148_v60, %v3152_v5  ;;  %vm14724_vm9 = vmmov %vm14723_vm15  ;;  %v10981_v12 = vmul.f32 %v14711_v24, %v2760_v13  ;;  %v10986_v43 = vsel %vm10022_vm2, 1.0, %v14714_v1  ;;  %v14728_v32 = vld [vmem:[#allocation109_spill] sm:$0xff]  ;;  %v10996_v24 = vpop.permute.xlu0 %2349  ;;  %v3207_v54 = vpop.permute.xlu1 %3206 }
 0x751   : > { %v3158_v49 = vsel %vm14724_vm9, %v3152_v5, %v3148_v60  ;;  %14727 = vst [vmem:[#allocation262_spill] sm:$0xff] %v10986_v43  ;;  %v2941_v23 = vadd.f32 %v2937_v62, %v2886_v63  ;;  %v2942_v47 = vadd.f32 %v2938_v29, %v2887_v44  ;;  %v3669_v60 = vsel %vm3650_vm13, %v14729_v39, %v14728_v32 }
 0x752   : > { %14725 = vst [vmem:[#allocation71_spill] sm:$0xff] %v10981_v12  ;;  %v3047_v5 = vmul.f32 %v10961_v2, %v3043_v45  ;;  %v3048_v13 = vmul.f32 %v10173_v9, %v3044_v55  ;;  %v10999_v4 = vstv %s10935_s17  ;;  %vm13828_vm2 = vcmp.lt.s32.totalorder %v8777_v20, 98  ;;  %v14768_v12 = vld [vmem:[#allocation214_spill] sm:$0xff]  ;;  %3369 = vrot.lane.b32.xlu0 %v8643_v8, %s14010_s22  ;;  %4196 = vrot.lane.b32.xlu1 %v8395_v22, %s14835_s29  ;;  %s12586_s17 = sld [smem:[#allocation7 + $0x30]] }
 0x753   : > { %14730 = vst [vmem:[#allocation231_spill] sm:$0xff] %v10999_v4  ;;  %v2996_v10 = vadd.f32 %v2992_v35, %v2941_v23  ;;  %v2997_v3 = vadd.f32 %v2993_v7, %v2942_v47  ;;  %v3161_v62 = vmul.f32 %v10966_v18, %v3156_v21  ;;  %v3162_v29 = vmul.f32 %v10966_v18, %v3158_v49  ;;  %v14733_v35 = vld [vmem:[#allocation252_spill] sm:$0xff]  ;;  %v14735_v21 = vld [vmem:[#allocation110_spill] sm:$0xff]  ;;  %v14742_v18 = vld [vmem:[#allocation267_spill] sm:$0xff] }
 0x754   : > { %v3102_v59 = vmul.f32 %v10986_v43, %v3098_v16  ;;  %v3103_v45 = vmul.f32 %v10225_v57, %v3099_v36  ;;  %vm14731_vm11 = vcmp.lt.s32.totalorder %v8777_v20, 126  ;;  %v3671_v44 = vsel %vm3650_vm13, %v14728_v32, %v14729_v39  ;;  %v11033_v32 = vpop.permute.xlu0 %2353  ;;  %v14739_v39 = vld [vmem:[#allocation113_spill] sm:$0xff]  ;;  %v3258_v61 = vpop.permute.xlu1 %3257 }
 0x755   : > { %v3211_v55 = vsel %vm14731_vm11, %v3203_v28, %v3207_v54  ;;  %vm14732_vm1 = vmmov %vm14731_vm11  ;;  %v11019_v7 = vmul.f32 %v14733_v35, %v3669_v60  ;;  %vm14737_vm10 = vcmp.lt.s32.totalorder %v8777_v20, 15  ;;  %v3051_v23 = vadd.f32 %v3047_v5, %v2996_v10  ;;  %v14740_v60 = vld [vmem:[#allocation111_spill] sm:$0xff] }
 0x756   : > { %v3213_v63 = vsel %vm14732_vm1, %v3207_v54, %v3203_v28  ;;  %v3216_v16 = vmul.f32 %v10999_v4, %v3211_v55  ;;  %v14736_v28 = vld [vmem:[#allocation108_spill] sm:$0xff]  ;;  %vm14738_vm5 = vmmov %vm14737_vm10  ;;  %v3052_v47 = vadd.f32 %v3048_v13, %v2997_v3  ;;  %v3724_v54 = vsel %vm13883_vm0, %v14740_v60, %v14739_v39  ;;  %3373 = vrot.lane.b32.xlu0 %v8653_v14, %s14010_s22  ;;  %s11492_s22 = sld [smem:[#allocation7 + $0x20]] }
 0x757   : > { %v3217_v36 = vmul.f32 %v10999_v4, %v3213_v63  ;;  %v2815_v49 = vsel %vm14737_vm10, %v14736_v28, %v14735_v21  ;;  %v2817_v0 = vsel %vm14738_vm5, %v14735_v21, %v14736_v28  ;;  %v3726_v55 = vsel %vm13883_vm0, %v14739_v39, %v14740_v60  ;;  %v14741_v63 = vld [vmem:[#allocation75_spill] sm:$0xff]  ;;  %v14749_v39 = vld [vmem:[#allocation81_spill] sm:$0xff]  ;;  %4247 = vrot.lane.b32.xlu1 %v8385_v53, %s14877_s18 }
 0x758   : > { %v3183_v4 = vadd.f32 %v14741_v63, %v3161_v62  ;;  %v3184_v37 = vadd.f32 %v14742_v18, %v3162_v29  ;;  %v11046_v5 = vmul.f32 %v14733_v35, %v3671_v44  ;;  %vm13801_vm3 = vcmp.lt.s32.totalorder %v8777_v20, 97  ;;  %v14745_v62 = vld [vmem:[#allocation213_spill] sm:$0xff]  ;;  %v14748_v29 = vld [vmem:[#allocation271_spill] sm:$0xff]  ;;  %v14750_v63 = vld [vmem:[#allocation52_spill] sm:$0xff] }
 0x759   : > { %v11052_v10 = vsel %vm10078_vm8, 1.0, %v14714_v1  ;;  %v3106_v3 = vadd.f32 %v3102_v59, %v3051_v23  ;;  %v3107_v21 = vadd.f32 %v3103_v45, %v3052_v47  ;;  %v11057_v28 = vmul.f32 %v14745_v62, %v2817_v0 }
 0x75a   : > { %14744 = vst [vmem:[#allocation234_spill] sm:$0xff] %v11052_v10  ;;  %v11060_v18 = vmul.f32 %v14745_v62, %v2815_v49  ;;  %v3238_v44 = vadd.f32 %v14748_v29, %v3216_v16  ;;  %v3239_v60 = vadd.f32 %v14749_v39, %v3217_v36  ;;  %v11067_v13 = vmul.f32 %v14750_v63, %v3724_v54  ;;  %v11077_v49 = vpop.permute.xlu0 %2404  ;;  %v14754_v16 = vld [vmem:[#allocation112_spill] sm:$0xff]  ;;  %v14755_v36 = vld [vmem:[#allocation114_spill] sm:$0xff]  ;;  %v3262_v62 = vpop.permute.xlu1 %3261 }
 0x75b   : > { %14746 = vst [vmem:[#allocation273_spill] sm:$0xff] %v11057_v28  ;;  %v11070_v59 = vmul.f32 %v14750_v63, %v3726_v55  ;;  %v11075_v0 = vsel %vm14525_vm12, 1.0, %v14714_v1  ;;  %14752 = vst [vmem:[#allocation236_spill] sm:$0xff] %v11077_v49  ;;  %v11080_v23 = vstv %s11001_s5  ;;  %vm14756_vm8 = vcmp.lt.s32.totalorder %v8777_v20, 14  ;;  %v14757_v39 = vld [vmem:[#allocation200_spill] sm:$0xff]  ;;  %v14758_v63 = vld [vmem:[#allocation203_spill] sm:$0xff]  ;;  %3424 = vrot.lane.b32.xlu0 %v8643_v8, %s14015_s25  ;;  %4251 = vrot.lane.b32.xlu1 %v8395_v22, %s14877_s18 }
 0x75c   : > { %14747 = vst [vmem:[#allocation76_spill] sm:$0xff] %v11060_v18  ;;  %14753 = vst [vmem:[#allocation237_spill] sm:$0xff] %v11080_v23  ;;  %v2872_v47 = vsel %vm14756_vm8, %v14755_v36, %v14754_v16  ;;  %vm13816_vm4 = vcmp.lt.s32.totalorder %v8777_v20, 96  ;;  %v3187_v54 = vmul.f32 %v11052_v10, %v3183_v4  ;;  %v3188_v55 = vmul.f32 %v10255_v56, %v3184_v37  ;;  %v14767_v28 = vld [vmem:[#allocation83_spill] sm:$0xff] }
 0x75d   : > { %v11092_v29 = vadd.s32 128, %v8777_v20  ;;  %v3136_v45 = vadd.f32 %v14757_v39, %v3106_v3  ;;  %v3137_v35 = vadd.f32 %v14758_v63, %v3107_v21  ;;  %vm14759_vm12 = vcmp.lt.s32.totalorder %v8777_v20, 125  ;;  %vm14762_vm11 = vmmov %vm14756_vm8  ;;  %v14763_v21 = vld [vmem:[#allocation117_spill] sm:$0xff]  ;;  %v14764_v63 = vld [vmem:[#allocation115_spill] sm:$0xff] }
 0x75e   : > { %v3266_v40 = vsel %vm14759_vm12, %v3258_v61, %v3262_v62  ;;  %vm14760_vm15 = vmmov %vm14759_vm12  ;;  %vm13815_vm9 = vcmp.lt.s32.totalorder %v8777_v20, 95  ;;  %v3242_v37 = vmul.f32 %v11075_v0, %v3238_v44  ;;  %v3243_v4 = vmul.f32 %v10285_v50, %v3239_v60  ;;  %v11126_v60 = vpop.permute.xlu0 %2408  ;;  %v3313_v48 = vpop.permute.xlu1 %3312 }
 0x75f   : > { %v3268_v38 = vsel %vm14760_vm15, %v3262_v62, %v3258_v61  ;;  %v3271_v18 = vmul.f32 %v11080_v23, %v3266_v40  ;;  %v2870_v61 = vsel %vm14762_vm11, %v14754_v16, %v14755_v36  ;;  %v3779_v62 = vsel %vm13828_vm2, %v14764_v63, %v14763_v21  ;;  %v14766_v16 = vld [vmem:[#allocation85_spill] sm:$0xff]  ;;  %3428 = vrot.lane.b32.xlu0 %v8653_v14, %s14015_s25  ;;  %s11596_s25 = sld [smem:[#allocation7 + $0x21]] }
 0x760   : > { %v3272_v3 = vmul.f32 %v11080_v23, %v3268_v38  ;;  %v3781_v40 = vsel %vm13828_vm2, %v14763_v21, %v14764_v63  ;;  %v11124_v44 = vsel %vm10129_vm14, 1.0, %v14714_v1  ;;  %v3191_v39 = vadd.f32 %v3187_v54, %v3136_v45  ;;  %v14771_v21 = vld [vmem:[#allocation116_spill] sm:$0xff]  ;;  %v14780_v38 = vld [vmem:[#allocation121_spill] sm:$0xff]  ;;  %4302 = vrot.lane.b32.xlu1 %v8385_v53, %s14921_s30 }
 0x761   : > { %v3192_v23 = vadd.f32 %v3188_v55, %v3137_v35  ;;  %v3293_v36 = vadd.f32 %v14766_v16, %v3271_v18  ;;  %v11131_v19 = vmul.f32 %v14768_v12, %v2872_v47  ;;  %vm14772_vm1 = vcmp.lt.s32.totalorder %v8777_v20, 13  ;;  %v14775_v45 = vld [vmem:[#allocation56_spill] sm:$0xff] }
 0x762   : > { %v3294_v11 = vadd.f32 %v14767_v28, %v3272_v3  ;;  %v2925_v63 = vsel %vm14772_vm1, %v14771_v21, %v14770_v6  ;;  %vm14773_vm14 = vmmov %vm14772_vm1  ;;  %vm1677_vm10 = vcmp.lt.s32.totalorder %v11092_v29, 240  ;;  %v3246_v35 = vadd.f32 %v3242_v37, %v3191_v39  ;;  %v11158_v37 = vpop.permute.xlu0 %2459 }
 0x763   : > { %14769 = vst [vmem:[#allocation92_spill] sm:$0xff] %v11131_v19  ;;  %v2927_v54 = vsel %vm14773_vm14, %v14770_v6, %v14771_v21  ;;  %v3247_v28 = vadd.f32 %v3243_v4, %v3192_v23  ;;  %v3297_v18 = vmul.f32 %v11124_v44, %v3293_v36  ;;  %v11149_v55 = vmul.f32 %v14768_v12, %v2870_v61  ;;  %v14781_v12 = vld [vmem:[#allocation119_spill] sm:$0xff]  ;;  %v3317_v36 = vpop.permute.xlu1 %3316 }
 0x764   : > { %v3298_v47 = vmul.f32 %v10295_v25, %v3294_v11  ;;  %v11152_v3 = vmul.f32 %v14775_v45, %v3779_v62  ;;  %v11155_v6 = vmul.f32 %v14775_v45, %v3781_v40  ;;  %vm13827_vm5 = vcmp.lt.s32.totalorder %v8777_v20, 94  ;;  %14776 = vst [vmem:[#allocation239_spill] sm:$0xff] %v11158_v37  ;;  %v14778_v11 = vld [vmem:[#allocation217_spill] sm:$0xff]  ;;  %v14782_v40 = vld [vmem:[#allocation103_spill] sm:$0xff]  ;;  %3479 = vrot.lane.b32.xlu0 %v8643_v8, %s14020_s26 }
 0x765   : > { %14774 = vst [vmem:[#allocation88_spill] sm:$0xff] %v11149_v55  ;;  %v11161_v23 = vstv %s11082_s1  ;;  %v11166_v4 = vmul.f32 %v14778_v11, %v2927_v54  ;;  %v3834_v61 = vsel %vm13801_vm3, %v14781_v12, %v14780_v38  ;;  %v3301_v62 = vadd.f32 %v3297_v18, %v3246_v35  ;;  %v14789_v18 = vld [vmem:[#allocation122_spill] sm:$0xff]  ;;  %v14796_v45 = vld [vmem:[#allocation125_spill] sm:$0xff]  ;;  %v14804_v19 = vld [vmem:[#allocation275_spill] sm:$0xff]  ;;  %4306 = vrot.lane.b32.xlu1 %v8395_v22, %s14921_s30  ;;  %s15434_s1 = sld [smem:[#allocation342_spill]] }
 0x766   : > { %14777 = vst [vmem:[#allocation240_spill] sm:$0xff] %v11161_v23  ;;  %v3302_v39 = vadd.f32 %v3298_v47, %v3247_v28  ;;  %vm14783_vm8 = vnez %v14782_v40  ;;  %v11181_v21 = vmul.f32 %v14778_v11, %v2925_v63  ;;  %v3836_v54 = vsel %vm13801_vm3, %v14780_v38, %v14781_v12  ;;  %v14790_v47 = vld [vmem:[#allocation120_spill] sm:$0xff]  ;;  %v14811_v37 = vld [vmem:[#allocation127_spill] sm:$0xff] }
 0x767   : > { %14779 = vst [vmem:[#allocation288_spill] sm:$0xff] %v11166_v4  ;;  %vm11176_vm12 = vmand %vm1677_vm10, %vm14783_vm8  ;;  %vm13826_vm15 = vcmp.lt.s32.totalorder %v8777_v20, 93  ;;  %vm14787_vm11 = vcmp.lt.s32.totalorder %v8777_v20, 115  ;;  %vm14791_vm14 = vcmp.lt.s32.totalorder %v8777_v20, 3  ;;  %v3368_v46 = vpop.permute.xlu1 %3367  ;;  %v11594_v49 = vstv %s11492_s22  ;;  %s15439_s22 = sld [smem:[#allocation19_spill]] }
 0x768   : > { %14786 = vst [vmem:[#allocation284_spill] sm:$0xff] %v11181_v21  ;;  %v3321_v35 = vsel %vm14787_vm11, %v3313_v48, %v3317_v36  ;;  %vm14788_vm1 = vmmov %vm14787_vm11  ;;  %v2980_v63 = vsel %vm14791_vm14, %v14790_v47, %v14789_v18  ;;  %v14797_v21 = vld [vmem:[#allocation123_spill] sm:$0xff]  ;;  %3483 = vrot.lane.b32.xlu0 %v8653_v14, %s14020_s26  ;;  %s11679_s26 = sld [smem:[#allocation7 + $0x23]] }
 0x769   : > { %v3323_v28 = vsel %vm14788_vm1, %v3317_v36, %v3313_v48  ;;  %vm14792_vm3 = vmmov %vm14791_vm14  ;;  %v3326_v38 = vmul.f32 %v11161_v23, %v3321_v35  ;;  %v14794_v48 = vld [vmem:[#allocation62_spill] sm:$0xff]  ;;  %v3889_v4 = vsel %vm13816_vm4, %v14797_v21, %v14796_v45  ;;  %v11220_v35 = vsel %vm11176_vm12, 1.0, %v14714_v1  ;;  %14948 = vst [vmem:[#allocation200_spill] sm:$0xff] %v11594_v49  ;;  %4357 = vrot.lane.b32.xlu1 %v8385_v53, %s14960_s14 }
 0x76a   : > { %v2982_v11 = vsel %vm14792_vm3, %v14789_v18, %v14790_v47  ;;  %v3327_v12 = vmul.f32 %v11161_v23, %v3323_v28  ;;  %v11207_v36 = vmul.f32 %v14794_v48, %v3834_v61  ;;  %v3891_v18 = vsel %vm13816_vm4, %v14796_v45, %v14797_v21  ;;  %14798 = vst [vmem:[#allocation243_spill] sm:$0xff] %v11220_v35  ;;  %v11222_v28 = vpop.permute.xlu0 %2463  ;;  %v14800_v47 = vld [vmem:[#allocation126_spill] sm:$0xff]  ;;  %v14801_v61 = vld [vmem:[#allocation124_spill] sm:$0xff] }
 0x76b   : > { %14799 = vst [vmem:[#allocation311_spill] sm:$0xff] %v11222_v28  ;;  %vm14802_vm3 = vcmp.lt.s32.totalorder %v8777_v20, 2  ;;  %v3348_v41 = vadd.f32 %v14804_v19, %v3326_v38  ;;  %v14805_v45 = vld [vmem:[#allocation276_spill] sm:$0xff]  ;;  %v11235_v16 = vmul.f32 %v14794_v48, %v3836_v54  ;;  %v11238_v33 = vmul.f32 %v14807_v17, %v2982_v11  ;;  %v14812_v19 = vld [vmem:[#allocation66_spill] sm:$0xff] }
 0x76c   : > { %14795 = vst [vmem:[#allocation242_spill] sm:$0xff] %v11207_v36  ;;  %v3035_v23 = vsel %vm14802_vm3, %v14801_v61, %v14800_v47  ;;  %vm14803_vm11 = vmmov %vm14802_vm3  ;;  %v3349_v21 = vadd.f32 %v14805_v45, %v3327_v12  ;;  %v11241_v31 = vmul.f32 %v14807_v17, %v2980_v63  ;;  %v14810_v36 = vld [vmem:[#allocation129_spill] sm:$0xff]  ;;  %vm4090_vm12 = vcmp.lt.s32.totalorder %v8777_v20, 83  ;;  %v14815_v12 = vld [vmem:[#allocation222_spill] sm:$0xff]  ;;  %3534 = vrot.lane.b32.xlu0 %v8643_v8, %s14494_s12 }
 0x76d   : > { %v3037_v55 = vsel %vm14803_vm11, %v14800_v47, %v14801_v61  ;;  %14806 = vst [vmem:[#allocation297_spill] sm:$0xff] %v11235_v16  ;;  %14808 = vst [vmem:[#allocation246_spill] sm:$0xff] %v11238_v33  ;;  %v3944_v47 = vsel %vm13815_vm9, %v14811_v37, %v14810_v36  ;;  %v11251_v54 = vmul.f32 %v14812_v19, %v3889_v4  ;;  %vm13856_vm1 = vcmp.lt.s32.totalorder %v8777_v20, 82  ;;  %v14852_v16 = vld [vmem:[#allocation138_spill] sm:$0xff]  ;;  %v14853_v28 = vld [vmem:[#allocation136_spill] sm:$0xff] }
 0x76e   : > { %14809 = vst [vmem:[#allocation248_spill] sm:$0xff] %v11241_v31  ;;  %v3946_v11 = vsel %vm13815_vm9, %v14810_v36, %v14811_v37  ;;  %v3352_v17 = vmul.f32 %v14720_v30, %v3348_v41  ;;  %v3353_v63 = vmul.f32 %v11220_v35, %v3349_v21  ;;  %v11262_v38 = vmul.f32 %v14812_v19, %v3891_v18  ;;  %v11271_v45 = vpop.permute.xlu0 %2514  ;;  %v14820_v41 = vld [vmem:[#allocation67_spill] sm:$0xff]  ;;  %v14822_v21 = vld [vmem:[#allocation128_spill] sm:$0xff]  ;;  %v14823_v18 = vld [vmem:[#allocation130_spill] sm:$0xff]  ;;  %v3372_v35 = vpop.permute.xlu1 %3371 }
 0x76f   : > { %14813 = vst [vmem:[#allocation327_spill] sm:$0xff] %v11251_v54  ;;  %v11265_v61 = vmul.f32 %v14815_v12, %v3037_v55  ;;  %v11268_v4 = vmul.f32 %v14815_v12, %v3035_v23  ;;  %14818 = vst [vmem:[#allocation45_spill] sm:$0xff] %v11271_v45  ;;  %v11274_v37 = vstv %s11163_s0  ;;  %v11279_v36 = vmul.f32 %v14820_v41, %v3944_v47  ;;  %v14825_v23 = vld [vmem:[#allocation295_spill] sm:$0xff]  ;;  %v14847_v31 = vld [vmem:[#allocation93_spill] sm:$0xff] }
 0x770   : > { %14814 = vst [vmem:[#allocation322_spill] sm:$0xff] %v11262_v38  ;;  %14819 = vst [vmem:[#allocation251_spill] sm:$0xff] %v11274_v37  ;;  %vm14824_vm14 = vcmp.lt.s32.totalorder %v8777_v20, 1  ;;  %v3356_v19 = vadd.f32 %v3352_v17, %v3301_v62  ;;  %v3357_v48 = vadd.f32 %v3353_v63, %v3302_v39  ;;  %vm14826_vm3 = vnez %v14825_v23  ;;  %v14833_v17 = vld [vmem:[#allocation133_spill] sm:$0xff]  ;;  %v14834_v63 = vld [vmem:[#allocation131_spill] sm:$0xff]  ;;  %4361 = vrot.lane.b32.xlu1 %v8395_v22, %s14960_s14 }
 0x771   : > { %14816 = vst [vmem:[#allocation39_spill] sm:$0xff] %v11265_v61  ;;  %14817 = vst [vmem:[#allocation249_spill] sm:$0xff] %v11268_v4  ;;  %v3092_v55 = vsel %vm14824_vm14, %v14823_v18, %v14822_v21  ;;  %v11294_v4 = vmul.f32 %v14820_v41, %v3946_v11  ;;  %v3999_v11 = vsel %vm13827_vm5, %v14834_v63, %v14833_v17  ;;  %v14849_v54 = vld [vmem:[#allocation77_spill] sm:$0xff]  ;;  %3538 = vrot.lane.b32.xlu0 %v8653_v14, %s14494_s12  ;;  %s11755_s12 = sld [smem:[#allocation7 + $0x24]] }
 0x772   : > { %14821 = vst [vmem:[#allocation49_spill] sm:$0xff] %v11279_v36  ;;  %vm11289_vm11 = vmand %vm1677_vm10, %vm14826_vm3  ;;  %v4001_v41 = vsel %vm13827_vm5, %v14833_v17, %v14834_v63  ;;  %v14839_v36 = vld [vmem:[#allocation132_spill] sm:$0xff]  ;;  %v14845_v63 = vld [vmem:[#allocation135_spill] sm:$0xff]  ;;  %v3423_v38 = vpop.permute.xlu1 %3422  ;;  %v11351_v45 = vmul.f32 %v14849_v54, %v3999_v11 }
 0x773   : > { %14829 = vst [vmem:[#allocation48_spill] sm:$0xff] %v11294_v4  ;;  %vm14830_vm9 = vmmov %vm14824_vm14  ;;  %vm14831_vm14 = vcmp.lt.s32.totalorder %v8777_v20, 114  ;;  %v14838_v4 = vld [vmem:[#allocation134_spill] sm:$0xff] }
 0x774   : > { %v3090_v47 = vsel %vm14830_vm9, %v14822_v21, %v14823_v18  ;;  %v3376_v62 = vsel %vm14831_vm14, %v3368_v46, %v3372_v35  ;;  %vm14832_vm4 = vmmov %vm14831_vm14  ;;  %vm13838_vm14 = vcmp.lt.s32.totalorder %v8777_v20, 81  ;;  %14850 = vst [vmem:[#allocation59_spill] sm:$0xff] %v11351_v45  ;;  %4412 = vrot.lane.b32.xlu1 %v8385_v53, %s14990_s16 }
 0x775   : > { %v3378_v39 = vsel %vm14832_vm4, %v3372_v35, %v3368_v46  ;;  %v3381_v21 = vmul.f32 %v11274_v37, %v3376_v62  ;;  %v14836_v46 = vld [vmem:[#allocation225_spill] sm:$0xff]  ;;  %vm14840_vm4 = vcmp.lt.s32.totalorder %v8777_v20, 127  ;;  %v11333_v62 = vsel %vm11289_vm11, 1.0, %v14714_v1  ;;  %3589 = vrot.lane.b32.xlu0 %v8643_v8, %s14550_s10 }
 0x776   : > { %v3382_v18 = vmul.f32 %v11274_v37, %v3378_v39  ;;  %v11319_v35 = vmul.f32 %v14836_v46, %v3092_v55  ;;  %v3175_v61 = vsel %vm14840_vm4, %v14839_v36, %v14838_v4  ;;  %vm14841_vm9 = vmmov %vm14840_vm4  ;;  %14842 = vst [vmem:[#allocation53_spill] sm:$0xff] %v11333_v62  ;;  %v11335_v39 = vpop.permute.xlu0 %2518  ;;  %v14844_v55 = vld [vmem:[#allocation137_spill] sm:$0xff]  ;;  %v11348_v12 = vmul.f32 %v14836_v46, %v3090_v47 }
 0x777   : > { %v3177_v17 = vsel %vm14841_vm9, %v14838_v4, %v14839_v36  ;;  %14843 = vst [vmem:[#allocation57_spill] sm:$0xff] %v11335_v39  ;;  %v4054_v37 = vsel %vm13826_vm15, %v14845_v63, %v14844_v55  ;;  %v14846_v4 = vld [vmem:[#allocation182_spill] sm:$0xff]  ;;  %v11354_v39 = vmul.f32 %v14849_v54, %v4001_v41  ;;  %vm14854_vm11 = vcmp.lt.s32.totalorder %v8777_v20, 126  ;;  %v14858_v41 = vld [vmem:[#allocation268_spill] sm:$0xff] }
 0x778   : > { %14837 = vst [vmem:[#allocation256_spill] sm:$0xff] %v11319_v35  ;;  %v4056_v35 = vsel %vm13826_vm15, %v14844_v55, %v14845_v63  ;;  %v3403_v36 = vadd.f32 %v14846_v4, %v3381_v21  ;;  %v3404_v33 = vadd.f32 %v14847_v31, %v3382_v18  ;;  %14848 = vst [vmem:[#allocation55_spill] sm:$0xff] %v11348_v12  ;;  %v14855_v31 = vld [vmem:[#allocation228_spill] sm:$0xff]  ;;  %vm13855_vm9 = vcmp.lt.s32.totalorder %v8777_v20, 80 }
 0x779   : > { %14851 = vst [vmem:[#allocation259_spill] sm:$0xff] %v11354_v39  ;;  %v3230_v55 = vsel %vm14854_vm11, %v14853_v28, %v14852_v16  ;;  %v11363_v21 = vmul.f32 %v14855_v31, %v3175_v61  ;;  %v11366_v47 = vmul.f32 %v14855_v31, %v3177_v17  ;;  %v11373_v46 = vmul.f32 %v14858_v41, %v4054_v37  ;;  %vm14861_vm4 = vmmov %vm14854_vm11  ;;  %v14866_v37 = vld [vmem:[#allocation141_spill] sm:$0xff]  ;;  %v14867_v31 = vld [vmem:[#allocation139_spill] sm:$0xff] }
 0x77a   : > { %v3407_v11 = vmul.f32 %v10961_v2, %v3403_v36  ;;  %v3408_v18 = vmul.f32 %v11333_v62, %v3404_v33  ;;  %v11376_v63 = vmul.f32 %v14858_v41, %v4056_v35  ;;  %v3232_v61 = vsel %vm14861_vm4, %v14852_v16, %v14853_v28  ;;  %v11383_v17 = vpop.permute.xlu0 %2569  ;;  %v14864_v33 = vld [vmem:[#allocation232_spill] sm:$0xff]  ;;  %vm3416_vm11 = vmand %vm1677_vm10, %vm10148_vm6  ;;  %v3427_v28 = vpop.permute.xlu1 %3426  ;;  %4416 = vrot.lane.b32.xlu1 %v8395_v22, %s14990_s16 }
 0x77b   : > { %14856 = vst [vmem:[#allocation65_spill] sm:$0xff] %v11363_v21  ;;  %14857 = vst [vmem:[#allocation260_spill] sm:$0xff] %v11366_v47  ;;  %v11386_v4 = vstv %s11276_s3  ;;  %v11391_v36 = vmul.f32 %v14864_v33, %v3230_v55  ;;  %v4109_v35 = vsel %vm4090_vm12, %v14867_v31, %v14866_v37  ;;  %v4111_v16 = vsel %vm4090_vm12, %v14866_v37, %v14867_v31  ;;  %v14869_v55 = vld [vmem:[#allocation142_spill] sm:$0xff]  ;;  %v14876_v37 = vld [vmem:[#allocation143_spill] sm:$0xff] }
 0x77c   : > { %14859 = vst [vmem:[#allocation106_spill] sm:$0xff] %v11373_v46  ;;  %14860 = vst [vmem:[#allocation104_spill] sm:$0xff] %v11376_v63  ;;  %v3411_v41 = vadd.f32 %v3407_v11, %v3356_v19  ;;  %v3412_v54 = vadd.f32 %v3408_v18, %v3357_v48  ;;  %v14870_v46 = vld [vmem:[#allocation140_spill] sm:$0xff]  ;;  %vm14871_vm4 = vcmp.lt.s32.totalorder %v8777_v20, 125  ;;  %vm14872_vm15 = vcmp.lt.s32.totalorder %v8777_v20, 113  ;;  %v14875_v18 = vld [vmem:[#allocation145_spill] sm:$0xff]  ;;  %3593 = vrot.lane.b32.xlu0 %v8653_v14, %s14550_s10 }
 0x77d   : > { %14862 = vst [vmem:[#allocation301_spill] sm:$0xff] %v11383_v17  ;;  %14863 = vst [vmem:[#allocation210_spill] sm:$0xff] %v11386_v4  ;;  %v3285_v62 = vsel %vm14871_vm4, %v14870_v46, %v14869_v55  ;;  %v3431_v19 = vsel %vm14872_vm15, %v3423_v38, %v3427_v28  ;;  %v4164_v31 = vsel %vm13856_vm1, %v14876_v37, %v14875_v18  ;;  %v14890_v21 = vld [vmem:[#allocation235_spill] sm:$0xff]  ;;  %s11867_s10 = sld [smem:[#allocation7 + $0x25]] }
 0x77e   : > { %14865 = vst [vmem:[#allocation287_spill] sm:$0xff] %v11391_v36  ;;  %vm14873_vm5 = vmmov %vm14872_vm15  ;;  %v3436_v39 = vmul.f32 %v11386_v4, %v3431_v19  ;;  %v11440_v19 = vpop.permute.xlu0 %2573  ;;  %v11456_v12 = vmul.f32 %v14890_v21, %v3285_v62  ;;  %vm14905_vm15 = vcmp.lt.s32.totalorder %v8777_v20, 114 }
 0x77f   : > { %v3433_v48 = vsel %vm14873_vm5, %v3427_v28, %v3423_v38  ;;  %vm14874_vm2 = vmmov %vm14871_vm4  ;;  %v11428_v38 = vmul.f32 %v14864_v33, %v3232_v61  ;;  %v14879_v28 = vld [vmem:[#allocation82_spill] sm:$0xff]  ;;  %14882 = vst [vmem:[#allocation265_spill] sm:$0xff] %v11440_v19  ;;  %v14887_v33 = vld [vmem:[#allocation280_spill] sm:$0xff] }
 0x780   : > { %v3287_v11 = vsel %vm14874_vm2, %v14869_v55, %v14870_v46  ;;  %v3437_v45 = vmul.f32 %v11386_v4, %v3433_v48  ;;  %v11431_v36 = vmul.f32 %v14879_v28, %v4109_v35  ;;  %v4166_v46 = vsel %vm13856_vm1, %v14875_v18, %v14876_v37  ;;  %v14883_v48 = vld [vmem:[#allocation146_spill] sm:$0xff]  ;;  %v14884_v4 = vld [vmem:[#allocation144_spill] sm:$0xff]  ;;  %v3478_v18 = vpop.permute.xlu1 %3477  ;;  %14891 = vst [vmem:[#allocation291_spill] sm:$0xff] %v11456_v12 }
 0x781   : > { %14878 = vst [vmem:[#allocation264_spill] sm:$0xff] %v11428_v38  ;;  %v11438_v55 = vsel %vm3416_vm11, 1.0, %v14714_v1  ;;  %vm14885_vm2 = vcmp.lt.s32.totalorder %v8777_v20, 115  ;;  %v3458_v35 = vadd.f32 %v14887_v33, %v3436_v39  ;;  %v11453_v37 = vmul.f32 %v14879_v28, %v4111_v16  ;;  %v14893_v19 = vld [vmem:[#allocation86_spill] sm:$0xff]  ;;  %3644 = vrot.lane.b32.xlu0 %v8643_v8, %s14578_s21 }
 0x782   : > { %14880 = vst [vmem:[#allocation69_spill] sm:$0xff] %v11431_v36  ;;  %14881 = vst [vmem:[#allocation292_spill] sm:$0xff] %v11438_v55  ;;  %v3340_v47 = vsel %vm14885_vm2, %v14884_v4, %v14883_v48  ;;  %v14888_v36 = vld [vmem:[#allocation97_spill] sm:$0xff]  ;;  %v11459_v17 = vmul.f32 %v14890_v21, %v3287_v11  ;;  %v11462_v2 = vmul.f32 %v14893_v19, %v4164_v31  ;;  %v14898_v21 = vld [vmem:[#allocation238_spill] sm:$0xff]  ;;  %v11490_v33 = vstv %s11388_s23  ;;  %s15437_s23 = sld [smem:[#allocation344_spill]] }
 0x783   : > { %vm14886_vm5 = vmmov %vm14885_vm2  ;;  %v3459_v38 = vadd.f32 %v14888_v36, %v3437_v45  ;;  %14889 = vst [vmem:[#allocation266_spill] sm:$0xff] %v11453_v37  ;;  %v11467_v39 = vmul.f32 %v14893_v19, %v4166_v46  ;;  %v14896_v45 = vld [vmem:[#allocation149_spill] sm:$0xff]  ;;  %v3462_v62 = vmul.f32 %v10986_v43, %v3458_v35  ;;  %v11478_v11 = vmul.f32 %v14898_v21, %v3340_v47  ;;  %v14904_v35 = vld [vmem:[#allocation148_spill] sm:$0xff] }
 0x784   : > { %v3342_v61 = vsel %vm14886_vm5, %v14883_v48, %v14884_v4  ;;  %14892 = vst [vmem:[#allocation109_spill] sm:$0xff] %v11459_v17  ;;  %14894 = vst [vmem:[#allocation107_spill] sm:$0xff] %v11462_v2  ;;  %v14897_v4 = vld [vmem:[#allocation147_spill] sm:$0xff]  ;;  %v11487_v48 = vpop.permute.xlu0 %2624  ;;  %v14906_v19 = vld [vmem:[#allocation102_spill] sm:$0xff]  ;;  %vm14908_vm11 = vcmp.lt.s32.totalorder %v8777_v20, 51 }
 0x785   : > { %14895 = vst [vmem:[#allocation110_spill] sm:$0xff] %v11467_v39  ;;  %v4219_v36 = vsel %vm13838_vm14, %v14897_v4, %v14896_v45  ;;  %v3463_v16 = vmul.f32 %v11438_v55, %v3459_v38  ;;  %14899 = vst [vmem:[#allocation108_spill] sm:$0xff] %v11478_v11  ;;  %v11481_v31 = vmul.f32 %v14898_v21, %v3342_v61  ;;  %v14903_v38 = vld [vmem:[#allocation150_spill] sm:$0xff]  ;;  %v14909_v2 = vld [vmem:[#allocation195_spill] sm:$0xff]  ;;  %3648 = vrot.lane.b32.xlu0 %v8653_v14, %s14578_s21  ;;  %s11919_s21 = sld [smem:[#allocation7 + $0x26]] }
 0x786   : > { %v4221_v46 = vsel %vm13838_vm14, %v14896_v45, %v14897_v4  ;;  %14901 = vst [vmem:[#allocation111_spill] sm:$0xff] %v11487_v48  ;;  %14902 = vst [vmem:[#allocation75_spill] sm:$0xff] %v11490_v33  ;;  %v3395_v47 = vsel %vm14905_vm15, %v14904_v35, %v14903_v38  ;;  %v14907_v28 = vld [vmem:[#allocation294_spill] sm:$0xff]  ;;  %v3466_v21 = vadd.f32 %v3462_v62, %v3411_v41  ;;  %vm14910_vm4 = vnez %v14909_v2  ;;  %v3482_v4 = vpop.permute.xlu1 %3481  ;;  %v14913_v55 = vld [vmem:[#allocation89_spill] sm:$0xff] }
 0x787   : > { %14900 = vst [vmem:[#allocation113_spill] sm:$0xff] %v11481_v31  ;;  %v1743_v61 = vsel %vm14908_vm11, %v14907_v28, %v14906_v19  ;;  %v3467_v39 = vadd.f32 %v3463_v16, %v3412_v54  ;;  %vm11506_vm2 = vmand %vm1677_vm10, %vm14910_vm4  ;;  %v11511_v37 = vmul.f32 %v14913_v55, %v4219_v36  ;;  %vm14916_vm11 = vcmp.lt.s32.totalorder %v8777_v20, 112  ;;  %v14918_v62 = vld [vmem:[#allocation153_spill] sm:$0xff]  ;;  %v14919_v16 = vld [vmem:[#allocation151_spill] sm:$0xff] }
 0x788   : > { %vm14915_vm5 = vmmov %vm14905_vm15  ;;  %vm13854_vm15 = vcmp.lt.s32.totalorder %v8777_v20, 79  ;;  %v3486_v54 = vsel %vm14916_vm11, %v3478_v18, %v3482_v4  ;;  %v4274_v36 = vsel %vm13855_vm9, %v14919_v16, %v14918_v62  ;;  %v14925_v17 = vld [vmem:[#allocation105_spill] sm:$0xff]  ;;  %v11546_v48 = vsel %vm11506_vm2, 1.0, %v14714_v1 }
 0x789   : > { %14914 = vst [vmem:[#allocation267_spill] sm:$0xff] %v11511_v37  ;;  %v3397_v31 = vsel %vm14915_vm5, %v14903_v38, %v14904_v35  ;;  %vm14917_vm14 = vmmov %vm14916_vm11  ;;  %vm14920_vm5 = vcmp.lt.s32.totalorder %v8777_v20, 51  ;;  %v3491_v35 = vmul.f32 %v11490_v33, %v3486_v54  ;;  %v1747_v12 = vmul.f32 %v14925_v17, %v1743_v61  ;;  %v14929_v54 = vld [vmem:[#allocation306_spill] sm:$0xff]  ;;  %3699 = vrot.lane.b32.xlu0 %v8643_v8, %s14602_s27 }
 0x78a   : > { %v3488_v41 = vsel %vm14917_vm14, %v3482_v4, %v3478_v18  ;;  %v1741_v38 = vsel %vm14920_vm5, %v14906_v19, %v14907_v28  ;;  %v11537_v18 = vmul.f32 %v14913_v55, %v4221_v46  ;;  %v14923_v4 = vld [vmem:[#allocation241_spill] sm:$0xff]  ;;  %14926 = vst [vmem:[#allocation271_spill] sm:$0xff] %v11546_v48  ;;  %v11548_v28 = vpop.permute.xlu0 %2628  ;;  %vm14931_vm14 = vcmp.lt.s32.totalorder %v8777_v20, 50  ;;  %v3533_v61 = vpop.permute.xlu1 %3532 }
 0x78b   : > { %v3492_v37 = vmul.f32 %v11490_v33, %v3488_v41  ;;  %v11540_v11 = vmul.f32 %v14923_v4, %v3395_v47  ;;  %14927 = vst [vmem:[#allocation81_spill] sm:$0xff] %v11548_v28  ;;  %v11551_v19 = vmul.f32 %v14923_v4, %v3397_v31  ;;  %v14930_v41 = vld [vmem:[#allocation321_spill] sm:$0xff]  ;;  %v4276_v45 = vsel %vm13855_vm9, %v14918_v62, %v14919_v16  ;;  %vm14936_vm2 = vmmov %vm14931_vm14  ;;  %v14941_v62 = vld [vmem:[#allocation332_spill] sm:$0xff] }
 0x78c   : > { %14922 = vst [vmem:[#allocation293_spill] sm:$0xff] %v11537_v18  ;;  %v1809_v46 = vsel %vm14931_vm14, %v14930_v41, %v14929_v54  ;;  %v14932_v55 = vld [vmem:[#allocation281_spill] sm:$0xff]  ;;  %v14933_v18 = vld [vmem:[#allocation282_spill] sm:$0xff]  ;;  %v1748_v31 = vmul.f32 %v14925_v17, %v1741_v38  ;;  %v1807_v4 = vsel %vm14936_vm2, %v14929_v54, %v14930_v41  ;;  %vm14939_vm11 = vcmp.lt.s32.totalorder %v8777_v20, 113 }
 0x78d   : > { %14924 = vst [vmem:[#allocation213_spill] sm:$0xff] %v11540_v11  ;;  %14928 = vst [vmem:[#allocation296_spill] sm:$0xff] %v11551_v19  ;;  %v3513_v47 = vadd.f32 %v14932_v55, %v3491_v35  ;;  %v3514_v33 = vadd.f32 %v14933_v18, %v3492_v37  ;;  %v14934_v11 = vld [vmem:[#allocation279_spill] sm:$0xff]  ;;  %v14937_v55 = vld [vmem:[#allocation154_spill] sm:$0xff]  ;;  %vm14942_vm5 = vcmp.lt.s32.totalorder %v8777_v20, 49  ;;  %3703 = vrot.lane.b32.xlu0 %v8653_v14, %s14602_s27  ;;  %s12236_s27 = sld [smem:[#allocation7 + $0x27]] }
 0x78e   : > { %v11564_v28 = vmul.f32 %v14934_v11, %v4274_v36  ;;  %v14938_v37 = vld [vmem:[#allocation152_spill] sm:$0xff]  ;;  %v14940_v18 = vld [vmem:[#allocation325_spill] sm:$0xff]  ;;  %vm14944_vm14 = vmmov %vm14939_vm11  ;;  %v11591_v2 = vpop.permute.xlu0 %2679 }
 0x78f   : > { %v3450_v35 = vsel %vm14939_vm11, %v14938_v37, %v14937_v55  ;;  %v1875_v16 = vsel %vm14942_vm5, %v14941_v62, %v14940_v18  ;;  %v14943_v36 = vld [vmem:[#allocation196_spill] sm:$0xff]  ;;  %v3518_v38 = vmul.f32 %v11546_v48, %v3514_v33  ;;  %v3452_v54 = vsel %vm14944_vm14, %v14937_v55, %v14938_v37  ;;  %v14945_v41 = vld [vmem:[#allocation42_spill] sm:$0xff]  ;;  %14947 = vst [vmem:[#allocation114_spill] sm:$0xff] %v11591_v2  ;;  %vm14949_vm2 = vmmov %vm14942_vm5 }
 0x790   : > { %14935 = vst [vmem:[#allocation112_spill] sm:$0xff] %v11564_v28  ;;  %v3517_v17 = vmul.f32 %v14943_v36, %v3513_v47  ;;  %v1769_v28 = vadd.f32 %v14945_v41, %v1747_v12  ;;  %v14946_v19 = vld [vmem:[#allocation304_spill] sm:$0xff]  ;;  %v1873_v47 = vsel %vm14949_vm2, %v14940_v18, %v14941_v62  ;;  %vm11607_vm11 = vmand %vm1677_vm10, %vm10178_vm7  ;;  %v14953_v37 = vld [vmem:[#allocation250_spill] sm:$0xff]  ;;  %vm14955_vm5 = vcmp.lt.s32.totalorder %v8777_v20, 111 }
 0x791   : > { %v1813_v43 = vmul.f32 %v14946_v19, %v1809_v46  ;;  %v1814_v33 = vmul.f32 %v14946_v19, %v1807_v4  ;;  %v3522_v36 = vadd.f32 %v3518_v38, %v3467_v39  ;;  %v3537_v46 = vpop.permute.xlu1 %3536  ;;  %v1770_v19 = vadd.f32 %v14953_v37, %v1748_v31  ;;  %v14954_v4 = vld [vmem:[#allocation308_spill] sm:$0xff]  ;;  %vm14956_vm14 = vmmov %vm14955_vm5  ;;  %v14958_v62 = vld [vmem:[#allocation247_spill] sm:$0xff]  ;;  %3754 = vrot.lane.b32.xlu0 %v8643_v8, %s14626_s15 }
 0x792   : > { %v3521_v48 = vadd.f32 %v3517_v17, %v3466_v21  ;;  %v1879_v41 = vmul.f32 %v14954_v4, %v1875_v16  ;;  %v3541_v18 = vsel %vm14955_vm5, %v3533_v61, %v3537_v46  ;;  %v3543_v39 = vsel %vm14956_vm14, %v3537_v46, %v3533_v61  ;;  %v14962_v61 = vld [vmem:[#allocation44_spill] sm:$0xff] }
 0x793   : > { %v11622_v21 = vmul.f32 %v14934_v11, %v4276_v45  ;;  %v11625_v17 = vmul.f32 %v14958_v62, %v3450_v35  ;;  %v3546_v38 = vmul.f32 %v11594_v49, %v3541_v18  ;;  %v3547_v31 = vmul.f32 %v11594_v49, %v3543_v39  ;;  %v11641_v35 = vpop.permute.xlu0 %2683  ;;  %v14965_v18 = vld [vmem:[#allocation157_spill] sm:$0xff]  ;;  %v14966_v11 = vld [vmem:[#allocation155_spill] sm:$0xff] }
 0x794   : > { %v11632_v16 = vmul.f32 %v14958_v62, %v3452_v54  ;;  %v1835_v46 = vadd.f32 %v14962_v61, %v1813_v43  ;;  %v1880_v37 = vmul.f32 %v14954_v4, %v1873_v47  ;;  %v11639_v45 = vsel %vm11607_vm11, 1.0, %v14714_v1  ;;  %14964 = vst [vmem:[#allocation85_spill] sm:$0xff] %v11641_v35  ;;  %v14968_v49 = vld [vmem:[#allocation47_spill] sm:$0xff]  ;;  %v14969_v62 = vld [vmem:[#allocation286_spill] sm:$0xff]  ;;  %v14970_v43 = vld [vmem:[#allocation100_spill] sm:$0xff] }
 0x795   : > { %14957 = vst [vmem:[#allocation203_spill] sm:$0xff] %v11622_v21  ;;  %14959 = vst [vmem:[#allocation117_spill] sm:$0xff] %v11625_v17  ;;  %v11647_v39 = vsel %vm13854_vm15, %v14966_v11, %v14965_v18  ;;  %v1836_v54 = vadd.f32 %v14968_v49, %v1814_v33  ;;  %v3568_v21 = vadd.f32 %v14969_v62, %v3546_v38  ;;  %v3588_v47 = vpop.permute.xlu1 %3587  ;;  %v14971_v4 = vld [vmem:[#allocation309_spill] sm:$0xff]  ;;  %v14975_v33 = vld [vmem:[#allocation50_spill] sm:$0xff]  ;;  %vm14978_vm5 = vcmp.lt.s32.totalorder %v8777_v20, 48 }
 0x796   : > { %14961 = vst [vmem:[#allocation115_spill] sm:$0xff] %v11632_v16  ;;  %14963 = vst [vmem:[#allocation194_spill] sm:$0xff] %v11639_v45  ;;  %v3569_v61 = vadd.f32 %v14970_v43, %v3547_v31  ;;  %vm14972_vm2 = vnez %v14971_v4  ;;  %v11660_v12 = vsel %vm13854_vm15, %v14965_v18, %v14966_v11  ;;  %v14974_v16 = vld [vmem:[#allocation300_spill] sm:$0xff]  ;;  %v1774_v49 = vmul.f32 %v10146_v26, %v1770_v19  ;;  %v14976_v31 = vld [vmem:[#allocation198_spill] sm:$0xff] }
 0x797   : > { %14967 = vst [vmem:[#allocation83_spill] sm:$0xff] %v11647_v39  ;;  %vm3581_vm11 = vmand %vm1677_vm10, %vm14972_vm2  ;;  %v1773_v17 = vmul.f32 %v14974_v16, %v1769_v28  ;;  %v1901_v38 = vadd.f32 %v14975_v33, %v1879_v41  ;;  %v14977_v62 = vld [vmem:[#allocation187_spill] sm:$0xff]  ;;  %v3572_v28 = vmul.f32 %v11052_v10, %v3568_v21  ;;  %v11683_v4 = vpop.permute.xlu0 %2734  ;;  %v1840_v21 = vmul.f32 %v10173_v9, %v1836_v54  ;;  %v14986_v10 = vld [vmem:[#allocation314_spill] sm:$0xff] }
 0x798   : > { %14973 = vst [vmem:[#allocation214_spill] sm:$0xff] %v11660_v12  ;;  %v1939_v43 = vsel %vm14978_vm5, %v14977_v62, %v14976_v31  ;;  %vm14979_vm14 = vmmov %vm14978_vm5  ;;  %v3573_v19 = vmul.f32 %v11639_v45, %v3569_v61  ;;  %v14980_v41 = vld [vmem:[#allocation303_spill] sm:$0xff]  ;;  %v11686_v55 = vsel %vm3581_vm11, 1.0, %v14714_v1  ;;  %v11689_v12 = vstv %s11596_s25  ;;  %3758 = vrot.lane.b32.xlu0 %v8653_v14, %s14626_s15  ;;  %s12310_s15 = sld [smem:[#allocation7 + $0x2a]]  ;;  %s15440_s25 = sld [smem:[#allocation22_spill]] }
 0x799   : > { %v1941_v11 = vsel %vm14979_vm14, %v14976_v31, %v14977_v62  ;;  %v1839_v16 = vmul.f32 %v14980_v41, %v1835_v46  ;;  %v14981_v18 = vld [vmem:[#allocation255_spill] sm:$0xff]  ;;  %14982 = vst [vmem:[#allocation118_spill] sm:$0xff] %v11683_v4  ;;  %14983 = vst [vmem:[#allocation116_spill] sm:$0xff] %v11686_v55  ;;  %v3576_v31 = vadd.f32 %v3572_v28, %v3521_v48  ;;  %v3592_v62 = vpop.permute.xlu1 %3591  ;;  %v11693_v45 = vstv %s11611_s7  ;;  %s6595_s7 = sshll.u32 %s15439_s22, 7 }
 0x79a   : > { %v1902_v33 = vadd.f32 %v14981_v18, %v1880_v37  ;;  %14984 = vst [vmem:[#allocation217_spill] sm:$0xff] %v11689_v12  ;;  %v3577_v61 = vadd.f32 %v3573_v19, %v3522_v36  ;;  %14985 = vst [vmem:[#allocation121_spill] sm:$0xff] %v11693_v45  ;;  %v1945_v39 = vmul.f32 %v14986_v10, %v1941_v11  ;;  %vm14987_vm5 = vcmp.lt.s32.totalorder %v8777_v20, 110  ;;  %v14989_v18 = vld [vmem:[#allocation307_spill] sm:$0xff]  ;;  %v14991_v11 = vld [vmem:[#allocation310_spill] sm:$0xff] }
 0x79b   : > { %v1946_v46 = vmul.f32 %v14986_v10, %v1939_v43  ;;  %v3596_v37 = vsel %vm14987_vm5, %v3588_v47, %v3592_v62  ;;  %vm14988_vm14 = vmmov %vm14987_vm5  ;;  %v1905_v54 = vmul.f32 %v14989_v18, %v1901_v38  ;;  %vm14992_vm11 = vnez %v14991_v11  ;;  %v14995_v43 = vld [vmem:[#allocation219_spill] sm:$0xff] }
 0x79c   : > { %v3598_v41 = vsel %vm14988_vm14, %v3592_v62, %v3588_v47  ;;  %v3601_v48 = vmul.f32 %v11689_v12, %v3596_v37  ;;  %vm11712_vm5 = vmand %vm1677_vm10, %vm14992_vm11  ;;  %vm1683_vm14 = vcmp.lt.s32.totalorder %v11092_v29, 224  ;;  %v1843_v47 = vadd.f32 %v1839_v16, %v1773_v17  ;;  %v14996_v28 = vld [vmem:[#allocation199_spill] sm:$0xff]  ;;  %v11726_v62 = vpop.permute.xlu0 %2738  ;;  %v15000_v37 = vld [vmem:[#allocation245_spill] sm:$0xff]  ;;  %3809 = vrot.lane.b32.xlu0 %v8643_v8, %s14658_s11 }
 0x79d   : > { %v3602_v36 = vmul.f32 %v11689_v12, %v3598_v41  ;;  %v1906_v38 = vmul.f32 %v10225_v57, %v1902_v33  ;;  %vm14997_vm15 = vcmp.lt.s32.totalorder %v8777_v20, 47  ;;  %14999 = vst [vmem:[#allocation119_spill] sm:$0xff] %v11726_v62  ;;  %v15001_v41 = vld [vmem:[#allocation209_spill] sm:$0xff]  ;;  %vm15002_vm10 = vcmp.lt.s32.totalorder %v8777_v20, 46  ;;  %v15004_v16 = vld [vmem:[#allocation298_spill] sm:$0xff]  ;;  %v15005_v12 = vld [vmem:[#allocation299_spill] sm:$0xff]  ;;  %v3643_v4 = vpop.permute.xlu1 %3642 }
 0x79e   : > { %v2005_v19 = vsel %vm14997_vm15, %v14996_v28, %v14995_v43  ;;  %vm14998_vm9 = vmmov %vm14997_vm15  ;;  %v2071_v18 = vsel %vm15002_vm10, %v15001_v41, %v15000_v37  ;;  %v3623_v33 = vadd.f32 %v15004_v16, %v3601_v48  ;;  %v1844_v2 = vadd.f32 %v1840_v21, %v1774_v49  ;;  %v15007_v62 = vld [vmem:[#allocation54_spill] sm:$0xff]  ;;  %v15012_v48 = vld [vmem:[#allocation316_spill] sm:$0xff]  ;;  %p15443_p1 = scmp.ne.s32.totalorder %s15440_s25, 0 }
 0x79f   : > { %v2007_v53 = vsel %vm14998_vm9, %v14995_v43, %v14996_v28  ;;  %vm15003_vm1 = vmmov %vm15002_vm10  ;;  %v3624_v11 = vadd.f32 %v15005_v12, %v3602_v36  ;;  %v15006_v43 = vld [vmem:[#allocation51_spill] sm:$0xff]  ;;  %v1968_v35 = vadd.f32 %v15007_v62, %v1946_v46  ;;  %v11745_v57 = vsel %vm11712_vm5, 1.0, %v14714_v1  ;;  %v15013_v62 = vld [vmem:[#allocation318_spill] sm:$0xff] }
 0x7a0   : > { %v2073_v17 = vsel %vm15003_vm1, %v15000_v37, %v15001_v41  ;;  %v1967_v28 = vadd.f32 %v15006_v43, %v1945_v39  ;;  %15008 = vst [vmem:[#allocation122_spill] sm:$0xff] %v11745_v57  ;;  %vm11751_vm1 = vmand %vm1683_vm14, %vm14783_vm8  ;;  %v1909_v39 = vadd.f32 %v1905_v54, %v1843_v47  ;;  %v3627_v49 = vmul.f32 %v11075_v0, %v3623_v33  ;;  %v11768_v16 = vpop.permute.xlu0 %2789 }
 0x7a1   : > { %v3628_v21 = vmul.f32 %v11686_v55, %v3624_v11  ;;  %v11762_v46 = vstv %s11679_s26  ;;  %v2011_v36 = vmul.f32 %v15012_v48, %v2007_v53  ;;  %v2012_v10 = vmul.f32 %v15012_v48, %v2005_v19  ;;  %v3647_v43 = vpop.permute.xlu1 %3646  ;;  %v15015_v11 = vld [vmem:[#allocation313_spill] sm:$0xff]  ;;  %v15023_v48 = vld [vmem:[#allocation60_spill] sm:$0xff]  ;;  %vm3746_vm5 = vmand %vm1683_vm14, %vm14826_vm3  ;;  %3813 = vrot.lane.b32.xlu0 %v8653_v14, %s14658_s11  ;;  %s12342_s11 = sld [smem:[#allocation7 + $0x2c]] }
 0x7a2   : > { %15011 = vst [vmem:[#allocation120_spill] sm:$0xff] %v11762_v46  ;;  %v2077_v37 = vmul.f32 %v15013_v62, %v2073_v17  ;;  %v2078_v41 = vmul.f32 %v15013_v62, %v2071_v18  ;;  %v1910_v54 = vadd.f32 %v1906_v38, %v1844_v2  ;;  %v3631_v47 = vadd.f32 %v3627_v49, %v3576_v31  ;;  %v15016_v2 = vld [vmem:[#allocation257_spill] sm:$0xff]  ;;  %v15017_v31 = vld [vmem:[#allocation227_spill] sm:$0xff] }
 0x7a3   : > { %v3632_v33 = vadd.f32 %v3628_v21, %v3577_v61  ;;  %v11773_v22 = vsel %vm11751_vm1, 1.0, %v14714_v1  ;;  %v1971_v55 = vmul.f32 %v15015_v11, %v1967_v28  ;;  %v1972_v53 = vmul.f32 %v14585_v15, %v1968_v35  ;;  %v15020_v28 = vld [vmem:[#allocation31_spill] sm:$0xff]  ;;  %v15022_v49 = vld [vmem:[#allocation61_spill] sm:$0xff] }
 0x7a4   : > { %15014 = vst [vmem:[#allocation125_spill] sm:$0xff] %v11773_v22  ;;  %v3651_v19 = vsel %vm3650_vm13, %v3643_v4, %v3647_v43  ;;  %v3653_v18 = vsel %vm3650_vm13, %v3647_v43, %v3643_v4  ;;  %vm15018_vm9 = vcmp.lt.s32.totalorder %v8777_v20, 45  ;;  %4435 = vrot.lane.b32.xlu1 %v15020_v28, %s14990_s16  ;;  %v15021_v4 = vld [vmem:[#allocation258_spill] sm:$0xff]  ;;  %v2034_v21 = vadd.f32 %v15022_v49, %v2012_v10  ;;  %v15024_v43 = vld [vmem:[#allocation63_spill] sm:$0xff]  ;;  %v11799_v40 = vpop.permute.xlu0 %2793 }
 0x7a5   : > { %v2137_v61 = vsel %vm15018_vm9, %v15017_v31, %v15016_v2  ;;  %vm15019_vm15 = vmmov %vm15018_vm9  ;;  %v3656_v35 = vmul.f32 %v11693_v45, %v3651_v19  ;;  %v3657_v17 = vmul.f32 %v11693_v45, %v3653_v18  ;;  %v2033_v12 = vadd.f32 %v15021_v4, %v2011_v36  ;;  %v15034_v45 = vld [vmem:[#allocation64_spill] sm:$0xff]  ;;  %3864 = vrot.lane.b32.xlu0 %v8643_v8, %s14680_s28 }
 0x7a6   : > { %v2139_v38 = vsel %vm15019_vm15, %v15016_v2, %v15017_v31  ;;  %v2099_v62 = vadd.f32 %v15023_v48, %v2077_v37  ;;  %v2100_v11 = vadd.f32 %v15024_v43, %v2078_v41  ;;  %vm15025_vm10 = vcmp.lt.s32.totalorder %v8777_v20, 35  ;;  %v3698_v41 = vpop.permute.xlu1 %3697  ;;  %v15027_v2 = vld [vmem:[#allocation320_spill] sm:$0xff] }
 0x7a7   : > { %v2192_v19 = vsel %vm15025_vm10, %v10826_v58, %v10850_v52  ;;  %vm15026_vm1 = vmmov %vm15025_vm10  ;;  %v3678_v10 = vadd.f32 %v11019_v7, %v3656_v35  ;;  %v3679_v37 = vadd.f32 %v11046_v5, %v3657_v17  ;;  %v1975_v18 = vadd.f32 %v1971_v55, %v1909_v39  ;;  %v15030_v7 = vld [vmem:[#allocation315_spill] sm:$0xff]  ;;  %v15031_v39 = vld [vmem:[#allocation169_spill] sm:$0xff] }
 0x7a8   : > { %v2194_v36 = vsel %vm15026_vm1, %v10850_v52, %v10826_v58  ;;  %v2143_v31 = vmul.f32 %v15027_v2, %v2139_v38  ;;  %v2144_v28 = vmul.f32 %v15027_v2, %v2137_v61  ;;  %v11820_v4 = vstv %s11755_s12  ;;  %v11831_v35 = vpop.permute.xlu0 %2844  ;;  %v15032_v17 = vld [vmem:[#allocation317_spill] sm:$0xff]  ;;  %v15033_v2 = vld [vmem:[#allocation263_spill] sm:$0xff] }
 0x7a9   : > { %15028 = vst [vmem:[#allocation123_spill] sm:$0xff] %v11820_v4  ;;  %v1976_v49 = vadd.f32 %v1972_v53, %v1910_v54  ;;  %v3682_v48 = vmul.f32 %v11124_v44, %v3678_v10  ;;  %v3683_v58 = vmul.f32 %v11745_v57, %v3679_v37  ;;  %v11825_v52 = vsel %vm3746_vm5, 1.0, %v14714_v1  ;;  %3868 = vrot.lane.b32.xlu0 %v8653_v14, %s14680_s28  ;;  %s12358_s28 = sld [smem:[#allocation7 + $0x2d]] }
 0x7aa   : > { %15029 = vst [vmem:[#allocation126_spill] sm:$0xff] %v11825_v52  ;;  %v2037_v5 = vmul.f32 %v15030_v7, %v2033_v12  ;;  %v2038_v55 = vmul.f32 %v10255_v56, %v2034_v21  ;;  %v2198_v38 = vmul.f32 %v15031_v39, %v2194_v36  ;;  %v2199_v61 = vmul.f32 %v15031_v39, %v2192_v19  ;;  %v3702_v37 = vpop.permute.xlu1 %3701  ;;  %v15037_v36 = vld [vmem:[#allocation70_spill] sm:$0xff] }
 0x7ab   : > { %v2103_v43 = vmul.f32 %v15032_v17, %v2099_v62  ;;  %v2104_v54 = vmul.f32 %v10285_v50, %v2100_v11  ;;  %v3686_v53 = vadd.f32 %v3682_v48, %v3631_v47  ;;  %v3687_v10 = vadd.f32 %v3683_v58, %v3632_v33 }
 0x7ac   : > { %v2165_v57 = vadd.f32 %v15033_v2, %v2143_v31  ;;  %v2166_v23 = vadd.f32 %v15034_v45, %v2144_v28  ;;  %v3706_v12 = vsel %vm13883_vm0, %v3698_v41, %v3702_v37  ;;  %v3708_v21 = vsel %vm13883_vm0, %v3702_v37, %v3698_v41  ;;  %v15038_v31 = vld [vmem:[#allocation68_spill] sm:$0xff]  ;;  %v11855_v48 = vpop.permute.xlu0 %2848 }
 0x7ad   : > { %vm15035_vm9 = vcmp.lt.s32.totalorder %v8777_v20, 34  ;;  %v3711_v45 = vmul.f32 %v11762_v46, %v3706_v12  ;;  %v3712_v62 = vmul.f32 %v11762_v46, %v3708_v21  ;;  %v2041_v11 = vadd.f32 %v2037_v5, %v1975_v18  ;;  %3919 = vrot.lane.b32.xlu0 %v8643_v8, %s14696_s9 }
 0x7ae   : > { %v2247_v47 = vsel %vm15035_vm9, %v10882_v34, %v10906_v27  ;;  %vm15036_vm15 = vmmov %vm15035_vm9  ;;  %v2042_v19 = vadd.f32 %v2038_v55, %v1976_v49  ;;  %v2220_v41 = vadd.f32 %v15037_v36, %v2198_v38  ;;  %v2221_v28 = vadd.f32 %v15038_v31, %v2199_v61  ;;  %v3753_v49 = vpop.permute.xlu1 %3752  ;;  %v15041_v55 = vld [vmem:[#allocation167_spill] sm:$0xff] }
 0x7af   : > { %v2249_v33 = vsel %vm15036_vm15, %v10906_v27, %v10882_v34  ;;  %vm15039_vm5 = vcmp.lt.s32.totalorder %v8777_v20, 33  ;;  %v3733_v27 = vadd.f32 %v11067_v13, %v3711_v45  ;;  %v3734_v18 = vadd.f32 %v11070_v59, %v3712_v62  ;;  %v15042_v61 = vld [vmem:[#allocation319_spill] sm:$0xff]  ;;  %v15047_v62 = vld [vmem:[#allocation74_spill] sm:$0xff] }
 0x7b0   : > { %v2302_v58 = vsel %vm15039_vm5, %v10933_v42, %v10968_v51  ;;  %vm15040_vm10 = vmmov %vm15039_vm5  ;;  %v2107_v7 = vadd.f32 %v2103_v43, %v2041_v11  ;;  %v2108_v5 = vadd.f32 %v2104_v54, %v2042_v19  ;;  %v2253_v39 = vmul.f32 %v15041_v55, %v2249_v33  ;;  %v15043_v59 = vld [vmem:[#allocation171_spill] sm:$0xff]  ;;  %v11881_v21 = vpop.permute.xlu0 %2899  ;;  %v15048_v19 = vld [vmem:[#allocation72_spill] sm:$0xff] }
 0x7b1   : > { %v2304_v34 = vsel %vm15040_vm10, %v10968_v51, %v10933_v42  ;;  %v2254_v38 = vmul.f32 %v15041_v55, %v2247_v47  ;;  %v2169_v17 = vmul.f32 %v15042_v61, %v2165_v57  ;;  %v2170_v42 = vmul.f32 %v10295_v25, %v2166_v23  ;;  %v15044_v54 = vld [vmem:[#allocation175_spill] sm:$0xff]  ;;  %vm3801_vm10 = vmand %vm1683_vm14, %vm10148_vm6  ;;  %3923 = vrot.lane.b32.xlu0 %v8653_v14, %s14696_s9  ;;  %s12414_s9 = sld [smem:[#allocation7 + $0x2e]] }
 0x7b2   : > { %v3737_v51 = vmul.f32 %v14720_v30, %v3733_v27  ;;  %v3738_v13 = vmul.f32 %v11773_v22, %v3734_v18  ;;  %v2224_v37 = vmul.f32 %v15043_v59, %v2220_v41  ;;  %v2225_v43 = vmul.f32 %v10146_v26, %v2221_v28  ;;  %v3757_v45 = vpop.permute.xlu1 %3756  ;;  %v15051_v28 = vld [vmem:[#allocation269_spill] sm:$0xff]  ;;  %v15053_v18 = vld [vmem:[#allocation324_spill] sm:$0xff] }
 0x7b3   : > { %v2308_v2 = vmul.f32 %v15044_v54, %v2304_v34  ;;  %v2309_v12 = vmul.f32 %v15044_v54, %v2302_v58  ;;  %vm15045_vm1 = vcmp.lt.s32.totalorder %v8777_v20, 32  ;;  %v2275_v11 = vadd.f32 %v15047_v62, %v2253_v39  ;;  %v15052_v34 = vld [vmem:[#allocation270_spill] sm:$0xff]  ;;  %v15110_v22 = vld [vmem:[#allocation184_spill] sm:$0xff] }
 0x7b4   : > { %v2357_v57 = vsel %vm15045_vm1, %v10996_v24, %v11033_v32  ;;  %vm15046_vm9 = vmmov %vm15045_vm1  ;;  %v3741_v47 = vadd.f32 %v3737_v51, %v3686_v53  ;;  %v3742_v33 = vadd.f32 %v3738_v13, %v3687_v10  ;;  %v2276_v36 = vadd.f32 %v15048_v19, %v2254_v38  ;;  %v11909_v39 = vpop.permute.xlu0 %2903  ;;  %v15056_v13 = vld [vmem:[#allocation165_spill] sm:$0xff] }
 0x7b5   : > { %v2359_v23 = vsel %vm15046_vm9, %v11033_v32, %v10996_v24  ;;  %vm15049_vm15 = vcmp.lt.s32.totalorder %v8777_v20, 98  ;;  %v2173_v24 = vadd.f32 %v2169_v17, %v2107_v7  ;;  %v2174_v32 = vadd.f32 %v2170_v42, %v2108_v5  ;;  %3974 = vrot.lane.b32.xlu0 %v8643_v8, %s14713_s4 }
 0x7b6   : > { %v3761_v41 = vsel %vm15049_vm15, %v3753_v49, %v3757_v45  ;;  %vm15050_vm5 = vmmov %vm15049_vm15  ;;  %v2330_v58 = vadd.f32 %v15051_v28, %v2308_v2  ;;  %v2331_v27 = vadd.f32 %v15052_v34, %v2309_v12  ;;  %v2364_v55 = vmul.f32 %v15053_v18, %v2357_v57  ;;  %v3808_v7 = vpop.permute.xlu1 %3807  ;;  %v15060_v12 = vld [vmem:[#allocation229_spill] sm:$0xff]  ;;  %v15069_v34 = vld [vmem:[#allocation326_spill] sm:$0xff] }
 0x7b7   : > { %v3763_v31 = vsel %vm15050_vm5, %v3757_v45, %v3753_v49  ;;  %v3766_v53 = vmul.f32 %v11820_v4, %v3761_v41  ;;  %v2363_v49 = vmul.f32 %v15053_v18, %v2359_v23  ;;  %v11914_v5 = vsel %vm3801_vm10, 1.0, %v14714_v1  ;;  %v15061_v57 = vld [vmem:[#allocation173_spill] sm:$0xff]  ;;  %v15062_v45 = vld [vmem:[#allocation312_spill] sm:$0xff] }
 0x7b8   : > { %v3767_v10 = vmul.f32 %v11820_v4, %v3763_v31  ;;  %15054 = vst [vmem:[#allocation124_spill] sm:$0xff] %v11914_v5  ;;  %v11917_v17 = vstv %s11867_s10  ;;  %v2228_v42 = vadd.f32 %v2224_v37, %v2173_v24  ;;  %v2229_v51 = vadd.f32 %v2225_v43, %v2174_v32  ;;  %v11939_v31 = vpop.permute.xlu0 %2954  ;;  %v15065_v24 = vld [vmem:[#allocation311_spill] sm:$0xff]  ;;  %s15442_s10 = sld [smem:[#allocation345_spill]] }
 0x7b9   : > { %v3788_v38 = vadd.f32 %v11152_v3, %v3766_v53  ;;  %15055 = vst [vmem:[#allocation275_spill] sm:$0xff] %v11917_v17  ;;  %v2279_v59 = vmul.f32 %v15056_v13, %v2275_v11  ;;  %v2280_v54 = vmul.f32 %v10173_v9, %v2276_v36  ;;  %v15057_v3 = vld [vmem:[#allocation236_spill] sm:$0xff]  ;;  %vm15058_vm1 = vcmp.lt.s32.totalorder %v8777_v20, 31  ;;  %v15063_v11 = vld [vmem:[#allocation79_spill] sm:$0xff]  ;;  %3978 = vrot.lane.b32.xlu0 %v8653_v14, %s14713_s4  ;;  %s12588_s4 = sld [smem:[#allocation7 + $0xb0]] }
 0x7ba   : > { %v3789_v61 = vadd.f32 %v11155_v6, %v3767_v10  ;;  %v2412_v6 = vsel %vm15058_vm1, %v15057_v3, %v11126_v60  ;;  %vm15059_vm9 = vmmov %vm15058_vm1  ;;  %v2334_v23 = vmul.f32 %v15061_v57, %v2330_v58  ;;  %v2335_v62 = vmul.f32 %v15062_v45, %v2331_v27  ;;  %v15064_v36 = vld [vmem:[#allocation80_spill] sm:$0xff]  ;;  %v15066_v32 = vld [vmem:[#allocation239_spill] sm:$0xff]  ;;  %v3812_v58 = vpop.permute.xlu1 %3811 }
 0x7bb   : > { %v2414_v2 = vsel %vm15059_vm9, %v11126_v60, %v15057_v3  ;;  %v3792_v37 = vmul.f32 %v15060_v12, %v3788_v38  ;;  %v2385_v19 = vadd.f32 %v15063_v11, %v2363_v49  ;;  %v2386_v41 = vadd.f32 %v15064_v36, %v2364_v55  ;;  %vm3856_vm9 = vmand %vm1683_vm14, %vm14910_vm4  ;;  %v15073_v3 = vld [vmem:[#allocation323_spill] sm:$0xff]  ;;  %v15075_v11 = vld [vmem:[#allocation242_spill] sm:$0xff] }
 0x7bc   : > { %v3793_v43 = vmul.f32 %v11825_v52, %v3789_v61  ;;  %vm15067_vm15 = vcmp.lt.s32.totalorder %v8777_v20, 30  ;;  %v2418_v27 = vmul.f32 %v15069_v34, %v2414_v2  ;;  %v2419_v18 = vmul.f32 %v15069_v34, %v2412_v6  ;;  %v11967_v57 = vpop.permute.xlu0 %2958  ;;  %v15080_v34 = vld [vmem:[#allocation274_spill] sm:$0xff] }
 0x7bd   : > { %v2467_v53 = vsel %vm15067_vm15, %v15066_v32, %v15065_v24  ;;  %vm15068_vm5 = vmmov %vm15067_vm15  ;;  %v3796_v10 = vadd.f32 %v3792_v37, %v3741_v47  ;;  %vm15070_vm10 = vcmp.lt.s32.totalorder %v8777_v20, 97  ;;  %v2283_v47 = vadd.f32 %v2279_v59, %v2228_v42  ;;  %v15109_v52 = vld [vmem:[#allocation278_spill] sm:$0xff]  ;;  %4029 = vrot.lane.b32.xlu0 %v8643_v8, %s14734_s13 }
 0x7be   : > { %v2469_v60 = vsel %vm15068_vm5, %v15065_v24, %v15066_v32  ;;  %v3797_v28 = vadd.f32 %v3793_v43, %v3742_v33  ;;  %v3816_v49 = vsel %vm15070_vm10, %v3808_v7, %v3812_v58  ;;  %vm15071_vm1 = vmmov %vm15070_vm10  ;;  %v2284_v33 = vadd.f32 %v2280_v54, %v2229_v51  ;;  %v15076_v24 = vld [vmem:[#allocation297_spill] sm:$0xff]  ;;  %v3863_v42 = vpop.permute.xlu1 %3862 }
 0x7bf   : > { %v3818_v55 = vsel %vm15071_vm1, %v3812_v58, %v3808_v7  ;;  %v3821_v61 = vmul.f32 %v11917_v17, %v3816_v49  ;;  %v2389_v6 = vmul.f32 %v15073_v3, %v2385_v19  ;;  %v2390_v2 = vmul.f32 %v14585_v15, %v2386_v41  ;;  %v15074_v7 = vld [vmem:[#allocation330_spill] sm:$0xff]  ;;  %v15079_v58 = vld [vmem:[#allocation84_spill] sm:$0xff]  ;;  %v15082_v49 = vld [vmem:[#allocation45_spill] sm:$0xff] }
 0x7c0   : > { %v3822_v13 = vmul.f32 %v11917_v17, %v3818_v55  ;;  %v2473_v37 = vmul.f32 %v15074_v7, %v2469_v60  ;;  %v2474_v43 = vmul.f32 %v15074_v7, %v2467_v53  ;;  %v11972_v51 = vsel %vm3856_vm9, 1.0, %v14714_v1  ;;  %v15081_v53 = vld [vmem:[#allocation57_spill] sm:$0xff]  ;;  %v15087_v3 = vld [vmem:[#allocation87_spill] sm:$0xff] }
 0x7c1   : > { %v3843_v36 = vadd.f32 %v15075_v11, %v3821_v61  ;;  %15077 = vst [vmem:[#allocation276_spill] sm:$0xff] %v11972_v51  ;;  %v11975_v59 = vstv %s11919_s21  ;;  %v2338_v54 = vadd.f32 %v2334_v23, %v2283_v47  ;;  %v2339_v19 = vadd.f32 %v2335_v62, %v2284_v33  ;;  %v11993_v11 = vpop.permute.xlu0 %3009  ;;  %4033 = vrot.lane.b32.xlu0 %v8653_v14, %s14734_s13  ;;  %s13189_s21 = scalar_lea.hbm %s15442_s10, %s6595_s7 }
 0x7c2   : > { %v3844_v32 = vadd.f32 %v15076_v24, %v3822_v13  ;;  %15078 = vst [vmem:[#allocation220_spill] sm:$0xff] %v11975_v59  ;;  %v2440_v41 = vadd.f32 %v15079_v58, %v2418_v27  ;;  %v2441_v60 = vadd.f32 %v15080_v34, %v2419_v18  ;;  %vm15083_vm15 = vcmp.lt.s32.totalorder %v8777_v20, 29  ;;  %v15085_v13 = vld [vmem:[#allocation262_spill] sm:$0xff]  ;;  %v15086_v18 = vld [vmem:[#allocation277_spill] sm:$0xff] }
 0x7c3   : > { %v2522_v55 = vsel %vm15083_vm15, %v15082_v49, %v15081_v53  ;;  %vm15084_vm5 = vmmov %vm15083_vm15  ;;  %v3847_v23 = vmul.f32 %v15085_v13, %v3843_v36  ;;  %v2393_v27 = vadd.f32 %v2389_v6, %v2338_v54  ;;  %v2394_v47 = vadd.f32 %v2390_v2, %v2339_v19  ;;  %v15088_v24 = vld [vmem:[#allocation265_spill] sm:$0xff]  ;;  %v3867_v6 = vpop.permute.xlu1 %3866  ;;  %v15092_v2 = vld [vmem:[#allocation179_spill] sm:$0xff] }
 0x7c4   : > { %v2524_v61 = vsel %vm15084_vm5, %v15081_v53, %v15082_v49  ;;  %v3848_v62 = vmul.f32 %v11914_v5, %v3844_v32  ;;  %v2495_v33 = vadd.f32 %v15086_v18, %v2473_v37  ;;  %v2496_v7 = vadd.f32 %v15087_v3, %v2474_v43  ;;  %v15089_v58 = vld [vmem:[#allocation301_spill] sm:$0xff]  ;;  %v15095_v49 = vld [vmem:[#allocation328_spill] sm:$0xff]  ;;  %v15108_v5 = vld [vmem:[#allocation91_spill] sm:$0xff] }
 0x7c5   : > { %vm15090_vm10 = vcmp.lt.s32.totalorder %v8777_v20, 19  ;;  %v3851_v53 = vadd.f32 %v3847_v23, %v3796_v10  ;;  %v2528_v54 = vmul.f32 %v15092_v2, %v2524_v61  ;;  %v2529_v37 = vmul.f32 %v15092_v2, %v2522_v55  ;;  %v15096_v61 = vld [vmem:[#allocation331_spill] sm:$0xff]  ;;  %4084 = vrot.lane.b32.xlu0 %v8643_v8, %s14761_s8 }
 0x7c6   : > { %v2577_v34 = vsel %vm15090_vm10, %v15089_v58, %v15088_v24  ;;  %vm15091_vm1 = vmmov %vm15090_vm10  ;;  %v3852_v32 = vadd.f32 %v3848_v62, %v3797_v28  ;;  %vm15093_vm9 = vcmp.lt.s32.totalorder %v8777_v20, 96  ;;  %v2444_v18 = vmul.f32 %v15095_v49, %v2440_v41  ;;  %v15097_v62 = vld [vmem:[#allocation81_spill] sm:$0xff] }
 0x7c7   : > { %v2579_v36 = vsel %vm15091_vm1, %v15088_v24, %v15089_v58  ;;  %v3871_v43 = vsel %vm15093_vm9, %v3863_v42, %v3867_v6  ;;  %vm15094_vm15 = vmmov %vm15093_vm9  ;;  %v2445_v3 = vmul.f32 %v10255_v56, %v2441_v60  ;;  %v2584_v55 = vmul.f32 %v15096_v61, %v2577_v34  ;;  %v15098_v24 = vld [vmem:[#allocation111_spill] sm:$0xff]  ;;  %v12025_v58 = vpop.permute.xlu0 %3013  ;;  %v15101_v60 = vld [vmem:[#allocation85_spill] sm:$0xff] }
 0x7c8   : > { %v3873_v19 = vsel %vm15094_vm15, %v3867_v6, %v3863_v42  ;;  %v3876_v10 = vmul.f32 %v11975_v59, %v3871_v43  ;;  %v2583_v23 = vmul.f32 %v15096_v61, %v2579_v36  ;;  %vm15099_vm5 = vcmp.lt.s32.totalorder %v8777_v20, 18  ;;  %v15102_v6 = vld [vmem:[#allocation114_spill] sm:$0xff]  ;;  %v15105_v36 = vld [vmem:[#allocation327_spill] sm:$0xff]  ;;  %v12037_v61 = vpop.permute.xlu1 %3917 }
 0x7c9   : > { %v3877_v28 = vmul.f32 %v11975_v59, %v3873_v19  ;;  %v2632_v42 = vsel %vm15099_vm5, %v15098_v24, %v15097_v62  ;;  %vm15100_vm10 = vmmov %vm15099_vm5  ;;  %vm15103_vm1 = vcmp.lt.s32.totalorder %v8777_v20, 17  ;;  %v15106_v19 = vld [vmem:[#allocation322_spill] sm:$0xff]  ;;  %v15107_v59 = vld [vmem:[#allocation329_spill] sm:$0xff]  ;;  %v2550_v17 = vadd.f32 %v15108_v5, %v2528_v54  ;;  %4088 = vrot.lane.b32.xlu0 %v8653_v14, %s14761_s8 }
 0x7ca   : > { %v2634_v41 = vsel %vm15100_vm10, %v15097_v62, %v15098_v24  ;;  %v2687_v2 = vsel %vm15103_vm1, %v15102_v6, %v15101_v60  ;;  %vm15104_vm9 = vmmov %vm15103_vm1  ;;  %v3898_v43 = vadd.f32 %v15105_v36, %v3876_v10  ;;  %v2499_v62 = vmul.f32 %v15107_v59, %v2495_v33  ;;  %v15111_v10 = vld [vmem:[#allocation196_spill] sm:$0xff]  ;;  %v15113_v59 = vld [vmem:[#allocation98_spill] sm:$0xff] }
 0x7cb   : > { %v2689_v34 = vsel %vm15104_vm9, %v15101_v60, %v15102_v6  ;;  %v3899_v49 = vadd.f32 %v15106_v19, %v3877_v28  ;;  %v2500_v24 = vmul.f32 %v10285_v50, %v2496_v7  ;;  %v2551_v4 = vadd.f32 %v15109_v52, %v2529_v37  ;;  %v15112_v36 = vld [vmem:[#allocation96_spill] sm:$0xff]  ;;  %v15114_v7 = vld [vmem:[#allocation333_spill] sm:$0xff]  ;;  %v12053_v52 = vpop.permute.xlu0 %3064  ;;  %v15115_v54 = vld [vmem:[#allocation119_spill] sm:$0xff] }
 0x7cc   : > { %v2638_v46 = vmul.f32 %v15110_v22, %v2634_v41  ;;  %v2639_v60 = vmul.f32 %v15110_v22, %v2632_v42  ;;  %v3902_v6 = vmul.f32 %v15111_v10, %v3898_v43  ;;  %v2605_v19 = vadd.f32 %v15112_v36, %v2583_v23  ;;  %v15116_v37 = vld [vmem:[#allocation118_spill] sm:$0xff]  ;;  %v15120_v43 = vld [vmem:[#allocation177_spill] sm:$0xff] }
 0x7cd   : > { %v3903_v28 = vmul.f32 %v11972_v51, %v3899_v49  ;;  %v2606_v33 = vadd.f32 %v15113_v59, %v2584_v55  ;;  %v2693_v38 = vmul.f32 %v15114_v7, %v2689_v34  ;;  %v2694_v5 = vmul.f32 %v15114_v7, %v2687_v2  ;;  %v12067_v55 = vpop.permute.xlu1 %3921  ;;  %v15121_v59 = vld [vmem:[#allocation99_spill] sm:$0xff]  ;;  %v15122_v51 = vld [vmem:[#allocation285_spill] sm:$0xff]  ;;  %4139 = vrot.lane.b32.xlu0 %v8643_v8, %s14793_s20 }
 0x7ce   : > { %vm15117_vm15 = vcmp.lt.s32.totalorder %v8777_v20, 16  ;;  %v12063_v42 = vadd.f32 %v3902_v6, %v3851_v53  ;;  %v2448_v34 = vadd.f32 %v2444_v18, %v2393_v27  ;;  %v2449_v2 = vadd.f32 %v2445_v3, %v2394_v47 }
 0x7cf   : > { %v2742_v41 = vsel %vm15117_vm15, %v15116_v37, %v15115_v54  ;;  %vm15118_vm5 = vmmov %vm15117_vm15  ;;  %v12065_v23 = vadd.f32 %v3903_v28, %v3852_v32  ;;  %v2554_v49 = vmul.f32 %v15120_v43, %v2550_v17  ;;  %v2555_v36 = vmul.f32 %v10295_v25, %v2551_v4  ;;  %v15125_v4 = vld [vmem:[#allocation193_spill] sm:$0xff]  ;;  %v3069_v3 = vpop.permute.xlu0 %3068 }
 0x7d0   : > { %v2744_v22 = vsel %vm15118_vm5, %v15115_v54, %v15116_v37  ;;  %v2660_v7 = vadd.f32 %v15121_v59, %v2638_v46  ;;  %v2661_v10 = vadd.f32 %v15122_v51, %v2639_v60  ;;  %vm15123_vm10 = vcmp.lt.s32.totalorder %v8777_v20, 15  ;;  %v15126_v46 = vld [vmem:[#allocation206_spill] sm:$0xff]  ;;  %v15127_v60 = vld [vmem:[#allocation289_spill] sm:$0xff]  ;;  %v15129_v59 = vld [vmem:[#allocation335_spill] sm:$0xff] }
 0x7d1   : > { %15119 = vst [vmem:[#allocation129_spill] sm:$0xff] %v12065_v23  ;;  %v2797_v53 = vsel %vm15123_vm10, %v11768_v16, %v11799_v40  ;;  %vm15124_vm1 = vmmov %vm15123_vm10  ;;  %v2503_v17 = vadd.f32 %v2499_v62, %v2448_v34  ;;  %v2504_v47 = vadd.f32 %v2500_v24, %v2449_v2  ;;  %v2748_v32 = vmul.f32 %v15125_v4, %v2744_v22  ;;  %v15128_v54 = vld [vmem:[#allocation290_spill] sm:$0xff]  ;;  %v12089_v43 = vpop.permute.xlu1 %3972  ;;  %v15134_v34 = vld [vmem:[#allocation71_spill] sm:$0xff] }
 0x7d2   : > { %v2799_v27 = vsel %vm15124_vm1, %v11799_v40, %v11768_v16  ;;  %v2749_v18 = vmul.f32 %v15125_v4, %v2742_v41  ;;  %v2609_v6 = vmul.f32 %v15126_v46, %v2605_v19  ;;  %v2610_v51 = vmul.f32 %v10146_v26, %v2606_v33  ;;  %v15132_v19 = vld [vmem:[#allocation207_spill] sm:$0xff]  ;;  %v15133_v41 = vld [vmem:[#allocation254_spill] sm:$0xff]  ;;  %4143 = vrot.lane.b32.xlu0 %v8653_v14, %s14793_s20  ;;  %s15436_s20 = sld [smem:[#allocation343_spill]] }
 0x7d3   : > { %v2715_v28 = vadd.f32 %v15127_v60, %v2693_v38  ;;  %v2716_v37 = vadd.f32 %v15128_v54, %v2694_v5  ;;  %v2803_v23 = vmul.f32 %v15129_v59, %v2799_v27  ;;  %v2804_v40 = vmul.f32 %v15129_v59, %v2797_v53  ;;  %v15140_v60 = vld [vmem:[#allocation76_spill] sm:$0xff]  ;;  %v15144_v59 = vld [vmem:[#allocation191_spill] sm:$0xff] }
 0x7d4   : > { %vm15130_vm9 = vcmp.lt.s32.totalorder %v8777_v20, 14  ;;  %v2558_v38 = vadd.f32 %v2554_v49, %v2503_v17  ;;  %v2559_v24 = vadd.f32 %v2555_v36, %v2504_v47  ;;  %v2664_v33 = vmul.f32 %v15132_v19, %v2660_v7  ;;  %v15137_v7 = vld [vmem:[#allocation205_spill] sm:$0xff]  ;;  %v15146_v19 = vld [vmem:[#allocation88_spill] sm:$0xff] }
 0x7d5   : > { %v2852_v16 = vsel %vm15130_vm9, %v11831_v35, %v11855_v48  ;;  %vm15131_vm15 = vmmov %vm15130_vm9  ;;  %v2665_v5 = vmul.f32 %v10173_v9, %v2661_v10  ;;  %v2770_v22 = vadd.f32 %v15133_v41, %v2748_v32  ;;  %v2771_v2 = vadd.f32 %v15134_v34, %v2749_v18  ;;  %v12119_v17 = vpop.permute.xlu1 %3976  ;;  %v15138_v47 = vld [vmem:[#allocation181_spill] sm:$0xff] }
 0x7d6   : > { %v2854_v62 = vsel %vm15131_vm15, %v11855_v48, %v11831_v35  ;;  %vm15135_vm5 = vcmp.lt.s32.totalorder %v8777_v20, 13  ;;  %v12115_v48 = vpop.permute.xlu0 %3149  ;;  %v2613_v49 = vadd.f32 %v2609_v6, %v2558_v38  ;;  %v2614_v36 = vadd.f32 %v2610_v51, %v2559_v24  ;;  %v15139_v18 = vld [vmem:[#allocation273_spill] sm:$0xff]  ;;  %v15145_v38 = vld [vmem:[#allocation92_spill] sm:$0xff]  ;;  %4194 = vrot.lane.b32.xlu0 %v8643_v8, %s14835_s29 }
 0x7d7   : > { %v2907_v53 = vsel %vm15135_vm5, %v11881_v21, %v11909_v39  ;;  %vm15136_vm10 = vmmov %vm15135_vm5  ;;  %v2858_v10 = vmul.f32 %v15137_v7, %v2854_v62  ;;  %v2859_v27 = vmul.f32 %v15137_v7, %v2852_v16  ;;  %v2719_v4 = vmul.f32 %v15138_v47, %v2715_v28 }
 0x7d8   : > { %v2909_v35 = vsel %vm15136_vm10, %v11909_v39, %v11881_v21  ;;  %v2720_v32 = vmul.f32 %v15062_v45, %v2716_v37  ;;  %v2825_v46 = vadd.f32 %v15139_v18, %v2803_v23  ;;  %v2826_v54 = vadd.f32 %v15140_v60, %v2804_v40  ;;  %v15141_v21 = vld [vmem:[#allocation218_spill] sm:$0xff] }
 0x7d9   : > { %v2913_v39 = vmul.f32 %v15141_v21, %v2909_v35  ;;  %v2914_v6 = vmul.f32 %v15141_v21, %v2907_v53  ;;  %vm15142_vm1 = vcmp.lt.s32.totalorder %v8777_v20, 3  ;;  %v2668_v23 = vadd.f32 %v2664_v33, %v2613_v49  ;;  %v15150_v53 = vld [vmem:[#allocation334_spill] sm:$0xff] }
 0x7da   : > { %v2962_v51 = vsel %vm15142_vm1, %v11939_v31, %v11967_v57  ;;  %vm15143_vm9 = vmmov %vm15142_vm1  ;;  %v2669_v37 = vadd.f32 %v2665_v5, %v2614_v36  ;;  %v2774_v40 = vmul.f32 %v15144_v59, %v2770_v22  ;;  %v2775_v16 = vmul.f32 %v14585_v15, %v2771_v2  ;;  %v3154_v62 = vpop.permute.xlu0 %3153  ;;  %v15149_v15 = vld [vmem:[#allocation221_spill] sm:$0xff]  ;;  %v15151_v36 = vld [vmem:[#allocation288_spill] sm:$0xff]  ;;  %4198 = vrot.lane.b32.xlu0 %v8653_v14, %s14835_s29 }
 0x7db   : > { %v2964_v28 = vsel %vm15143_vm9, %v11967_v57, %v11939_v31  ;;  %v2880_v24 = vadd.f32 %v15145_v38, %v2858_v10  ;;  %v2881_v41 = vadd.f32 %v15146_v19, %v2859_v27  ;;  %vm15147_vm15 = vcmp.lt.s32.totalorder %v8777_v20, 2  ;;  %v12149_v57 = vpop.permute.xlu1 %4027  ;;  %v15153_v10 = vld [vmem:[#allocation224_spill] sm:$0xff] }
 0x7dc   : > { %v3017_v34 = vsel %vm15147_vm15, %v11993_v11, %v12025_v58  ;;  %vm15148_vm5 = vmmov %vm15147_vm15  ;;  %v2723_v33 = vadd.f32 %v2719_v4, %v2668_v23  ;;  %v2724_v5 = vadd.f32 %v2720_v32, %v2669_v37  ;;  %v2968_v22 = vmul.f32 %v15149_v15, %v2964_v28  ;;  %v15158_v28 = vld [vmem:[#allocation156_spill] sm:$0xff] }
 0x7dd   : > { %v3019_v31 = vsel %vm15148_vm5, %v12025_v58, %v11993_v11  ;;  %v2969_v2 = vmul.f32 %v15149_v15, %v2962_v51  ;;  %vm4365_vm10 = vcmp.lt.s32.totalorder %v8777_v20, 78  ;;  %v2829_v35 = vmul.f32 %v15150_v53, %v2825_v46  ;;  %v15152_v11 = vld [vmem:[#allocation284_spill] sm:$0xff]  ;;  %v15157_v51 = vld [vmem:[#allocation158_spill] sm:$0xff]  ;;  %v15166_v53 = vld [vmem:[#allocation249_spill] sm:$0xff] }
 0x7de   : > { %v2830_v49 = vmul.f32 %v10255_v56, %v2826_v54  ;;  %v2935_v7 = vadd.f32 %v15151_v36, %v2913_v39  ;;  %v2936_v58 = vadd.f32 %v15152_v11, %v2914_v6  ;;  %v3023_v27 = vmul.f32 %v15153_v10, %v3019_v31  ;;  %v3205_v18 = vpop.permute.xlu0 %3204  ;;  %v15156_v54 = vld [vmem:[#allocation202_spill] sm:$0xff]  ;;  %v15162_v59 = vld [vmem:[#allocation248_spill] sm:$0xff]  ;;  %v15167_v11 = vld [vmem:[#allocation83_spill] sm:$0xff]  ;;  %4249 = vrot.lane.b32.xlu0 %v8643_v8, %s14877_s18 }
 0x7df   : > { %v3024_v47 = vmul.f32 %v15153_v10, %v3017_v34  ;;  %vm15154_vm1 = vcmp.lt.s32.totalorder %v8777_v20, 1  ;;  %v2778_v46 = vadd.f32 %v2774_v40, %v2723_v33  ;;  %v2779_v60 = vadd.f32 %v2775_v16, %v2724_v5  ;;  %v12170_v6 = vpop.permute.xlu1 %4031  ;;  %v15164_v34 = vld [vmem:[#allocation216_spill] sm:$0xff]  ;;  %v15165_v5 = vld [vmem:[#allocation39_spill] sm:$0xff] }
 0x7e0   : > { %v3072_v4 = vsel %vm15154_vm1, %v12053_v52, %v3069_v3  ;;  %vm15155_vm9 = vmmov %vm15154_vm1  ;;  %v2884_v21 = vmul.f32 %v15156_v54, %v2880_v24  ;;  %v2885_v39 = vmul.f32 %v10285_v50, %v2881_v41  ;;  %vm15159_vm15 = vcmp.lt.s32.totalorder %v8777_v20, 112  ;;  %v15163_v24 = vld [vmem:[#allocation226_spill] sm:$0xff] }
 0x7e1   : > { %v3074_v32 = vsel %vm15155_vm9, %v3069_v3, %v12053_v52  ;;  %v3505_v23 = vsel %vm15159_vm15, %v15158_v28, %v15157_v51  ;;  %vm15160_vm5 = vmmov %vm15159_vm15  ;;  %v15161_v52 = vld [vmem:[#allocation246_spill] sm:$0xff]  ;;  %v2991_v40 = vadd.f32 %v15162_v59, %v2969_v2  ;;  %v2833_v16 = vadd.f32 %v2829_v35, %v2778_v46  ;;  %v15168_v2 = vld [vmem:[#allocation95_spill] sm:$0xff] }
 0x7e2   : > { %v3507_v37 = vsel %vm15160_vm5, %v15157_v51, %v15158_v28  ;;  %v2990_v3 = vadd.f32 %v15161_v52, %v2968_v22  ;;  %v2834_v38 = vadd.f32 %v2830_v49, %v2779_v60  ;;  %v3078_v19 = vmul.f32 %v15163_v24, %v3074_v32  ;;  %v3209_v22 = vpop.permute.xlu0 %3208  ;;  %v15169_v54 = vld [vmem:[#allocation214_spill] sm:$0xff]  ;;  %v15172_v46 = vld [vmem:[#allocation41_spill] sm:$0xff]  ;;  %4253 = vrot.lane.b32.xlu0 %v8653_v14, %s14877_s18  ;;  %s15438_s18 = sld [smem:[#allocation24_spill]] }
 0x7e3   : > { %v3079_v41 = vmul.f32 %v15163_v24, %v3072_v4  ;;  %v2939_v31 = vmul.f32 %v15164_v34, %v2935_v7  ;;  %v2940_v33 = vmul.f32 %v10295_v25, %v2936_v58  ;;  %v3045_v15 = vadd.f32 %v15165_v5, %v3023_v27  ;;  %v12198_v4 = vpop.permute.xlu1 %4082  ;;  %v15181_v5 = vld [vmem:[#allocation160_spill] sm:$0xff] }
 0x7e4   : > { %v3046_v36 = vadd.f32 %v15166_v53, %v3024_v47  ;;  %v12192_v10 = vmul.f32 %v15168_v2, %v15167_v11  ;;  %v12196_v35 = vmul.f32 %v15168_v2, %v15169_v54  ;;  %v2888_v49 = vadd.f32 %v2884_v21, %v2833_v16 }
 0x7e5   : > { %v2889_v32 = vadd.f32 %v2885_v39, %v2834_v38  ;;  %v2994_v7 = vmul.f32 %v14720_v30, %v2990_v3  ;;  %v2995_v58 = vmul.f32 %v10146_v26, %v2991_v40  ;;  %vm15170_vm1 = vcmp.lt.s32.totalorder %v8777_v20, 127  ;;  %v15173_v39 = vld [vmem:[#allocation256_spill] sm:$0xff]  ;;  %v15174_v26 = vld [vmem:[#allocation55_spill] sm:$0xff] }
 0x7e6   : > { %v3157_v27 = vsel %vm15170_vm1, %v12115_v48, %v3154_v62  ;;  %vm15171_vm9 = vmmov %vm15170_vm1  ;;  %v12211_v60 = vmul.f32 %v15172_v46, %v3505_v23  ;;  %v12214_v21 = vmul.f32 %v15172_v46, %v3507_v37  ;;  %v3100_v51 = vadd.f32 %v15173_v39, %v3078_v19  ;;  %v15178_v19 = vld [vmem:[#allocation161_spill] sm:$0xff]  ;;  %v15186_v46 = vld [vmem:[#allocation260_spill] sm:$0xff]  ;;  %4304 = vrot.lane.b32.xlu0 %v8643_v8, %s14921_s30 }
 0x7e7   : > { %v3159_v47 = vsel %vm15171_vm9, %v3154_v62, %v12115_v48  ;;  %v3101_v28 = vadd.f32 %v15174_v26, %v3079_v41  ;;  %v2943_v52 = vadd.f32 %v2939_v31, %v2888_v49  ;;  %v2944_v3 = vadd.f32 %v2940_v33, %v2889_v32  ;;  %v3260_v48 = vpop.permute.xlu0 %3259  ;;  %v15175_v62 = vld [vmem:[#allocation230_spill] sm:$0xff]  ;;  %v12226_v24 = vpop.permute.xlu1 %4086  ;;  %v15179_v41 = vld [vmem:[#allocation159_spill] sm:$0xff] }
 0x7e8   : > { %v3049_v59 = vmul.f32 %v15060_v12, %v3045_v15  ;;  %v3050_v40 = vmul.f32 %v10173_v9, %v3046_v36  ;;  %v3163_v16 = vmul.f32 %v15175_v62, %v3157_v27  ;;  %v3164_v38 = vmul.f32 %v15175_v62, %v3159_v47  ;;  %v15184_v49 = vld [vmem:[#allocation231_spill] sm:$0xff]  ;;  %v15185_v27 = vld [vmem:[#allocation65_spill] sm:$0xff] }
 0x7e9   : > { %vm15176_vm15 = vcmp.lt.s32.totalorder %v8777_v20, 126  ;;  %v4384_v34 = vsel %vm4365_vm10, %v15179_v41, %v15178_v19  ;;  %v4386_v9 = vsel %vm4365_vm10, %v15178_v19, %v15179_v41  ;;  %v2998_v31 = vadd.f32 %v2994_v7, %v2943_v52  ;;  %v15190_v52 = vld [vmem:[#allocation164_spill] sm:$0xff] }
 0x7ea   : > { %v3212_v23 = vsel %vm15176_vm15, %v3205_v18, %v3209_v22  ;;  %vm15177_vm5 = vmmov %vm15176_vm15  ;;  %v2999_v33 = vadd.f32 %v2995_v58, %v2944_v3  ;;  %vm15182_vm1 = vcmp.lt.s32.totalorder %v8777_v20, 111  ;;  %v3104_v36 = vmul.f32 %v15085_v13, %v3100_v51  ;;  %4308 = vrot.lane.b32.xlu0 %v8653_v14, %s14921_s30  ;;  %s6388_s30 = sshll.u32 %s15438_s18, 3 }
 0x7eb   : > { %v3214_v37 = vsel %vm15177_vm5, %v3209_v22, %v3205_v18  ;;  %v15180_v18 = vld [vmem:[#allocation162_spill] sm:$0xff]  ;;  %vm15183_vm9 = vmmov %vm15182_vm1  ;;  %v3105_v22 = vmul.f32 %v15062_v45, %v3101_v28  ;;  %v3053_v11 = vadd.f32 %v3049_v59, %v2998_v31  ;;  %v3218_v32 = vmul.f32 %v15184_v49, %v3212_v23  ;;  %v3264_v58 = vpop.permute.xlu0 %3263  ;;  %v12262_v26 = vpop.permute.xlu1 %4137 }
 0x7ec   : > { %v3560_v15 = vsel %vm15182_vm1, %v15181_v5, %v15180_v18  ;;  %v3562_v53 = vsel %vm15183_vm9, %v15180_v18, %v15181_v5  ;;  %v3054_v54 = vadd.f32 %v3050_v40, %v2999_v33  ;;  %v3219_v7 = vmul.f32 %v15184_v49, %v3214_v37  ;;  %v15189_v28 = vld [vmem:[#allocation166_spill] sm:$0xff]  ;;  %v15193_v40 = vld [vmem:[#allocation237_spill] sm:$0xff]  ;;  %v15200_v33 = vld [vmem:[#allocation40_spill] sm:$0xff] }
 0x7ed   : > { %v3185_v47 = vadd.f32 %v15185_v27, %v3163_v16  ;;  %v3186_v39 = vadd.f32 %v15186_v46, %v3164_v38  ;;  %vm15187_vm15 = vcmp.lt.s32.totalorder %v8777_v20, 125  ;;  %vm15191_vm1 = vcmp.lt.s32.totalorder %v8777_v20, 110  ;;  %v15201_v5 = vld [vmem:[#allocation287_spill] sm:$0xff]  ;;  %v15202_v49 = vld [vmem:[#allocation264_spill] sm:$0xff]  ;;  %v15203_v46 = vld [vmem:[#allocation46_spill] sm:$0xff] }
 0x7ee   : > { %v3267_v51 = vsel %vm15187_vm15, %v3260_v48, %v3264_v58  ;;  %vm15188_vm5 = vmmov %vm15187_vm15  ;;  %v3615_v3 = vsel %vm15191_vm1, %v15190_v52, %v15189_v28  ;;  %v3108_v41 = vadd.f32 %v3104_v36, %v3053_v11  ;;  %v3109_v31 = vadd.f32 %v3105_v22, %v3054_v54  ;;  %4359 = vrot.lane.b32.xlu0 %v8643_v8, %s14960_s14 }
 0x7ef   : > { %v3269_v45 = vsel %vm15188_vm5, %v3264_v58, %v3260_v48  ;;  %vm15192_vm9 = vmmov %vm15191_vm1  ;;  %v3273_v62 = vmul.f32 %v15193_v40, %v3267_v51  ;;  %v15194_v48 = vld [vmem:[#allocation283_spill] sm:$0xff]  ;;  %v12291_v18 = vmul.f32 %v15200_v33, %v3560_v15  ;;  %v3241_v58 = vadd.f32 %v15202_v49, %v3219_v7  ;;  %v3315_v27 = vpop.permute.xlu0 %3314  ;;  %v15207_v15 = vld [vmem:[#allocation234_spill] sm:$0xff]  ;;  %v12314_v11 = vpop.permute.xlu1 %4141 }
 0x7f0   : > { %v3617_v59 = vsel %vm15192_vm9, %v15189_v28, %v15190_v52  ;;  %v3274_v16 = vmul.f32 %v15193_v40, %v3269_v45  ;;  %v12277_v38 = vmul.f32 %v15194_v48, %v4384_v34  ;;  %v12280_v23 = vmul.f32 %v15194_v48, %v4386_v9  ;;  %vm12286_vm15 = vmand %vm1683_vm14, %vm10178_vm7  ;;  %v15210_v7 = vld [vmem:[#allocation291_spill] sm:$0xff]  ;;  %v15211_v52 = vld [vmem:[#allocation109_spill] sm:$0xff] }
 0x7f1   : > { %v12294_v34 = vmul.f32 %v15200_v33, %v3562_v53  ;;  %v3240_v9 = vadd.f32 %v15201_v5, %v3218_v32  ;;  %v12299_v51 = vmul.f32 %v15203_v46, %v3615_v3  ;;  %v12302_v45 = vmul.f32 %v15203_v46, %v3617_v59  ;;  %vm3966_vm5 = vmand %vm1683_vm14, %vm14972_vm2  ;;  %v15214_v59 = vld [vmem:[#allocation212_spill] sm:$0xff] }
 0x7f2   : > { %15195 = vst [vmem:[#allocation127_spill] sm:$0xff] %v12277_v38  ;;  %15196 = vst [vmem:[#allocation222_spill] sm:$0xff] %v12280_v23  ;;  %v3189_v53 = vmul.f32 %v15207_v15, %v3185_v47  ;;  %v3190_v22 = vmul.f32 %v10255_v56, %v3186_v39  ;;  %v12319_v54 = vsel %vm12286_vm15, 1.0, %v14714_v1  ;;  %v12322_v32 = vstv %s12236_s27  ;;  %v15213_v47 = vld [vmem:[#allocation211_spill] sm:$0xff]  ;;  %4363 = vrot.lane.b32.xlu0 %v8653_v14, %s14960_s14  ;;  %s408_s14 = scalar_lea.vmem [#allocation10], %s6388_s30  ;;  %s6268_s27 = scalar_lea.sflag [#allocation5], %s15438_s18 }
 0x7f3   : > { %15204 = vst [vmem:[#allocation128_spill] sm:$0xff] %v12299_v51  ;;  %15205 = vst [vmem:[#allocation130_spill] sm:$0xff] %v12302_v45  ;;  %v3295_v28 = vadd.f32 %v15210_v7, %v3273_v62  ;;  %v3296_v3 = vadd.f32 %v15211_v52, %v3274_v16  ;;  %v12329_v56 = vstv %s12250_s2  ;;  %v3139_v39 = vadd.f32 %v15213_v47, %v3109_v31  ;;  %v3319_v5 = vpop.permute.xlu0 %3318  ;;  %v15225_v47 = vld [vmem:[#allocation240_spill] sm:$0xff]  ;;  %v15246_v51 = vld [vmem:[#allocation53_spill] sm:$0xff]  ;;  %s6282_s26 = sshll.u32 %s408_s14, 4  ;;  %s13191_s26 = int_to_ptr.vmem [resolvable:$true] %s6282_s26 }
 0x7f4   : > { %15208 = vst [vmem:[#allocation133_spill] sm:$0xff] %v12319_v54  ;;  %15209 = vst [vmem:[#allocation131_spill] sm:$0xff] %v12322_v32  ;;  %v3138_v40 = vadd.f32 %v15214_v59, %v3108_v41  ;;  %vm1689_vm1 = vcmp.lt.s32.totalorder %v11092_v29, 208  ;;  %v12335_v19 = vsel %vm3966_vm5, 1.0, %v14714_v1  ;;  %v12338_v33 = vstv %s12252_s6  ;;  %v15233_v41 = vld [vmem:[#allocation243_spill] sm:$0xff]  ;;  %s7253_s2 = scalar_lea.vmem %s13191_s26, 128 }
 0x7f5   : > { %15212 = vst [vmem:[#allocation225_spill] sm:$0xff] %v12329_v56  ;;  %15215 = vst [vmem:[#allocation134_spill] sm:$0xff] %v12335_v19  ;;  %v3244_v62 = vmul.f32 %v11075_v0, %v3240_v9  ;;  %v3245_v16 = vmul.f32 %v10285_v50, %v3241_v58  ;;  %v3194_v46 = vadd.f32 %v3190_v22, %v3139_v39  ;;  %vm15220_vm15 = vcmp.lt.s32.totalorder %v8777_v20, 115  ;;  %v12356_v50 = vpop.permute.xlu1 %4192  ;;  %v15231_v58 = vld [vmem:[#allocation113_spill] sm:$0xff]  ;;  %p7254_p10 = scmp.ne.s32.totalorder %s13191_s26, %s7253_s2  ;;  %s7389_s6 = smov [#allocation10]  }
 0x7f6   : > { %15216 = vst [vmem:[#allocation132_spill] sm:$0xff] %v12338_v33  ;;  %v3193_v49 = vadd.f32 %v3189_v53, %v3138_v40  ;;  %vm12348_vm9 = vmand %vm1683_vm14, %vm14992_vm11  ;;  %v3322_v31 = vsel %vm15220_vm15, %v3315_v27, %v3319_v5  ;;  %v3299_v22 = vmul.f32 %v11124_v44, %v3295_v28  ;;  %v3300_v52 = vmul.f32 %v10295_v25, %v3296_v3 }
 0x7f7   : > { %vm15221_vm5 = vmmov %vm15220_vm15  ;;  %v3328_v39 = vmul.f32 %v15225_v47, %v3322_v31  ;;  %vm15228_vm15 = vcmp.lt.s32.totalorder %v8777_v20, 94  ;;  %v15230_v31 = vld [vmem:[#allocation108_spill] sm:$0xff]  ;;  %v3370_v48 = vpop.permute.xlu0 %3369  ;;  %v12403_v2 = vstv %s12310_s15  ;;  %4414 = vrot.lane.b32.xlu0 %v8643_v8, %s14990_s16  ;;  %p7255_p5 = pnand %p7254_p10, %p15443_p1  ;;  %s7257_s15 = sshll.u32 %s7389_s6, 4  ;;  %s7258_s15 = int_to_ptr.vmem [resolvable:$false] %s7257_s15 }
 0x7f8   : > { %v3324_v9 = vsel %vm15221_vm5, %v3319_v5, %v3315_v27  ;;  %vm12364_vm0 = vmand %vm1689_vm1, %vm14783_vm8  ;;  %vm15226_vm8 = vcmp.lt.s32.totalorder %v8777_v20, 95  ;;  %v3981_v25 = vsel %vm15228_vm15, %v12089_v43, %v12119_v17  ;;  %v3248_v40 = vadd.f32 %v3244_v62, %v3193_v49  ;;  %p7260_p6 = scmp.lt.s32.totalorder %s13191_s26, %s7258_s15 }
 0x7f9   : > { %v3329_v27 = vmul.f32 %v15225_v47, %v3324_v9  ;;  %v3926_v59 = vsel %vm15226_vm8, %v12037_v61, %v12067_v55  ;;  %vm15227_vm14 = vmmov %vm15226_vm8  ;;  %v3249_v5 = vadd.f32 %v3245_v16, %v3194_v46  ;;  %v3350_v9 = vadd.f32 %v15230_v31, %v3328_v39  ;;  %v12412_v62 = vpop.permute.xlu1 %4196  ;;  %p7256_p4 = pneg %p7255_p5 }
 0x7fa   : > { %v3928_v28 = vsel %vm15227_vm14, %v12067_v55, %v12037_v61  ;;  %vm15229_vm5 = vmmov %vm15228_vm15  ;;  %v12395_v61 = vsel %vm12348_vm9, 1.0, %v14714_v1  ;;  %v12400_v55 = vsel %vm12364_vm0, 1.0, %v14714_v1  ;;  %v3303_v16 = vadd.f32 %v3299_v22, %v3248_v40 }
 0x7fb   : > { %v3983_v3 = vsel %vm15229_vm5, %v12119_v17, %v12089_v43  ;;  %v3351_v47 = vadd.f32 %v15231_v58, %v3329_v27  ;;  %vm4131_vm8 = vmand %vm1689_vm1, %vm14826_vm3  ;;  %v12410_v17 = vstv %s12312_s19  ;;  %v3304_v49 = vadd.f32 %v3300_v52, %v3249_v5  ;;  %4418 = vrot.lane.b32.xlu0 %v8653_v14, %s14990_s16  ;;  %s7259_s19 = scalar_lea.vmem %s7258_s15, 256 }
 0x7fc   : > { %v3354_v46 = vmul.f32 %v14720_v30, %v3350_v9  ;;  %vm4186_vm0 = vmand %vm1689_vm1, %vm10148_vm6  ;;  %v3931_v39 = vmul.f32 %v12322_v32, %v3926_v59  ;;  %v3932_v22 = vmul.f32 %v12322_v32, %v3928_v28  ;;  %v3986_v52 = vmul.f32 %v12329_v56, %v3981_v25  ;;  %v3374_v9 = vpop.permute.xlu0 %3373  ;;  %v15242_v32 = vld [vmem:[#allocation59_spill] sm:$0xff]  ;;  %p7261_p9 = scmp.lt.s32.totalorder %s7259_s19, %s7253_s2 }
 0x7fd   : > { %v3355_v53 = vmul.f32 %v15233_v41, %v3351_v47  ;;  %v3987_v27 = vmul.f32 %v12329_v56, %v3983_v3  ;;  %v12431_v40 = vsel %vm4131_vm8, 1.0, %v14714_v1  ;;  %v12434_v31 = vstv %s12342_s11  ;;  %v12443_v25 = vpop.permute.xlu1 %4247  ;;  %vm4241_vm15 = vmand %vm1689_vm1, %vm14910_vm4  ;;  %v15240_v41 = vld [vmem:[#allocation49_spill] sm:$0xff] }
 0x7fe   : > { %v3358_v63 = vadd.f32 %v3354_v46, %v3303_v16  ;;  %v12437_v58 = vsel %vm4186_vm0, 1.0, %v14714_v1  ;;  %vm15234_vm6 = vcmp.lt.s32.totalorder %v8777_v20, 114  ;;  %v12446_v3 = vstv %s12358_s28  ;;  %v15238_v16 = vld [vmem:[#allocation251_spill] sm:$0xff]  ;;  %vm4296_vm5 = vmand %vm1689_vm1, %vm10178_vm7  ;;  %p7262_p11 = por %p7261_p9, %p7260_p6 }
 0x7ff   : > { %v3359_v5 = vadd.f32 %v3355_v53, %v3304_v49  ;;  %v3377_v59 = vsel %vm15234_vm6, %v3370_v48, %v3374_v9  ;;  %vm15235_vm3 = vmmov %vm15234_vm6  ;;  %vm15236_vm9 = vcmp.lt.s32.totalorder %v8777_v20, 93  ;;  %v3953_v53 = vadd.f32 %v15240_v41, %v3931_v39 }
 0x800   : > { %v3379_v28 = vsel %vm15235_vm3, %v3374_v9, %v3370_v48  ;;  %v4036_v47 = vsel %vm15236_vm9, %v12149_v57, %v12170_v6  ;;  %vm15237_vm14 = vmmov %vm15236_vm9  ;;  %v3383_v49 = vmul.f32 %v15238_v16, %v3377_v59  ;;  %v15241_v9 = vld [vmem:[#allocation48_spill] sm:$0xff]  ;;  %v4008_v45 = vadd.f32 %v15242_v32, %v3986_v52  ;;  %p7263_p0 = pnand %p7262_p11, %p7256_p4 }
 0x801   : > { %v4038_v43 = vsel %vm15237_vm14, %v12170_v6, %v12149_v57  ;;  %v3384_v46 = vmul.f32 %v15238_v16, %v3379_v28  ;;  %v3954_v56 = vadd.f32 %v15241_v9, %v3932_v22  ;;  %v15243_v57 = vld [vmem:[#allocation259_spill] sm:$0xff]  ;;  %v4091_v59 = vsel %vm4090_vm12, %v12198_v4, %v12226_v24  ;;  %v15244_v22 = vld [vmem:[#allocation213_spill] sm:$0xff]  ;;  %v15245_v52 = vld [vmem:[#allocation296_spill] sm:$0xff]  ;;  %v3425_v28 = vpop.permute.xlu0 %3424  ;;  %v4252_v41 = vpop.permute.xlu1 %4251 }
 0x802   : > { %v4009_v6 = vadd.f32 %v15243_v57, %v3987_v27  ;;  %v4093_v39 = vsel %vm4090_vm12, %v12226_v24, %v12198_v4  ;;  %v3405_v32 = vadd.f32 %v15244_v22, %v3383_v49  ;;  %v4041_v37 = vmul.f32 %v12338_v33, %v4036_v47 }
 0x803   : > { %v3406_v27 = vadd.f32 %v15245_v52, %v3384_v46  ;;  %v4042_v16 = vmul.f32 %v12338_v33, %v4038_v43  ;;  %v12485_v48 = vsel %vm4241_vm15, 1.0, %v14714_v1  ;;  %v12488_v9 = vstv %s12414_s9  ;;  %v15248_v33 = vld [vmem:[#allocation106_spill] sm:$0xff] }
 0x804   : > { %v3409_v57 = vmul.f32 %v15060_v12, %v3405_v32  ;;  %v12495_v4 = vsel %vm4296_vm5, 1.0, %v14714_v1  ;;  %v12498_v24 = vstv %s12424_s24  ;;  %v3957_v47 = vmul.f32 %v15207_v15, %v3953_v53 }
 0x805   : > { %v3410_v7 = vmul.f32 %v15246_v51, %v3406_v27  ;;  %15247 = vst [vmem:[#allocation137_spill] sm:$0xff] %v12495_v4  ;;  %v3958_v43 = vmul.f32 %v12319_v54, %v3954_v56  ;;  %v4096_v49 = vmul.f32 %v12403_v2, %v4091_v59  ;;  %v4097_v46 = vmul.f32 %v12403_v2, %v4093_v39  ;;  %v3429_v27 = vpop.permute.xlu0 %3428  ;;  %v15249_v4 = vld [vmem:[#allocation104_spill] sm:$0xff]  ;;  %v4303_v59 = vpop.permute.xlu1 %4302  ;;  %v15255_v39 = vld [vmem:[#allocation129_spill] sm:$0xff] }
 0x806   : > { %v4012_v22 = vmul.f32 %v11075_v0, %v4008_v45  ;;  %v4013_v51 = vmul.f32 %v12335_v19, %v4009_v6  ;;  %v3413_v32 = vadd.f32 %v3409_v57, %v3358_v63  ;;  %v4063_v23 = vadd.f32 %v15248_v33, %v4041_v37  ;;  %v15254_v33 = vld [vmem:[#allocation210_spill] sm:$0xff]  ;;  %v15256_v37 = vld [vmem:[#allocation69_spill] sm:$0xff]  ;;  %v15262_v54 = vld [vmem:[#allocation292_spill] sm:$0xff] }
 0x807   : > { %v3414_v52 = vadd.f32 %v3410_v7, %v3359_v5  ;;  %v4064_v38 = vadd.f32 %v15249_v4, %v4042_v16  ;;  %vm15250_vm7 = vcmp.lt.s32.totalorder %v8777_v20, 113  ;;  %vm15252_vm8 = vcmp.lt.s32.totalorder %v8777_v20, 82  ;;  %v15257_v57 = vld [vmem:[#allocation266_spill] sm:$0xff] }
 0x808   : > { %v3432_v53 = vsel %vm15250_vm7, %v3425_v28, %v3429_v27  ;;  %vm15251_vm4 = vmmov %vm15250_vm7  ;;  %v4146_v45 = vsel %vm15252_vm8, %v12262_v26, %v12314_v11  ;;  %v3961_v6 = vadd.f32 %v3957_v47, %v12063_v42  ;;  %v4118_v16 = vadd.f32 %v15256_v37, %v4096_v49 }
 0x809   : > { %v3434_v56 = vsel %vm15251_vm4, %v3429_v27, %v3425_v28  ;;  %vm15253_vm0 = vmmov %vm15252_vm8  ;;  %v3438_v63 = vmul.f32 %v15254_v33, %v3432_v53  ;;  %v3962_v28 = vadd.f32 %v3958_v43, %v15255_v39  ;;  %v4119_v4 = vadd.f32 %v15257_v57, %v4097_v46  ;;  %v15260_v27 = vld [vmem:[#allocation117_spill] sm:$0xff]  ;;  %v3480_v47 = vpop.permute.xlu0 %3479  ;;  %v4307_v39 = vpop.permute.xlu1 %4306 }
 0x80a   : > { %v4148_v7 = vsel %vm15253_vm0, %v12314_v11, %v12262_v26  ;;  %v3439_v5 = vmul.f32 %v15254_v33, %v3434_v56  ;;  %vm15258_vm6 = vcmp.lt.s32.totalorder %v8777_v20, 81  ;;  %v15261_v56 = vld [vmem:[#allocation115_spill] sm:$0xff]  ;;  %v4016_v43 = vadd.f32 %v4012_v22, %v3961_v6  ;;  %vm4351_vm8 = vmand %vm1689_vm1, %vm14972_vm2 }
 0x80b   : > { %v4201_v26 = vsel %vm15258_vm6, %v12356_v50, %v12412_v62  ;;  %vm15259_vm3 = vmmov %vm15258_vm6  ;;  %v3460_v53 = vadd.f32 %v15260_v27, %v3438_v63  ;;  %v4017_v33 = vadd.f32 %v4013_v51, %v3962_v28  ;;  %v4151_v49 = vmul.f32 %v12410_v17, %v4146_v45  ;;  %v15266_v28 = vld [vmem:[#allocation110_spill] sm:$0xff] }
 0x80c   : > { %v4203_v11 = vsel %vm15259_vm3, %v12412_v62, %v12356_v50  ;;  %v3461_v42 = vadd.f32 %v15261_v56, %v3439_v5  ;;  %v4152_v46 = vmul.f32 %v12410_v17, %v4148_v7  ;;  %v4067_v37 = vmul.f32 %v11124_v44, %v4063_v23  ;;  %v15265_v5 = vld [vmem:[#allocation107_spill] sm:$0xff] }
 0x80d   : > { %v4068_v57 = vmul.f32 %v12395_v61, %v4064_v38  ;;  %v3464_v19 = vmul.f32 %v15085_v13, %v3460_v53  ;;  %v4122_v62 = vmul.f32 %v14720_v30, %v4118_v16  ;;  %v4123_v22 = vmul.f32 %v12400_v55, %v4119_v4  ;;  %v3484_v63 = vpop.permute.xlu0 %3483  ;;  %v15269_v56 = vld [vmem:[#allocation75_spill] sm:$0xff] }
 0x80e   : > { %v3465_v50 = vmul.f32 %v15262_v54, %v3461_v42  ;;  %v4206_v51 = vmul.f32 %v12434_v31, %v4201_v26  ;;  %v4207_v45 = vmul.f32 %v12434_v31, %v4203_v11  ;;  %vm15263_vm9 = vcmp.lt.s32.totalorder %v8777_v20, 80  ;;  %v4358_v11 = vpop.permute.xlu1 %4357 }
 0x80f   : > { %v4256_v23 = vsel %vm15263_vm9, %v12443_v25, %v4252_v41  ;;  %vm15264_vm14 = vmmov %vm15263_vm9  ;;  %v3468_v54 = vadd.f32 %v3464_v19, %v3413_v32  ;;  %v4173_v6 = vadd.f32 %v15265_v5, %v4151_v49  ;;  %v4174_v16 = vadd.f32 %v15266_v28, %v4152_v46  ;;  %v15270_v19 = vld [vmem:[#allocation267_spill] sm:$0xff]  ;;  %v15271_v32 = vld [vmem:[#allocation293_spill] sm:$0xff] }
 0x810   : > { %v4258_v38 = vsel %vm15264_vm14, %v4252_v41, %v12443_v25  ;;  %v3469_v7 = vadd.f32 %v3465_v50, %v3414_v52  ;;  %vm15267_vm15 = vcmp.lt.s32.totalorder %v8777_v20, 112  ;;  %v4071_v27 = vadd.f32 %v4067_v37, %v4016_v43  ;;  %v15274_v5 = vld [vmem:[#allocation196_spill] sm:$0xff]  ;;  %v15275_v28 = vld [vmem:[#allocation271_spill] sm:$0xff]  ;;  %vm4406_vm14 = vmand %vm1689_vm1, %vm14992_vm11 }
 0x811   : > { %v3487_v4 = vsel %vm15267_vm15, %v3480_v47, %v3484_v63  ;;  %vm15268_vm5 = vmmov %vm15267_vm15  ;;  %v4072_v53 = vadd.f32 %v4068_v57, %v4017_v33  ;;  %v4228_v41 = vadd.f32 %v15270_v19, %v4206_v51  ;;  %v4229_v52 = vadd.f32 %v15271_v32, %v4207_v45  ;;  %v3535_v57 = vpop.permute.xlu0 %3534 }
 0x812   : > { %v3489_v26 = vsel %vm15268_vm5, %v3484_v63, %v3480_v47  ;;  %v3493_v42 = vmul.f32 %v15269_v56, %v3487_v4  ;;  %v4261_v49 = vmul.f32 %v12446_v3, %v4256_v23  ;;  %v4262_v46 = vmul.f32 %v12446_v3, %v4258_v38  ;;  %v4362_v23 = vpop.permute.xlu1 %4361 }
 0x813   : > { %v3494_v25 = vmul.f32 %v15269_v56, %v3489_v26  ;;  %vm15272_vm7 = vcmp.lt.s32.totalorder %v8777_v20, 79  ;;  %v4126_v50 = vadd.f32 %v4122_v62, %v4071_v27  ;;  %v4127_v63 = vadd.f32 %v4123_v22, %v4072_v53 }
 0x814   : > { %v4311_v47 = vsel %vm15272_vm7, %v4303_v59, %v4307_v39  ;;  %vm15273_vm4 = vmmov %vm15272_vm7  ;;  %v3515_v33 = vadd.f32 %v12211_v60, %v3493_v42  ;;  %v4177_v51 = vmul.f32 %v15060_v12, %v4173_v6  ;;  %v4178_v45 = vmul.f32 %v12431_v40, %v4174_v16 }
 0x815   : > { %v4313_v43 = vsel %vm15273_vm4, %v4307_v39, %v4303_v59  ;;  %v3516_v37 = vadd.f32 %v12214_v21, %v3494_v25  ;;  %v4366_v26 = vsel %vm4365_vm10, %v4358_v11, %v4362_v23  ;;  %v4368_v60 = vsel %vm4365_vm10, %v4362_v23, %v4358_v11  ;;  %v15276_v21 = vld [vmem:[#allocation112_spill] sm:$0xff]  ;;  %v15277_v39 = vld [vmem:[#allocation203_spill] sm:$0xff]  ;;  %v3539_v56 = vpop.permute.xlu0 %3538 }
 0x816   : > { %v3519_v38 = vmul.f32 %v15274_v5, %v3515_v33  ;;  %v4283_v59 = vadd.f32 %v15276_v21, %v4261_v49  ;;  %v4284_v62 = vadd.f32 %v15277_v39, %v4262_v46  ;;  %v4316_v22 = vmul.f32 %v12488_v9, %v4311_v47  ;;  %v4413_v32 = vpop.permute.xlu1 %4412  ;;  %v15282_v23 = vld [vmem:[#allocation127_spill] sm:$0xff] }
 0x817   : > { %v3520_v4 = vmul.f32 %v15275_v28, %v3516_v37  ;;  %v4317_v6 = vmul.f32 %v12488_v9, %v4313_v43  ;;  %v4232_v16 = vmul.f32 %v15085_v13, %v4228_v41  ;;  %v4233_v27 = vmul.f32 %v12437_v58, %v4229_v52  ;;  %v15283_v28 = vld [vmem:[#allocation222_spill] sm:$0xff] }
 0x818   : > { %v3523_v11 = vadd.f32 %v3519_v38, %v3468_v54  ;;  %v4371_v42 = vmul.f32 %v12498_v24, %v4366_v26  ;;  %v4372_v25 = vmul.f32 %v12498_v24, %v4368_v60  ;;  %vm15278_vm0 = vcmp.lt.s32.totalorder %v8777_v20, 111 }
 0x819   : > { %v3524_v53 = vadd.f32 %v3520_v4, %v3469_v7  ;;  %v3542_v19 = vsel %vm15278_vm0, %v3535_v57, %v3539_v56  ;;  %vm15279_vm6 = vmmov %vm15278_vm0  ;;  %v4181_v52 = vadd.f32 %v4177_v51, %v4126_v50  ;;  %v4182_v54 = vadd.f32 %v4178_v45, %v4127_v63  ;;  %v15280_v7 = vld [vmem:[#allocation200_spill] sm:$0xff]  ;;  %v3590_v63 = vpop.permute.xlu0 %3589 }
 0x81a   : > { %v3544_v41 = vsel %vm15279_vm6, %v3539_v56, %v3535_v57  ;;  %v3548_v49 = vmul.f32 %v15280_v7, %v3542_v19  ;;  %v4287_v46 = vmul.f32 %v15274_v5, %v4283_v59  ;;  %v4288_v47 = vmul.f32 %v12485_v48, %v4284_v62  ;;  %v15287_v62 = vld [vmem:[#allocation137_spill] sm:$0xff] }
 0x81b   : > { %v3549_v36 = vmul.f32 %v15280_v7, %v3544_v41  ;;  %v4338_v43 = vadd.f32 %v12192_v10, %v4316_v22  ;;  %v4339_v33 = vadd.f32 %v12196_v35, %v4317_v6  ;;  %v12615_v37 = vsel %vm4351_vm8, 1.0, %v14714_v1  ;;  %v4417_v10 = vpop.permute.xlu1 %4416  ;;  %v15284_v35 = vld [vmem:[#allocation194_spill] sm:$0xff] }
 0x81c   : > { %15281 = vst [vmem:[#allocation135_spill] sm:$0xff] %v12615_v37  ;;  %v3570_v57 = vadd.f32 %v12291_v18, %v3548_v49  ;;  %vm4420_vm2 = vcmp.lt.s32.totalorder %v8777_v20, 77  ;;  %v4236_v51 = vadd.f32 %v4232_v16, %v4181_v52  ;;  %v4237_v45 = vadd.f32 %v4233_v27, %v4182_v54  ;;  %v15292_v49 = vld [vmem:[#allocation163_spill] sm:$0xff] }
 0x81d   : > { %v3571_v50 = vadd.f32 %v12294_v34, %v3549_v36  ;;  %v4393_v38 = vadd.f32 %v15282_v23, %v4371_v42  ;;  %v4394_v4 = vadd.f32 %v15283_v28, %v4372_v25  ;;  %v12625_v21 = vstv %s12586_s17  ;;  %v3594_v42 = vpop.permute.xlu0 %3593 }
 0x81e   : > { %v3574_v26 = vmul.f32 %v15207_v15, %v3570_v57  ;;  %15285 = vst [vmem:[#allocation182_spill] sm:$0xff] %v12625_v21  ;;  %v12630_v18 = vstv %s12588_s4  ;;  %v4291_v34 = vadd.f32 %v4287_v46, %v4236_v51  ;;  %v4292_v59 = vadd.f32 %v4288_v47, %v4237_v45  ;;  %v15293_v57 = vld [vmem:[#allocation128_spill] sm:$0xff] }
 0x81f   : > { %v3575_v60 = vmul.f32 %v15284_v35, %v3571_v50  ;;  %15286 = vst [vmem:[#allocation93_spill] sm:$0xff] %v12630_v18  ;;  %v4342_v39 = vmul.f32 %v15207_v15, %v4338_v43  ;;  %v4343_v22 = vmul.f32 %v15287_v62, %v4339_v33  ;;  %v4421_v27 = vsel %vm4420_vm2, %v4413_v32, %v4417_v10 }
 0x820   : > { %v3578_v6 = vadd.f32 %v3574_v26, %v3523_v11  ;;  %v4423_v56 = vsel %vm4420_vm2, %v4417_v10, %v4413_v32  ;;  %v4397_v25 = vmul.f32 %v11075_v0, %v4393_v38  ;;  %v4398_v19 = vmul.f32 %v12615_v37, %v4394_v4  ;;  %v4436_v11 = vpop.permute.xlu1 %4435  ;;  %v15296_v10 = vld [vmem:[#allocation170_spill] sm:$0xff]  ;;  %v15297_v26 = vld [vmem:[#allocation168_spill] sm:$0xff] }
 0x821   : > { %v3579_v16 = vadd.f32 %v3575_v60, %v3524_v53  ;;  %vm15288_vm3 = vcmp.lt.s32.totalorder %v8777_v20, 110  ;;  %v15291_v53 = vld [vmem:[#allocation217_spill] sm:$0xff]  ;;  %v4439_v36 = vsel %vm4420_vm2, %v15292_v49, %v4436_v11  ;;  %v4441_v46 = vsel %vm4420_vm2, %v4436_v11, %v15292_v49  ;;  %v3645_v23 = vpop.permute.xlu0 %3644  ;;  %v15299_v49 = vld [vmem:[#allocation252_spill] sm:$0xff] }
 0x822   : > { %v3597_v41 = vsel %vm15288_vm3, %v3590_v63, %v3594_v42  ;;  %vm15289_vm9 = vmmov %vm15288_vm3  ;;  %v4426_v47 = vmul.f32 %v12625_v21, %v4421_v27  ;;  %v4427_v29 = vmul.f32 %v12625_v21, %v4423_v56  ;;  %v4444_v43 = vmul.f32 %v12630_v18, %v4439_v36  ;;  %v15298_v56 = vld [vmem:[#allocation116_spill] sm:$0xff] }
 0x823   : > { %v3599_v52 = vsel %vm15289_vm9, %v3594_v42, %v3590_v63  ;;  %v3603_v7 = vmul.f32 %v15291_v53, %v3597_v41  ;;  %v4445_v33 = vmul.f32 %v12630_v18, %v4441_v46  ;;  %v15294_v63 = vld [vmem:[#allocation130_spill] sm:$0xff]  ;;  %v12665_v45 = vsel %vm4406_vm14, 1.0, %v14714_v1  ;;  %v15385_v18 = vld [vmem:[#allocation132_spill] sm:$0xff] }
 0x824   : > { %v3604_v32 = vmul.f32 %v15291_v53, %v3599_v52  ;;  %15295 = vst [vmem:[#allocation138_spill] sm:$0xff] %v12665_v45  ;;  %v4346_v38 = vadd.f32 %v4342_v39, %v4291_v34  ;;  %v4347_v28 = vadd.f32 %v4343_v22, %v4292_v59  ;;  %v4448_v4 = vadd.f32 %v4444_v43, %v4426_v47  ;;  %v15384_v1 = vld [vmem:[#allocation86_spill] sm:$0xff] }
 0x825   : > { %v3625_v50 = vadd.f32 %v15293_v57, %v3603_v7  ;;  %v4449_v8 = vadd.f32 %v4445_v33, %v4427_v29  ;;  %v3670_v35 = vsel %vm3650_vm13, %v15297_v26, %v15296_v10  ;;  %v3672_v60 = vsel %vm3650_vm13, %v15296_v10, %v15297_v26  ;;  %v3649_v54 = vpop.permute.xlu0 %3648 }
 0x826   : > { %v3626_v51 = vadd.f32 %v15294_v63, %v3604_v32  ;;  %v4401_v34 = vadd.f32 %v4397_v25, %v4346_v38  ;;  %v4402_v59 = vadd.f32 %v4398_v19, %v4347_v28  ;;  %v4452_v39 = vmul.f32 %v11124_v44, %v4448_v4  ;;  %v15300_v25 = vld [vmem:[#allocation121_spill] sm:$0xff]  ;;  %v15303_v38 = vld [vmem:[#allocation174_spill] sm:$0xff]  ;;  %v15304_v28 = vld [vmem:[#allocation172_spill] sm:$0xff] }
 0x827   : > { %v3629_v27 = vmul.f32 %v11075_v0, %v3625_v50  ;;  %v4453_v22 = vmul.f32 %v12665_v45, %v4449_v8  ;;  %v3652_v7 = vsel %vm3650_vm13, %v3645_v23, %v3649_v54  ;;  %v3654_v32 = vsel %vm3650_vm13, %v3649_v54, %v3645_v23 }
 0x828   : > { %v3630_v42 = vmul.f32 %v15298_v56, %v3626_v51  ;;  %v4456_v11 = vadd.f32 %v4452_v39, %v4401_v34  ;;  %v3676_v36 = vmul.f32 %v15299_v49, %v3670_v35  ;;  %v3677_v14 = vmul.f32 %v15299_v49, %v3672_v60  ;;  %v15302_v51 = vld [vmem:[#allocation122_spill] sm:$0xff]  ;;  %v15309_v56 = vld [vmem:[#allocation52_spill] sm:$0xff]  ;;  %v15314_v49 = vld [vmem:[#allocation125_spill] sm:$0xff] }
 0x829   : > { %v3633_v41 = vadd.f32 %v3629_v27, %v3578_v6  ;;  %v4457_v53 = vadd.f32 %v4453_v22, %v4402_v59  ;;  %v3658_v19 = vmul.f32 %v15300_v25, %v3652_v7  ;;  %v3659_v46 = vmul.f32 %v15300_v25, %v3654_v32  ;;  %v15301_v6 = vld [vmem:[#allocation38_spill] sm:$0xff]  ;;  %v3700_v33 = vpop.permute.xlu0 %3699  ;;  %v15310_v59 = vld [vmem:[#allocation120_spill] sm:$0xff] }
 0x82a   : > { %v3634_v52 = vadd.f32 %v3630_v42, %v3579_v16  ;;  %4437 = vrot.lane.b32.xlu0 %v15301_v6, %s14990_s16  ;;  %v4460_v16 = vsub.f32 0.0, %v4456_v11  ;;  %vm15305_vm13 = vcmp.lt.s32.totalorder %v8777_v20, 99  ;;  %vm15313_vm5 = vcmp.lt.s32.totalorder %v8777_v20, 98 }
 0x82b   : > { %v4461_v47 = vsub.f32 0.0, %v4457_v53  ;;  %v3680_v29 = vadd.f32 %v3676_v36, %v3658_v19  ;;  %v3681_v43 = vadd.f32 %v3677_v14, %v3659_v46  ;;  %v3725_v4 = vsel %vm15305_vm13, %v15304_v28, %v15303_v38  ;;  %vm15306_vm11 = vmmov %vm15305_vm13 }
 0x82c   : > { %v4464_v57 = vmul.f32 1.442695, %v4460_v16  ;;  %v3727_v8 = vsel %vm15306_vm11, %v15303_v38, %v15304_v28  ;;  %vm15307_vm1 = vmmov %vm15306_vm11  ;;  %v3731_v42 = vmul.f32 %v15309_v56, %v3725_v4  ;;  %v15316_v16 = vld [vmem:[#allocation56_spill] sm:$0xff]  ;;  %vm15323_vm0 = vcmp.lt.s32.totalorder %v8777_v20, 97 }
 0x82d   : > { %v4466_v50 = vmul.f32 1.442695, %v4461_v47  ;;  %v3684_v63 = vmul.f32 %v11124_v44, %v3680_v29  ;;  %v3685_v23 = vmul.f32 %v15302_v51, %v3681_v43  ;;  %v3704_v35 = vpop.permute.xlu0 %3703  ;;  %vm15308_vm15 = vmmov %vm15307_vm1  ;;  %v3732_v34 = vmul.f32 %v15309_v56, %v3727_v8 }
 0x82e   : > { %7140 = vpow2.f32 %v4464_v57  ;;  %v3707_v60 = vsel %vm15307_vm1, %v3700_v33, %v3704_v35  ;;  %v3709_v27 = vsel %vm15308_vm15, %v3704_v35, %v3700_v33  ;;  %vm15315_vm7 = vmmov %vm15313_vm5  ;;  %vm15331_vm14 = vcmp.lt.s32.totalorder %v8777_v20, 96 }
 0x82f   : > { %7142 = vpow2.f32 %v4466_v50  ;;  %v3688_v10 = vadd.f32 %v3684_v63, %v3633_v41  ;;  %v3689_v26 = vadd.f32 %v3685_v23, %v3634_v52  ;;  %v3713_v39 = vmul.f32 %v15310_v59, %v3707_v60  ;;  %v15311_v41 = vld [vmem:[#allocation178_spill] sm:$0xff]  ;;  %v15312_v52 = vld [vmem:[#allocation176_spill] sm:$0xff]  ;;  %vm15317_vm4 = vmmov %vm15313_vm5 }
 0x830   : > { %v3714_v22 = vmul.f32 %v15310_v59, %v3709_v27  ;;  %v3780_v7 = vsel %vm15313_vm5, %v15312_v52, %v15311_v41  ;;  %v3782_v14 = vsel %vm15315_vm7, %v15311_v41, %v15312_v52  ;;  %vm15318_vm8 = vmmov %vm15317_vm4  ;;  %v15319_v63 = vld [vmem:[#allocation123_spill] sm:$0xff]  ;;  %v15322_v27 = vld [vmem:[#allocation180_spill] sm:$0xff]  ;;  %vm15348_vm15 = vcmp.lt.s32.totalorder %v8777_v20, 95 }
 0x831   : > { %v3735_v54 = vadd.f32 %v3731_v42, %v3713_v39  ;;  %v3755_v53 = vpop.permute.xlu0 %3754  ;;  %v3786_v47 = vmul.f32 %v15316_v16, %v3780_v7  ;;  %v3787_v57 = vmul.f32 %v15316_v16, %v3782_v14  ;;  %v15321_v60 = vld [vmem:[#allocation183_spill] sm:$0xff]  ;;  %vm15324_vm6 = vmmov %vm15323_vm0  ;;  %vm15352_vm7 = vcmp.lt.s32.totalorder %v8777_v20, 94 }
 0x832   : > { %v3736_v11 = vadd.f32 %v3732_v34, %v3714_v22  ;;  %v3835_v56 = vsel %vm15323_vm0, %v15322_v27, %v15321_v60  ;;  %v3837_v42 = vsel %vm15324_vm6, %v15321_v60, %v15322_v27  ;;  %vm15325_vm3 = vmmov %vm15323_vm0  ;;  %v15328_v52 = vld [vmem:[#allocation275_spill] sm:$0xff] }
 0x833   : > { %v3739_v32 = vmul.f32 %v14720_v30, %v3735_v54  ;;  %vm15326_vm9 = vmmov %vm15323_vm0  ;;  %v15339_v27 = vld [vmem:[#allocation27_spill] sm:$0xff] }
 0x834   : > { %v3740_v36 = vmul.f32 %v15314_v49, %v3736_v11  ;;  %v15327_v11 = vld [vmem:[#allocation62_spill] sm:$0xff]  ;;  %vm15332_vm13 = vmmov %vm15331_vm14 }
 0x835   : > { %v3743_v25 = vadd.f32 %v3739_v32, %v3688_v10  ;;  %v3759_v46 = vpop.permute.xlu0 %3758  ;;  %v3842_v41 = vmul.f32 %v15327_v11, %v3837_v42  ;;  %v15329_v49 = vld [vmem:[#allocation190_spill] sm:$0xff]  ;;  %vm15336_vm11 = vmmov %vm15332_vm13  ;;  %v15340_v42 = vld [vmem:[#allocation220_spill] sm:$0xff] }
 0x836   : > { %v3744_v19 = vadd.f32 %v3740_v36, %v3689_v26  ;;  %v3762_v29 = vsel %vm15317_vm4, %v3755_v53, %v3759_v46  ;;  %v3764_v43 = vsel %vm15318_vm8, %v3759_v46, %v3755_v53  ;;  %v15320_v26 = vld [vmem:[#allocation126_spill] sm:$0xff]  ;;  %v3841_v53 = vmul.f32 %v15327_v11, %v3835_v56  ;;  %vm15337_vm1 = vmmov %vm15336_vm11 }
 0x837   : > { %v3768_v51 = vmul.f32 %v15319_v63, %v3762_v29  ;;  %v3769_v23 = vmul.f32 %v15319_v63, %v3764_v43  ;;  %v15330_v36 = vld [vmem:[#allocation186_spill] sm:$0xff]  ;;  %v15333_v29 = vld [vmem:[#allocation124_spill] sm:$0xff]  ;;  %vm15349_vm5 = vmmov %vm15348_vm15  ;;  %vm15356_vm8 = vcmp.lt.s32.totalorder %v8777_v20, 93 }
 0x838   : > { %v7141_v6 = vpop.eup %7140  ;;  %v3890_v14 = vsel %vm15331_vm14, %v15330_v36, %v15329_v49  ;;  %v15335_v63 = vld [vmem:[#allocation188_spill] sm:$0xff]  ;;  %vm15353_vm4 = vmmov %vm15352_vm7 }
 0x839   : > { %v7143_v33 = vpop.eup %7142  ;;  %v4472_v50 = vadd.f32 1.0, %v7141_v6  ;;  %v3790_v28 = vadd.f32 %v3786_v47, %v3768_v51  ;;  %v3791_v4 = vadd.f32 %v3787_v57, %v3769_v23  ;;  %v3810_v8 = vpop.permute.xlu0 %3809  ;;  %v3892_v6 = vsel %vm15332_vm13, %v15329_v49, %v15330_v36  ;;  %v15334_v57 = vld [vmem:[#allocation66_spill] sm:$0xff]  ;;  %vm15357_vm0 = vmmov %vm15356_vm8 }
 0x83a   : > { %v4473_v38 = vadd.f32 1.0, %v7143_v33  ;;  %v3897_v23 = vmul.f32 %v15334_v57, %v3892_v6  ;;  %vm15358_vm6 = vmmov %vm15349_vm5  ;;  %vm15371_vm13 = vcmp.lt.s32.totalorder %v8777_v20, 82 }
 0x83b   : > { %7144 = vrcp.f32 %v4472_v50  ;;  %v3794_v10 = vmul.f32 %v15060_v12, %v3790_v28  ;;  %v3795_v35 = vmul.f32 %v15320_v26, %v3791_v4  ;;  %v3896_v50 = vmul.f32 %v15334_v57, %v3890_v14  ;;  %vm15367_vm14 = vmmov %vm15353_vm4 }
 0x83c   : > { %7146 = vrcp.f32 %v4473_v38 }
 0x83d   : > { %v3798_v34 = vadd.f32 %v3794_v10, %v3743_v25  ;;  %v3799_v59 = vadd.f32 %v3795_v35, %v3744_v19  ;;  %v3814_v39 = vpop.permute.xlu0 %3813  ;;  %v15338_v35 = vld [vmem:[#allocation25_spill] sm:$0xff] }
 0x83e   : > { %v3817_v22 = vsel %vm15325_vm3, %v3810_v8, %v3814_v39  ;;  %v3819_v54 = vsel %vm15326_vm9, %v3814_v39, %v3810_v8  ;;  %vm15359_vm3 = vmmov %vm15349_vm5 }
 0x83f   : > { %v3823_v7 = vmul.f32 %v15328_v52, %v3817_v22  ;;  %v3824_v32 = vmul.f32 %v15328_v52, %v3819_v54  ;;  %v15341_v54 = vld [vmem:[#allocation26_spill] sm:$0xff]  ;;  %v15343_v52 = vld [vmem:[#allocation29_spill] sm:$0xff]  ;;  %vm15366_vm9 = vmmov %vm15353_vm4 }
 0x841   : > { %v3845_v25 = vadd.f32 %v3841_v53, %v3823_v7  ;;  %v3846_v19 = vadd.f32 %v3842_v41, %v3824_v32  ;;  %v3865_v46 = vpop.permute.xlu0 %3864  ;;  %v15344_v32 = vld [vmem:[#allocation30_spill] sm:$0xff] }
 0x843   : > { %v3849_v47 = vmul.f32 %v15085_v13, %v3845_v25  ;;  %v3850_v43 = vmul.f32 %v15333_v29, %v3846_v19 }
 0x845   : > { %v7145_v16 = vpop.eup %7144  ;;  %v3853_v38 = vadd.f32 %v3849_v47, %v3798_v34  ;;  %v3854_v28 = vadd.f32 %v3850_v43, %v3799_v59  ;;  %v3869_v4 = vpop.permute.xlu0 %3868  ;;  %v15342_v59 = vld [vmem:[#allocation28_spill] sm:$0xff] }
 0x846   : > { %v7147_v33 = vpop.eup %7146  ;;  %v4483_v51 = vrot.slane %v7145_v16, %v15335_v63  ;;  %v3872_v10 = vsel %vm15336_vm11, %v3865_v46, %v3869_v4  ;;  %v3874_v26 = vsel %vm15337_vm1, %v3869_v4, %v3865_v46  ;;  %vm15372_vm11 = vmmov %vm15371_vm13  ;;  %vm15375_vm1 = vcmp.lt.s32.totalorder %v8777_v20, 81 }
 0x847   : > { %v4487_v8 = vrot.slane %v7147_v33, %v15335_v63  ;;  %v3878_v39 = vmul.f32 %v15340_v42, %v3872_v10  ;;  %v3879_v22 = vmul.f32 %v15340_v42, %v3874_v26  ;;  %v15345_v33 = vld [vmem:[#allocation276_spill] sm:$0xff] }
 0x848   : > { %v4498_v60 = vmul.f32 %v4483_v51, %v15338_v35  ;;  %v4496_v56 = vmul.f32 %v4483_v51, %v15339_v27  ;;  %v4500_v7 = vmul.f32 %v4483_v51, %v15343_v52 }
 0x849   : > { %v4499_v34 = vmul.f32 %v4487_v8, %v15341_v54  ;;  %v4497_v11 = vmul.f32 %v4487_v8, %v15342_v59  ;;  %v4501_v49 = vmul.f32 %v4487_v8, %v15344_v32  ;;  %v3900_v36 = vadd.f32 %v3896_v50, %v3878_v39  ;;  %v3920_v25 = vpop.permute.xlu0 %3919 }
 0x84a   : > { %v4510_v53 = vmax.f32 %v4498_v60, 1e-06  ;;  %v4508_v41 = vmax.f32 %v4496_v56, 1e-06  ;;  %v3901_v14 = vadd.f32 %v3897_v23, %v3879_v22  ;;  %v4512_v47 = vmax.f32 %v4500_v7, 1e-06 }
 0x84b   : > { %v4511_v19 = vmax.f32 %v4499_v34, 1e-06  ;;  %v4509_v46 = vmax.f32 %v4497_v11, 1e-06  ;;  %v4513_v29 = vmax.f32 %v4501_v49, 1e-06  ;;  %v3904_v43 = vmul.f32 %v15274_v5, %v3900_v36 }
 0x84c   : > { %v4522_v6 = vmul.f32 %v4510_v53, %v4510_v53  ;;  %v4520_v16 = vmul.f32 %v4508_v41, %v4508_v41  ;;  %v3905_v57 = vmul.f32 %v15345_v33, %v3901_v14  ;;  %v4524_v51 = vmul.f32 %v4512_v47, %v4512_v47  ;;  %v15346_v36 = vld [vmem:[#allocation197_spill] sm:$0xff]  ;;  %v15347_v14 = vld [vmem:[#allocation192_spill] sm:$0xff]  ;;  %v15354_v33 = vld [vmem:[#allocation215_spill] sm:$0xff] }
 0x84d   : > { %v4523_v4 = vmul.f32 %v4511_v19, %v4511_v19  ;;  %v4521_v10 = vmul.f32 %v4509_v46, %v4509_v46  ;;  %v4525_v60 = vmul.f32 %v4513_v29, %v4513_v29  ;;  %v12773_v8 = vadd.f32 %v3904_v43, %v3853_v38  ;;  %v3924_v23 = vpop.permute.xlu0 %3923 }
 0x84e   : > { %v4534_v26 = vmul.f32 %v4522_v6, %v4510_v53  ;;  %v4532_v35 = vmul.f32 %v4520_v16, %v4508_v41  ;;  %v12775_v50 = vadd.f32 %v3905_v57, %v3854_v28  ;;  %v4536_v42 = vmul.f32 %v4524_v51, %v4512_v47  ;;  %v15350_v16 = vld [vmem:[#allocation204_spill] sm:$0xff]  ;;  %v15351_v47 = vld [vmem:[#allocation201_spill] sm:$0xff]  ;;  %v15360_v51 = vld [vmem:[#allocation67_spill] sm:$0xff] }
 0x84f   : > { %v4535_v27 = vmul.f32 %v4523_v4, %v4511_v19  ;;  %v4533_v56 = vmul.f32 %v4521_v10, %v4509_v46  ;;  %v4537_v39 = vmul.f32 %v4525_v60, %v4513_v29  ;;  %v3945_v19 = vsel %vm15348_vm15, %v15347_v14, %v15346_v36  ;;  %v15355_v57 = vld [vmem:[#allocation208_spill] sm:$0xff]  ;;  %vm15376_vm15 = vmmov %vm15375_vm1 }
 0x850   : > { %v3947_v46 = vsel %vm15349_vm5, %v15346_v36, %v15347_v14  ;;  %v4000_v29 = vsel %vm15352_vm7, %v15351_v47, %v15350_v16  ;;  %v4002_v43 = vsel %vm15353_vm4, %v15350_v16, %v15351_v47  ;;  %v4055_v4 = vsel %vm15356_vm8, %v15355_v57, %v15354_v33  ;;  %v15364_v14 = vld [vmem:[#allocation268_spill] sm:$0xff]  ;;  %vm15377_vm5 = vmmov %vm15357_vm0 }
 0x851   : > { %v4547_v22 = vadd.f32 %v4535_v27, %v4534_v26  ;;  %v4544_v54 = vadd.f32 %v4533_v56, %v4532_v35  ;;  %v4550_v34 = vadd.f32 %v4537_v39, %v4536_v42  ;;  %v3975_v59 = vpop.permute.xlu0 %3974  ;;  %v4057_v10 = vsel %vm15357_vm0, %v15354_v33, %v15355_v57  ;;  %v15361_v56 = vld [vmem:[#allocation233_spill] sm:$0xff]  ;;  %v15362_v42 = vld [vmem:[#allocation223_spill] sm:$0xff]  ;;  %vm15378_vm7 = vmmov %vm15357_vm0 }
 0x852   : > { %v3927_v26 = vsel %vm15358_vm6, %v3920_v25, %v3924_v23  ;;  %v3929_v35 = vsel %vm15359_vm3, %v3924_v23, %v3920_v25  ;;  %v3951_v60 = vmul.f32 %v15360_v51, %v3945_v19  ;;  %v3952_v27 = vmul.f32 %v15360_v51, %v3947_v46  ;;  %v15365_v46 = vld [vmem:[#allocation131_spill] sm:$0xff]  ;;  %v15368_v51 = vld [vmem:[#allocation82_spill] sm:$0xff]  ;;  %vm15388_vm0 = vmmov %vm15372_vm11 }
 0x853   : > { %4548 = vadd.xlane.f32.xlu0 %v4547_v22  ;;  %4545 = vadd.xlane.f32.xlu1 %v4544_v54  ;;  %v4110_v39 = vsel %vm4090_vm12, %v15362_v42, %v15361_v56  ;;  %v4112_v22 = vsel %vm4090_vm12, %v15361_v56, %v15362_v42  ;;  %v15363_v54 = vld [vmem:[#allocation77_spill] sm:$0xff]  ;;  %v4061_v25 = vmul.f32 %v15364_v14, %v4055_v4  ;;  %v15370_v42 = vld [vmem:[#allocation244_spill] sm:$0xff]  ;;  %vm15381_vm4 = vcmp.lt.s32.totalorder %v8777_v20, 80  ;;  %vm15389_vm6 = vmmov %vm15388_vm0 }
 0x854   : > { %v4007_v36 = vmul.f32 %v15363_v54, %v4002_v43  ;;  %v4062_v23 = vmul.f32 %v15364_v14, %v4057_v10  ;;  %v3933_v16 = vmul.f32 %v15365_v46, %v3927_v26  ;;  %v3934_v47 = vmul.f32 %v15365_v46, %v3929_v35  ;;  %v15369_v43 = vld [vmem:[#allocation43_spill] sm:$0xff]  ;;  %v15373_v26 = vld [vmem:[#allocation58_spill] sm:$0xff]  ;;  %v15374_v35 = vld [vmem:[#allocation253_spill] sm:$0xff] }
 0x855   : > { %v3979_v11 = vpop.permute.xlu0 %3978  ;;  %v4116_v56 = vmul.f32 %v15368_v51, %v4110_v39  ;;  %v4165_v4 = vsel %vm15371_vm13, %v15370_v42, %v15369_v43  ;;  %v4167_v10 = vsel %vm15372_vm11, %v15369_v43, %v15370_v42  ;;  %v15380_v14 = vld [vmem:[#allocation261_spill] sm:$0xff]  ;;  %vm15382_vm8 = vmmov %vm15381_vm4 }
 0x856   : > { %v3982_v33 = vsel %vm15366_vm9, %v3975_v59, %v3979_v11  ;;  %v3984_v57 = vsel %vm15367_vm14, %v3979_v11, %v3975_v59  ;;  %v4222_v59 = vsel %vm15376_vm15, %v15373_v26, %v15374_v35  ;;  %v15383_v43 = vld [vmem:[#allocation225_spill] sm:$0xff]  ;;  %v4171_v63 = vmul.f32 %v15384_v1, %v4165_v4  ;;  %vm15395_vm9 = vmmov %vm15375_vm1 }
 0x857   : > { %4551 = vadd.xlane.f32.xlu1 %v4550_v34  ;;  %v4006_v34 = vmul.f32 %v15363_v54, %v4000_v29  ;;  %v4117_v29 = vmul.f32 %v15368_v51, %v4112_v22  ;;  %v4220_v54 = vsel %vm15375_vm1, %v15374_v35, %v15373_v26  ;;  %v15379_v22 = vld [vmem:[#allocation73_spill] sm:$0xff]  ;;  %v3988_v42 = vmul.f32 %v15383_v43, %v3982_v33  ;;  %vm15396_vm14 = vmmov %vm15375_vm1 }
 0x858   : > { %v4275_v46 = vsel %vm15381_vm4, %v15380_v14, %v15379_v22  ;;  %v4277_v51 = vsel %vm15382_vm8, %v15379_v22, %v15380_v14  ;;  %v3989_v26 = vmul.f32 %v15383_v43, %v3984_v57  ;;  %v4172_v45 = vmul.f32 %v15384_v1, %v4167_v10  ;;  %v15386_v33 = vld [vmem:[#allocation89_spill] sm:$0xff]  ;;  %v15387_v43 = vld [vmem:[#allocation279_spill] sm:$0xff]  ;;  %v15390_v10 = vld [vmem:[#allocation272_spill] sm:$0xff] }
 0x859   : > { %v4030_v53 = vpop.permute.xlu0 %4029  ;;  %v4226_v14 = vmul.f32 %v15386_v33, %v4220_v54  ;;  %v4227_v57 = vmul.f32 %v15386_v33, %v4222_v59  ;;  %v4281_v4 = vmul.f32 %v15387_v43, %v4275_v46  ;;  %v4282_v1 = vmul.f32 %v15387_v43, %v4277_v51  ;;  %v15394_v59 = vld [vmem:[#allocation133_spill] sm:$0xff]  ;;  %vm15400_vm13 = vmmov %vm15381_vm4 }
 0x85a   : > { %vm15401_vm11 = vmmov %vm15381_vm4 }
 0x85d   : > { %v4034_v41 = vpop.permute.xlu0 %4033 }
 0x85e   : > { %v4037_v11 = vsel %vm15377_vm5, %v4030_v53, %v4034_v41  ;;  %v4039_v39 = vsel %vm15378_vm7, %v4034_v41, %v4030_v53  ;;  %v3955_v53 = vadd.f32 %v3951_v60, %v3933_v16  ;;  %v3956_v41 = vadd.f32 %v3952_v27, %v3934_v47 }
 0x85f   : > { %v4043_v21 = vmul.f32 %v15385_v18, %v4037_v11  ;;  %v4044_v37 = vmul.f32 %v15385_v18, %v4039_v39  ;;  %v4010_v60 = vadd.f32 %v4006_v34, %v3988_v42  ;;  %v4011_v27 = vadd.f32 %v4007_v36, %v3989_v26  ;;  %v15391_v11 = vld [vmem:[#allocation78_spill] sm:$0xff] }
 0x860   : > { %v3959_v54 = vmul.f32 %v15207_v15, %v3955_v53  ;;  %v3960_v39 = vmul.f32 %v15394_v59, %v3956_v41  ;;  %v15398_v26 = vld [vmem:[#allocation90_spill] sm:$0xff]  ;;  %vm15422_vm5 = vcmask 15360  }
 0x861   : > { %v4085_v52 = vpop.permute.xlu0 %4084  ;;  %vm15423_vm7 = vmmov %vm15422_vm5 }
 0x862   : > { %v3963_v33 = vadd.f32 %v3959_v54, %v12773_v8  ;;  %v3964_v43 = vadd.f32 %v3960_v39, %v12775_v50  ;;  %vm15425_vm8 = vmmov %vm15422_vm5 }
 0x865   : > { %v4089_v38 = vpop.permute.xlu0 %4088 }
 0x866   : > { %v4092_v62 = vsel %vm4090_vm12, %v4085_v52, %v4089_v38  ;;  %v4094_v22 = vsel %vm4090_vm12, %v4089_v38, %v4085_v52  ;;  %vm15392_vm12 = vcmp.lt.s32.totalorder %v8777_v20, 79 }
 0x867   : > { %v4330_v52 = vsel %vm15392_vm12, %v15391_v11, %v15390_v10  ;;  %vm15393_vm3 = vmmov %vm15392_vm12  ;;  %v4098_v34 = vmul.f32 %v12403_v2, %v4092_v62  ;;  %v4099_v36 = vmul.f32 %v12403_v2, %v4094_v22  ;;  %v15397_v62 = vld [vmem:[#allocation94_spill] sm:$0xff]  ;;  %vm15429_vm12 = vmmov 0  }
 0x868   : > { %v4332_v38 = vsel %vm15393_vm3, %v15390_v10, %v15391_v11  ;;  %vm15402_vm1 = vmmov %vm15393_vm3 }
 0x869   : > { %v4140_v7 = vpop.permute.xlu0 %4139  ;;  %v4120_v41 = vadd.f32 %v4116_v56, %v4098_v34  ;;  %v4121_v22 = vadd.f32 %v4117_v29, %v4099_v36  ;;  %vm15403_vm15 = vmmov %vm15402_vm1 }
 0x86a   : > { %vm15430_vm3 = vmmov %vm15422_vm5 }
 0x86b   : > { %v4124_v8 = vmul.f32 %v14720_v30, %v4120_v41  ;;  %v4125_v50 = vmul.f32 %v12400_v55, %v4121_v22 }
 0x86d   : > { %v4144_v28 = vpop.permute.xlu0 %4143 }
 0x86e   : > { %v4147_v16 = vsel %vm15388_vm0, %v4140_v7, %v4144_v28  ;;  %v4149_v18 = vsel %vm15389_vm6, %v4144_v28, %v4140_v7  ;;  %v4065_v7 = vadd.f32 %v4061_v25, %v4043_v21  ;;  %v4066_v28 = vadd.f32 %v4062_v23, %v4044_v37  ;;  %v15399_v25 = vld [vmem:[#allocation134_spill] sm:$0xff]  ;;  %vm15427_vm6 = vmmov %vm15422_vm5 }
 0x86f   : > { %v4153_v46 = vmul.f32 %v12410_v17, %v4147_v16  ;;  %v4154_v51 = vmul.f32 %v12410_v17, %v4149_v18  ;;  %v4385_v21 = vsel %vm4365_vm10, %v15398_v26, %v15397_v62  ;;  %v4387_v17 = vsel %vm4365_vm10, %v15397_v62, %v15398_v26 }
 0x870   : > { %v4014_v37 = vmul.f32 %v11075_v0, %v4010_v60  ;;  %v4015_v23 = vmul.f32 %v15399_v25, %v4011_v27  ;;  %v4069_v27 = vmul.f32 %v11124_v44, %v4065_v7  ;;  %v4070_v56 = vmul.f32 %v12395_v61, %v4066_v28 }
 0x871   : > { %v12777_v32 = vpop.permute.xlu0 %4194  ;;  %v4175_v29 = vadd.f32 %v4171_v63, %v4153_v46  ;;  %v4176_v18 = vadd.f32 %v4172_v45, %v4154_v51 }
 0x872   : > { %v4018_v10 = vadd.f32 %v4014_v37, %v3963_v33  ;;  %v4019_v11 = vadd.f32 %v4015_v23, %v3964_v43 }
 0x873   : > { %v4179_v30 = vmul.f32 %v15060_v12, %v4175_v29  ;;  %v4180_v55 = vmul.f32 %v12431_v40, %v4176_v18  ;;  %v15409_v18 = vld [vmem:[#allocation182_spill] sm:$0xff] }
 0x874   : > { %v4074_v59 = vadd.f32 %v4070_v56, %v4019_v11 }
 0x875   : > { %v12779_v49 = vpop.permute.xlu0 %4198 }
 0x876   : > { %v4202_v42 = vsel %vm15395_vm9, %v12777_v32, %v12779_v49  ;;  %v4204_v2 = vsel %vm15396_vm14, %v12779_v49, %v12777_v32  ;;  %vm15431_vm9 = vmmov %vm15430_vm3 }
 0x877   : > { %v4208_v16 = vmul.f32 %v12434_v31, %v4202_v42  ;;  %v4209_v60 = vmul.f32 %v12434_v31, %v4204_v2  ;;  %v15404_v42 = vld [vmem:[#allocation95_spill] sm:$0xff]  ;;  %vm15432_vm14 = vmmov %vm15430_vm3 }
 0x878   : > { %v4336_v2 = vmul.f32 %v15404_v42, %v4330_v52  ;;  %v4337_v62 = vmul.f32 %v15404_v42, %v4332_v38  ;;  %v15413_v42 = vld [vmem:[#allocation34_spill] sm:$0xff] }
 0x879   : > { %v12789_v6 = vpop.permute.xlu0 %4249  ;;  %v4230_v61 = vadd.f32 %v4226_v14, %v4208_v16  ;;  %v4231_v63 = vadd.f32 %v4227_v57, %v4209_v60  ;;  %v15407_v16 = vld [vmem:[#allocation135_spill] sm:$0xff] }
 0x87b   : > { %v4234_v12 = vmul.f32 %v15085_v13, %v4230_v61  ;;  %v4235_v40 = vmul.f32 %v12437_v58, %v4231_v63  ;;  %v15411_v63 = vld [vmem:[#allocation138_spill] sm:$0xff] }
 0x87d   : > { %v4254_v19 = vpop.permute.xlu0 %4253 }
 0x87e   : > { %v4257_v32 = vsel %vm15400_vm13, %v12789_v6, %v4254_v19  ;;  %v4259_v49 = vsel %vm15401_vm11, %v4254_v19, %v12789_v6  ;;  %vm15433_vm13 = vcmask 195584  }
 0x87f   : > { %v4263_v34 = vmul.f32 %v12446_v3, %v4257_v32  ;;  %v4264_v6 = vmul.f32 %v12446_v3, %v4259_v49  ;;  %v4073_v3 = vadd.f32 %v4069_v27, %v4018_v10  ;;  %v15408_v27 = vld [vmem:[#allocation101_spill] sm:$0xff] }
 0x881   : > { %v4305_v35 = vpop.permute.xlu0 %4304  ;;  %v4285_v39 = vadd.f32 %v4281_v4, %v4263_v34  ;;  %v4286_v7 = vadd.f32 %v4282_v1, %v4264_v6  ;;  %v4128_v57 = vadd.f32 %v4124_v8, %v4073_v3  ;;  %v15405_v4 = vld [vmem:[#allocation283_spill] sm:$0xff] }
 0x882   : > { %v4391_v1 = vmul.f32 %v15405_v4, %v4385_v21  ;;  %v4392_v26 = vmul.f32 %v15405_v4, %v4387_v17 }
 0x883   : > { %v4289_v25 = vmul.f32 %v15274_v5, %v4285_v39  ;;  %v4290_v23 = vmul.f32 %v12485_v48, %v4286_v7  ;;  %v15406_v5 = vld [vmem:[#allocation137_spill] sm:$0xff] }
 0x885   : > { %v4309_v47 = vpop.permute.xlu0 %4308 }
 0x886   : > { %v4312_v31 = vsel %vm15402_vm1, %v4305_v35, %v4309_v47  ;;  %v4314_v36 = vsel %vm15403_vm15, %v4309_v47, %v4305_v35  ;;  %v4129_v47 = vadd.f32 %v4125_v50, %v4074_v59 }
 0x887   : > { %v4318_v28 = vmul.f32 %v12488_v9, %v4312_v31  ;;  %v4319_v35 = vmul.f32 %v12488_v9, %v4314_v36  ;;  %v4183_v9 = vadd.f32 %v4179_v30, %v4128_v57 }
 0x888   : > { %v4184_v37 = vadd.f32 %v4180_v55, %v4129_v47 }
 0x889   : > { %v4360_v53 = vpop.permute.xlu0 %4359  ;;  %v4238_v38 = vadd.f32 %v4234_v12, %v4183_v9  ;;  %v15417_v9 = vld [vmem:[#allocation33_spill] sm:$0xff] }
 0x88a   : > { %v4239_v32 = vadd.f32 %v4235_v40, %v4184_v37  ;;  %v15415_v40 = vld [vmem:[#allocation36_spill] sm:$0xff] }
 0x88b   : > { %v4293_v21 = vadd.f32 %v4289_v25, %v4238_v38  ;;  %v15418_v25 = vld [vmem:[#allocation37_spill] sm:$0xff] }
 0x88c   : > { %v4294_v17 = vadd.f32 %v4290_v23, %v4239_v32 }
 0x88d   : > { %v4364_v19 = vpop.permute.xlu0 %4363 }
 0x88e   : > { %v4367_v45 = vsel %vm4365_vm10, %v4360_v53, %v4364_v19  ;;  %v4369_v54 = vsel %vm4365_vm10, %v4364_v19, %v4360_v53  ;;  %v4340_v53 = vadd.f32 %v4336_v2, %v4318_v28 }
 0x88f   : > { %v4373_v46 = vmul.f32 %v12498_v24, %v4367_v45  ;;  %v4374_v51 = vmul.f32 %v12498_v24, %v4369_v54  ;;  %v4341_v24 = vadd.f32 %v4337_v62, %v4319_v35  ;;  %v15414_v62 = vld [vmem:[#allocation32_spill] sm:$0xff] }
 0x890   : > { %v4344_v49 = vmul.f32 %v15207_v15, %v4340_v53  ;;  %v15410_v15 = vld [vmem:[#allocation93_spill] sm:$0xff] }
 0x891   : > { %v4415_v14 = vpop.permute.xlu0 %4414  ;;  %v4395_v52 = vadd.f32 %v4391_v1, %v4373_v46  ;;  %v4396_v22 = vadd.f32 %v4392_v26, %v4374_v51  ;;  %v4345_v33 = vmul.f32 %v15406_v5, %v4341_v24  ;;  %v15412_v46 = vld [vmem:[#allocation188_spill] sm:$0xff]  ;;  %v15416_v1 = vld [vmem:[#allocation35_spill] sm:$0xff] }
 0x892   : > { %v4348_v19 = vadd.f32 %v4344_v49, %v4293_v21 }
 0x893   : > { %v4399_v43 = vmul.f32 %v11075_v0, %v4395_v52  ;;  %v4400_v60 = vmul.f32 %v15407_v16, %v4396_v22  ;;  %v4349_v0 = vadd.f32 %v4345_v33, %v4294_v17 }
 0x895   : > { %v4419_v41 = vpop.permute.xlu0 %4418  ;;  %v4403_v31 = vadd.f32 %v4399_v43, %v4348_v19  ;;  %v4404_v36 = vadd.f32 %v4400_v60, %v4349_v0  ;;  %v12985_v19 = vld [vmem:[#allocation8 + $0x20] sm:$0xff] }
 0x896   : > { %v4422_v13 = vsel %vm4420_vm2, %v4415_v14, %v4419_v41  ;;  %v4424_v58 = vsel %vm4420_vm2, %v4419_v41, %v4415_v14 }
 0x897   : > { %v4428_v10 = vmul.f32 %v15409_v18, %v4422_v13  ;;  %v4429_v11 = vmul.f32 %v15409_v18, %v4424_v58 }
 0x89c   : > { %v4438_v48 = vpop.permute.xlu0 %4437 }
 0x89d   : > { %v4440_v56 = vsel %vm4420_vm2, %v15408_v27, %v4438_v48  ;;  %v4442_v29 = vsel %vm4420_vm2, %v4438_v48, %v15408_v27  ;;  %vm15421_vm2 = vcmask 7168  }
 0x89e   : > { %v4446_v34 = vmul.f32 %v15410_v15, %v4440_v56  ;;  %v4447_v6 = vmul.f32 %v15410_v15, %v4442_v29  ;;  %v12981_v15 = vld [vmem:[#allocation8] sm:$0xff]  ;;  %vm15424_vm4 = vmmov %vm15421_vm2 }
 0x89f   : > { %v5135_v0 = vand.u32 4294901760, %v12981_v15  ;;  %vm15426_vm0 = vmmov %vm15421_vm2 }
 0x8a0   : > { %v4450_v8 = vadd.f32 %v4446_v34, %v4428_v10  ;;  %v4451_v50 = vadd.f32 %v4447_v6, %v4429_v11  ;;  %v12977_v10 = vld [vmem:[#allocation8 + $0x8] sm:$0xff] }
 0x8a1   : > { %v12979_v11 = vld [vmem:[#allocation8 + $0x28] sm:$0xff]  ;;  %v5133_v34 = vand.u32 4294901760, %v12977_v10 }
 0x8a2   : > { %v4454_v61 = vmul.f32 %v11124_v44, %v4450_v8  ;;  %v4455_v45 = vmul.f32 %v15411_v63, %v4451_v50  ;;  %v5137_v6 = vand.u32 4294901760, %v12979_v11  ;;  %v5139_v50 = vand.u32 4294901760, %v12985_v19 }
 0x8a3   : > { %v13002_v63 = vsub.f32 %v12981_v15, %v5135_v0 }
 0x8a4   : > { %v4458_v54 = vadd.f32 %v4454_v61, %v4403_v31  ;;  %v4459_v3 = vadd.f32 %v4455_v45, %v4404_v36  ;;  %v12992_v36 = vsub.f32 %v12977_v10, %v5133_v34  ;;  %v12997_v61 = vsub.f32 %v12979_v11, %v5137_v6 }
 0x8a5   : > { %v13007_v45 = vsub.f32 %v12985_v19, %v5139_v50 }
 0x8a6   : > { %v4462_v59 = vsub.f32 0.0, %v4458_v54  ;;  %v4463_v30 = vsub.f32 0.0, %v4459_v3  ;;  %v5217_v54 = vand.u32 4294901760, %v12992_v36  ;;  %v5229_v3 = vand.u32 4294901760, %v12997_v61 }
 0x8a8   : > { %v4468_v55 = vmul.f32 1.442695, %v4462_v59  ;;  %v4470_v39 = vmul.f32 1.442695, %v4463_v30  ;;  %v5223_v59 = vand.u32 4294901760, %v13002_v63 }
 0x8aa   : > { %7148 = vpow2.f32 %v4468_v55 }
 0x8ab   : > { %7150 = vpow2.f32 %v4470_v39  ;;  %v5235_v39 = vand.u32 4294901760, %v13007_v45 }
 0x8b4   : > { %v7149_v7 = vpop.eup %7148 }
 0x8b5   : > { %v7151_v28 = vpop.eup %7150  ;;  %v4474_v35 = vadd.f32 1.0, %v7149_v7 }
 0x8b6   : > { %v4475_v14 = vadd.f32 1.0, %v7151_v28  ;;  %v5218_v28 = vsub.f32 %v12992_v36, %v5217_v54 }
 0x8b7   : > { %7152 = vrcp.f32 %v4474_v35  ;;  %v5230_v35 = vsub.f32 %v12997_v61, %v5229_v3 }
 0x8b8   : > { %7154 = vrcp.f32 %v4475_v14  ;;  %v5224_v14 = vsub.f32 %v13002_v63, %v5223_v59 }
 0x8c1   : > { %v7153_v57 = vpop.eup %7152 }
 0x8c2   : > { %v7155_v47 = vpop.eup %7154  ;;  %v4491_v44 = vrot.slane %v7153_v57, %v15412_v46  ;;  %v5236_v57 = vsub.f32 %v13007_v45, %v5235_v39 }
 0x8c3   : > { %v4495_v51 = vrot.slane %v7155_v47, %v15412_v46  ;;  %v5219_v47 = vand.u32 4294901760, %v5218_v28  ;;  %v15419_v28 = vld [vmem:[#allocation185_spill] sm:$0xff] }
 0x8c4   : > { %v4502_v2 = vmul.f32 %v4491_v44, %v15413_v42  ;;  %v4504_v12 = vmul.f32 %v4491_v44, %v15414_v62  ;;  %v4506_v4 = vmul.f32 %v4491_v44, %v15415_v40  ;;  %v5231_v44 = vand.u32 4294901760, %v5230_v35 }
 0x8c5   : > { %v4503_v26 = vmul.f32 %v4495_v51, %v15416_v1  ;;  %v4505_v37 = vmul.f32 %v4495_v51, %v15417_v9  ;;  %v4507_v23 = vmul.f32 %v4495_v51, %v15418_v25  ;;  %v5225_v51 = vand.u32 4294901760, %v5224_v14 }
 0x8c6   : > { %v4514_v53 = vmax.f32 %v4502_v2, 1e-06  ;;  %v4516_v24 = vmax.f32 %v4504_v12, 1e-06  ;;  %v4518_v41 = vmax.f32 %v4506_v4, 1e-06  ;;  %v6882_v12 = vpack.c.bf16 %v5231_v44, %v5219_v47 }
 0x8c7   : > { %v4515_v52 = vmax.f32 %v4503_v26, 1e-06  ;;  %v4517_v22 = vmax.f32 %v4505_v37, 1e-06  ;;  %v4519_v38 = vmax.f32 %v4507_v23, 1e-06  ;;  %vm4609_vm10 = vcmp.eq.s32.totalorder %v15419_v28, %v8777_v20 }
 0x8c8   : > { %v4526_v32 = vmul.f32 %v4514_v53, %v4514_v53  ;;  %v4528_v13 = vmul.f32 %v4516_v24, %v4516_v24  ;;  %v4530_v58 = vmul.f32 %v4518_v41, %v4518_v41  ;;  %v5237_v62 = vand.u32 4294901760, %v5236_v57  ;;  %6883 = vmatprep.subr.bf16.mxu1 %v6882_v12 }
 0x8c9   : > { %v4527_v21 = vmul.f32 %v4515_v52, %v4515_v52  ;;  %v4529_v17 = vmul.f32 %v4517_v22, %v4517_v22  ;;  %v4531_v49 = vmul.f32 %v4519_v38, %v4519_v38  ;;  %v15420_v57 = vmov 0.0  }
 0x8ca   : > { %v4538_v5 = vmul.f32 %v4526_v32, %v4514_v53  ;;  %v4540_v33 = vmul.f32 %v4528_v13, %v4516_v24  ;;  %v4542_v48 = vmul.f32 %v4530_v58, %v4518_v41  ;;  %v6884_v40 = vpack.c.bf16 %v5237_v62, %v5225_v51 }
 0x8cb   : > { %v4539_v43 = vmul.f32 %v4527_v21, %v4515_v52  ;;  %v4541_v16 = vmul.f32 %v4529_v17, %v4517_v22  ;;  %v4543_v60 = vmul.f32 %v4531_v49, %v4519_v38  ;;  %v13028_v47 = vsel %vm4609_vm10, 1.0, %v15420_v57 }
 0x8cc   : > { %6885 = vmatpush1.bf16.msra.mxu1 %v6884_v40  ;;  %v4613_v62 = vsel %vm15423_vm7, %v13028_v47, 0 }
 0x8cd   : > { %v4553_v27 = vadd.f32 %v4539_v43, %v4538_v5  ;;  %v4556_v56 = vadd.f32 %v4541_v16, %v4540_v33  ;;  %v4559_v29 = vadd.f32 %v4543_v60, %v4542_v48 }
 0x8cf   : > { %4554 = vadd.xlane.f32.xlu0 %v4553_v27 }
 0x8d3   : > { %4557 = vadd.xlane.f32.xlu0 %v4556_v56 }
 0x8d7   : > { %4560 = vadd.xlane.f32.xlu0 %v4559_v29 }
 0x8e0   : > { %v4546_v18 = vpop.xlane.xlu1 %4545  ;;  %v4549_v31 = vpop.xlane.xlu0 %4548 }
 0x8e1   : > { %v4562_v8 = vmul.f32 0.00390625, %v4546_v18  ;;  %v4563_v30 = vmul.f32 0.00390625, %v4549_v31 }
 0x8e3   : > { %v4568_v55 = vmax.f32 %v4562_v8, 1e-30  ;;  %v4569_v42 = vmax.f32 %v4563_v30, 1e-30 }
 0x8e4   : > { %v4552_v7 = vpop.xlane.xlu1 %4551 }
 0x8e5   : > { %7156 = vlog2.f32 %v4568_v55  ;;  %v4564_v2 = vmul.f32 0.00390625, %v4552_v7 }
 0x8e6   : > { %7158 = vlog2.f32 %v4569_v42 }
 0x8e7   : > { %v4570_v4 = vmax.f32 %v4564_v2, 1e-30 }
 0x8e9   : > { %7160 = vlog2.f32 %v4570_v4  ;;  %v4693_v4 = vsub.f32 %v4613_v62, %v4613_v62  ;;  %v6880_v62 = vpack.c.bf16 %v5139_v50, %v5135_v0 }
 0x8ef   : > { %v7157_v23 = vpop.eup %7156 }
 0x8f0   : > { %v4575_v41 = vmul.f32 0.6931472, %v7157_v23  ;;  %v7159_v22 = vpop.eup %7158 }
 0x8f1   : > { %v4577_v32 = vmul.f32 0.6931472, %v7159_v22 }
 0x8f2   : > { %v4586_v13 = vmul.f32 0.33333334, %v4575_v41  ;;  %v4694_v41 = vand.u32 4294901760, %v4693_v4 }
 0x8f3   : > { %v7161_v58 = vpop.eup %7160  ;;  %v4587_v49 = vmul.f32 0.33333334, %v4577_v32 }
 0x8f4   : > { %v4592_v5 = vmul.f32 1.442695, %v4586_v13  ;;  %v4579_v33 = vmul.f32 0.6931472, %v7161_v58  ;;  %v4695_v13 = vsub.f32 %v4693_v4, %v4694_v41 }
 0x8f5   : > { %v4594_v27 = vmul.f32 1.442695, %v4587_v49 }
 0x8f6   : > { %v4588_v56 = vmul.f32 0.33333334, %v4579_v33  ;;  %v4696_v49 = vand.u32 4294901760, %v4695_v13  ;;  %v15428_v33 = vmov 0.0|0.0  }
 0x8f8   : > { %v4596_v30 = vmul.f32 1.442695, %v4588_v56 }
 0x95c   : > { %v4555_v1 = vpop.xlane.xlu0 %4554 }
 0x95d   : > { %v4565_v26 = vmul.f32 0.00390625, %v4555_v1 }
 0x95f   : > { %v4571_v9 = vmax.f32 %v4565_v26, 1e-30 }
 0x960   : > { %v4558_v37 = vpop.xlane.xlu0 %4557 }
 0x961   : > { %7162 = vlog2.f32 %v4571_v9  ;;  %v4566_v25 = vmul.f32 0.00390625, %v4558_v37 }
 0x963   : > { %v4572_v53 = vmax.f32 %v4566_v25, 1e-30 }
 0x964   : > { %v4561_v24 = vpop.xlane.xlu0 %4560 }
 0x965   : > { %7164 = vlog2.f32 %v4572_v53  ;;  %v4567_v52 = vmul.f32 0.00390625, %v4561_v24 }
 0x967   : > { %v4573_v38 = vmax.f32 %v4567_v52, 1e-30 }
 0x969   : > { %7166 = vlog2.f32 %v4573_v38 }
 0x96a   : > { %7168 = vpow2.f32 %v4592_v5 }
 0x96b   : > { %v7163_v21 = vpop.eup %7162 }
 0x96c   : > { %v4581_v17 = vmul.f32 0.6931472, %v7163_v21 }
 0x96e   : > { %v4589_v48 = vmul.f32 0.33333334, %v4581_v17 }
 0x96f   : > { %v7165_v43 = vpop.eup %7164 }
 0x970   : > { %v4598_v16 = vmul.f32 1.442695, %v4589_v48  ;;  %v4583_v60 = vmul.f32 0.6931472, %v7165_v43 }
 0x972   : > { %7170 = vpow2.f32 %v4598_v16  ;;  %v4590_v29 = vmul.f32 0.33333334, %v4583_v60 }
 0x973   : > { %v7167_v18 = vpop.eup %7166  ;;  %7172 = vpow2.f32 %v4594_v27 }
 0x974   : > { %v4600_v8 = vmul.f32 1.442695, %v4590_v29  ;;  %v4585_v31 = vmul.f32 0.6931472, %v7167_v18  ;;  %v7169_v35 = vpop.eup %7168  ;;  %v5105_v29 = vld [vmem:[#allocation8 + $0x48] sm:$0xff] }
 0x975   : > { %v13066_v18 = vand.u32 4294901760, %v5105_v29 }
 0x976   : > { %7174 = vpow2.f32 %v4600_v8  ;;  %v4591_v55 = vmul.f32 0.33333334, %v4585_v31  ;;  %v5104_v8 = vld [vmem:[#allocation8 + $0x40] sm:$0xff] }
 0x977   : > { %7176 = vpow2.f32 %v4596_v30  ;;  %v13068_v31 = vand.u32 4294901760, %v5104_v8  ;;  %v5240_v30 = vsub.f32 %v5105_v29, %v13066_v18 }
 0x978   : > { %v4602_v7 = vmul.f32 1.442695, %v4591_v55 }
 0x979   : > { %v5246_v55 = vsub.f32 %v5104_v8, %v13068_v31 }
 0x97a   : > { %7178 = vpow2.f32 %v4602_v7  ;;  %v5241_v7 = vand.u32 4294901760, %v5240_v30 }
 0x97c   : > { %v7171_v14 = vpop.eup %7170 }
 0x97d   : > { %v4604_v44 = vsel %vm15421_vm2, %v7169_v35, %v7171_v14  ;;  %v7173_v42 = vpop.eup %7172  ;;  %v5247_v35 = vand.u32 4294901760, %v5246_v55  ;;  %v5242_v14 = vsub.f32 %v5240_v30, %v5241_v7 }
 0x97e   : > { %v4616_v51 = vsel %vm15422_vm5, %v4604_v44, 0 }
 0x97f   : > { %v4625_v2 = vand.u32 4294901760, %v4616_v51  ;;  %v5248_v44 = vsub.f32 %v5246_v55, %v5247_v35 }
 0x980   : > { %v7175_v12 = vpop.eup %7174 }
 0x981   : > { %v4605_v40 = vsel %vm15424_vm4, %v7173_v42, %v7175_v12  ;;  %v7177_v1 = vpop.eup %7176  ;;  %v4704_v9 = vsub.f32 %v4616_v51, %v4625_v2  ;;  %v5243_v51 = vand.u32 4294901760, %v5242_v14  ;;  %v5249_v42 = vand.u32 4294901760, %v5248_v44 }
 0x982   : > { %v4619_v20 = vsel %vm15425_vm8, %v4605_v40, 0  ;;  %v6894_v40 = vpack.c.bf16 %v5229_v3, %v5217_v54 }
 0x983   : > { %v4628_v26 = vand.u32 4294901760, %v4619_v20  ;;  %v4705_v52 = vand.u32 4294901760, %v4704_v9  ;;  %5244 = vmatprep.subr.mxu1 %v5243_v51 }
 0x984   : > { %v7179_v37 = vpop.eup %7178  ;;  %5250 = vmatpush1.msra.mxu1 %v5249_v42  ;;  %v5108_v42 = vld [vmem:[%s15434_s1] sm:$0xf] }
 0x985   : > { %v6861_v25 = vpack.c.bf16 %v4628_v26, %v4625_v2  ;;  %v4711_v23 = vsub.f32 %v4619_v20, %v4628_v26  ;;  %v4606_v53 = vsel %vm15426_vm0, %v7177_v1, %v7179_v37  ;;  %v4706_v58 = vsub.f32 %v4704_v9, %v4705_v52  ;;  %v5099_v20 = vld [vmem:[#allocation8 + $0x18] sm:$0xff]  ;;  %v5098_v1 = vld [vmem:[#allocation8 + $0x10] sm:$0xff] }
 0x986   : > { %v4622_v24 = vsel %vm15427_vm6, %v4606_v53, 0  ;;  %v6886_v2 = vpack.c.bf16 %v12997_v61, %v12992_v36  ;;  %v5102_v26 = vld [vmem:[#allocation8 + $0x30] sm:$0xff]  ;;  %v5650_v37 = vand.u32 4294901760, %v5099_v20  ;;  %v5107_v36 = vld [vmem:[#allocation8 + $0x58] sm:$0xff] }
 0x987   : > { %6862 = vmatpush3.bf16.xpose.msra.mxu0 %v6861_v25  ;;  %v4712_v22 = vand.u32 4294901760, %v4711_v23  ;;  %v4631_v38 = vand.u32 4294901760, %v4622_v24  ;;  %v4707_v5 = vand.u32 4294901760, %v4706_v58  ;;  %v6867_v27 = vpack.c.bf16 %v4711_v23, %v4704_v9 }
 0x988   : > { %6792 = vmatprep.subr.mxu0 %v15420_v57  ;;  %6887 = vmatprep.subr.bf16.mxu1 %v6886_v2  ;;  %v6896_v9 = vpack.c.bf16 %v5235_v39, %v5223_v59  ;;  %v5656_v53 = vand.u32 4294901760, %v5102_v26  ;;  %v13116_v61 = vsub.f32 %v5099_v20, %v5650_v37  ;;  %v13124_v3 = vand.u32 4294901760, %v5107_v36  ;;  %v5106_v59 = vld [vmem:[#allocation8 + $0x50] sm:$0xff] }
 0x989   : > { %v4713_v32 = vsub.f32 %v4711_v23, %v4712_v22  ;;  %v4718_v21 = vsub.f32 %v4622_v24, %v4631_v38  ;;  %v6873_v56 = vpack.c.bf16 %v4712_v22, %v4705_v52  ;;  %v5652_v23 = vand.u32 4294901760, %v5098_v1  ;;  %v15435_v2 = vld [vmem:[#allocation189_spill] sm:$0xff] }
 0x98a   : > { %v5734_v39 = vand.u32 4294901760, %v13116_v61 }
 0x98b   : > { %v4714_v17 = vand.u32 4294901760, %v4713_v32  ;;  %v4719_v43 = vand.u32 4294901760, %v4718_v21 }
 0x98c   : > { %v5735_v13 = vsub.f32 %v13116_v61, %v5734_v39 }
 0x98d   : > { %v6864_v48 = vpack.c.bf16 %v4714_v17, %v4707_v5  ;;  %v4720_v16 = vsub.f32 %v4718_v21, %v4719_v43 }
 0x98f   : > { %6793 = vmatpush3.xpose.msra.mxu0 %v4631_v38  ;;  %v4721_v60 = vand.u32 4294901760, %v4720_v16 }
 0x990   : > { %6863 = vmatprep.subr.bf16.mxu0 %v15428_v33 }
 0x992   : > { %6795 = vmatmul.mubr.f32.vlgmr.msra.gmra.mrb[8].mxu0 %v4696_v49 }
 0x993   : > { %6865 = vmatpush3.bf16.xpose.msra.mxu0 %v6864_v48  ;;  %6803 = vmatprep.mubr.msk.f32.mxu0 %vm15429_vm12, %v15420_v57  ;;  %v5736_v48 = vand.u32 4294901760, %v5735_v13 }
 0x994   : > { %6801 = vmatprep.subr.mxu0 %v15420_v57 }
 0x99b   : > { %6802 = vmatpush3.xpose.msra.mxu0 %v4721_v60 }
 0x99c   : > { %6866 = vmatprep.subr.bf16.mxu0 %v15428_v33 }
 0x99e   : > { %6804 = vmatmul.mubr.msk.f32.vlgmr.msra.gmra.mrb[8].mxu0 %vm15430_vm3, %v13028_v47 }
 0x99f   : > { %6868 = vmatpush3.bf16.xpose.msra.mxu0 %v6867_v27  ;;  %6812 = vmatprep.mubr.msk.f32.mxu0 %vm15429_vm12, %v15420_v57 }
 0x9a0   : > { %6810 = vmatprep.subr.mxu0 %v15420_v57 }
 0x9a7   : > { %6811 = vmatpush3.xpose.msra.mxu0 %v4718_v21 }
 0x9a8   : > { %6869 = vmatprep.subr.bf16.mxu0 %v15428_v33 }
 0x9aa   : > { %6813 = vmatmul.mubr.f32.vlgmr.msra.gmra.mrb[8].mxu0 %v4693_v4  ;;  %v5103_v4 = vld [vmem:[#allocation8 + $0x38] sm:$0xff] }
 0x9ab   : > { %6871 = vmatpush3.bf16.xpose.msra.mxu0 %v6861_v25  ;;  %6821 = vmatprep.mubr.msk.f32.mxu0 %vm15429_vm12, %v15420_v57 }
 0x9ac   : > { %6819 = vmatprep.subr.mxu0 %v15420_v57 }
 0x9b3   : > { %6820 = vmatpush3.xpose.msra.mxu0 %v4631_v38 }
 0x9b4   : > { %6872 = vmatprep.subr.bf16.mxu0 %v15428_v33 }
 0x9b6   : > { %6822 = vmatmul.mubr.f32.vlgmr.msra.gmra.mrb[8].mxu0 %v4694_v41  ;;  %v13128_v41 = vand.u32 4294901760, %v5106_v59 }
 0x9b7   : > { %6874 = vmatpush3.bf16.xpose.msra.mxu0 %v6873_v56  ;;  %6830 = vmatprep.mubr.msk.f32.mxu0 %vm15429_vm12, %v15420_v57 }
 0x9b8   : > { %6828 = vmatprep.subr.mxu0 %v15420_v57  ;;  %v5763_v21 = vsub.f32 %v5106_v59, %v13128_v41 }
 0x9ba   : > { %v5764_v27 = vand.u32 4294901760, %v5763_v21 }
 0x9bc   : > { %v5765_v8 = vsub.f32 %v5763_v21, %v5764_v27 }
 0x9bf   : > { %6829 = vmatpush3.xpose.msra.mxu0 %v4719_v43 }
 0x9c0   : > { %6875 = vmatprep.subr.bf16.mxu0 %v15428_v33  ;;  %v6904_v33 = vpack.c.bf16 %v5656_v53, %v5652_v23 }
 0x9c2   : > { %6831 = vmatmul.mubr.msk.f32.vlgmr.msra.gmra.mrb[8].mxu0 %vm15431_vm9, %v13028_v47 }
 0x9c3   : > { %6877 = vmatpush3.bf16.xpose.msra.mxu0 %v6861_v25  ;;  %6839 = vmatprep.mubr.msk.f32.mxu0 %vm15429_vm12, %v15420_v57  ;;  %v5654_v25 = vand.u32 4294901760, %v5103_v4 }
 0x9c4   : > { %6837 = vmatprep.subr.mxu0 %v15420_v57 }
 0x9c5   : > { %v13118_v54 = vsub.f32 %v5103_v4, %v5654_v25  ;;  %v6902_v32 = vpack.c.bf16 %v5654_v25, %v5650_v37 }
 0x9c7   : > { %v5746_v24 = vand.u32 4294901760, %v13118_v54 }
 0x9c9   : > { %v5747_v58 = vsub.f32 %v13118_v54, %v5746_v24 }
 0x9cb   : > { %6838 = vmatpush3.xpose.msra.mxu0 %v4631_v38  ;;  %v5757_v38 = vsub.f32 %v5107_v36, %v13124_v3  ;;  %v5748_v43 = vand.u32 4294901760, %v5747_v58  ;;  %v5124_v36 = vsub.s32 3, %v15419_v28 }
 0x9cd   : > { %v5758_v5 = vand.u32 4294901760, %v5757_v38  ;;  %v6906_v29 = vpack.c.bf16 %v5748_v43, %v5736_v48 }
 0x9ce   : > { %6840 = vmatmul.mubr.msk.f32.vlgmr.msra.gmra.mrb[8].mxu0 %vm15432_vm14, %v13028_v47  ;;  %v6878_v47 = vpack.c.bf16 %v5137_v6, %v5133_v34  ;;  %v6888_v34 = vpack.c.bf16 %v13007_v45, %v13002_v63  ;;  %v13120_v63 = vsub.f32 %v5098_v1, %v5652_v23  ;;  %v13122_v45 = vsub.f32 %v5102_v26, %v5656_v53 }
 0x9cf   : > { %5203 = vmatprep.mubr.f32.mxu0 %v15420_v57  ;;  %v5759_v56 = vsub.f32 %v5757_v38, %v5758_v5  ;;  %v5120_v53 = vsub.s32 2, %v15419_v28 }
 0x9d0   : > { %6879 = vmatprep.subr.bf16.mxu0 %v6878_v47  ;;  %v5740_v52 = vand.u32 4294901760, %v13120_v63  ;;  %v5752_v22 = vand.u32 4294901760, %v13122_v45 }
 0x9d1   : > { %6881 = vmatpush1.bf16.msra.mxu0 %v6880_v62 }
 0x9d2   : > { %5142 = vmatprep.subr.mxu0 %v13066_v18  ;;  %v5741_v17 = vsub.f32 %v13120_v63, %v5740_v52  ;;  %v5753_v49 = vsub.f32 %v13122_v45, %v5752_v22  ;;  %v6920_v14 = vpack.c.bf16 %v5752_v22, %v5740_v52 }
 0x9d4   : > { %v5742_v16 = vand.u32 4294901760, %v5741_v17  ;;  %v5754_v60 = vand.u32 4294901760, %v5753_v49 }
 0x9d5   : > { %5144 = vmatpush1.msra.mxu0 %v13068_v31 }
 0xaa1   : > { %v5092_v12 = vpop.f32.mrb[8].mxu0 }
 0xaa2   : > { %v5131_v10 = vsel %vm15433_vm13, %v5092_v12, 0  ;;  %v6841_v11 = vpop.f32.mrb[9].mxu0  ;;  %v6193_v12 = vld [vmem:[%s15437_s23] sm:$0xf] }
 0xaa3   : > { %v13087_v6 = vand.u32 4294901760, %v5131_v10  ;;  %v6202_v20 = vrot.slane %v6193_v12, %v15435_v2  ;;  %v6210_v22 = vrot.slane %v6193_v12, %v5124_v36 }
 0xaa5   : > { %v13090_v15 = vsub.f32 %v5131_v10, %v13087_v6  ;;  %5311 = vmatmul.mubr.f32.vlgmr.msra.gmra.mrb[6].mxu1 %v13087_v6 }
 0xaa6   : > { %6889 = vmatpush1.bf16.msra.mxu1 %v6888_v34  ;;  %5393 = vmatprep.mubr.f32.mxu1 %v15420_v57 }
 0xaa7   : > { %v13095_v19 = vand.u32 4294901760, %v13090_v15  ;;  %5331 = vmatprep.subr.mxu1 %v5240_v30  ;;  %v5760_v30 = vand.u32 4294901760, %v5759_v56 }
 0xaa9   : > { %v5207_v0 = vsub.f32 %v13090_v15, %v13095_v19 }
 0xaaa   : > { %5334 = vmatpush1.msra.mxu1 %v5246_v55  ;;  %v6910_v55 = vpack.c.bf16 %v13118_v54, %v13116_v61  ;;  %v5121_v61 = vrot.slane %v5108_v42, %v5120_v53  ;;  %v5125_v54 = vrot.slane %v5108_v42, %v5124_v36 }
 0xaab   : > { %v13099_v50 = vand.u32 4294901760, %v5207_v0  ;;  %6891 = vmatprep.subr.bf16.mxu1 %v6878_v47  ;;  %v6198_v0 = vrot.slane %v6193_v12, %v15412_v46 }
 0xaad   : > { %5209 = vmatmul.mubr.f32.vlgmr.msra.gmra.mrb[10].mxu0 %v13099_v50  ;;  %5396 = vmatmul.mubr.f32.vlgmr.msra.gmra.mrb[6].mxu1 %v13090_v15 }
 0xaae   : > { %6893 = vmatpush1.bf16.msra.mxu1 %v6880_v62  ;;  %5472 = vmatprep.mubr.f32.mxu1 %v15420_v57 }
 0xaaf   : > { %5411 = vmatprep.subr.mxu1 %v13066_v18 }
 0xab2   : > { %5413 = vmatpush1.msra.mxu1 %v13068_v31 }
 0xab3   : > { %6895 = vmatprep.subr.bf16.mxu1 %v6894_v40 }
 0xab5   : > { %5476 = vmatmul.mubr.f32.vlgmr.msra.gmra.mrb[6].mxu1 %v13095_v19 }
 0xab6   : > { %6897 = vmatpush1.bf16.msra.mxu1 %v6896_v9  ;;  %5564 = vmatprep.mubr.f32.mxu1 %v15420_v57 }
 0xab7   : > { %5501 = vmatprep.subr.mxu1 %v5241_v7  ;;  %v6912_v7 = vpack.c.bf16 %v13122_v45, %v13120_v63 }
 0xaba   : > { %5505 = vmatpush1.msra.mxu1 %v5247_v35  ;;  %v6918_v35 = vpack.c.bf16 %v5746_v24, %v5734_v39  ;;  %v6206_v24 = vrot.slane %v6193_v12, %v5120_v53 }
 0xabb   : > { %6899 = vmatprep.subr.bf16.mxu1 %v6878_v47  ;;  %v5113_v47 = vrot.slane %v5108_v42, %v15412_v46 }
 0xabd   : > { %5566 = vmatmul.mubr.f32.vlgmr.msra.gmra.mrb[6].mxu1 %v13087_v6 }
 0xabe   : > { %6901 = vmatpush1.bf16.msra.mxu1 %v6880_v62  ;;  %5642 = vmatprep.mubr.f32.mxu1 %v15420_v57  ;;  %v5117_v62 = vrot.slane %v5108_v42, %v15435_v2 }
 0xabf   : > { %5581 = vmatprep.subr.mxu1 %v13066_v18  ;;  %v6908_v18 = vpack.c.bf16 %v5754_v60, %v5742_v16 }
 0xac2   : > { %5583 = vmatpush1.msra.mxu1 %v13068_v31  ;;  %v5766_v31 = vand.u32 4294901760, %v5765_v8 }
 0xac3   : > { %6903 = vmatprep.subr.bf16.mxu1 %v6902_v32 }
 0xac5   : > { %5644 = vmatmul.mubr.f32.vlgmr.msra.gmra.mrb[6].mxu1 %v13087_v6 }
 0xac6   : > { %6905 = vmatpush1.bf16.msra.mxu1 %v6904_v33  ;;  %5720 = vmatprep.mubr.f32.mxu1 %v15420_v57 }
 0xac7   : > { %5659 = vmatprep.subr.mxu1 %v13124_v3 }
 0xaca   : > { %5661 = vmatpush1.msra.mxu1 %v13128_v41 }
 0xacb   : > { %5726 = vmatmul.mubr.f32.vlgmr.msra.gmra.mrb[8].mxu1 %v13099_v50  ;;  %6907 = vmatprep.subr.bf16.mxu1 %v6906_v29 }
 0xacc   : > { %6909 = vmatpush1.bf16.msra.mxu1 %v6908_v18  ;;  %5826 = vmatprep.mubr.f32.mxu1 %v15420_v57 }
 0xacd   : > { %5761 = vmatprep.subr.mxu1 %v5760_v30 }
 0xad0   : > { %5767 = vmatpush1.msra.mxu1 %v5766_v31 }
 0xad1   : > { %6911 = vmatprep.subr.bf16.mxu1 %v6910_v55 }
 0xad3   : > { %5828 = vmatmul.mubr.f32.vlgmr.msra.gmra.mrb[8].mxu1 %v13087_v6 }
 0xad4   : > { %6913 = vmatpush1.bf16.msra.mxu1 %v6912_v7  ;;  %5910 = vmatprep.mubr.f32.mxu1 %v15420_v57 }
 0xad5   : > { %5848 = vmatprep.subr.mxu1 %v5757_v38 }
 0xad8   : > { %5851 = vmatpush1.msra.mxu1 %v5763_v21 }
 0xad9   : > { %6915 = vmatprep.subr.bf16.mxu1 %v6902_v32 }
 0xadb   : > { %5913 = vmatmul.mubr.f32.vlgmr.msra.gmra.mrb[8].mxu1 %v13090_v15 }
 0xadc   : > { %6917 = vmatpush1.bf16.msra.mxu1 %v6904_v33  ;;  %5989 = vmatprep.mubr.f32.mxu1 %v15420_v57 }
 0xadd   : > { %5928 = vmatprep.subr.mxu1 %v13124_v3 }
 0xae0   : > { %5930 = vmatpush1.msra.mxu1 %v13128_v41 }
 0xae1   : > { %6919 = vmatprep.subr.bf16.mxu1 %v6918_v35 }
 0xae3   : > { %5993 = vmatmul.mubr.f32.vlgmr.msra.gmra.mrb[8].mxu1 %v13095_v19 }
 0xae4   : > { %6921 = vmatpush1.bf16.msra.mxu1 %v6920_v14  ;;  %6081 = vmatprep.mubr.f32.mxu1 %v15420_v57 }
 0xae5   : > { %6018 = vmatprep.subr.mxu1 %v5758_v5 }
 0xae8   : > { %6022 = vmatpush1.msra.mxu1 %v5764_v27  ;;  %v15441_v27 = vlaneseq }
 0xae9   : > { %6923 = vmatprep.subr.bf16.mxu1 %v6902_v32 }
 0xaea   : > { %vm6263_vm11 = vcmp.lt.s32.totalorder %v15441_v27, 512 }
 0xaeb   : > { %6083 = vmatmul.mubr.f32.vlgmr.msra.gmra.mrb[8].mxu1 %v13087_v6 }
 0xaec   : > { %6925 = vmatpush1.bf16.msra.mxu1 %v6904_v33  ;;  %6159 = vmatprep.mubr.f32.mxu1 %v15420_v57  ;;  %v6167_v57 = vld [vmem:[%s15436_s20] sm:$0xf] }
 0xaed   : > { %6098 = vmatprep.subr.mxu1 %v13124_v3  ;;  %v6172_v11 = vrot.slane %v6167_v57, %v15412_v46  ;;  %v6176_v15 = vrot.slane %v6167_v57, %v15435_v2  ;;  %v6180_v63 = vrot.slane %v6167_v57, %v5120_v53  ;;  %v7388_v46 = vmov 1966171168  }
 0xaee   : > { %v6230_v45 = vunpack.c.l.s4 %v7388_v46  ;;  %v6184_v59 = vrot.slane %v6167_v57, %v5124_v36 }
 0xaf0   : > { %6100 = vmatpush1.msra.mxu1 %v13128_v41  ;;  %v6231_v32 = vunpack.c.0.s8 %v6230_v45 }
 0xaf2   : > { %v6234_v49 = vsub.s32 %v6231_v32, %v15419_v28 }
 0xaf3   : > { %6161 = vmatmul.mubr.f32.vlgmr.msra.gmra.mrb[8].mxu1 %v13087_v6 }
 0xb80   : > { %v5210_v44 = vpop.f32.mrb[10].mxu0 }
 0xb81   : > { %v5212_v51 = vpop.f32.mrb[11].mxu0  ;;  %v5211_v10 = vadd.f32 %v5210_v44, %v5113_v47 }
 0xb82   : > { %v5213_v34 = vadd.f32 %v5212_v51, %v5117_v62 }
 0xb98   : > { %v5645_v6 = vpop.f32.mrb[6].mxu1 }
 0xb99   : > { %v6930_v19 = vadd.f32 %v5645_v6, %v5211_v10  ;;  %v5647_v50 = vpop.f32.mrb[7].mxu1 }
 0xb9a   : > { %v6932_v40 = vadd.f32 %v5647_v50, %v5213_v34 }
 0xb9b   : > { %v6189_v4 = vmul.f32 %v6930_v19, %v6172_v11 }
 0xb9c   : > { %v6190_v1 = vmul.f32 %v6932_v40, %v6176_v15 }
 0xb9d   : > { %v6215_v26 = vadd.f32 %v6198_v0, %v6189_v4 }
 0xb9e   : > { %v6216_v9 = vadd.f32 %v6202_v20, %v6190_v1 }
 0xb9f   : > { %v6219_v37 = vmax.f32 %v6215_v26, 0.0 }
 0xba0   : > { %v6220_v25 = vmax.f32 %v6216_v9, 0.0 }
 0xba2   : > { %v6227_v23 = vcombine.low %v6219_v37, %v6220_v25 }
 0xba4   : > { %v6235_v48 = vrot.slane %v6227_v23, %v6234_v49 }
 0xbc6   : > { %v6162_v3 = vpop.f32.mrb[8].mxu1 }
 0xbc7   : > { %v6933_v39 = vadd.f32 %v6162_v3, %v5121_v61  ;;  %v6164_v41 = vpop.f32.mrb[9].mxu1 }
 0xbc8   : > { %v6934_v52 = vadd.f32 %v6164_v41, %v5125_v54 }
 0xbc9   : > { %v6191_v38 = vmul.f32 %v6933_v39, %v6180_v63 }
 0xbca   : > { %v6192_v13 = vmul.f32 %v6934_v52, %v6184_v59 }
 0xbcb   : > { %v6217_v58 = vadd.f32 %v6206_v24, %v6191_v38 }
 0xbcc   : > { %v6218_v21 = vadd.f32 %v6210_v22, %v6192_v13 }
 0xbcd   : > { %v6221_v17 = vmax.f32 %v6217_v58, 0.0 }
 0xbce   : > { %v6222_v5 = vmax.f32 %v6218_v21, 0.0 }
 0xbd0   : > { %v6228_v33 = vcombine.low %v6221_v17, %v6222_v5 }
 0xbd2   : > { %v6242_v43 = vrot.slane %v6228_v33, %v6234_v49 }
 0xbd4   : > { %v6243_v16 = vcombine.low %v6235_v48, %v6242_v43  ;;  %v6244_v60 = vcombine.high %v6235_v48, %v6242_v43 }
 0xbd6   : > { %v6251_v28 = vrot.slane %v6243_v16, %v6234_v49  ;;  %v6258_v56 = vrot.slane %v6244_v60, %v6234_v49 }
 0xbd8   : > { %6265 = vst.msk [vmem:[%s408_s14] sm:$0xf] %vm6263_vm11, %v6251_v28  ;;  %6266 = vst.msk [vmem:[%s408_s14 + $0x4] sm:$0xf] %vm6263_vm11, %v6258_v56 }
 0xbd9   : > { %7266 = shalt.err (!%p7263_p0)
}
 0xbda   : > { %s7267_s11 = scalar_lea.hbm %s13189_s21, 128  ;;  %s7271_s24 = scalar_lea.hbm %s15442_s10, 256 }
 0xbdb   : > { %p7268_p2 = scmp.ne.s32.totalorder %s13189_s21, %s7267_s11  ;;  %p7272_p13 = scmp.lt.u32.totalorder %s13189_s21, %s15442_s10 }
 0xbdc   : > { %p7273_p12 = scmp.lt.u32.totalorder %s7271_s24, %s7267_s11  ;;  %p7275_p10 = scmp.lt.u32.totalorder %s7267_s11, %s13189_s21 }
 0xbdd   : > { %p7269_p7 = pnand %p7268_p2, %p15443_p1 }
 0xbde   : > { %p7274_p8 = por %p7273_p12, %p7272_p13 }
 0xbdf   : > { %p7270_p3 = pneg %p7269_p7 }
 0xbe0   : > { %p7276_p5 = por %p7275_p10, %p7274_p8 }
 0xbe2   : > { %p7277_p4 = pnand %p7276_p5, %p7270_p3 }
 0xbe4   : > { %7280 = shalt.err (!%p7277_p4)
}
 0xbe5   : > { %s7390_s5 = smov 64   ;;  %s7391_s13 = smov 4  }
 0xbe6   : > { %7010 = dma.vmem_to_hbm [thread:$0]  (%p15443_p1), %s13191_s26, 128, %s13189_s21, %s6268_s27, %s7390_s5, %s7390_s5, %s7391_s13  }
 0xbe7 PF: > { %s15444_s1 = sld [smem:[#allocation15_spill]]  ;;  %s15445_s8 = sld [smem:[#allocation23_spill]] }
 0xbe8   : > { %s15446_s0 = sld [smem:[#allocation18_spill]] }
 0xbed   : > { %s6297_s20 = sand.u32 1, %s15444_s1   ;;  %p15447_p6 = scmp.ne.s32.totalorder %s15445_s8, 0 }
 0xbee   : > { %p15448_p9 = scmp.ge.s32.totalorder %s15446_s0, 2  ;;  %s6298_s3 = scalar_lea.sflag [#allocation5], %s6297_s20 }
 0xbf0   : > { %p7024_p11 = pnand %p15448_p9, %p15447_p6 }
 0xbf2   : > { %7310 = dma.done.wait (!%p7024_p11), %s6298_s3, 128  }
 0xbf3   : > { %7312 = vsyncadd (!%p7024_p11), %s6298_s3, 4294967168  ;;  %s15449_s15 = sld [smem:[#allocation20_spill]]  ;;  %s15450_s5 = sld [smem:[#allocation16_spill]] }
 0xbf4   : > { %s15451_s13 = sld [smem:[#allocation17_spill]]  ;;  %s15452_s14 = sld [smem:[#allocation21_spill]] }
 0xbf9   : > { %p26_p0 = scmp.ge.s32.totalorder %s15449_s15, 4  }
 0xbfb   :  { %28 = sbr.rel (!%p26_p0) target bundleno = 18 (0x12), region = 114 }
 0xc02   :  { %6303 = vsyncpa [#allocation4], 1 }
 0xc03   :  { %6305 = vsyncpa [#allocation4 + $0x1], 1 }
 0xc04   :  { %6306 = vsyncpa [#allocation9], 1 }
 0xc05   :  { %6307 = vsyncpa [#allocation5], 1 }
 0xc06   :  { %6309 = vsyncpa [#allocation5 + $0x1], 1 }
 0xc07   :  { %6310 = vsyncpa [#allocation6], 1 }
 0xc08   :  { %6312 = vsyncpa [#allocation6 + $0x1], 1 }

</bundles_post_ra>
